<compile_context>
chip_gen: v7x
topology: tpu7x:2x2x1
jax: 0.10.0
libtpu: 0.0.40
codegen_flags: <defaults>
</compile_context>

<pallas_src>
import jax
import jax.numpy as jnp
from jax import lax
from jax.experimental import pallas as pl
from jax.experimental.pallas import tpu as pltpu

BN_EPS = 1e-5
FC_PAD = 128  # lane width every head feature dim is zero-padded to


def _silu(x):
    return x * jax.nn.sigmoid(x)


# ----------------------------------------------------------------------------
# Fused kernel: synthetic backbone + head, one batch tile per grid step.
# ----------------------------------------------------------------------------
def fused_model_kernel(x_ref, wstem_ref, wproj_ref, x1g_ref,
                       w1a_ref, w2_ref, b2_ref, w3_ref, b3_ref, out_ref):
    cmid, cin = wstem_ref.shape
    hw = x_ref.shape[1] // cin

    # ----- synthetic backbone stand-in (see TODO above) ---------------------
    # Per-channel slices are static, HW-aligned lane slices, hoisted out of the
    # k-loop (image stays f32 end-to-end: no blanket upcast copy).
    xc = [x_ref[:, c * hw:(c + 1) * hw] for c in range(cin)]       # [TB, HW] f32

    # 1x1 conv (K=cin) + SiLU + GAP sums as VPU broadcast-MACs (stem scalars in
    # SMEM), then ONE small MXU dot with the projection (1/HW pre-folded).
    cols = []
    for k in range(cmid):
        acc = wstem_ref[k, 0] * xc[0]
        for c in range(1, cin):
            acc = acc + wstem_ref[k, c] * xc[c]
        hk = _silu(acc)                                            # [TB, HW]
        cols.append(jnp.sum(hk, axis=-1, keepdims=True))           # [TB, 1]
    pooled = jnp.concatenate(cols, axis=-1)                        # [TB, cmid]
    feats = _silu(jnp.dot(pooled, wproj_ref[...],
                          preferred_element_type=jnp.float32))     # [TB, in_feat]

    # ----- head: (Dropout=id) Linear -> SiLU -> BN (folded), x2, Linear+bias -
    h1 = jnp.dot(feats.astype(jnp.bfloat16), w1a_ref[...],
                 preferred_element_type=jnp.float32)
    h1 = _silu(h1 + x1g_ref[...])          # one-hot @ W1b pre-computed in wrapper

    # BN1 folded into W2 rows + bias b2; BN2 folded into W3/b3.
    h2 = jnp.dot(h1.astype(jnp.bfloat16), w2_ref[...],
                 preferred_element_type=jnp.float32) + b2_ref[...]
    h2 = _silu(h2)

    # Final Linear(fc2 -> 1) as an NT matmul: [1,128] x [TB,128]^T -> [1,TB],
    # lane-dense along the batch -> unmasked full-width store.
    out = lax.dot_general(w3_ref[...], h2, (((1,), (1,)), ((), ())),
                          preferred_element_type=jnp.float32)      # [1, TB]
    out_ref[...] = out + b3_ref[0]


# ----------------------------------------------------------------------------
# Wrapper
# ----------------------------------------------------------------------------
def _pick_tile_b(batch):
    # Prefer 128/256-wide tiles (lane-dense output, full MXU M) while keeping
    # >= 2 grid steps so both v7x TensorCores get work.
    for t in (256, 128):
        if batch % t == 0 and batch // t >= 2:
            return t
    for t in (256, 128):
        if batch % t == 0:
            return t
    assert batch % 8 == 0, "batch must be a multiple of 8"
    return batch   # single full-batch tile (output block == full array)


def base_model_forward(x0_img, x1_onehot, kp, *, tile_b=None):
    """Full BaseModel forward: single fused pallas_call, gridded over batch."""
    B, Cin, H, W = x0_img.shape
    HW = H * W
    assert HW % 128 == 0, "flattened spatial dim should be a multiple of 128 lanes"

    if tile_b is None:
        tile_b = _pick_tile_b(B)
    assert B % tile_b == 0 and tile_b % 8 == 0
    assert tile_b % 128 == 0 or tile_b == B, "tile_b must be 128-aligned (or == B)"
    n_tiles = B // tile_b

    # f32 image, free reshape (channel c owns lanes [c*HW, (c+1)*HW)).
    x_flat = x0_img.reshape(B, Cin * HW)

    # one_hot @ W1b done here as a tiny [B,16]x[16,128] matmul: exactly the
    # original cat+Linear semantics (robust to multi-/zero-hot rows) and removes
    # the K=16 matmul and one-hot DMA from the kernel.
    x1g = x1_onehot.astype(jnp.float32) @ kp["w1b"]                 # [B, FC_PAD]

    vmem = pltpu.MemorySpace.VMEM
    smem = pltpu.MemorySpace.SMEM

    # VMEM budget: 2 pipeline buffers x per-tile DMAs + resident weights.  Keep
    # comfortably under v7x's 64 MiB physical VMEM; shrink tile_b (or tile HW)
    # for realistic backbone image sizes.
    bytes_per_step = tile_b * Cin * HW * 4 + tile_b * FC_PAD * 4 + tile_b * 4
    weight_bytes = (kp["w_proj"].size * 4 + kp["w1a"].size * 2 + kp["w2"].size * 2
                    + kp["b2"].size * 4 + kp["w3"].size * 4)
    need = 2 * bytes_per_step + weight_bytes + (1 << 20)
    assert need <= (56 << 20), "per-step VMEM too large for v7x; reduce tile_b"
    vmem_limit = int(min(max(2 * need, 32 << 20), 64 << 20))

    grid_spec = pltpu.PrefetchScalarGridSpec(
        num_scalar_prefetch=0,
        grid=(n_tiles,),
        in_specs=[
            pl.BlockSpec((tile_b, Cin * HW), lambda b: (b, 0), memory_space=vmem),
            pl.BlockSpec(kp["w_stem"].shape, lambda b: (0, 0),
                         memory_space=smem),                        # tiny scalars
            pl.BlockSpec(kp["w_proj"].shape, lambda b: (0, 0), memory_space=vmem),
            pl.BlockSpec((tile_b, FC_PAD), lambda b: (b, 0), memory_space=vmem),
            pl.BlockSpec(kp["w1a"].shape, lambda b: (0, 0), memory_space=vmem),
            pl.BlockSpec(kp["w2"].shape, lambda b: (0, 0), memory_space=vmem),
            pl.BlockSpec(kp["b2"].shape, lambda b: (0, 0), memory_space=vmem),
            pl.BlockSpec(kp["w3"].shape, lambda b: (0, 0), memory_space=vmem),
            pl.BlockSpec((1,), lambda b: (0,), memory_space=smem),   # bias scalar
        ],
        out_specs=pl.BlockSpec((1, tile_b), lambda b: (0, b), memory_space=vmem),
    )

    out = pl.pallas_call(
        fused_model_kernel,
        out_shape=jax.ShapeDtypeStruct((1, B), jnp.float32),   # lane-dense slab
        grid_spec=grid_spec,
        compiler_params=pltpu.CompilerParams(
            dimension_semantics=("parallel",),      # shard batch tiles across TCs
            vmem_limit_bytes=vmem_limit),
    )(x_flat, kp["w_stem"], kp["w_proj"], x1g,
      kp["w1a"], kp["w2"], kp["b2"], kp["w3"], kp["b3"])

    return out.reshape(B, 1)


# ----------------------------------------------------------------------------
# Parameters: raw (PyTorch-like) + kernel-folded/padded preparation.
# ----------------------------------------------------------------------------
def make_params(key, *, cin=3, cmid=8, in_feat=64, n_orders=16):
    """Raw, PyTorch-layout synthetic parameters (the shapes BaseModel implies)."""
    head_in = in_feat + n_orders
    fc1 = head_in // 4
    fc2 = head_in // 16
    ks = jax.random.split(key, 10)
    s = 0.1
    nrm = lambda k, shp: s * jax.random.normal(k, shp, jnp.float32)
    return {
        "w_stem": nrm(ks[0], (cmid, cin)),          # synthetic 1x1 conv stem
        "w_proj": nrm(ks[1], (cmid, in_feat)),      # synthetic projection
        "w1": nrm(ks[2], (head_in, fc1)),           # Linear, no bias
        "w2": nrm(ks[3], (fc1, fc2)),               # Linear, no bias
        "w3": nrm(ks[4], (fc2, 1)),                 # Linear + bias
        "b3": nrm(ks[5], (1,)),
        "bn1_gamma": 1.0 + 0.05 * jax.random.normal(ks[6], (fc1,), jnp.float32),
        "bn1_beta": jnp.zeros((fc1,), jnp.float32),
        "bn1_mean": 0.05 * jax.random.normal(ks[7], (fc1,), jnp.float32),
        "bn1_var": jnp.ones((fc1,), jnp.float32),
        "bn2_gamma": 1.0 + 0.05 * jax.random.normal(ks[8], (fc2,), jnp.float32),
        "bn2_beta": jnp.zeros((fc2,), jnp.float32),
        "bn2_mean": 0.05 * jax.random.normal(ks[9], (fc2,), jnp.float32),
        "bn2_var": jnp.ones((fc2,), jnp.float32),
    }


def prepare_params(p, *, hw, in_feat, fc_pad=FC_PAD):
    """Fold constants (BN affines, 1/HW) and pad head lane dims to 128."""
    pad_cols = lambda a: jnp.pad(a, ((0, 0), (0, fc_pad - a.shape[1])))
    pad_rows = lambda a: jnp.pad(a, ((0, fc_pad - a.shape[0]), (0, 0)))
    pad_vec = lambda v: jnp.pad(v, (0, fc_pad - v.shape[0]))

    def fold_bn(g, b, m, v):
        scale = g * jax.lax.rsqrt(v + BN_EPS)
        shift = b - m * scale
        return pad_vec(scale), pad_vec(shift)

    w1 = pad_cols(p["w1"])                       # [head_in, 128]
    w1a = w1[:in_feat]                           # [in_feat, 128]
    w1b = w1[in_feat:]                           # [n_orders, 128] (wrapper matmul)

    s1, t1 = fold_bn(p["bn1_gamma"], p["bn1_beta"], p["bn1_mean"], p["bn1_var"])
    s2, t2 = fold_bn(p["bn2_gamma"], p["bn2_beta"], p["bn2_mean"], p["bn2_var"])

    w2 = pad_cols(pad_rows(p["w2"]))             # [128, 128]
    w2_fold = s1[:, None] * w2                   # BN1 scale -> W2 rows
    b2 = (t1 @ w2)[None, :]                      # BN1 shift -> bias after 2nd dot

    w3 = pad_rows(p["w3"])                       # [128, 1]
    w3_row = w3[:, 0][None, :]                   # [1, 128]
    w3_fold = s2[None, :] * w3_row               # BN2 scale -> W3 lanes
    b3_fold = jnp.sum(t2 * w3[:, 0]) + p["b3"]   # BN2 shift -> final bias, (1,)

    return {
        "w_stem": p["w_stem"],                   # f32, SMEM scalars
        "w_proj": p["w_proj"] / float(hw),       # fold 1/HW of global-avg-pool
        "w1a": w1a.astype(jnp.bfloat16),         # bf16 MXU weights
        "w1b": w1b,                              # f32, consumed in the wrapper
        "w2": w2_fold.astype(jnp.bfloat16),
        "b2": b2.astype(jnp.float32),
        "w3": w3_fold.astype(jnp.float32),
        "b3": b3_fold.astype(jnp.float32),
    }


# ----------------------------------------------------------------------------
# Pure-JAX f32 reference (original, un-folded math) for the correctness check.
# ----------------------------------------------------------------------------
def ref_forward(x0_img, x1_onehot, p):
    B, Cin, H, W = x0_img.shape
    x = x0_img.reshape(B, Cin, H * W)
    h = _silu(jnp.einsum("kc,bcn->bkn", p["w_stem"], x))
    feats = _silu(jnp.mean(h, axis=-1) @ p["w_proj"])
    xcat = jnp.concatenate([feats, x1_onehot.astype(jnp.float32)], axis=1)
    h = _silu(xcat @ p["w1"])
    h = (h - p["bn1_mean"]) * jax.lax.rsqrt(p["bn1_var"] + BN_EPS) \
        * p["bn1_gamma"] + p["bn1_beta"]
    h = _silu(h @ p["w2"])
    h = (h - p["bn2_mean"]) * jax.lax.rsqrt(p["bn2_var"] + BN_EPS) \
        * p["bn2_gamma"] + p["bn2_beta"]
    return h @ p["w3"] + p["b3"]


if __name__ == "__main__":
    key = jax.random.PRNGKey(0)
    k_img, k_ord, k_par = jax.random.split(key, 3)

    # Small spatial size; batch chosen so tile_b=128 gives a 2-step grid
    # (lane-dense 128-wide output blocks, both v7x TensorCores busy).
    B, Cin, H, W = 256, 3, 16, 16
    CMID, IN_FEAT, N_ORDERS = 8, 64, 16

    # NCHW image input (PyTorch convention) + one-hot phylogenetic orders.
    x0 = jax.random.normal(k_img, (B, Cin, H, W), jnp.float32)
    order_ids = jax.random.randint(k_ord, (B,), 0, N_ORDERS)
    x1 = jax.nn.one_hot(order_ids, N_ORDERS, dtype=jnp.float32)

    raw_params = make_params(k_par, cin=Cin, cmid=CMID,
                             in_feat=IN_FEAT, n_orders=N_ORDERS)
    kparams = prepare_params(raw_params, hw=H * W, in_feat=IN_FEAT)

    out = jax.block_until_ready(base_model_forward(x0, x1, kparams))
    ref = jax.block_until_ready(ref_forward(x0, x1, raw_params))

    assert out.shape == (B, 1) and out.dtype == jnp.float32
    assert bool(jnp.all(jnp.isfinite(out)))
    err = float(jnp.max(jnp.abs(out - ref)))
    assert err < 5e-3, f"max abs err vs f32 reference: {err}"
    print("KERNEL_OK")
</pallas_src>

<mosaic_0001>
module attributes {stable_mosaic.version = 11 : i64} {
  func.func @fused_model_kernel(%arg0: i32, %arg1: memref<128x768xf32, #tpu.memory_space<vmem>>, %arg2: memref<8x3xf32, #tpu.memory_space<smem>>, %arg3: memref<8x64xf32, #tpu.memory_space<vmem>>, %arg4: memref<128x128xf32, #tpu.memory_space<vmem>>, %arg5: memref<64x128xbf16, #tpu.memory_space<vmem>>, %arg6: memref<128x128xbf16, #tpu.memory_space<vmem>>, %arg7: memref<1x128xf32, #tpu.memory_space<vmem>>, %arg8: memref<1x128xf32, #tpu.memory_space<vmem>>, %arg9: memref<1xf32, #tpu.memory_space<smem>>, %arg10: memref<1x128xf32, #tpu.memory_space<vmem>>) attributes {dimension_semantics = [#tpu.dimension_semantics<parallel>], iteration_bounds = array<i64: 2>, scalar_prefetch = 0 : i64, scratch_operands = 0 : i64, tpu.core_type = #tpu.core_type<tc>, window_params = [{transform_indices = @transform_0, window_bounds = array<i64: 128, 768>}, {transform_indices = @transform_1, window_bounds = array<i64: 8, 3>}, {pipeline_mode = #tpu.pipeline_mode<synchronous>, transform_indices = @transform_2, window_bounds = array<i64: 8, 64>}, {transform_indices = @transform_3, window_bounds = array<i64: 128, 128>}, {pipeline_mode = #tpu.pipeline_mode<synchronous>, transform_indices = @transform_4, window_bounds = array<i64: 64, 128>}, {pipeline_mode = #tpu.pipeline_mode<synchronous>, transform_indices = @transform_5, window_bounds = array<i64: 128, 128>}, {pipeline_mode = #tpu.pipeline_mode<synchronous>, transform_indices = @transform_6, window_bounds = array<i64: 1, 128>}, {pipeline_mode = #tpu.pipeline_mode<synchronous>, transform_indices = @transform_7, window_bounds = array<i64: 1, 128>}, {transform_indices = @transform_8, window_bounds = array<i64: 1>}, {transform_indices = @transform_9, window_bounds = array<i64: 1, 128>}]} {
    %c0 = arith.constant 0 : index
    %c0_0 = arith.constant 0 : index
    %0 = vector.load %arg1[%c0, %c0_0] : memref<128x768xf32, #tpu.memory_space<vmem>>, vector<128x256xf32>
    %c0_1 = arith.constant 0 : index
    %c256 = arith.constant 256 : index
    %1 = vector.load %arg1[%c0_1, %c256] : memref<128x768xf32, #tpu.memory_space<vmem>>, vector<128x256xf32>
    %c0_2 = arith.constant 0 : index
    %c512 = arith.constant 512 : index
    %2 = vector.load %arg1[%c0_2, %c512] : memref<128x768xf32, #tpu.memory_space<vmem>>, vector<128x256xf32>
    %c0_3 = arith.constant 0 : index
    %c0_4 = arith.constant 0 : index
    %3 = memref.load %arg2[%c0_3, %c0_4] : memref<8x3xf32, #tpu.memory_space<smem>>
    %4 = vector.broadcast %3 : f32 to vector<128x256xf32>
    %5 = arith.mulf %4, %0 : vector<128x256xf32>
    %c0_5 = arith.constant 0 : index
    %c1 = arith.constant 1 : index
    %6 = memref.load %arg2[%c0_5, %c1] : memref<8x3xf32, #tpu.memory_space<smem>>
    %7 = vector.broadcast %6 : f32 to vector<128x256xf32>
    %8 = arith.mulf %7, %1 : vector<128x256xf32>
    %9 = arith.addf %5, %8 : vector<128x256xf32>
    %c0_6 = arith.constant 0 : index
    %c2 = arith.constant 2 : index
    %10 = memref.load %arg2[%c0_6, %c2] : memref<8x3xf32, #tpu.memory_space<smem>>
    %11 = vector.broadcast %10 : f32 to vector<128x256xf32>
    %12 = arith.mulf %11, %2 : vector<128x256xf32>
    %13 = arith.addf %9, %12 : vector<128x256xf32>
    %14 = arith.negf %13 : vector<128x256xf32>
    %15 = math.exp %14 : vector<128x256xf32>
    %cst = arith.constant 1.000000e+00 : f32
    %16 = vector.broadcast %cst : f32 to vector<128x256xf32>
    %17 = arith.addf %16, %15 : vector<128x256xf32>
    %18 = arith.divf %16, %17 : vector<128x256xf32>
    %19 = arith.mulf %13, %18 : vector<128x256xf32>
    %cst_7 = arith.constant dense<0.000000e+00> : vector<128xf32>
    %20 = vector.multi_reduction <add>, %19, %cst_7 [1] : vector<128x256xf32> to vector<128xf32>
    %21 = vector.shape_cast %20 : vector<128xf32> to vector<128x1xf32>
    %c1_8 = arith.constant 1 : index
    %c0_9 = arith.constant 0 : index
    %22 = memref.load %arg2[%c1_8, %c0_9] : memref<8x3xf32, #tpu.memory_space<smem>>
    %23 = vector.broadcast %22 : f32 to vector<128x256xf32>
    %24 = arith.mulf %23, %0 : vector<128x256xf32>
    %c1_10 = arith.constant 1 : index
    %c1_11 = arith.constant 1 : index
    %25 = memref.load %arg2[%c1_10, %c1_11] : memref<8x3xf32, #tpu.memory_space<smem>>
    %26 = vector.broadcast %25 : f32 to vector<128x256xf32>
    %27 = arith.mulf %26, %1 : vector<128x256xf32>
    %28 = arith.addf %24, %27 : vector<128x256xf32>
    %c1_12 = arith.constant 1 : index
    %c2_13 = arith.constant 2 : index
    %29 = memref.load %arg2[%c1_12, %c2_13] : memref<8x3xf32, #tpu.memory_space<smem>>
    %30 = vector.broadcast %29 : f32 to vector<128x256xf32>
    %31 = arith.mulf %30, %2 : vector<128x256xf32>
    %32 = arith.addf %28, %31 : vector<128x256xf32>
    %33 = arith.negf %32 : vector<128x256xf32>
    %34 = math.exp %33 : vector<128x256xf32>
    %cst_14 = arith.constant 1.000000e+00 : f32
    %35 = vector.broadcast %cst_14 : f32 to vector<128x256xf32>
    %36 = arith.addf %35, %34 : vector<128x256xf32>
    %37 = arith.divf %35, %36 : vector<128x256xf32>
    %38 = arith.mulf %32, %37 : vector<128x256xf32>
    %cst_15 = arith.constant dense<0.000000e+00> : vector<128xf32>
    %39 = vector.multi_reduction <add>, %38, %cst_15 [1] : vector<128x256xf32> to vector<128xf32>
    %40 = vector.shape_cast %39 : vector<128xf32> to vector<128x1xf32>
    %c2_16 = arith.constant 2 : index
    %c0_17 = arith.constant 0 : index
    %41 = memref.load %arg2[%c2_16, %c0_17] : memref<8x3xf32, #tpu.memory_space<smem>>
    %42 = vector.broadcast %41 : f32 to vector<128x256xf32>
    %43 = arith.mulf %42, %0 : vector<128x256xf32>
    %c2_18 = arith.constant 2 : index
    %c1_19 = arith.constant 1 : index
    %44 = memref.load %arg2[%c2_18, %c1_19] : memref<8x3xf32, #tpu.memory_space<smem>>
    %45 = vector.broadcast %44 : f32 to vector<128x256xf32>
    %46 = arith.mulf %45, %1 : vector<128x256xf32>
    %47 = arith.addf %43, %46 : vector<128x256xf32>
    %c2_20 = arith.constant 2 : index
    %c2_21 = arith.constant 2 : index
    %48 = memref.load %arg2[%c2_20, %c2_21] : memref<8x3xf32, #tpu.memory_space<smem>>
    %49 = vector.broadcast %48 : f32 to vector<128x256xf32>
    %50 = arith.mulf %49, %2 : vector<128x256xf32>
    %51 = arith.addf %47, %50 : vector<128x256xf32>
    %52 = arith.negf %51 : vector<128x256xf32>
    %53 = math.exp %52 : vector<128x256xf32>
    %cst_22 = arith.constant 1.000000e+00 : f32
    %54 = vector.broadcast %cst_22 : f32 to vector<128x256xf32>
    %55 = arith.addf %54, %53 : vector<128x256xf32>
    %56 = arith.divf %54, %55 : vector<128x256xf32>
    %57 = arith.mulf %51, %56 : vector<128x256xf32>
    %cst_23 = arith.constant dense<0.000000e+00> : vector<128xf32>
    %58 = vector.multi_reduction <add>, %57, %cst_23 [1] : vector<128x256xf32> to vector<128xf32>
    %59 = vector.shape_cast %58 : vector<128xf32> to vector<128x1xf32>
    %c3 = arith.constant 3 : index
    %c0_24 = arith.constant 0 : index
    %60 = memref.load %arg2[%c3, %c0_24] : memref<8x3xf32, #tpu.memory_space<smem>>
    %61 = vector.broadcast %60 : f32 to vector<128x256xf32>
    %62 = arith.mulf %61, %0 : vector<128x256xf32>
    %c3_25 = arith.constant 3 : index
    %c1_26 = arith.constant 1 : index
    %63 = memref.load %arg2[%c3_25, %c1_26] : memref<8x3xf32, #tpu.memory_space<smem>>
    %64 = vector.broadcast %63 : f32 to vector<128x256xf32>
    %65 = arith.mulf %64, %1 : vector<128x256xf32>
    %66 = arith.addf %62, %65 : vector<128x256xf32>
    %c3_27 = arith.constant 3 : index
    %c2_28 = arith.constant 2 : index
    %67 = memref.load %arg2[%c3_27, %c2_28] : memref<8x3xf32, #tpu.memory_space<smem>>
    %68 = vector.broadcast %67 : f32 to vector<128x256xf32>
    %69 = arith.mulf %68, %2 : vector<128x256xf32>
    %70 = arith.addf %66, %69 : vector<128x256xf32>
    %71 = arith.negf %70 : vector<128x256xf32>
    %72 = math.exp %71 : vector<128x256xf32>
    %cst_29 = arith.constant 1.000000e+00 : f32
    %73 = vector.broadcast %cst_29 : f32 to vector<128x256xf32>
    %74 = arith.addf %73, %72 : vector<128x256xf32>
    %75 = arith.divf %73, %74 : vector<128x256xf32>
    %76 = arith.mulf %70, %75 : vector<128x256xf32>
    %cst_30 = arith.constant dense<0.000000e+00> : vector<128xf32>
    %77 = vector.multi_reduction <add>, %76, %cst_30 [1] : vector<128x256xf32> to vector<128xf32>
    %78 = vector.shape_cast %77 : vector<128xf32> to vector<128x1xf32>
    %c4 = arith.constant 4 : index
    %c0_31 = arith.constant 0 : index
    %79 = memref.load %arg2[%c4, %c0_31] : memref<8x3xf32, #tpu.memory_space<smem>>
    %80 = vector.broadcast %79 : f32 to vector<128x256xf32>
    %81 = arith.mulf %80, %0 : vector<128x256xf32>
    %c4_32 = arith.constant 4 : index
    %c1_33 = arith.constant 1 : index
    %82 = memref.load %arg2[%c4_32, %c1_33] : memref<8x3xf32, #tpu.memory_space<smem>>
    %83 = vector.broadcast %82 : f32 to vector<128x256xf32>
    %84 = arith.mulf %83, %1 : vector<128x256xf32>
    %85 = arith.addf %81, %84 : vector<128x256xf32>
    %c4_34 = arith.constant 4 : index
    %c2_35 = arith.constant 2 : index
    %86 = memref.load %arg2[%c4_34, %c2_35] : memref<8x3xf32, #tpu.memory_space<smem>>
    %87 = vector.broadcast %86 : f32 to vector<128x256xf32>
    %88 = arith.mulf %87, %2 : vector<128x256xf32>
    %89 = arith.addf %85, %88 : vector<128x256xf32>
    %90 = arith.negf %89 : vector<128x256xf32>
    %91 = math.exp %90 : vector<128x256xf32>
    %cst_36 = arith.constant 1.000000e+00 : f32
    %92 = vector.broadcast %cst_36 : f32 to vector<128x256xf32>
    %93 = arith.addf %92, %91 : vector<128x256xf32>
    %94 = arith.divf %92, %93 : vector<128x256xf32>
    %95 = arith.mulf %89, %94 : vector<128x256xf32>
    %cst_37 = arith.constant dense<0.000000e+00> : vector<128xf32>
    %96 = vector.multi_reduction <add>, %95, %cst_37 [1] : vector<128x256xf32> to vector<128xf32>
    %97 = vector.shape_cast %96 : vector<128xf32> to vector<128x1xf32>
    %c5 = arith.constant 5 : index
    %c0_38 = arith.constant 0 : index
    %98 = memref.load %arg2[%c5, %c0_38] : memref<8x3xf32, #tpu.memory_space<smem>>
    %99 = vector.broadcast %98 : f32 to vector<128x256xf32>
    %100 = arith.mulf %99, %0 : vector<128x256xf32>
    %c5_39 = arith.constant 5 : index
    %c1_40 = arith.constant 1 : index
    %101 = memref.load %arg2[%c5_39, %c1_40] : memref<8x3xf32, #tpu.memory_space<smem>>
    %102 = vector.broadcast %101 : f32 to vector<128x256xf32>
    %103 = arith.mulf %102, %1 : vector<128x256xf32>
    %104 = arith.addf %100, %103 : vector<128x256xf32>
    %c5_41 = arith.constant 5 : index
    %c2_42 = arith.constant 2 : index
    %105 = memref.load %arg2[%c5_41, %c2_42] : memref<8x3xf32, #tpu.memory_space<smem>>
    %106 = vector.broadcast %105 : f32 to vector<128x256xf32>
    %107 = arith.mulf %106, %2 : vector<128x256xf32>
    %108 = arith.addf %104, %107 : vector<128x256xf32>
    %109 = arith.negf %108 : vector<128x256xf32>
    %110 = math.exp %109 : vector<128x256xf32>
    %cst_43 = arith.constant 1.000000e+00 : f32
    %111 = vector.broadcast %cst_43 : f32 to vector<128x256xf32>
    %112 = arith.addf %111, %110 : vector<128x256xf32>
    %113 = arith.divf %111, %112 : vector<128x256xf32>
    %114 = arith.mulf %108, %113 : vector<128x256xf32>
    %cst_44 = arith.constant dense<0.000000e+00> : vector<128xf32>
    %115 = vector.multi_reduction <add>, %114, %cst_44 [1] : vector<128x256xf32> to vector<128xf32>
    %116 = vector.shape_cast %115 : vector<128xf32> to vector<128x1xf32>
    %c6 = arith.constant 6 : index
    %c0_45 = arith.constant 0 : index
    %117 = memref.load %arg2[%c6, %c0_45] : memref<8x3xf32, #tpu.memory_space<smem>>
    %118 = vector.broadcast %117 : f32 to vector<128x256xf32>
    %119 = arith.mulf %118, %0 : vector<128x256xf32>
    %c6_46 = arith.constant 6 : index
    %c1_47 = arith.constant 1 : index
    %120 = memref.load %arg2[%c6_46, %c1_47] : memref<8x3xf32, #tpu.memory_space<smem>>
    %121 = vector.broadcast %120 : f32 to vector<128x256xf32>
    %122 = arith.mulf %121, %1 : vector<128x256xf32>
    %123 = arith.addf %119, %122 : vector<128x256xf32>
    %c6_48 = arith.constant 6 : index
    %c2_49 = arith.constant 2 : index
    %124 = memref.load %arg2[%c6_48, %c2_49] : memref<8x3xf32, #tpu.memory_space<smem>>
    %125 = vector.broadcast %124 : f32 to vector<128x256xf32>
    %126 = arith.mulf %125, %2 : vector<128x256xf32>
    %127 = arith.addf %123, %126 : vector<128x256xf32>
    %128 = arith.negf %127 : vector<128x256xf32>
    %129 = math.exp %128 : vector<128x256xf32>
    %cst_50 = arith.constant 1.000000e+00 : f32
    %130 = vector.broadcast %cst_50 : f32 to vector<128x256xf32>
    %131 = arith.addf %130, %129 : vector<128x256xf32>
    %132 = arith.divf %130, %131 : vector<128x256xf32>
    %133 = arith.mulf %127, %132 : vector<128x256xf32>
    %cst_51 = arith.constant dense<0.000000e+00> : vector<128xf32>
    %134 = vector.multi_reduction <add>, %133, %cst_51 [1] : vector<128x256xf32> to vector<128xf32>
    %135 = vector.shape_cast %134 : vector<128xf32> to vector<128x1xf32>
    %c7 = arith.constant 7 : index
    %c0_52 = arith.constant 0 : index
    %136 = memref.load %arg2[%c7, %c0_52] : memref<8x3xf32, #tpu.memory_space<smem>>
    %137 = vector.broadcast %136 : f32 to vector<128x256xf32>
    %138 = arith.mulf %137, %0 : vector<128x256xf32>
    %c7_53 = arith.constant 7 : index
    %c1_54 = arith.constant 1 : index
    %139 = memref.load %arg2[%c7_53, %c1_54] : memref<8x3xf32, #tpu.memory_space<smem>>
    %140 = vector.broadcast %139 : f32 to vector<128x256xf32>
    %141 = arith.mulf %140, %1 : vector<128x256xf32>
    %142 = arith.addf %138, %141 : vector<128x256xf32>
    %c7_55 = arith.constant 7 : index
    %c2_56 = arith.constant 2 : index
    %143 = memref.load %arg2[%c7_55, %c2_56] : memref<8x3xf32, #tpu.memory_space<smem>>
    %144 = vector.broadcast %143 : f32 to vector<128x256xf32>
    %145 = arith.mulf %144, %2 : vector<128x256xf32>
    %146 = arith.addf %142, %145 : vector<128x256xf32>
    %147 = arith.negf %146 : vector<128x256xf32>
    %148 = math.exp %147 : vector<128x256xf32>
    %cst_57 = arith.constant 1.000000e+00 : f32
    %149 = vector.broadcast %cst_57 : f32 to vector<128x256xf32>
    %150 = arith.addf %149, %148 : vector<128x256xf32>
    %151 = arith.divf %149, %150 : vector<128x256xf32>
    %152 = arith.mulf %146, %151 : vector<128x256xf32>
    %cst_58 = arith.constant dense<0.000000e+00> : vector<128xf32>
    %153 = vector.multi_reduction <add>, %152, %cst_58 [1] : vector<128x256xf32> to vector<128xf32>
    %154 = vector.shape_cast %153 : vector<128xf32> to vector<128x1xf32>
    %155 = tpu.concatenate %21, %40, %59, %78, %97, %116, %135, %154 in 1 : vector<128x1xf32>, vector<128x1xf32>, vector<128x1xf32>, vector<128x1xf32>, vector<128x1xf32>, vector<128x1xf32>, vector<128x1xf32>, vector<128x1xf32> -> vector<128x8xf32>
    %c0_59 = arith.constant 0 : index
    %c0_60 = arith.constant 0 : index
    %156 = vector.load %arg3[%c0_59, %c0_60] : memref<8x64xf32, #tpu.memory_space<vmem>>, vector<8x64xf32>
    %cst_61 = arith.constant dense<0.000000e+00> : vector<128x64xf32>
    %157 = tpu.matmul %155, %156, %cst_61 {dimension_numbers = #tpu.dot_dimension_numbers<[1], [0], [0], [1], [0, 0, 1, 1], [], []>} : vector<128x8xf32>, vector<8x64xf32>, vector<128x64xf32> -> vector<128x64xf32>
    %158 = arith.negf %157 : vector<128x64xf32>
    %159 = math.exp %158 : vector<128x64xf32>
    %cst_62 = arith.constant 1.000000e+00 : f32
    %160 = vector.broadcast %cst_62 : f32 to vector<128x64xf32>
    %161 = arith.addf %160, %159 : vector<128x64xf32>
    %162 = arith.divf %160, %161 : vector<128x64xf32>
    %163 = arith.mulf %157, %162 : vector<128x64xf32>
    %164 = arith.truncf %163 : vector<128x64xf32> to vector<128x64xbf16>
    %c0_63 = arith.constant 0 : index
    %c0_64 = arith.constant 0 : index
    %165 = vector.load %arg5[%c0_63, %c0_64] : memref<64x128xbf16, #tpu.memory_space<vmem>>, vector<64x128xbf16>
    %cst_65 = arith.constant dense<0.000000e+00> : vector<128x128xf32>
    %166 = tpu.matmul %164, %165, %cst_65 {dimension_numbers = #tpu.dot_dimension_numbers<[1], [0], [0], [1], [0, 0, 1, 1], [], []>} : vector<128x64xbf16>, vector<64x128xbf16>, vector<128x128xf32> -> vector<128x128xf32>
    %c0_66 = arith.constant 0 : index
    %c0_67 = arith.constant 0 : index
    %167 = vector.load %arg4[%c0_66, %c0_67] : memref<128x128xf32, #tpu.memory_space<vmem>>, vector<128x128xf32>
    %168 = arith.addf %166, %167 : vector<128x128xf32>
    %169 = arith.negf %168 : vector<128x128xf32>
    %170 = math.exp %169 : vector<128x128xf32>
    %cst_68 = arith.constant 1.000000e+00 : f32
    %171 = vector.broadcast %cst_68 : f32 to vector<128x128xf32>
    %172 = arith.addf %171, %170 : vector<128x128xf32>
    %173 = arith.divf %171, %172 : vector<128x128xf32>
    %174 = arith.mulf %168, %173 : vector<128x128xf32>
    %175 = arith.truncf %174 : vector<128x128xf32> to vector<128x128xbf16>
    %c0_69 = arith.constant 0 : index
    %c0_70 = arith.constant 0 : index
    %176 = vector.load %arg6[%c0_69, %c0_70] : memref<128x128xbf16, #tpu.memory_space<vmem>>, vector<128x128xbf16>
    %cst_71 = arith.constant dense<0.000000e+00> : vector<128x128xf32>
    %177 = tpu.matmul %175, %176, %cst_71 {dimension_numbers = #tpu.dot_dimension_numbers<[1], [0], [0], [1], [0, 0, 1, 1], [], []>} : vector<128x128xbf16>, vector<128x128xbf16>, vector<128x128xf32> -> vector<128x128xf32>
    %c0_72 = arith.constant 0 : index
    %c0_73 = arith.constant 0 : index
    %178 = vector.load %arg7[%c0_72, %c0_73] : memref<1x128xf32, #tpu.memory_space<vmem>>, vector<1x128xf32>
    %179 = vector.broadcast %178 : vector<1x128xf32> to vector<128x128xf32>
    %180 = arith.addf %177, %179 : vector<128x128xf32>
    %181 = arith.negf %180 : vector<128x128xf32>
    %182 = math.exp %181 : vector<128x128xf32>
    %cst_74 = arith.constant 1.000000e+00 : f32
    %183 = vector.broadcast %cst_74 : f32 to vector<128x128xf32>
    %184 = arith.addf %183, %182 : vector<128x128xf32>
    %185 = arith.divf %183, %184 : vector<128x128xf32>
    %186 = arith.mulf %180, %185 : vector<128x128xf32>
    %c0_75 = arith.constant 0 : index
    %c0_76 = arith.constant 0 : index
    %187 = vector.load %arg8[%c0_75, %c0_76] : memref<1x128xf32, #tpu.memory_space<vmem>>, vector<1x128xf32>
    %cst_77 = arith.constant dense<0.000000e+00> : vector<1x128xf32>
    %188 = tpu.matmul %187, %186, %cst_77 {dimension_numbers = #tpu.dot_dimension_numbers<[1], [1], [0], [0], [0, 0, 1, 0], [], []>} : vector<1x128xf32>, vector<128x128xf32>, vector<1x128xf32> -> vector<1x128xf32>
    %c0_78 = arith.constant 0 : index
    %189 = memref.load %arg9[%c0_78] : memref<1xf32, #tpu.memory_space<smem>>
    %190 = vector.broadcast %189 : f32 to vector<1x128xf32>
    %191 = arith.addf %188, %190 : vector<1x128xf32>
    %c0_79 = arith.constant 0 : index
    %c0_80 = arith.constant 0 : index
    %192 = vector.load %arg10[%c0_79, %c0_80] : memref<1x128xf32, #tpu.memory_space<vmem>>, vector<1x128xf32>
    tpu.vector_store %arg10[%c0_79, %c0_80], %191 {strides = array<i32>} : memref<1x128xf32, #tpu.memory_space<vmem>>, vector<1x128xf32>,
    return
  }
  func.func @transform_0(%arg0: i32) -> (i32, i32) {
    %c0_i32 = arith.constant 0 : i32
    %c0_i32_0 = arith.constant 0 : i32
    return %arg0, %c0_i32 : i32, i32
  }
  func.func @transform_1(%arg0: i32) -> (i32, i32) {
    %c0_i32 = arith.constant 0 : i32
    %c0_i32_0 = arith.constant 0 : i32
    %c0_i32_1 = arith.constant 0 : i32
    return %c0_i32, %c0_i32_0 : i32, i32
  }
  func.func @transform_2(%arg0: i32) -> (i32, i32) {
    %c0_i32 = arith.constant 0 : i32
    %c0_i32_0 = arith.constant 0 : i32
    %c0_i32_1 = arith.constant 0 : i32
    return %c0_i32, %c0_i32_0 : i32, i32
  }
  func.func @transform_3(%arg0: i32) -> (i32, i32) {
    %c0_i32 = arith.constant 0 : i32
    %c0_i32_0 = arith.constant 0 : i32
    return %arg0, %c0_i32 : i32, i32
  }
  func.func @transform_4(%arg0: i32) -> (i32, i32) {
    %c0_i32 = arith.constant 0 : i32
    %c0_i32_0 = arith.constant 0 : i32
    %c0_i32_1 = arith.constant 0 : i32
    return %c0_i32, %c0_i32_0 : i32, i32
  }
  func.func @transform_5(%arg0: i32) -> (i32, i32) {
    %c0_i32 = arith.constant 0 : i32
    %c0_i32_0 = arith.constant 0 : i32
    %c0_i32_1 = arith.constant 0 : i32
    return %c0_i32, %c0_i32_0 : i32, i32
  }
  func.func @transform_6(%arg0: i32) -> (i32, i32) {
    %c0_i32 = arith.constant 0 : i32
    %c0_i32_0 = arith.constant 0 : i32
    %c0_i32_1 = arith.constant 0 : i32
    return %c0_i32, %c0_i32_0 : i32, i32
  }
  func.func @transform_7(%arg0: i32) -> (i32, i32) {
    %c0_i32 = arith.constant 0 : i32
    %c0_i32_0 = arith.constant 0 : i32
    %c0_i32_1 = arith.constant 0 : i32
    return %c0_i32, %c0_i32_0 : i32, i32
  }
  func.func @transform_8(%arg0: i32) -> i32 {
    %c0_i32 = arith.constant 0 : i32
    %c0_i32_0 = arith.constant 0 : i32
    return %c0_i32 : i32
  }
  func.func @transform_9(%arg0: i32) -> (i32, i32) {
    %c0_i32 = arith.constant 0 : i32
    %c0_i32_0 = arith.constant 0 : i32
    return %c0_i32, %arg0 : i32, i32
  }
}

</mosaic_0001>

<bundles_post_ra>
// kernel: tpu_custom_call.1
= control target key start
LH: loop header
LB: loop body
LE: loop exit
PB: predicated region body
PF: predicated region fallthrough
CT: control target
= control target key end

     0   :  { %s11442_s0 = inlined_call_operand.hbm [shape: f32[256,768], index: 0, kind: input, shape index: {}]   ;;  %s11443_s1 = inlined_call_operand.vmem [shape: f32[8,3], index: 1, kind: input, shape index: {}]   ;;  %s11444_s2 = inlined_call_operand.vmem [shape: f32[8,64], index: 2, kind: input, shape index: {}]   ;;  %s11445_s3 = inlined_call_operand.hbm [shape: f32[256,128], index: 3, kind: input, shape index: {}]   ;;  %s11446_s4 = inlined_call_operand.hbm [shape: bf16[64,128], index: 4, kind: input, shape index: {}]   ;;  %s11447_s5 = inlined_call_operand.hbm [shape: bf16[128,128], index: 5, kind: input, shape index: {}]   ;;  %s11448_s6 = inlined_call_operand.vmem [shape: f32[1,128], index: 6, kind: input, shape index: {}]   ;;  %s11449_s7 = inlined_call_operand.vmem [shape: f32[1,128], index: 7, kind: input, shape index: {}]   ;;  %s11450_s8 = inlined_call_operand.<no memory space> [shape: f32[1], index: 8, kind: input, shape index: {}]   ;;  %s11451_s9 = inlined_call_operand.hbm [shape: f32[1,256], index: 9, kind: output, shape index: {}]  }
   0x1   :  { %11575 = sst [smem:[#allocation63_spill]] %s11442_s0 }
   0x2   :  { %11576 = sst [smem:[#allocation64_spill]] %s11443_s1 }
   0x3   :  { %11577 = sst [smem:[#allocation65_spill]] %s11446_s4 }
   0x4   :  { %11578 = sst [smem:[#allocation66_spill]] %s11447_s5 }
   0x5   :  { %14 = sst [smem:[#allocation2]] %s11450_s8 }
   0x6   :  { %15 = vsyncpa [#allocation4], 0 }
   0x7   :  { %17 = vsyncpa [#allocation4 + $0x1], 0 }
   0x8   :  { %18 = vsyncpa [#allocation6], 0 }
   0x9   :  { %19 = vsyncpa [#allocation9], 0 }
   0xa   :  { %21 = vsyncpa [#allocation9 + $0x1], 0 }
   0xb   :  { %22 = vsyncpa [#allocation12], 0 }
   0xc   :  { %23 = vsyncpa [#allocation5], 0 }
   0xd   :  { %25 = vsyncpa [#allocation5 + $0x1], 0  ;;  %s7526_s11 = smov 0   ;;  %s7528_s12 = smov 0  }
   0xe   :  { %s7530_s13 = smov 0   ;;  %s7532_s14 = smov 0  }
   0xf LB: > { %11579 = sst [smem:[#allocation20_spill]] %s7452_s13  ;;  %s7547_s8 = sadd.s32 4294967295, %s7456_s14   ;;  %s7456_s14 = sphi %s7532_s14, %s11804_s14   ;;  %s7452_s13 = sphi %s7530_s13, %s11801_s13   ;;  %s7448_s12 = sphi %s7528_s12, %s11803_s12   ;;  %s7444_s11 = sphi %s7526_s11, %s11802_s11  }
  0x10   : > { %s5249_s15 = sadd.s32 4294967294, %s7456_s14   ;;  %p51_p0 = scmp.ne.s32.totalorder %s7448_s12, %s7444_s11 }
  0x11   : > { %p11452_p1 = scmp.eq.s32.totalorder %s7547_s8, 0  ;;  %p254_p3 = scmp.eq.s32.totalorder %s5249_s15, 1 }
  0x12   : > { %p5250_p5 = scmp.ge.s32.totalorder %s7456_s14, 1  ;;  %p261_p7 = scmp.lt.s32.totalorder %s7456_s14, 3 }
  0x13   : > { %p7556_p4 = por %p11452_p1, %p51_p0  ;;  %p7561_p6 = por %p254_p3, %p51_p0 }
  0x14   : > { %p7566_p8 = pnand %p5250_p5, %p261_p7  ;;  %s7458_s19 = smov [#allocation10]  }
  0x15   : > { %s11580_s16 = scalar_select %p7556_p4, 1, 0 }
  0x16   : > { %s11581_s17 = scalar_select %p7561_p6, 1, 0 }
  0x17   : > { %s11582_s18 = scalar_select %p7566_p8, 1, 0 }
  0x18   : > { %s287_s20 = sshll.u32 %s7458_s19, 4  ;;  %p5858_p9 = pneg %p7566_p8  ;;  %s7570_s20 = int_to_ptr.vmem [resolvable:$true] %s287_s20 }
  0x19   : > { %s11583_s1 = sld [smem:[#allocation64_spill]]  ;;  %s7459_s25 = smov [#allocation11]  }
  0x1a   : > { %p7580_p11 = pnand %p5858_p9, %p11452_p1  ;;  %s7586_s26 = sshll.u32 %s7459_s25, 4  ;;  %s301_s26 = int_to_ptr.vmem [resolvable:$true] %s7586_s26 }
  0x1b   : > { %s11585_s4 = sld [smem:[#allocation65_spill]] }
  0x1c   : > { %p7596_p13 = pneg %p7580_p11 }
  0x1f   : > { %s274_s23 = sshll.u32 %s11583_s1, 4  ;;  %s7584_s23 = int_to_ptr.vmem [resolvable:$true] %s274_s23 }
  0x21   : > { %s7243_s29 = scalar_lea.hbm %s11585_s4, 512 }
  0x22   : > { %p7244_p12 = scmp.ne.s32.totalorder %s11585_s4, %s7243_s29  ;;  %p7250_p5 = scmp.lt.u32.totalorder %s7243_s29, %s11585_s4 }
  0x24   : > { %p7246_p0 = pnand %p7596_p13, %p7244_p12 }
  0x26   : > { %p7247_p3 = pneg %p7246_p0 }
  0x28   : > { %p7252_p7 = pnand %p7250_p5, %p7247_p3 }
  0x2a   : > { %7255 = shalt.err (!%p7252_p7)
}
  0x2b   : > { %s7256_s22 = scalar_lea.vmem %s7570_s20, 512  ;;  %p7264_p2 = scmp.lt.s32.totalorder %s7570_s20, %s7570_s20 }
  0x2c   : > { %p7257_p9 = scmp.ne.s32.totalorder %s7570_s20, %s7256_s22  ;;  %p7265_p6 = scmp.lt.s32.totalorder %s7256_s22, %s7256_s22 }
  0x2e   : > { %p7259_p10 = pnand %p7257_p9, %p7596_p13  ;;  %p7266_p12 = por %p7265_p6, %p7264_p2 }
  0x30   : > { %p7260_p1 = pneg %p7259_p10 }
  0x32   : > { %p7267_p0 = pnand %p7266_p12, %p7260_p1 }
  0x34   : > { %7270 = shalt.err (!%p7267_p0)
}
  0x35   : > { %s11453_s25 = smov 64   ;;  %s7461_s27 = smov 4  }
  0x36   : > { %5864 = dma.hbm_to_vmem [thread:$0]  (!%p7580_p11), %s11585_s4, 512, %s7570_s20, [#allocation9], %s11453_s25, %s11453_s25, %s7461_s27  }
  0x37   : > { %s7271_s30 = scalar_lea.vmem %s7584_s23, 128  ;;  %p7279_p10 = scmp.lt.s32.totalorder %s7584_s23, %s7584_s23 }
  0x38   : > { %p7272_p2 = scmp.ne.s32.totalorder %s7584_s23, %s7271_s30  ;;  %p7280_p3 = scmp.lt.s32.totalorder %s7271_s30, %s7271_s30 }
  0x3a   : > { %p7274_p1 = pnand %p7272_p2, %p7596_p13  ;;  %p7281_p5 = por %p7280_p3, %p7279_p10 }
  0x3c   : > { %p7275_p6 = pneg %p7274_p1 }
  0x3e   : > { %p7282_p7 = pnand %p7281_p5, %p7275_p6 }
  0x40   : > { %7285 = shalt.err (!%p7282_p7)
}
  0x41   : > { %s7462_s10 = smov [#allocation7]   ;;  %s11587_s5 = sld [smem:[#allocation66_spill]] }
  0x42   : > { %5861 = dma.vmem_to_smem (!%p7580_p11), %s7584_s23, 128, %s7462_s10, [#allocation6]  }
  0x47   : > { %s7286_s21 = scalar_lea.hbm %s11587_s5, 1024 }
  0x48   : > { %p7287_p9 = scmp.ne.s32.totalorder %s11587_s5, %s7286_s21  ;;  %p7293_p2 = scmp.lt.u32.totalorder %s7286_s21, %s11587_s5 }
  0x4a   : > { %p7289_p12 = pnand %p7287_p9, %p7596_p13 }
  0x4c   : > { %p7290_p0 = pneg %p7289_p12 }
  0x4e   : > { %p7295_p1 = pnand %p7293_p2, %p7290_p0 }
  0x50   : > { %7298 = shalt.err (!%p7295_p1)
}
  0x51   : > { %s7299_s25 = scalar_lea.vmem %s301_s26, 1024  ;;  %p7307_p5 = scmp.lt.s32.totalorder %s301_s26, %s301_s26 }
  0x52   : > { %p7300_p6 = scmp.ne.s32.totalorder %s301_s26, %s7299_s25  ;;  %p7308_p7 = scmp.lt.s32.totalorder %s7299_s25, %s7299_s25 }
  0x54   : > { %p7302_p10 = pnand %p7300_p6, %p7596_p13  ;;  %p7309_p4 = por %p7308_p7, %p7307_p5 }
  0x56   : > { %p7303_p3 = pneg %p7302_p10 }
  0x58   : > { %p7310_p8 = pnand %p7309_p4, %p7303_p3 }
  0x5a   : > { %7313 = shalt.err (!%p7310_p8)
}
  0x5b   : > { %s11588_s23 = smov 64   ;;  %s7652_s15 = sadd.s32 1, %s7456_s14  }
  0x5c   : > { %5867 = dma.hbm_to_vmem [thread:$0]  (!%p7580_p11), %s11587_s5, 1024, %s301_s26, [#allocation12], %s11588_s23, %s11588_s23, %s7461_s27  }
  0x5d   : > { %s35_s24 = ssub.s32 %s7456_s14, %s7652_s15  ;;  %s38_s25 = sadd.s32 1, %s7452_s13 }
  0x5e   : > { %p36_p4 = scmp.eq.s32.totalorder %s35_s24, 0  ;;  %p45_p8 = scmp.ne.s32.totalorder %s7452_s13, %s7448_s12 }
  0x5f   : > { %p46_p13 = scmp.eq.s32.totalorder %s7456_s14, 0  ;;  %p5882_p9 = scmp.lt.s32.totalorder %s7456_s14, 2 }
  0x60   : > { %s7662_s19 = scalar_select %p36_p4, %s7452_s13, %s38_s25  }
  0x61   : > { %p47_p12 = por %p46_p13, %p45_p8  ;;  %p11590_p0 = scmp.eq.s32.totalorder %s7547_s8, 1 }
  0x62   : > { %11589 = sst [smem:[#allocation21_spill]] %s7662_s19  ;;  %s7671_s22 = sand.u32 1, %s7452_s13  }
  0x63   : > { %p7666_p2 = por %p11590_p0, %p45_p8  ;;  %s5838_s26 = smul.u32 12288, %s7456_s14 }
  0x64   : > { %s5837_s27 = smul.u32 768, %s7671_s22  ;;  %s11592_s0 = sld [smem:[#allocation63_spill]] }
  0x65   : > { %p7680_p11 = pnand %p5882_p9, %p47_p12  ;;  %s324_s24 = scalar_lea.sflag [#allocation4], %s7671_s22 }
  0x66   : > { %s327_s10 = scalar_lea.vmem [#allocation3], %s5837_s27 }
  0x67   : > { %s335_s20 = sshll.u32 %s327_s10, 4  ;;  %p7316_p6 = pneg %p7680_p11  ;;  %s7684_s20 = int_to_ptr.vmem [resolvable:$true] %s335_s20 }
  0x6a   : > { %s7678_s30 = scalar_lea.hbm %s11592_s0, %s5838_s26  ;;  %s7319_s29 = scalar_lea.hbm %s11592_s0, 24576 }
  0x6b   : > { %s7314_s25 = scalar_lea.hbm %s7678_s30, 12288  ;;  %p7320_p5 = scmp.lt.u32.totalorder %s7678_s30, %s11592_s0 }
  0x6c   : > { %p7315_p1 = scmp.ne.s32.totalorder %s7678_s30, %s7314_s25  ;;  %p7321_p7 = scmp.lt.u32.totalorder %s7319_s29, %s7314_s25 }
  0x6d   : > { %p7323_p8 = scmp.lt.u32.totalorder %s7314_s25, %s7678_s30 }
  0x6e   : > { %p7317_p10 = pnand %p7316_p6, %p7315_p1  ;;  %p7322_p4 = por %p7321_p7, %p7320_p5 }
  0x70   : > { %p7318_p3 = pneg %p7317_p10  ;;  %p7324_p13 = por %p7323_p8, %p7322_p4 }
  0x72   : > { %p7325_p9 = pnand %p7324_p13, %p7318_p3 }
  0x74   : > { %7328 = shalt.err (!%p7325_p9)
}
  0x75   : > { %s7329_s27 = scalar_lea.vmem %s7684_s20, 12288  ;;  %s7463_s10 = smov [#allocation3]  }
  0x76   : > { %p7330_p12 = scmp.ne.s32.totalorder %s7684_s20, %s7329_s27  ;;  %s7334_s26 = sshll.u32 %s7463_s10, 4  ;;  %s7335_s26 = int_to_ptr.vmem [resolvable:$false] %s7334_s26 }
  0x77   : > { %s7336_s1 = scalar_lea.vmem %s7335_s26, 24576  ;;  %p7337_p10 = scmp.lt.s32.totalorder %s7684_s20, %s7335_s26 }
  0x78   : > { %p7332_p0 = pnand %p7330_p12, %p7316_p6  ;;  %p7338_p5 = scmp.lt.s32.totalorder %s7336_s1, %s7329_s27 }
  0x7a   : > { %p7333_p1 = pneg %p7332_p0  ;;  %p7339_p7 = por %p7338_p5, %p7337_p10 }
  0x7c   : > { %p7340_p4 = pnand %p7339_p7, %p7333_p1 }
  0x7e   : > { %7343 = shalt.err (!%p7340_p4)
}
  0x7f   : > { %s7464_s4 = smov 768   ;;  %s7465_s25 = smov 48  }
  0x80   : > { %5871 = dma.hbm_to_vmem [thread:$0]  (!%p7680_p11), %s7678_s30, 12288, %s7684_s20, %s324_s24, %s7464_s4, %s7464_s4, %s7465_s25  }
  0x81   : > { %s345_s28 = sand.u32 1, %s7456_s14   ;;  %s5258_s29 = sshll.u32 %s7671_s22, 7 }
  0x82   : > { %s5633_s10 = sshll.u32 %s7456_s14, 11  ;;  %s349_s27 = scalar_lea.vmem [#allocation8], %s5258_s29 }
  0x83   : > { %s356_s26 = sshll.u32 %s349_s27, 4  ;;  %s7720_s5 = scalar_lea.hbm %s11445_s3, %s5633_s10  ;;  %s7722_s26 = int_to_ptr.vmem [resolvable:$true] %s356_s26 }
  0x84   : > { %s7724_s19 = scalar_lea.sflag [#allocation9], %s345_s28  ;;  %s7344_s13 = scalar_lea.hbm %s7720_s5, 2048 }
  0x85   : > { %p7345_p3 = scmp.ne.s32.totalorder %s7720_s5, %s7344_s13  ;;  %s7349_s0 = scalar_lea.hbm %s11445_s3, 4096 }
  0x86   : > { %p7350_p9 = scmp.lt.u32.totalorder %s7720_s5, %s11445_s3  ;;  %p7351_p12 = scmp.lt.u32.totalorder %s7349_s0, %s7344_s13 }
  0x87   : > { %p7347_p8 = pnand %p7345_p3, %p7316_p6  ;;  %p7353_p1 = scmp.lt.u32.totalorder %s7344_s13, %s7720_s5 }
  0x88   : > { %p7352_p0 = por %p7351_p12, %p7350_p9 }
  0x89   : > { %p7348_p13 = pneg %p7347_p8 }
  0x8a   : > { %p7354_p10 = por %p7353_p1, %p7352_p0 }
  0x8c   : > { %p7355_p5 = pnand %p7354_p10, %p7348_p13 }
  0x8e   : > { %7358 = shalt.err (!%p7355_p5)
}
  0x8f   : > { %s7359_s4 = scalar_lea.vmem %s7722_s26, 2048  ;;  %s7466_s25 = smov [#allocation8]  }
  0x90   : > { %p7360_p7 = scmp.ne.s32.totalorder %s7722_s26, %s7359_s4  ;;  %s7364_s28 = sshll.u32 %s7466_s25, 4  ;;  %s7365_s28 = int_to_ptr.vmem [resolvable:$false] %s7364_s28 }
  0x91   : > { %s7366_s29 = scalar_lea.vmem %s7365_s28, 4096  ;;  %p7367_p8 = scmp.lt.s32.totalorder %s7722_s26, %s7365_s28 }
  0x92   : > { %p7362_p4 = pnand %p7360_p7, %p7316_p6  ;;  %p7368_p9 = scmp.lt.s32.totalorder %s7366_s29, %s7359_s4 }
  0x94   : > { %p7363_p3 = pneg %p7362_p4  ;;  %p7369_p12 = por %p7368_p9, %p7367_p8 }
  0x96   : > { %p7370_p0 = pnand %p7369_p12, %p7363_p3 }
  0x98   : > { %7373 = shalt.err (!%p7370_p0)
}
  0x99   : > { %s7467_s13 = smov 128   ;;  %s7468_s10 = smov 8  }
  0x9a   : > { %5874 = dma.hbm_to_vmem [thread:$0]  (!%p7680_p11), %s7720_s5, 2048, %s7722_s26, %s7724_s19, %s7467_s13, %s7467_s13, %s7468_s10  }
  0x9b   : > { %p11594_p6 = scmp.ne.s32.totalorder %s11582_s18, 0 }
  0x9d   : > { %368 = sbr.rel (%p11594_p6) target bundleno = 2031 (0x7ef), region = 56 }
  0xa4   : > { %s7753_s27 = sand.u32 1, %s7448_s12   ;;  %p11595_p13 = scmp.ne.s32.totalorder %s11580_s16, 0 }
  0xa5   : > { %s5839_s1 = smul.u32 768, %s7753_s27  ;;  %s371_s22 = scalar_lea.sflag [#allocation4], %s7753_s27 }
  0xa7   : > { %s7757_s30 = scalar_lea.vmem [#allocation3], %s5839_s1 }
  0xa8   : > { %7419 = dma.done.wait (%p11595_p13), %s371_s22, 12288  }
  0xa9   : > { %7421 = vsyncadd (%p11595_p13), %s371_s22, 4294955008  ;;  %p11596_p11 = scmp.eq.s32.totalorder %s7547_s8, 0 }
  0xab   : > { %7423 = dma.done.wait (%p11596_p11), [#allocation6], 128   ;;  %p11597_p1 = pmov %p11596_p11 }
  0xac   : > { %s383_s5 = sand.u32 1, %s7547_s8   ;;  %s5263_s18 = sshll.u32 %s7753_s27, 7 }
  0xad   : > { %7425 = vsyncadd (%p11597_p1), [#allocation6], 4294967168  ;;  %s384_s19 = scalar_lea.sflag [#allocation9], %s383_s5  ;;  %s7769_s23 = scalar_lea.vmem [#allocation8], %s5263_s18 }
  0xae   : > { %7427 = dma.done.wait (%p11595_p13), %s384_s19, 2048  }
  0xaf   : > { %7429 = vsyncadd (%p11595_p13), %s384_s19, 4294965248  ;;  %p11598_p10 = pmov %p11597_p1 }
  0xb0   : > { %p11599_p5 = pmov %p11597_p1 }
  0xb1   : > { %7431 = dma.done.wait (%p11598_p10), [#allocation9], 512  }
  0xb2   : > { %7433 = vsyncadd (%p11599_p5), [#allocation9], 4294966784  ;;  %p11600_p7 = pmov %p11597_p1 }
  0xb3   : > { %p11601_p4 = pmov %p11597_p1 }
  0xb4   : > { %7435 = dma.done.wait (%p11600_p7), [#allocation12], 1024  }
  0xb5   : > { %7437 = vsyncadd (%p11601_p4), [#allocation12], 4294966272 }
  0xb6   : > { %400 = sfence }
  0xb7   : > { %s534_s26 = sld [smem:[#allocation7]]  ;;  %s5266_s16 = sld [smem:[#allocation7 + $0x1]]  ;;  %v7784_v0 = vld [vmem:[%s7757_s30 + $0x30] sm:$0xff]  ;;  %v7789_v1 = vld [vmem:[%s7757_s30 + $0x38] sm:$0xff]  ;;  %v7792_v2 = vld [vmem:[%s7757_s30 + $0x40] sm:$0xff]  ;;  %vm4038_vm0 = vcmask 7168  }
  0xb8   : > { %s5267_s0 = sld [smem:[#allocation7 + $0x2]]  ;;  %s7786_s20 = sld [smem:[#allocation7 + $0x80]]  ;;  %v7795_v3 = vld [vmem:[%s7757_s30] sm:$0xff]  ;;  %v7800_v4 = vld [vmem:[%s7757_s30 + $0x48] sm:$0xff]  ;;  %v7803_v5 = vld [vmem:[%s7757_s30 + $0x50] sm:$0xff]  ;;  %vm4055_vm1 = vcmask 15360  }
  0xb9   : > { %s7797_s24 = sld [smem:[#allocation7 + $0x81]]  ;;  %v7806_v6 = vld [vmem:[%s7757_s30 + $0x8] sm:$0xff]  ;;  %v7809_v7 = vld [vmem:[%s7757_s30 + $0x58] sm:$0xff]  ;;  %v7814_v9 = vld [vmem:[%s7757_s30 + $0x10] sm:$0xff]  ;;  %s7819_s4 = sld [smem:[#allocation7 + $0x82]]  ;;  %vm4072_vm2 = vcmask 23552  }
  0xba   : > { %v7817_v10 = vld [vmem:[%s7757_s30 + $0x18] sm:$0xff]  ;;  %v7828_v14 = vld [vmem:[%s7757_s30 + $0x20] sm:$0xff]  ;;  %v7831_v15 = vld [vmem:[%s7757_s30 + $0x28] sm:$0xff]  ;;  %s7861_s25 = sld [smem:[#allocation7 + $0x100]]  ;;  %s7871_s28 = sld [smem:[#allocation7 + $0x101]]  ;;  %vm4089_vm3 = vcmask 31744  }
  0xbb   : > { %s7881_s29 = sld [smem:[#allocation7 + $0x102]]  ;;  %s7883_s13 = sld [smem:[#allocation7 + $0x180]]  ;;  %vm4106_vm4 = vcmask 39936   ;;  %vm4123_vm5 = vcmask 48128   ;;  %vm4140_vm6 = vcmask 56320   ;;  %vm4158_vm7 = vcmask 64512  }
  0xbc   : > { %s7937_s10 = sld [smem:[#allocation7 + $0x181]]  ;;  %s7947_s1 = sld [smem:[#allocation7 + $0x182]]  ;;  %vm4520_vm8 = vcmask 523264   ;;  %vm7470_vm9 = vmmov 0  }
  0xbd   : > { %v7811_v8 = vstv %s534_s26  ;;  %v7825_v13 = vstv %s5266_s16  ;;  %s8012_s22 = sld [smem:[#allocation7 + $0x200]]  ;;  %s8031_s5 = sld [smem:[#allocation7 + $0x201]] }
  0xbe   : > { %11602 = vst [vmem:[#allocation22_spill] sm:$0xff] %v7811_v8  ;;  %v538_v11 = vmul.f32 %v7811_v8, %v7784_v0  ;;  %v539_v12 = vmul.f32 %v7811_v8, %v7789_v1  ;;  %11603 = vst [vmem:[#allocation23_spill] sm:$0xff] %v7825_v13  ;;  %v536_v16 = vmul.f32 %v7811_v8, %v7795_v3  ;;  %v7839_v19 = vstv %s5267_s0  ;;  %s8046_s18 = sld [smem:[#allocation7 + $0x202]]  ;;  %s8128_s19 = sld [smem:[#allocation7 + $0x280]] }
  0xbf   : > { %v572_v17 = vmul.f32 %v7825_v13, %v7792_v2  ;;  %v573_v18 = vmul.f32 %v7825_v13, %v7800_v4  ;;  %11604 = vst [vmem:[#allocation24_spill] sm:$0xff] %v7839_v19  ;;  %v537_v20 = vmul.f32 %v7811_v8, %v7806_v6  ;;  %v638_v21 = vmul.f32 %v7839_v19, %v7803_v5  ;;  %s8130_s26 = sld [smem:[#allocation7 + $0x281]]  ;;  %s8155_s16 = sld [smem:[#allocation7 + $0x282]] }
  0xc0   : > { %v639_v22 = vmul.f32 %v7839_v19, %v7809_v7  ;;  %v570_v23 = vmul.f32 %v7825_v13, %v7814_v9  ;;  %v571_v24 = vmul.f32 %v7825_v13, %v7817_v10  ;;  %v636_v27 = vmul.f32 %v7839_v19, %v7828_v14  ;;  %s8208_s0 = sld [smem:[#allocation7 + $0x300]] }
  0xc1   : > { %v604_v25 = vadd.f32 %v572_v17, %v538_v11  ;;  %v605_v26 = vadd.f32 %v573_v18, %v539_v12  ;;  %v637_v28 = vmul.f32 %v7839_v19, %v7831_v15  ;;  %v7856_v31 = vstv %s7786_s20  ;;  %s8210_s20 = sld [smem:[#allocation7 + $0x301]] }
  0xc2   : > { %v602_v29 = vadd.f32 %v570_v23, %v536_v16  ;;  %v603_v30 = vadd.f32 %v571_v24, %v537_v20  ;;  %11605 = vst [vmem:[#allocation25_spill] sm:$0xff] %v7856_v31  ;;  %v7859_v32 = vstv %s7797_s24  ;;  %v976_v35 = vmul.f32 %v7856_v31, %v7784_v0  ;;  %s8232_s24 = sld [smem:[#allocation7 + $0x302]] }
  0xc3   : > { %11606 = vst [vmem:[#allocation26_spill] sm:$0xff] %v7859_v32  ;;  %v7863_v33 = vadd.f32 %v638_v21, %v604_v25  ;;  %v7865_v34 = vadd.f32 %v639_v22, %v605_v26  ;;  %v977_v36 = vmul.f32 %v7856_v31, %v7789_v1  ;;  %v1010_v39 = vmul.f32 %v7859_v32, %v7792_v2 }
  0xc4   : > { %v7873_v37 = vadd.f32 %v636_v27, %v602_v29  ;;  %v7875_v38 = vadd.f32 %v637_v28, %v603_v30  ;;  %v1011_v40 = vmul.f32 %v7859_v32, %v7800_v4  ;;  %v7888_v43 = vstv %s7819_s4  ;;  %s8303_s4 = sld [smem:[#allocation7 + $0x380]] }
  0xc5   : > { %v5270_v41 = vmul.f32 -1.442695, %v7863_v33  ;;  %v5271_v42 = vmul.f32 -1.442695, %v7865_v34  ;;  %11607 = vst [vmem:[#allocation27_spill] sm:$0xff] %v7888_v43  ;;  %v974_v44 = vmul.f32 %v7856_v31, %v7795_v3  ;;  %v1042_v47 = vadd.f32 %v1010_v39, %v976_v35 }
  0xc6   : > { %v5268_v45 = vmul.f32 -1.442695, %v7873_v37  ;;  %v5269_v46 = vmul.f32 -1.442695, %v7875_v38  ;;  %v1043_v48 = vadd.f32 %v1011_v40, %v977_v36  ;;  %v1076_v49 = vmul.f32 %v7888_v43, %v7803_v5 }
  0xc7   : > { %5943 = vpow2.f32 %v5270_v41  ;;  %v1077_v50 = vmul.f32 %v7888_v43, %v7809_v7  ;;  %v975_v51 = vmul.f32 %v7856_v31, %v7806_v6  ;;  %v1008_v52 = vmul.f32 %v7859_v32, %v7814_v9 }
  0xc8   : > { %5945 = vpow2.f32 %v5271_v42  ;;  %v1009_v53 = vmul.f32 %v7859_v32, %v7817_v10  ;;  %v1074_v54 = vmul.f32 %v7888_v43, %v7828_v14  ;;  %v7906_v55 = vadd.f32 %v1076_v49, %v1042_v47 }
  0xc9   : > { %5947 = vpow2.f32 %v5268_v45  ;;  %v7908_v56 = vadd.f32 %v1077_v50, %v1043_v48  ;;  %v1075_v57 = vmul.f32 %v7888_v43, %v7831_v15  ;;  %v1040_v58 = vadd.f32 %v1008_v52, %v974_v44 }
  0xca   : > { %5949 = vpow2.f32 %v5269_v46  ;;  %v1041_v59 = vadd.f32 %v1009_v53, %v975_v51  ;;  %v7913_v60 = vstv %s7861_s25  ;;  %v5305_v61 = vmul.f32 -1.442695, %v7906_v55  ;;  %s8312_s25 = sld [smem:[#allocation7 + $0x381]] }
  0xcb   : > { %11608 = vst [vmem:[#allocation28_spill] sm:$0xff] %v7913_v60  ;;  %v5306_v62 = vmul.f32 -1.442695, %v7908_v56  ;;  %v1414_v63 = vmul.f32 %v7913_v60, %v7784_v0  ;;  %v1415_v11 = vmul.f32 %v7913_v60, %v7789_v1  ;;  %v7921_v12 = vadd.f32 %v1074_v54, %v1040_v58 }
  0xcc   : > { %v7923_v16 = vadd.f32 %v1075_v57, %v1041_v59  ;;  %v7926_v17 = vstv %s7871_s28  ;;  %v7929_v18 = vstv %s7881_s29  ;;  %5951 = vpow2.f32 %v5305_v61  ;;  %s8314_s28 = sld [smem:[#allocation7 + $0x382]] }
  0xcd   : > { %11609 = vst [vmem:[#allocation29_spill] sm:$0xff] %v7926_v17  ;;  %11610 = vst [vmem:[#allocation30_spill] sm:$0xff] %v7929_v18  ;;  %v1448_v20 = vmul.f32 %v7926_v17, %v7792_v2  ;;  %v1449_v21 = vmul.f32 %v7926_v17, %v7800_v4  ;;  %v1514_v22 = vmul.f32 %v7929_v18, %v7803_v5  ;;  %5953 = vpow2.f32 %v5306_v62 }
  0xce   : > { %v5303_v23 = vmul.f32 -1.442695, %v7921_v12  ;;  %v5304_v24 = vmul.f32 -1.442695, %v7923_v16  ;;  %v1515_v25 = vmul.f32 %v7929_v18, %v7809_v7  ;;  %v1412_v28 = vmul.f32 %v7913_v60, %v7795_v3 }
  0xcf   : > { %v1480_v26 = vadd.f32 %v1448_v20, %v1414_v63  ;;  %v1481_v27 = vadd.f32 %v1449_v21, %v1415_v11  ;;  %v1413_v29 = vmul.f32 %v7913_v60, %v7806_v6  ;;  %v1446_v30 = vmul.f32 %v7926_v17, %v7814_v9 }
  0xd0   : > { %5955 = vpow2.f32 %v5303_v23  ;;  %v1447_v35 = vmul.f32 %v7926_v17, %v7817_v10  ;;  %v1512_v36 = vmul.f32 %v7929_v18, %v7828_v14  ;;  %v1513_v42 = vmul.f32 %v7929_v18, %v7831_v15 }
  0xd1   : > { %v5944_v39 = vpop.eup %5943  ;;  %5957 = vpow2.f32 %v5304_v24  ;;  %v7955_v40 = vadd.f32 %v1514_v22, %v1480_v26  ;;  %v7957_v41 = vadd.f32 %v1515_v25, %v1481_v27  ;;  %v1478_v46 = vadd.f32 %v1446_v30, %v1412_v28 }
  0xd2   : > { %v5946_v44 = vpop.eup %5945  ;;  %v798_v45 = vadd.f32 1.0, %v5944_v39  ;;  %v1479_v47 = vadd.f32 %v1447_v35, %v1413_v29  ;;  %v7962_v48 = vstv %s7883_s13  ;;  %v7975_v63 = vstv %s7937_s10 }
  0xd3   : > { %11611 = vst [vmem:[#allocation31_spill] sm:$0xff] %v7962_v48  ;;  %v5948_v49 = vpop.eup %5947  ;;  %v799_v50 = vadd.f32 1.0, %v5946_v44  ;;  %v5340_v51 = vmul.f32 -1.442695, %v7955_v40  ;;  %v5341_v52 = vmul.f32 -1.442695, %v7957_v41  ;;  %v1852_v53 = vmul.f32 %v7962_v48, %v7784_v0 }
  0xd4   : > { %v5950_v54 = vpop.eup %5949  ;;  %5959 = vrcp.f32 %v798_v45  ;;  %v796_v57 = vadd.f32 1.0, %v5948_v49  ;;  %v7968_v58 = vadd.f32 %v1512_v36, %v1478_v46  ;;  %v7970_v59 = vadd.f32 %v1513_v42, %v1479_v47  ;;  %11612 = vst [vmem:[#allocation32_spill] sm:$0xff] %v7975_v63 }
  0xd5   : > { %5961 = vrcp.f32 %v799_v50  ;;  %v797_v61 = vadd.f32 1.0, %v5950_v54  ;;  %v1853_v62 = vmul.f32 %v7962_v48, %v7789_v1  ;;  %v1886_v21 = vmul.f32 %v7975_v63, %v7792_v2 }
  0xd6   : > { %5963 = vrcp.f32 %v796_v57  ;;  %v5338_v11 = vmul.f32 -1.442695, %v7968_v58  ;;  %v5339_v20 = vmul.f32 -1.442695, %v7970_v59  ;;  %v5952_v22 = vpop.eup %5951  ;;  %v1887_v23 = vmul.f32 %v7975_v63, %v7800_v4 }
  0xd7   : > { %5965 = vrcp.f32 %v797_v61  ;;  %v7984_v24 = vstv %s7947_s1  ;;  %v1850_v25 = vmul.f32 %v7962_v48, %v7795_v3  ;;  %v5954_v26 = vpop.eup %5953  ;;  %v1236_v27 = vadd.f32 1.0, %v5952_v22  ;;  %v8010_v61 = vld [vmem:[%s7757_s30 + $0x70] sm:$0xff] }
  0xd8   : > { %11613 = vst [vmem:[#allocation33_spill] sm:$0xff] %v7984_v24  ;;  %5967 = vpow2.f32 %v5340_v51  ;;  %v1918_v28 = vadd.f32 %v1886_v21, %v1852_v53  ;;  %v1952_v29 = vmul.f32 %v7984_v24, %v7803_v5  ;;  %v1237_v30 = vadd.f32 1.0, %v5954_v26  ;;  %v8003_v51 = vld [vmem:[%s7757_s30 + $0x60] sm:$0xff] }
  0xd9   : > { %5969 = vpow2.f32 %v5341_v52  ;;  %v1919_v35 = vadd.f32 %v1887_v23, %v1853_v62  ;;  %v1953_v36 = vmul.f32 %v7984_v24, %v7809_v7  ;;  %v1851_v44 = vmul.f32 %v7962_v48, %v7806_v6  ;;  %v8006_v52 = vld [vmem:[%s7757_s30 + $0x68] sm:$0xff]  ;;  %v8018_v23 = vld [vmem:[%s7757_s30 + $0x78] sm:$0xff] }
  0xda   : > { %v5956_v39 = vpop.eup %5955  ;;  %5971 = vrcp.f32 %v1236_v27  ;;  %v7992_v42 = vadd.f32 %v1952_v29, %v1918_v28  ;;  %v1884_v45 = vmul.f32 %v7975_v63, %v7814_v9  ;;  %v1885_v50 = vmul.f32 %v7975_v63, %v7817_v10 }
  0xdb   : > { %v5958_v46 = vpop.eup %5957  ;;  %5973 = vrcp.f32 %v1237_v30  ;;  %v1234_v47 = vadd.f32 1.0, %v5956_v39  ;;  %v7998_v49 = vadd.f32 %v1953_v36, %v1919_v35  ;;  %v1950_v22 = vmul.f32 %v7984_v24, %v7828_v14 }
  0xdc   : > { %v1235_v53 = vadd.f32 1.0, %v5958_v46  ;;  %5975 = vpow2.f32 %v5338_v11  ;;  %v5375_v54 = vmul.f32 -1.442695, %v7992_v42  ;;  %v1916_v57 = vadd.f32 %v1884_v45, %v1850_v25  ;;  %v8037_v45 = vld [vmem:[%s7757_s30 + $0x80] sm:$0xff]  ;;  %v8040_v46 = vld [vmem:[%s7757_s30 + $0x88] sm:$0xff] }
  0xdd   : > { %5977 = vrcp.f32 %v1234_v47  ;;  %v5376_v62 = vmul.f32 -1.442695, %v7998_v49  ;;  %v1917_v21 = vadd.f32 %v1885_v50, %v1851_v44  ;;  %v1951_v11 = vmul.f32 %v7984_v24, %v7831_v15 }
  0xde   : > { %v5960_v26 = vpop.eup %5959  ;;  %5979 = vrcp.f32 %v1235_v53  ;;  %v540_v25 = vmul.f32 %v7811_v8, %v8003_v51  ;;  %v541_v27 = vmul.f32 %v7811_v8, %v8006_v52  ;;  %v8027_v30 = vadd.f32 %v1950_v22, %v1916_v57 }
  0xdf   : > { %v5962_v28 = vpop.eup %5961  ;;  %v894_v29 = vmul.f32 %v5960_v26, %v7863_v33  ;;  %5981 = vpow2.f32 %v5339_v20  ;;  %v574_v35 = vmul.f32 %v7825_v13, %v8010_v61  ;;  %v8034_v44 = vadd.f32 %v1951_v11, %v1917_v21 }
  0xe0   : > { %v5964_v36 = vpop.eup %5963  ;;  %v895_v39 = vmul.f32 %v5962_v28, %v7865_v34  ;;  %5983 = vpow2.f32 %v5375_v54  ;;  %v575_v33 = vmul.f32 %v7825_v13, %v8018_v23  ;;  %v5373_v50 = vmul.f32 -1.442695, %v8027_v30 }
  0xe1   : > { %v5966_v20 = vpop.eup %5965  ;;  %v892_v47 = vmul.f32 %v5964_v36, %v7873_v37  ;;  %5985 = vpow2.f32 %v5376_v62  ;;  %v606_v53 = vadd.f32 %v574_v35, %v540_v25  ;;  %v5374_v21 = vmul.f32 -1.442695, %v8034_v44 }
  0xe2   : > { %v5968_v34 = vpop.eup %5967  ;;  %v927_v54 = vadd.f32 %v895_v39, %v894_v29  ;;  %v893_v57 = vmul.f32 %v5966_v20, %v7875_v38  ;;  %v607_v22 = vadd.f32 %v575_v33, %v541_v27  ;;  %5987 = vpow2.f32 %v5373_v50 }
  0xe3   : > { %v5970_v26 = vpop.eup %5969  ;;  %v1674_v11 = vadd.f32 1.0, %v5968_v34  ;;  %v640_v37 = vmul.f32 %v7839_v19, %v8037_v45  ;;  %v641_v62 = vmul.f32 %v7839_v19, %v8040_v46  ;;  %5989 = vpow2.f32 %v5374_v21 }
  0xe4   : > { %v5972_v25 = vpop.eup %5971  ;;  %928 = vadd.xlane.f32.xlu1 %v927_v54  ;;  %v924_v28 = vadd.f32 %v893_v57, %v892_v47  ;;  %v1675_v35 = vadd.f32 1.0, %v5970_v26  ;;  %v8055_v29 = vstv %s8012_s22  ;;  %v8070_v57 = vstv %s8031_s5  ;;  %s5043_s22 = sld [smem:[#allocation2]]  ;;  %s5630_s5 = sshll.u32 %s7547_s8, 4 }
  0xe5   : > { %11614 = vst [vmem:[#allocation34_spill] sm:$0xff] %v8055_v29  ;;  %v5974_v38 = vpop.eup %5973  ;;  %v1332_v27 = vmul.f32 %v5972_v25, %v7906_v55  ;;  %5991 = vrcp.f32 %v1674_v11  ;;  %v8058_v36 = vadd.f32 %v640_v37, %v606_v53  ;;  %v8060_v39 = vadd.f32 %v641_v62, %v607_v22  ;;  %11615 = vst [vmem:[#allocation35_spill] sm:$0xff] %v8070_v57  ;;  %s7472_s8 = smov [#allocation13]  }
  0xe6   : > { %v5976_v33 = vpop.eup %5975  ;;  %925 = vadd.xlane.f32.xlu0 %v924_v28  ;;  %v1333_v20 = vmul.f32 %v5974_v38, %v7908_v56  ;;  %5993 = vrcp.f32 %v1675_v35  ;;  %v2288_v47 = vmul.f32 %v8055_v29, %v7795_v3  ;;  %v2289_v50 = vmul.f32 %v8055_v29, %v7806_v6 }
  0xe7   : > { %v5978_v34 = vpop.eup %5977  ;;  %v1672_v54 = vadd.f32 1.0, %v5976_v33  ;;  %v5272_v55 = vmul.f32 -1.442695, %v8058_v36  ;;  %v5273_v53 = vmul.f32 -1.442695, %v8060_v39  ;;  %v2322_v26 = vmul.f32 %v8070_v57, %v7814_v9 }
  0xe8   : > { %v5980_v21 = vpop.eup %5979  ;;  %v1365_v22 = vadd.f32 %v1333_v20, %v1332_v27  ;;  %v1330_v56 = vmul.f32 %v5978_v34, %v7921_v12  ;;  %v2323_v11 = vmul.f32 %v8070_v57, %v7817_v10  ;;  %v8079_v25 = vstv %s8046_s18  ;;  %s434_s18 = scalar_lea.vmem [#allocation13], %s7753_s27 }
  0xe9   : > { %v5982_v37 = vpop.eup %5981  ;;  %v1331_v62 = vmul.f32 %v5980_v21, %v7923_v16  ;;  %5995 = vrcp.f32 %v1672_v54  ;;  %11616 = vst [vmem:[#allocation36_spill] sm:$0xff] %v8079_v25  ;;  %v2290_v28 = vmul.f32 %v8055_v29, %v7784_v0  ;;  %v2354_v12 = vadd.f32 %v2322_v26, %v2288_v47 }
  0xea   : > { %v5984_v35 = vpop.eup %5983  ;;  %1366 = vadd.xlane.f32.xlu1 %v1365_v22  ;;  %v1673_v38 = vadd.f32 1.0, %v5982_v37  ;;  %5997 = vpow2.f32 %v5272_v55  ;;  %v2355_v27 = vadd.f32 %v2323_v11, %v2289_v50  ;;  %v2388_v24 = vmul.f32 %v8079_v25, %v7828_v14 }
  0xeb   : > { %v5986_v33 = vpop.eup %5985  ;;  %v1362_v20 = vadd.f32 %v1331_v62, %v1330_v56  ;;  %v2112_v34 = vadd.f32 1.0, %v5984_v35  ;;  %5999 = vpow2.f32 %v5273_v53  ;;  %v2389_v54 = vmul.f32 %v8079_v25, %v7831_v15 }
  0xec   : > { %6001 = vrcp.f32 %v1673_v38  ;;  %v2113_v16 = vadd.f32 1.0, %v5986_v33  ;;  %v2291_v21 = vmul.f32 %v8055_v29, %v7789_v1  ;;  %v5988_v22 = vpop.eup %5987  ;;  %v8089_v47 = vadd.f32 %v2388_v24, %v2354_v12 }
  0xed   : > { %1363 = vadd.xlane.f32.xlu0 %v1362_v20  ;;  %6003 = vrcp.f32 %v2112_v34  ;;  %v2324_v50 = vmul.f32 %v8070_v57, %v7792_v2  ;;  %v2325_v55 = vmul.f32 %v8070_v57, %v7800_v4  ;;  %v5990_v53 = vpop.eup %5989  ;;  %v2110_v56 = vadd.f32 1.0, %v5988_v22 }
  0xee   : > { %6005 = vrcp.f32 %v2113_v16  ;;  %v8095_v26 = vadd.f32 %v2389_v54, %v2355_v27  ;;  %v2390_v11 = vmul.f32 %v8079_v25, %v7803_v5  ;;  %v2111_v62 = vadd.f32 1.0, %v5990_v53  ;;  %v8119_v53 = vld [vmem:[%s7757_s30 + $0x90] sm:$0xff] }
  0xef   : > { %v5992_v37 = vpop.eup %5991  ;;  %v5408_v35 = vmul.f32 -1.442695, %v8089_v47  ;;  %v2356_v24 = vadd.f32 %v2324_v50, %v2290_v28  ;;  %v2357_v38 = vadd.f32 %v2325_v55, %v2291_v21  ;;  %6007 = vrcp.f32 %v2110_v56  ;;  %v8122_v56 = vld [vmem:[%s7757_s30 + $0x98] sm:$0xff] }
  0xf0   : > { %v5994_v12 = vpop.eup %5993  ;;  %v1770_v33 = vmul.f32 %v5992_v37, %v7955_v40  ;;  %v5409_v20 = vmul.f32 -1.442695, %v8095_v26  ;;  %v2391_v27 = vmul.f32 %v8079_v25, %v7809_v7  ;;  %6009 = vrcp.f32 %v2111_v62 }
  0xf1   : > { %v1771_v34 = vmul.f32 %v5994_v12, %v7957_v41  ;;  %v8105_v16 = vadd.f32 %v2390_v11, %v2356_v24  ;;  %v978_v28 = vmul.f32 %v7856_v31, %v8003_v51  ;;  %6011 = vpow2.f32 %v5408_v35 }
  0xf2   : > { %v8109_v54 = vadd.f32 %v2391_v27, %v2357_v38  ;;  %v979_v40 = vmul.f32 %v7856_v31, %v8006_v52  ;;  %v1012_v21 = vmul.f32 %v7859_v32, %v8010_v61  ;;  %6013 = vpow2.f32 %v5409_v20  ;;  %v8135_v20 = vld [vmem:[%s7757_s30 + $0xa0] sm:$0xff] }
  0xf3   : > { %v5996_v22 = vpop.eup %5995  ;;  %v1803_v50 = vadd.f32 %v1771_v34, %v1770_v33  ;;  %v5410_v41 = vmul.f32 -1.442695, %v8105_v16  ;;  %v1013_v55 = vmul.f32 %v7859_v32, %v8018_v23  ;;  %v1078_v24 = vmul.f32 %v7888_v43, %v8037_v45 }
  0xf4   : > { %v5998_v11 = vpop.eup %5997  ;;  %v1768_v37 = vmul.f32 %v5996_v22, %v7968_v58  ;;  %v5411_v62 = vmul.f32 -1.442695, %v8109_v54  ;;  %v1044_v35 = vadd.f32 %v1012_v21, %v978_v28  ;;  %v1079_v58 = vmul.f32 %v7888_v43, %v8040_v46  ;;  %v8140_v21 = vld [vmem:[%s7757_s30 + $0xa8] sm:$0xff] }
  0xf5   : > { %v6000_v38 = vpop.eup %5999  ;;  %1804 = vadd.xlane.f32.xlu1 %v1803_v50  ;;  %v800_v12 = vadd.f32 1.0, %v5998_v11  ;;  %6015 = vpow2.f32 %v5410_v41  ;;  %v1045_v33 = vadd.f32 %v1013_v55, %v979_v40  ;;  %v542_v22 = vmul.f32 %v7811_v8, %v8119_v53  ;;  %v8148_v41 = vld [vmem:[%s7757_s30 + $0xb0] sm:$0xff]  ;;  %v8151_v55 = vld [vmem:[%s7757_s30 + $0xb8] sm:$0xff] }
  0xf6   : > { %v6002_v27 = vpop.eup %6001  ;;  %v801_v34 = vadd.f32 1.0, %v6000_v38  ;;  %6017 = vpow2.f32 %v5411_v62  ;;  %v8137_v28 = vadd.f32 %v1078_v24, %v1044_v35  ;;  %v543_v62 = vmul.f32 %v7811_v8, %v8122_v56 }
  0xf7   : > { %v6004_v50 = vpop.eup %6003  ;;  %v1769_v11 = vmul.f32 %v6002_v27, %v7970_v59  ;;  %6019 = vrcp.f32 %v800_v12  ;;  %v8145_v40 = vadd.f32 %v1079_v58, %v1045_v33  ;;  %v576_v59 = vmul.f32 %v7825_v13, %v8135_v20 }
  0xf8   : > { %v6006_v35 = vpop.eup %6005  ;;  %v2208_v24 = vmul.f32 %v6004_v50, %v7992_v42  ;;  %6021 = vrcp.f32 %v801_v34  ;;  %v5307_v38 = vmul.f32 -1.442695, %v8137_v28  ;;  %v577_v27 = vmul.f32 %v7825_v13, %v8140_v21 }
  0xf9   : > { %v1800_v12 = vadd.f32 %v1769_v11, %v1768_v37  ;;  %v2209_v33 = vmul.f32 %v6006_v35, %v7998_v49  ;;  %v5308_v58 = vmul.f32 -1.442695, %v8145_v40  ;;  %v6008_v8 = vpop.eup %6007  ;;  %v608_v25 = vadd.f32 %v576_v59, %v542_v22 }
  0xfa   : > { %6023 = vpow2.f32 %v5307_v38  ;;  %v642_v42 = vmul.f32 %v7839_v19, %v8148_v41  ;;  %v643_v34 = vmul.f32 %v7839_v19, %v8151_v55  ;;  %v6010_v50 = vpop.eup %6009  ;;  %v2206_v49 = vmul.f32 %v6008_v8, %v8027_v30 }
  0xfb   : > { %1801 = vadd.xlane.f32.xlu0 %v1800_v12  ;;  %v2241_v37 = vadd.f32 %v2209_v33, %v2208_v24  ;;  %6025 = vpow2.f32 %v5308_v58  ;;  %v609_v11 = vadd.f32 %v577_v27, %v543_v62  ;;  %v6012_v35 = vpop.eup %6011  ;;  %v2207_v13 = vmul.f32 %v6010_v50, %v8034_v44 }
  0xfc   : > { %v8171_v57 = vadd.f32 %v642_v42, %v608_v25  ;;  %v8174_v38 = vstv %s8128_s19  ;;  %v8177_v22 = vstv %s8130_s26  ;;  %v6014_v59 = vpop.eup %6013  ;;  %v2548_v19 = vadd.f32 1.0, %v6012_v35  ;;  %s5129_s19 = sshll.u32 %s434_s18, 4  ;;  %s11400_s19 = int_to_ptr.vmem [resolvable:$true] %s5129_s19 }
  0xfd   : > { %11617 = vst [vmem:[#allocation37_spill] sm:$0xff] %v8174_v38  ;;  %11618 = vst [vmem:[#allocation38_spill] sm:$0xff] %v8177_v22  ;;  %2242 = vadd.xlane.f32.xlu1 %v2241_v37  ;;  %v8179_v29 = vadd.f32 %v643_v34, %v609_v11  ;;  %v2726_v8 = vmul.f32 %v8174_v38, %v7795_v3  ;;  %v2727_v30 = vmul.f32 %v8174_v38, %v7806_v6 }
  0xfe   : > { %v2238_v62 = vadd.f32 %v2207_v13, %v2206_v49  ;;  %v2549_v44 = vadd.f32 1.0, %v6014_v59  ;;  %v5274_v25 = vmul.f32 -1.442695, %v8171_v57  ;;  %v2760_v24 = vmul.f32 %v8177_v22, %v7814_v9 }
  0xff   : > { %11619 = vst [vmem:[#allocation39_spill] sm:$0xff] %v8179_v29  ;;  %v6016_v12 = vpop.eup %6015  ;;  %6027 = vrcp.f32 %v2548_v19  ;;  %v5275_v33 = vmul.f32 -1.442695, %v8179_v29  ;;  %v2761_v58 = vmul.f32 %v8177_v22, %v7817_v10  ;;  %v8192_v27 = vstv %s8155_s16 }
 0x100   : > { %11620 = vst [vmem:[#allocation40_spill] sm:$0xff] %v8192_v27  ;;  %v6018_v42 = vpop.eup %6017  ;;  %2239 = vadd.xlane.f32.xlu0 %v2238_v62  ;;  %6029 = vrcp.f32 %v2549_v44  ;;  %v2550_v34 = vadd.f32 1.0, %v6016_v12  ;;  %v2792_v13 = vadd.f32 %v2760_v24, %v2726_v8  ;;  %v2826_v50 = vmul.f32 %v8192_v27, %v7828_v14 }
 0x101   : > { %v6020_v37 = vpop.eup %6019  ;;  %v2551_v49 = vadd.f32 1.0, %v6018_v42  ;;  %6031 = vpow2.f32 %v5274_v25  ;;  %v2793_v11 = vadd.f32 %v2761_v58, %v2727_v30  ;;  %v2827_v19 = vmul.f32 %v8192_v27, %v7831_v15 }
 0x102   : > { %v6022_v35 = vpop.eup %6021  ;;  %v896_v59 = vmul.f32 %v6020_v37, %v8058_v36  ;;  %6033 = vrcp.f32 %v2550_v34  ;;  %v8199_v29 = vadd.f32 %v2826_v50, %v2792_v13  ;;  %v1416_v62 = vmul.f32 %v7913_v60, %v8003_v51 }
 0x103   : > { %v897_v8 = vmul.f32 %v6022_v35, %v8060_v39  ;;  %6035 = vrcp.f32 %v2551_v49  ;;  %v8204_v44 = vadd.f32 %v2827_v19, %v2793_v11  ;;  %v1417_v30 = vmul.f32 %v7913_v60, %v8006_v52 }
 0x104   : > { %v6024_v25 = vpop.eup %6023  ;;  %6037 = vpow2.f32 %v5275_v33  ;;  %v5443_v36 = vmul.f32 -1.442695, %v8199_v29  ;;  %v1450_v24 = vmul.f32 %v7926_v17, %v8010_v61  ;;  %v1451_v39 = vmul.f32 %v7926_v17, %v8018_v23 }
 0x105   : > { %v6026_v12 = vpop.eup %6025  ;;  %v930_v58 = vadd.f32 %v897_v8, %v896_v59  ;;  %v1238_v42 = vadd.f32 1.0, %v6024_v25  ;;  %v5444_v34 = vmul.f32 -1.442695, %v8204_v44  ;;  %v1516_v13 = vmul.f32 %v7929_v18, %v8037_v45 }
 0x106   : > { %v1239_v50 = vadd.f32 1.0, %v6026_v12  ;;  %6039 = vpow2.f32 %v5443_v36  ;;  %v1482_v37 = vadd.f32 %v1450_v24, %v1416_v62  ;;  %v1483_v33 = vadd.f32 %v1451_v39, %v1417_v30 }
 0x107   : > { %931 = vadd.xlane.f32.xlu1 %v930_v58  ;;  %6041 = vrcp.f32 %v1238_v42  ;;  %v1517_v49 = vmul.f32 %v7929_v18, %v8040_v46  ;;  %v980_v11 = vmul.f32 %v7856_v31, %v8119_v53  ;;  %v981_v19 = vmul.f32 %v7856_v31, %v8122_v56 }
 0x108   : > { %6043 = vrcp.f32 %v1239_v50  ;;  %v8226_v35 = vadd.f32 %v1516_v13, %v1482_v37  ;;  %v1014_v59 = vmul.f32 %v7859_v32, %v8135_v20  ;;  %v1015_v62 = vmul.f32 %v7859_v32, %v8140_v21 }
 0x109   : > { %v6028_v8 = vpop.eup %6027  ;;  %6045 = vpow2.f32 %v5444_v34  ;;  %v8234_v30 = vadd.f32 %v1517_v49, %v1483_v33  ;;  %v1080_v25 = vmul.f32 %v7888_v43, %v8148_v41  ;;  %v1081_v36 = vmul.f32 %v7888_v43, %v8151_v55 }
 0x10a   : > { %v6030_v24 = vpop.eup %6029  ;;  %v2644_v39 = vmul.f32 %v6028_v8, %v8089_v47  ;;  %v5342_v12 = vmul.f32 -1.442695, %v8226_v35  ;;  %v1046_v58 = vadd.f32 %v1014_v59, %v980_v11  ;;  %v1047_v42 = vadd.f32 %v1015_v62, %v981_v19 }
 0x10b   : > { %v6032_v13 = vpop.eup %6031  ;;  %v2645_v50 = vmul.f32 %v6030_v24, %v8095_v26  ;;  %v5343_v34 = vmul.f32 -1.442695, %v8234_v30  ;;  %v8245_v37 = vstv %s8208_s0  ;;  %v8248_v33 = vstv %s8210_s20  ;;  %s11398_s0 = scalar_lea.hbm %s11451_s9, %s5630_s5  ;;  %s5117_s20 = scalar_lea.sflag [#allocation5], %s7753_s27 }
 0x10c   : > { %11621 = vst [vmem:[#allocation41_spill] sm:$0xff] %v8245_v37  ;;  %11622 = vst [vmem:[#allocation42_spill] sm:$0xff] %v8248_v33  ;;  %v6034_v49 = vpop.eup %6033  ;;  %v802_v32 = vadd.f32 1.0, %v6032_v13  ;;  %6047 = vpow2.f32 %v5342_v12  ;;  %v8250_v43 = vadd.f32 %v1080_v25, %v1046_v58  ;;  %v8252_v31 = vadd.f32 %v1081_v36, %v1047_v42 }
 0x10d   : > { %v6036_v47 = vpop.eup %6035  ;;  %v2676_v8 = vadd.f32 %v2645_v50, %v2644_v39  ;;  %v2646_v11 = vmul.f32 %v6034_v49, %v8105_v16  ;;  %6049 = vpow2.f32 %v5343_v34  ;;  %v3164_v26 = vmul.f32 %v8245_v37, %v7795_v3 }
 0x10e   : > { %v6038_v19 = vpop.eup %6037  ;;  %v2647_v59 = vmul.f32 %v6036_v47, %v8109_v54  ;;  %6051 = vrcp.f32 %v802_v32  ;;  %v5309_v62 = vmul.f32 -1.442695, %v8250_v43  ;;  %v5310_v25 = vmul.f32 -1.442695, %v8252_v31 }
 0x10f   : > { %2677 = vadd.xlane.f32.xlu0 %v2676_v8  ;;  %v803_v36 = vadd.f32 1.0, %v6038_v19  ;;  %v3165_v24 = vmul.f32 %v8245_v37, %v7806_v6  ;;  %v3198_v16 = vmul.f32 %v8248_v33, %v7814_v9  ;;  %v3199_v39 = vmul.f32 %v8248_v33, %v7817_v10 }
 0x110   : > { %v6040_v3 = vpop.eup %6039  ;;  %v2679_v12 = vadd.f32 %v2647_v59, %v2646_v11  ;;  %6053 = vpow2.f32 %v5309_v62  ;;  %v8267_v54 = vstv %s8232_s24  ;;  %v2728_v32 = vmul.f32 %v8174_v38, %v7784_v0  ;;  %s7374_s24 = scalar_lea.vmem %s11400_s19, 16 }
 0x111   : > { %11623 = vst [vmem:[#allocation43_spill] sm:$0xff] %v8267_v54  ;;  %v6042_v58 = vpop.eup %6041  ;;  %6055 = vrcp.f32 %v803_v36  ;;  %v2986_v42 = vadd.f32 1.0, %v6040_v3  ;;  %v3230_v13 = vadd.f32 %v3198_v16, %v3164_v26  ;;  %v3231_v50 = vadd.f32 %v3199_v39, %v3165_v24  ;;  %p7375_p3 = scmp.ne.s32.totalorder %s11400_s19, %s7374_s24 }
 0x112   : > { %v6044_v6 = vpop.eup %6043  ;;  %2680 = vadd.xlane.f32.xlu1 %v2679_v12  ;;  %v1334_v9 = vmul.f32 %v6042_v58, %v8137_v28  ;;  %6057 = vpow2.f32 %v5310_v25  ;;  %v3264_v10 = vmul.f32 %v8267_v54, %v7828_v14  ;;  %v3265_v34 = vmul.f32 %v8267_v54, %v7831_v15 }
 0x113   : > { %v6046_v49 = vpop.eup %6045  ;;  %v1335_v47 = vmul.f32 %v6044_v6, %v8145_v40  ;;  %6059 = vrcp.f32 %v2986_v42  ;;  %v2729_v0 = vmul.f32 %v8174_v38, %v7789_v1  ;;  %v2762_v8 = vmul.f32 %v8177_v22, %v7792_v2  ;;  %p7376_p8 = pnand %p7375_p3, %p7666_p2 }
 0x114   : > { %v2987_v11 = vadd.f32 1.0, %v6046_v49  ;;  %v8281_v26 = vadd.f32 %v3264_v10, %v3230_v13  ;;  %v8283_v28 = vadd.f32 %v3265_v34, %v3231_v50  ;;  %v2763_v14 = vmul.f32 %v8177_v22, %v7800_v4 }
 0x115   : > { %v1368_v19 = vadd.f32 %v1335_v47, %v1334_v9  ;;  %v2794_v15 = vadd.f32 %v2762_v8, %v2728_v32  ;;  %v2828_v40 = vmul.f32 %v8192_v27, %v7803_v5  ;;  %v2829_v59 = vmul.f32 %v8192_v27, %v7809_v7  ;;  %v11624_v9 = vld [vmem:[#allocation33_spill] sm:$0xff]  ;;  %v11625_v8 = vld [vmem:[#allocation39_spill] sm:$0xff]  ;;  %p7377_p9 = pneg %p7376_p8 }
 0x116   : > { %v6048_v1 = vpop.eup %6047  ;;  %6061 = vrcp.f32 %v2987_v11  ;;  %v5478_v2 = vmul.f32 -1.442695, %v8281_v26  ;;  %v5479_v62 = vmul.f32 -1.442695, %v8283_v28  ;;  %v2795_v25 = vadd.f32 %v2763_v14, %v2729_v0 }
 0x117   : > { %v6050_v36 = vpop.eup %6049  ;;  %1369 = vadd.xlane.f32.xlu0 %v1368_v19  ;;  %v1676_v24 = vadd.f32 1.0, %v6048_v1  ;;  %v8293_v16 = vadd.f32 %v2828_v40, %v2794_v15  ;;  %v1854_v4 = vmul.f32 %v7962_v48, %v8003_v51  ;;  %v1855_v5 = vmul.f32 %v7962_v48, %v8006_v52 }
 0x118   : > { %v6052_v39 = vpop.eup %6051  ;;  %v1677_v7 = vadd.f32 1.0, %v6050_v36  ;;  %6063 = vpow2.f32 %v5478_v2  ;;  %v8299_v3 = vadd.f32 %v2829_v59, %v2795_v25  ;;  %v1888_v12 = vmul.f32 %v7975_v63, %v8010_v61 }
 0x119   : > { %v898_v32 = vmul.f32 %v6052_v39, %v8171_v57  ;;  %6065 = vrcp.f32 %v1676_v24  ;;  %v5445_v58 = vmul.f32 -1.442695, %v8293_v16  ;;  %v1889_v42 = vmul.f32 %v7975_v63, %v8018_v23 }
 0x11a   : > { %v6054_v13 = vpop.eup %6053  ;;  %6067 = vrcp.f32 %v1677_v7  ;;  %v5446_v50 = vmul.f32 -1.442695, %v8299_v3  ;;  %v1920_v6 = vadd.f32 %v1888_v12, %v1854_v4  ;;  %v1954_v10 = vmul.f32 %v11624_v9, %v8037_v45 }
 0x11b   : > { %v6056_v34 = vpop.eup %6055  ;;  %v1240_v57 = vadd.f32 1.0, %v6054_v13  ;;  %6069 = vpow2.f32 %v5479_v62  ;;  %v1921_v49 = vadd.f32 %v1889_v42, %v1855_v5  ;;  %v1955_v47 = vmul.f32 %v11624_v9, %v8040_v46  ;;  %v7159_v13 = vld [vmem:[%s7757_s30] sm:$0xff] }
 0x11c   : > { %v6058_v0 = vpop.eup %6057  ;;  %v899_v11 = vmul.f32 %v6056_v34, %v11625_v8  ;;  %6071 = vpow2.f32 %v5445_v58  ;;  %v8319_v14 = vadd.f32 %v1954_v10, %v1920_v6  ;;  %v1418_v19 = vmul.f32 %v7913_v60, %v8119_v53  ;;  %v7160_v6 = vld [vmem:[%s7757_s30 + $0x8] sm:$0xff] }
 0x11d   : > { %v6060_v15 = vpop.eup %6059  ;;  %v1241_v40 = vadd.f32 1.0, %v6058_v0  ;;  %6073 = vrcp.f32 %v1240_v57  ;;  %v8323_v59 = vadd.f32 %v1955_v47, %v1921_v49  ;;  %v1419_v1 = vmul.f32 %v7913_v60, %v8122_v56 }
 0x11e   : > { %v933_v2 = vadd.f32 %v899_v11, %v898_v32  ;;  %v3082_v62 = vmul.f32 %v6060_v15, %v8199_v29  ;;  %6075 = vpow2.f32 %v5446_v50  ;;  %v5377_v25 = vmul.f32 -1.442695, %v8319_v14  ;;  %v7161_v15 = vld [vmem:[%s7757_s30 + $0x10] sm:$0xff] }
 0x11f   : > { %6077 = vrcp.f32 %v1241_v40  ;;  %v5378_v36 = vmul.f32 -1.442695, %v8323_v59  ;;  %v1452_v24 = vmul.f32 %v7926_v17, %v8135_v20  ;;  %v1453_v4 = vmul.f32 %v7926_v17, %v8140_v21 }
 0x120   : > { %v6062_v5 = vpop.eup %6061  ;;  %934 = vadd.xlane.f32.xlu1 %v933_v2  ;;  %6079 = vpow2.f32 %v5377_v25  ;;  %v1518_v29 = vmul.f32 %v7929_v18, %v8148_v41  ;;  %v1519_v39 = vmul.f32 %v7929_v18, %v8151_v55  ;;  %v8339_v7 = vstv %s8303_s4  ;;  %v7163_v25 = vld [vmem:[%s7757_s30 + $0x20] sm:$0xff]  ;;  %s7378_s4 = sshll.u32 %s7472_s8, 4  ;;  %s7379_s4 = int_to_ptr.vmem [resolvable:$false] %s7378_s4 }
 0x121   : > { %11626 = vst [vmem:[#allocation39_spill] sm:$0xff] %v8339_v7  ;;  %v3083_v12 = vmul.f32 %v6062_v5, %v8204_v44  ;;  %6081 = vpow2.f32 %v5378_v36  ;;  %v1484_v32 = vadd.f32 %v1452_v24, %v1418_v19  ;;  %v1485_v58 = vadd.f32 %v1453_v4, %v1419_v1  ;;  %v7162_v1 = vld [vmem:[%s7757_s30 + $0x18] sm:$0xff]  ;;  %p7381_p12 = scmp.lt.s32.totalorder %s11400_s19, %s7379_s4 }
 0x122   : > { %v6064_v42 = vpop.eup %6063  ;;  %v3602_v50 = vmul.f32 %v7159_v13, %v8339_v7  ;;  %v3603_v10 = vmul.f32 %v7160_v6, %v8339_v7  ;;  %v8347_v34 = vstv %s8312_s25  ;;  %v8350_v57 = vstv %s8314_s28  ;;  %s7380_s25 = scalar_lea.vmem %s7379_s4, 32 }
 0x123   : > { %11627 = vst [vmem:[#allocation44_spill] sm:$0xff] %v8347_v34  ;;  %11628 = vst [vmem:[#allocation45_spill] sm:$0xff] %v8350_v57  ;;  %v6066_v49 = vpop.eup %6065  ;;  %v3114_v47 = vadd.f32 %v3083_v12, %v3082_v62  ;;  %v3424_v44 = vadd.f32 1.0, %v6064_v42  ;;  %v8352_v0 = vadd.f32 %v1518_v29, %v1484_v32  ;;  %v8354_v8 = vadd.f32 %v1519_v39, %v1485_v58  ;;  %v7164_v32 = vld [vmem:[%s7757_s30 + $0x28] sm:$0xff]  ;;  %p7382_p0 = scmp.lt.s32.totalorder %s7380_s25, %s7374_s24 }
 0x124   : > { %v6068_v11 = vpop.eup %6067  ;;  %v1772_v19 = vmul.f32 %v6066_v49, %v8226_v35  ;;  %v3636_v40 = vmul.f32 %v7161_v15, %v8347_v34  ;;  %v3637_v2 = vmul.f32 %v7162_v1, %v8347_v34  ;;  %v3702_v36 = vmul.f32 %v7163_v25, %v8350_v57  ;;  %v8369_v49 = vld [vmem:[%s7757_s30 + $0x30] sm:$0xff]  ;;  %v8379_v15 = vld [vmem:[%s7757_s30 + $0x38] sm:$0xff]  ;;  %v8384_v1 = vld [vmem:[%s7757_s30 + $0x40] sm:$0xff] }
 0x125   : > { %v6070_v24 = vpop.eup %6069  ;;  %3115 = vadd.xlane.f32.xlu0 %v3114_v47  ;;  %v1773_v62 = vmul.f32 %v6068_v11, %v8234_v30  ;;  %6083 = vrcp.f32 %v3424_v44  ;;  %v5344_v4 = vmul.f32 -1.442695, %v8352_v0  ;;  %v5345_v35 = vmul.f32 -1.442695, %v8354_v8  ;;  %p7383_p6 = por %p7382_p0, %p7381_p12 }
 0x126   : > { %v6072_v5 = vpop.eup %6071  ;;  %v3425_v29 = vadd.f32 1.0, %v6070_v24  ;;  %v3668_v39 = vadd.f32 %v3636_v40, %v3602_v50  ;;  %v3669_v12 = vadd.f32 %v3637_v2, %v3603_v10  ;;  %v3703_v58 = vmul.f32 %v7164_v32, %v8350_v57 }
 0x127   : > { %v6074_v42 = vpop.eup %6073  ;;  %v1806_v13 = vadd.f32 %v1773_v62, %v1772_v19  ;;  %v2988_v6 = vadd.f32 1.0, %v6072_v5  ;;  %6085 = vpow2.f32 %v5344_v4  ;;  %v3166_v30 = vmul.f32 %v8369_v49, %v8245_v37  ;;  %v8392_v5 = vld [vmem:[%s7757_s30 + $0x48] sm:$0xff]  ;;  %p7384_p13 = pnand %p7383_p6, %p7377_p9 }
 0x128   : > { %v6076_v47 = vpop.eup %6075  ;;  %v1336_v44 = vmul.f32 %v6074_v42, %v8250_v43  ;;  %6087 = vrcp.f32 %v3425_v29  ;;  %v8374_v50 = vadd.f32 %v3702_v36, %v3668_v39  ;;  %v8376_v10 = vadd.f32 %v3703_v58, %v3669_v12  ;;  %v8397_v58 = vld [vmem:[%s7757_s30 + $0x50] sm:$0xff]  ;;  %v8402_v42 = vld [vmem:[%s7757_s30 + $0x58] sm:$0xff] }
 0x129   : > { %v6078_v11 = vpop.eup %6077  ;;  %1807 = vadd.xlane.f32.xlu1 %v1806_v13  ;;  %v2989_v19 = vadd.f32 1.0, %v6076_v47  ;;  %6089 = vrcp.f32 %v2988_v6  ;;  %v3167_v40 = vmul.f32 %v8379_v15, %v8245_v37  ;;  %v3200_v43 = vmul.f32 %v8384_v1, %v8248_v33  ;;  %v11629_v6 = vld [vmem:[#allocation34_spill] sm:$0xff] }
 0x12a   : > { %v6080_v2 = vpop.eup %6079  ;;  %v1337_v25 = vmul.f32 %v6078_v11, %v8252_v31  ;;  %6091 = vpow2.f32 %v5345_v35  ;;  %v5513_v36 = vmul.f32 -1.442695, %v8374_v50  ;;  %v5514_v24 = vmul.f32 -1.442695, %v8376_v10  ;;  %v11630_v11 = vld [vmem:[#allocation35_spill] sm:$0xff] }
 0x12b   : > { %v6082_v62 = vpop.eup %6081  ;;  %6093 = vrcp.f32 %v2989_v19  ;;  %v2114_v4 = vadd.f32 1.0, %v6080_v2  ;;  %v3201_v29 = vmul.f32 %v8392_v5, %v8248_v33  ;;  %v3232_v39 = vadd.f32 %v3200_v43, %v3166_v30 }
 0x12c   : > { %v1371_v12 = vadd.f32 %v1337_v25, %v1336_v44  ;;  %v2115_v32 = vadd.f32 1.0, %v6082_v62  ;;  %6095 = vpow2.f32 %v5513_v36  ;;  %v3266_v31 = vmul.f32 %v8397_v58, %v8267_v54  ;;  %v11631_v25 = vld [vmem:[#allocation36_spill] sm:$0xff] }
 0x12d   : > { %6097 = vrcp.f32 %v2114_v4  ;;  %v3233_v35 = vadd.f32 %v3201_v29, %v3167_v40  ;;  %v3267_v13 = vmul.f32 %v8402_v42, %v8267_v54  ;;  %v2292_v47 = vmul.f32 %v11629_v6, %v8003_v51 }
 0x12e   : > { %1372 = vadd.xlane.f32.xlu0 %v1371_v12  ;;  %6099 = vrcp.f32 %v2115_v32  ;;  %v8408_v30 = vadd.f32 %v3266_v31, %v3232_v39  ;;  %v2293_v44 = vmul.f32 %v11629_v6, %v8006_v52  ;;  %v2326_v19 = vmul.f32 %v11630_v11, %v8010_v61 }
 0x12f   : > { %v6084_v43 = vpop.eup %6083  ;;  %6101 = vpow2.f32 %v5514_v24  ;;  %v8414_v40 = vadd.f32 %v3267_v13, %v3233_v35  ;;  %v2327_v2 = vmul.f32 %v11630_v11, %v8018_v23  ;;  %v2392_v51 = vmul.f32 %v11631_v25, %v8037_v45 }
 0x130   : > { %v3520_v36 = vmul.f32 %v6084_v43, %v8281_v26  ;;  %v5480_v62 = vmul.f32 -1.442695, %v8408_v30  ;;  %v2358_v4 = vadd.f32 %v2326_v19, %v2292_v47  ;;  %v2393_v52 = vmul.f32 %v11631_v25, %v8040_v46 }
 0x131   : > { %v6086_v29 = vpop.eup %6085  ;;  %v5481_v61 = vmul.f32 -1.442695, %v8414_v40  ;;  %v2359_v24 = vadd.f32 %v2327_v2, %v2293_v44  ;;  %v1856_v39 = vmul.f32 %v7962_v48, %v8119_v53  ;;  %v1857_v23 = vmul.f32 %v7962_v48, %v8122_v56 }
 0x132   : > { %v6088_v12 = vpop.eup %6087  ;;  %v1678_v45 = vadd.f32 1.0, %v6086_v29  ;;  %6103 = vpow2.f32 %v5480_v62  ;;  %v8429_v26 = vadd.f32 %v2392_v51, %v2358_v4  ;;  %v1890_v32 = vmul.f32 %v7975_v63, %v8135_v20 }
 0x133   : > { %v6090_v31 = vpop.eup %6089  ;;  %v3521_v46 = vmul.f32 %v6088_v12, %v8283_v28  ;;  %6105 = vpow2.f32 %v5481_v61  ;;  %v8434_v35 = vadd.f32 %v2393_v52, %v2359_v24  ;;  %v1891_v13 = vmul.f32 %v7975_v63, %v8140_v21 }
 0x134   : > { %v6092_v47 = vpop.eup %6091  ;;  %v3084_v44 = vmul.f32 %v6090_v31, %v8293_v16  ;;  %6107 = vrcp.f32 %v1678_v45  ;;  %v5412_v19 = vmul.f32 -1.442695, %v8429_v26  ;;  %v1922_v43 = vadd.f32 %v1890_v32, %v1856_v39 }
 0x135   : > { %v6094_v2 = vpop.eup %6093  ;;  %v3552_v51 = vadd.f32 %v3521_v46, %v3520_v36  ;;  %v1679_v62 = vadd.f32 1.0, %v6092_v47  ;;  %v5413_v4 = vmul.f32 -1.442695, %v8434_v35  ;;  %v1923_v29 = vadd.f32 %v1891_v13, %v1857_v23 }
 0x136   : > { %v6096_v28 = vpop.eup %6095  ;;  %v3085_v52 = vmul.f32 %v6094_v2, %v8299_v3  ;;  %6109 = vpow2.f32 %v5412_v19  ;;  %v1956_v61 = vmul.f32 %v11624_v9, %v8148_v41  ;;  %v1957_v16 = vmul.f32 %v11624_v9, %v8151_v55 }
 0x137   : > { %v6098_v24 = vpop.eup %6097  ;;  %3553 = vadd.xlane.f32.xlu1 %v3552_v51  ;;  %6111 = vrcp.f32 %v1679_v62  ;;  %v3862_v39 = vadd.f32 1.0, %v6096_v28  ;;  %v2294_v36 = vmul.f32 %v11629_v6, %v8119_v53  ;;  %v2295_v23 = vmul.f32 %v11629_v6, %v8122_v56 }
 0x138   : > { %v6100_v12 = vpop.eup %6099  ;;  %v3117_v45 = vadd.f32 %v3085_v52, %v3084_v44  ;;  %v2210_v3 = vmul.f32 %v6098_v24, %v8319_v14  ;;  %6113 = vpow2.f32 %v5413_v4  ;;  %v8451_v32 = vadd.f32 %v1956_v61, %v1922_v43 }
 0x139   : > { %v6102_v31 = vpop.eup %6101  ;;  %v2211_v46 = vmul.f32 %v6100_v12, %v8323_v59  ;;  %6115 = vrcp.f32 %v3862_v39  ;;  %v8454_v13 = vadd.f32 %v1957_v16, %v1923_v29  ;;  %v2328_v47 = vmul.f32 %v11630_v11, %v8135_v20 }
 0x13a   : > { %3118 = vadd.xlane.f32.xlu0 %v3117_v45  ;;  %v3863_v19 = vadd.f32 1.0, %v6102_v31  ;;  %v5379_v2 = vmul.f32 -1.442695, %v8451_v32  ;;  %v2329_v44 = vmul.f32 %v11630_v11, %v8140_v21  ;;  %v2394_v14 = vmul.f32 %v11631_v25, %v8148_v41 }
 0x13b   : > { %v2244_v43 = vadd.f32 %v2211_v46, %v2210_v3  ;;  %v5380_v51 = vmul.f32 -1.442695, %v8454_v13  ;;  %v2360_v59 = vadd.f32 %v2328_v47, %v2294_v36  ;;  %v2395_v62 = vmul.f32 %v11631_v25, %v8151_v55 }
 0x13c   : > { %v6104_v4 = vpop.eup %6103  ;;  %6117 = vrcp.f32 %v3863_v19  ;;  %v2361_v29 = vadd.f32 %v2329_v44, %v2295_v23  ;;  %v3604_v28 = vmul.f32 %v8369_v49, %v8339_v7  ;;  %v3605_v52 = vmul.f32 %v8379_v15, %v8339_v7 }
 0x13d   : > { %v6106_v61 = vpop.eup %6105  ;;  %2245 = vadd.xlane.f32.xlu1 %v2244_v43  ;;  %v3426_v16 = vadd.f32 1.0, %v6104_v4  ;;  %6119 = vpow2.f32 %v5379_v2  ;;  %v8470_v24 = vadd.f32 %v2394_v14, %v2360_v59  ;;  %v3638_v39 = vmul.f32 %v8384_v1, %v8347_v34 }
 0x13e   : > { %v6108_v36 = vpop.eup %6107  ;;  %v3427_v12 = vadd.f32 1.0, %v6106_v61  ;;  %6121 = vpow2.f32 %v5380_v51  ;;  %v8474_v45 = vadd.f32 %v2395_v62, %v2361_v29  ;;  %v3639_v49 = vmul.f32 %v8392_v5, %v8347_v34 }
 0x13f   : > { %v1774_v23 = vmul.f32 %v6108_v36, %v8352_v0  ;;  %6123 = vrcp.f32 %v3426_v16  ;;  %v5414_v15 = vmul.f32 -1.442695, %v8470_v24  ;;  %v3670_v3 = vadd.f32 %v3638_v39, %v3604_v28 }
 0x140   : > { %v6110_v31 = vpop.eup %6109  ;;  %6125 = vrcp.f32 %v3427_v12  ;;  %v5415_v46 = vmul.f32 -1.442695, %v8474_v45  ;;  %v3671_v47 = vadd.f32 %v3639_v49, %v3605_v52  ;;  %v3704_v1 = vmul.f32 %v8397_v58, %v8350_v57  ;;  %v8506_v12 = vld [vmem:[%s7757_s30 + $0x60] sm:$0xff] }
 0x141   : > { %v6112_v19 = vpop.eup %6111  ;;  %v2552_v2 = vadd.f32 1.0, %v6110_v31  ;;  %6127 = vpow2.f32 %v5414_v15  ;;  %v3705_v5 = vmul.f32 %v8402_v42, %v8350_v57  ;;  %v2732_v0 = vmul.f32 %v8174_v38, %v8119_v53  ;;  %v8514_v31 = vld [vmem:[%s7757_s30 + $0x68] sm:$0xff] }
 0x142   : > { %v6114_v44 = vpop.eup %6113  ;;  %v1775_v14 = vmul.f32 %v6112_v19, %v8354_v8  ;;  %6129 = vpow2.f32 %v5415_v46  ;;  %v8488_v43 = vadd.f32 %v3704_v1, %v3670_v3  ;;  %v2733_v51 = vmul.f32 %v8174_v38, %v8122_v56 }
 0x143   : > { %v6116_v59 = vpop.eup %6115  ;;  %v2553_v58 = vadd.f32 1.0, %v6114_v44  ;;  %6131 = vrcp.f32 %v2552_v2  ;;  %v8492_v62 = vadd.f32 %v3705_v5, %v3671_v47  ;;  %v2766_v42 = vmul.f32 %v8177_v22, %v8135_v20  ;;  %v8521_v2 = vld [vmem:[%s7757_s30 + $0x70] sm:$0xff] }
 0x144   : > { %v1809_v4 = vadd.f32 %v1775_v14, %v1774_v23  ;;  %v3958_v29 = vmul.f32 %v6116_v59, %v8374_v50  ;;  %v5515_v8 = vmul.f32 -1.442695, %v8488_v43  ;;  %v2767_v28 = vmul.f32 %v8177_v22, %v8140_v21 }
 0x145   : > { %6133 = vrcp.f32 %v2553_v58  ;;  %v5516_v52 = vmul.f32 -1.442695, %v8492_v62  ;;  %v2798_v61 = vadd.f32 %v2766_v42, %v2732_v0  ;;  %v2832_v16 = vmul.f32 %v8192_v27, %v8148_v41  ;;  %v8526_v0 = vld [vmem:[%s7757_s30 + $0x78] sm:$0xff]  ;;  %v8532_v58 = vld [vmem:[%s7757_s30 + $0x80] sm:$0xff] }
 0x146   : > { %v6118_v39 = vpop.eup %6117  ;;  %1810 = vadd.xlane.f32.xlu0 %v1809_v4  ;;  %6135 = vpow2.f32 %v5515_v8  ;;  %v2799_v36 = vadd.f32 %v2767_v28, %v2733_v51  ;;  %v2833_v50 = vmul.f32 %v8192_v27, %v8151_v55  ;;  %v2730_v49 = vmul.f32 %v8506_v12, %v8174_v38 }
 0x147   : > { %v6120_v23 = vpop.eup %6119  ;;  %v3959_v15 = vmul.f32 %v6118_v39, %v8376_v10  ;;  %6137 = vpow2.f32 %v5516_v52  ;;  %v8511_v3 = vadd.f32 %v2832_v16, %v2798_v61  ;;  %v2731_v46 = vmul.f32 %v8514_v31, %v8174_v38  ;;  %v8540_v39 = vld [vmem:[%s7757_s30 + $0x88] sm:$0xff] }
 0x148   : > { %v6122_v47 = vpop.eup %6121  ;;  %v2116_v1 = vadd.f32 1.0, %v6120_v23  ;;  %v8518_v19 = vadd.f32 %v2833_v50, %v2799_v36  ;;  %v2764_v5 = vmul.f32 %v8521_v2, %v8177_v22  ;;  %v2765_v10 = vmul.f32 %v8526_v0, %v8177_v22 }
 0x149   : > { %v6124_v44 = vpop.eup %6123  ;;  %v3990_v14 = vadd.f32 %v3959_v15, %v3958_v29  ;;  %v2117_v51 = vadd.f32 1.0, %v6122_v47  ;;  %v5449_v59 = vmul.f32 -1.442695, %v8511_v3  ;;  %v2830_v42 = vmul.f32 %v8532_v58, %v8192_v27 }
 0x14a   : > { %v6126_v4 = vpop.eup %6125  ;;  %v3522_v8 = vmul.f32 %v6124_v44, %v8408_v30  ;;  %6139 = vrcp.f32 %v2116_v1  ;;  %v5450_v28 = vmul.f32 -1.442695, %v8518_v19  ;;  %v2796_v52 = vadd.f32 %v2764_v5, %v2730_v49 }
 0x14b   : > { %v6128_v61 = vpop.eup %6127  ;;  %3991 = vadd.xlane.f32.xlu1 %v3990_v14  ;;  %v3523_v16 = vmul.f32 %v6126_v4, %v8414_v40  ;;  %6141 = vrcp.f32 %v2117_v51  ;;  %v2797_v29 = vadd.f32 %v2765_v10, %v2731_v46  ;;  %v2831_v36 = vmul.f32 %v8540_v39, %v8192_v27 }
 0x14c   : > { %v6130_v50 = vpop.eup %6129  ;;  %v2554_v23 = vadd.f32 1.0, %v6128_v61  ;;  %6143 = vpow2.f32 %v5449_v59  ;;  %v8544_v15 = vadd.f32 %v2830_v42, %v2796_v52  ;;  %v3170_v30 = vmul.f32 %v8245_v37, %v8119_v53 }
 0x14d   : > { %v6132_v49 = vpop.eup %6131  ;;  %v3555_v47 = vadd.f32 %v3523_v16, %v3522_v8  ;;  %v2555_v1 = vadd.f32 1.0, %v6130_v50  ;;  %6145 = vpow2.f32 %v5450_v28  ;;  %v8548_v40 = vadd.f32 %v2831_v36, %v2797_v29 }
 0x14e   : > { %v2648_v46 = vmul.f32 %v6132_v49, %v8429_v26  ;;  %6147 = vrcp.f32 %v2554_v23  ;;  %v5447_v5 = vmul.f32 -1.442695, %v8544_v15  ;;  %v3171_v10 = vmul.f32 %v8245_v37, %v8122_v56 }
 0x14f   : > { %v6134_v44 = vpop.eup %6133  ;;  %3556 = vadd.xlane.f32.xlu0 %v3555_v47  ;;  %6149 = vrcp.f32 %v2555_v1  ;;  %v5448_v14 = vmul.f32 -1.442695, %v8548_v40  ;;  %v3204_v51 = vmul.f32 %v8248_v33, %v8135_v20  ;;  %v3205_v59 = vmul.f32 %v8248_v33, %v8140_v21 }
 0x150   : > { %v6136_v42 = vpop.eup %6135  ;;  %v2649_v26 = vmul.f32 %v6134_v44, %v8434_v35  ;;  %6151 = vpow2.f32 %v5447_v5  ;;  %v3270_v4 = vmul.f32 %v8267_v54, %v8148_v41  ;;  %v3271_v8 = vmul.f32 %v8267_v54, %v8151_v55 }
 0x151   : > { %v6138_v28 = vpop.eup %6137  ;;  %v3864_v52 = vadd.f32 1.0, %v6136_v42  ;;  %6153 = vpow2.f32 %v5448_v14  ;;  %v3236_v61 = vadd.f32 %v3204_v51, %v3170_v30  ;;  %v3237_v16 = vadd.f32 %v3205_v59, %v3171_v10 }
 0x152   : > { %v2682_v29 = vadd.f32 %v2649_v26, %v2648_v46  ;;  %v3865_v36 = vadd.f32 1.0, %v6138_v28  ;;  %v3168_v50 = vmul.f32 %v8506_v12, %v8245_v37  ;;  %v3169_v35 = vmul.f32 %v8514_v31, %v8245_v37 }
 0x153   : > { %6155 = vrcp.f32 %v3864_v52  ;;  %v8568_v23 = vadd.f32 %v3270_v4, %v3236_v61  ;;  %v8570_v49 = vadd.f32 %v3271_v8, %v3237_v16  ;;  %v3202_v47 = vmul.f32 %v8521_v2, %v8248_v33 }
 0x154   : > { %v6140_v1 = vpop.eup %6139  ;;  %2683 = vadd.xlane.f32.xlu1 %v2682_v29  ;;  %6157 = vrcp.f32 %v3865_v36  ;;  %v3203_v30 = vmul.f32 %v8526_v0, %v8248_v33  ;;  %v3268_v46 = vmul.f32 %v8532_v58, %v8267_v54  ;;  %v3269_v5 = vmul.f32 %v8540_v39, %v8267_v54 }
 0x155   : > { %v6142_v10 = vpop.eup %6141  ;;  %v2212_v44 = vmul.f32 %v6140_v1, %v8451_v32  ;;  %v5484_v14 = vmul.f32 -1.442695, %v8568_v23  ;;  %v5485_v51 = vmul.f32 -1.442695, %v8570_v49  ;;  %v3234_v59 = vadd.f32 %v3202_v47, %v3168_v50 }
 0x156   : > { %v6144_v42 = vpop.eup %6143  ;;  %v2213_v26 = vmul.f32 %v6142_v10, %v8454_v13  ;;  %v3235_v4 = vadd.f32 %v3203_v30, %v3169_v35  ;;  %v3608_v8 = vmul.f32 %v8339_v7, %v8119_v53  ;;  %v3609_v28 = vmul.f32 %v8339_v7, %v8122_v56 }
 0x157   : > { %v6146_v52 = vpop.eup %6145  ;;  %v2992_v61 = vadd.f32 1.0, %v6144_v42  ;;  %6159 = vpow2.f32 %v5484_v14  ;;  %v8588_v16 = vadd.f32 %v3268_v46, %v3234_v59  ;;  %v3642_v32 = vmul.f32 %v8347_v34, %v8135_v20 }
 0x158   : > { %v6148_v29 = vpop.eup %6147  ;;  %v2247_v36 = vadd.f32 %v2213_v26, %v2212_v44  ;;  %v2993_v50 = vadd.f32 1.0, %v6146_v52  ;;  %6161 = vpow2.f32 %v5485_v51  ;;  %v8592_v13 = vadd.f32 %v3269_v5, %v3235_v4  ;;  %v8611_v4 = vld [vmem:[%s7757_s30 + $0xc0] sm:$0xff]  ;;  %v8619_v52 = vld [vmem:[%s7757_s30 + $0xc8] sm:$0xff] }
 0x159   : > { %v6150_v35 = vpop.eup %6149  ;;  %v2650_v53 = vmul.f32 %v6148_v29, %v8470_v24  ;;  %6163 = vrcp.f32 %v2992_v61  ;;  %v5482_v56 = vmul.f32 -1.442695, %v8588_v16  ;;  %v3643_v47 = vmul.f32 %v8347_v34, %v8140_v21  ;;  %v8628_v29 = vld [vmem:[%s7757_s30 + $0xd0] sm:$0xff] }
 0x15a   : > { %v6152_v1 = vpop.eup %6151  ;;  %2248 = vadd.xlane.f32.xlu0 %v2247_v36  ;;  %v2651_v30 = vmul.f32 %v6150_v35, %v8474_v45  ;;  %6165 = vrcp.f32 %v2993_v50  ;;  %v5483_v20 = vmul.f32 -1.442695, %v8592_v13  ;;  %v3674_v46 = vadd.f32 %v3642_v32, %v3608_v8  ;;  %v8634_v50 = vld [vmem:[%s7757_s30 + $0xd8] sm:$0xff]  ;;  %v8637_v35 = vld [vmem:[%s7757_s30 + $0xe0] sm:$0xff] }
 0x15b   : > { %v6154_v5 = vpop.eup %6153  ;;  %v2990_v10 = vadd.f32 1.0, %v6152_v1  ;;  %6167 = vpow2.f32 %v5482_v56  ;;  %v3675_v44 = vadd.f32 %v3643_v47, %v3609_v28  ;;  %v3708_v24 = vmul.f32 %v8350_v57, %v8148_v41 }
 0x15c   : > { %v2685_v14 = vadd.f32 %v2651_v30, %v2650_v53  ;;  %v2991_v51 = vadd.f32 1.0, %v6154_v5  ;;  %6169 = vpow2.f32 %v5483_v20  ;;  %v3709_v21 = vmul.f32 %v8350_v57, %v8151_v55 }
 0x15d   : > { %v6156_v45 = vpop.eup %6155  ;;  %6171 = vrcp.f32 %v2990_v10  ;;  %v8604_v59 = vadd.f32 %v3708_v24, %v3674_v46  ;;  %v3606_v42 = vmul.f32 %v8506_v12, %v8339_v7  ;;  %v3607_v26 = vmul.f32 %v8514_v31, %v8339_v7  ;;  %v8650_v24 = vld [vmem:[%s7757_s30 + $0xe8] sm:$0xff] }
 0x15e   : > { %v6158_v41 = vpop.eup %6157  ;;  %2686 = vadd.xlane.f32.xlu1 %v2685_v14  ;;  %v3960_v8 = vmul.f32 %v6156_v45, %v8488_v43  ;;  %6173 = vrcp.f32 %v2991_v51  ;;  %v8614_v55 = vadd.f32 %v3709_v21, %v3675_v44  ;;  %v3640_v28 = vmul.f32 %v8521_v2, %v8347_v34  ;;  %v11634_v51 = vld [vmem:[#allocation27_spill] sm:$0xff] }
 0x15f   : > { %v3961_v12 = vmul.f32 %v6158_v41, %v8492_v62  ;;  %v5519_v31 = vmul.f32 -1.442695, %v8604_v59  ;;  %v3641_v61 = vmul.f32 %v8526_v0, %v8347_v34  ;;  %v3706_v32 = vmul.f32 %v8532_v58, %v8350_v57  ;;  %v11632_v62 = vld [vmem:[#allocation25_spill] sm:$0xff] }
 0x160   : > { %v5520_v43 = vmul.f32 -1.442695, %v8614_v55  ;;  %v3672_v36 = vadd.f32 %v3640_v28, %v3606_v42  ;;  %v3707_v2 = vmul.f32 %v8540_v39, %v8350_v57  ;;  %v982_v53 = vmul.f32 %v11632_v62, %v8611_v4  ;;  %v11633_v39 = vld [vmem:[#allocation26_spill] sm:$0xff] }
 0x161   : > { %v6160_v0 = vpop.eup %6159  ;;  %v3993_v56 = vadd.f32 %v3961_v12, %v3960_v8  ;;  %6175 = vpow2.f32 %v5519_v31  ;;  %v3673_v58 = vadd.f32 %v3641_v61, %v3607_v26  ;;  %v983_v47 = vmul.f32 %v11632_v62, %v8619_v52 }
 0x162   : > { %v6162_v1 = vpop.eup %6161  ;;  %v3430_v30 = vadd.f32 1.0, %v6160_v0  ;;  %6177 = vpow2.f32 %v5520_v43  ;;  %v8643_v20 = vadd.f32 %v3706_v32, %v3672_v36  ;;  %v1016_v46 = vmul.f32 %v11633_v39, %v8628_v29 }
 0x163   : > { %v6164_v5 = vpop.eup %6163  ;;  %3994 = vadd.xlane.f32.xlu0 %v3993_v56  ;;  %v3431_v10 = vadd.f32 1.0, %v6162_v1  ;;  %v8647_v44 = vadd.f32 %v3707_v2, %v3673_v58  ;;  %v1017_v14 = vmul.f32 %v11633_v39, %v8634_v50  ;;  %v1082_v21 = vmul.f32 %v11634_v51, %v8637_v35 }
 0x164   : > { %v6166_v45 = vpop.eup %6165  ;;  %v3088_v42 = vmul.f32 %v6164_v5, %v8511_v3  ;;  %6179 = vrcp.f32 %v3430_v30  ;;  %v5517_v26 = vmul.f32 -1.442695, %v8643_v20  ;;  %v1048_v41 = vadd.f32 %v1016_v46, %v982_v53  ;;  %v8671_v30 = vld [vmem:[%s7757_s30 + $0xf0] sm:$0xff] }
 0x165   : > { %v6168_v8 = vpop.eup %6167  ;;  %v3089_v28 = vmul.f32 %v6166_v45, %v8518_v19  ;;  %6181 = vrcp.f32 %v3431_v10  ;;  %v5518_v12 = vmul.f32 -1.442695, %v8647_v44  ;;  %v1049_v31 = vadd.f32 %v1017_v14, %v983_v47  ;;  %v11635_v19 = vld [vmem:[#allocation22_spill] sm:$0xff]  ;;  %v11636_v10 = vld [vmem:[#allocation23_spill] sm:$0xff]  ;;  %v8679_v14 = vld [vmem:[%s7757_s30 + $0xf8] sm:$0xff] }
 0x166   : > { %v6170_v61 = vpop.eup %6169  ;;  %v3428_v32 = vadd.f32 1.0, %v6168_v8  ;;  %6183 = vpow2.f32 %v5517_v26  ;;  %v1083_v43 = vmul.f32 %v11634_v51, %v8650_v24  ;;  %v8662_v36 = vadd.f32 %v1082_v21, %v1048_v41  ;;  %v8690_v41 = vld [vmem:[%s7757_s30 + $0x108] sm:$0xff] }
 0x167   : > { %v6172_v3 = vpop.eup %6171  ;;  %v3123_v2 = vadd.f32 %v3089_v28, %v3088_v42  ;;  %v3429_v53 = vadd.f32 1.0, %v6170_v61  ;;  %6185 = vpow2.f32 %v5518_v12  ;;  %v544_v0 = vmul.f32 %v11635_v19, %v8611_v4  ;;  %v11637_v42 = vld [vmem:[#allocation24_spill] sm:$0xff]  ;;  %11638 = vst [vmem:[#allocation46_spill] sm:$0xff] %v8690_v41 }
 0x168   : > { %v6174_v56 = vpop.eup %6173  ;;  %v3086_v58 = vmul.f32 %v6172_v3, %v8544_v15  ;;  %6187 = vrcp.f32 %v3428_v32  ;;  %v8667_v47 = vadd.f32 %v1083_v43, %v1049_v31  ;;  %v5311_v1 = vmul.f32 -1.442695, %v8662_v36  ;;  %v8695_v61 = vld [vmem:[%s7757_s30 + $0x110] sm:$0xff]  ;;  %v8698_v32 = vld [vmem:[%s7757_s30 + $0x118] sm:$0xff] }
 0x169   : > { %3124 = vadd.xlane.f32.xlu1 %v3123_v2  ;;  %v3087_v46 = vmul.f32 %v6174_v56, %v8548_v40  ;;  %6189 = vrcp.f32 %v3429_v53  ;;  %v545_v5 = vmul.f32 %v11635_v19, %v8619_v52  ;;  %v578_v15 = vmul.f32 %v11636_v10, %v8628_v29  ;;  %v8687_v40 = vld [vmem:[%s7757_s30 + $0x100] sm:$0xff]  ;;  %11639 = vst [vmem:[#allocation47_spill] sm:$0xff] %v8695_v61 }
 0x16a   : > { %6191 = vpow2.f32 %v5311_v1  ;;  %v5312_v21 = vmul.f32 -1.442695, %v8667_v47  ;;  %v579_v45 = vmul.f32 %v11636_v10, %v8634_v50  ;;  %v644_v26 = vmul.f32 %v11637_v42, %v8637_v35  ;;  %11640 = vst [vmem:[#allocation48_spill] sm:$0xff] %v8698_v32 }
 0x16b   : > { %v6176_v8 = vpop.eup %6175  ;;  %v3120_v28 = vadd.f32 %v3087_v46, %v3086_v58  ;;  %v610_v12 = vadd.f32 %v578_v15, %v544_v0  ;;  %v645_v31 = vmul.f32 %v11637_v42, %v8650_v24  ;;  %v984_v43 = vmul.f32 %v11632_v62, %v8671_v30 }
 0x16c   : > { %v6178_v3 = vpop.eup %6177  ;;  %v3868_v2 = vadd.f32 1.0, %v6176_v8  ;;  %6193 = vpow2.f32 %v5312_v21  ;;  %v611_v53 = vadd.f32 %v579_v45, %v545_v5  ;;  %v985_v56 = vmul.f32 %v11632_v62, %v8679_v14 }
 0x16d   : > { %3121 = vadd.xlane.f32.xlu0 %v3120_v28  ;;  %v3869_v58 = vadd.f32 1.0, %v6178_v3  ;;  %v8704_v0 = vadd.f32 %v644_v26, %v610_v12  ;;  %v1018_v1 = vmul.f32 %v11633_v39, %v8687_v40  ;;  %v1019_v46 = vmul.f32 %v11633_v39, %v8690_v41 }
 0x16e   : > { %v6180_v15 = vpop.eup %6179  ;;  %6195 = vrcp.f32 %v3868_v2  ;;  %v8710_v57 = vadd.f32 %v645_v31, %v611_v53  ;;  %v1084_v5 = vmul.f32 %v11634_v51, %v8695_v61  ;;  %v1085_v21 = vmul.f32 %v11634_v51, %v8698_v32 }
 0x16f   : > { %v6182_v45 = vpop.eup %6181  ;;  %v3526_v26 = vmul.f32 %v6180_v15, %v8568_v23  ;;  %6197 = vrcp.f32 %v3869_v58  ;;  %v5276_v8 = vmul.f32 -1.442695, %v8704_v0  ;;  %v1050_v28 = vadd.f32 %v1018_v1, %v984_v43 }
 0x170   : > { %v6184_v12 = vpop.eup %6183  ;;  %v3527_v3 = vmul.f32 %v6182_v45, %v8570_v49  ;;  %v5277_v2 = vmul.f32 -1.442695, %v8710_v57  ;;  %v1051_v31 = vadd.f32 %v1019_v46, %v985_v56  ;;  %v546_v53 = vmul.f32 %v11635_v19, %v8671_v30 }
 0x171   : > { %v6186_v34 = vpop.eup %6185  ;;  %v3866_v7 = vadd.f32 1.0, %v6184_v12  ;;  %6199 = vpow2.f32 %v5276_v8  ;;  %v8722_v54 = vadd.f32 %v1084_v5, %v1050_v28  ;;  %v547_v23 = vmul.f32 %v11635_v19, %v8679_v14 }
 0x172   : > { %v6188_v58 = vpop.eup %6187  ;;  %v3561_v15 = vadd.f32 %v3527_v3, %v3526_v26  ;;  %v3867_v43 = vadd.f32 1.0, %v6186_v34  ;;  %6201 = vpow2.f32 %v5277_v2  ;;  %v8726_v1 = vadd.f32 %v1085_v21, %v1051_v31 }
 0x173   : > { %v6190_v49 = vpop.eup %6189  ;;  %v3524_v56 = vmul.f32 %v6188_v58, %v8588_v16  ;;  %6203 = vrcp.f32 %v3866_v7  ;;  %v5313_v46 = vmul.f32 -1.442695, %v8722_v54  ;;  %v580_v45 = vmul.f32 %v11636_v10, %v8687_v40 }
 0x174   : > { %v6192_v5 = vpop.eup %6191  ;;  %3562 = vadd.xlane.f32.xlu1 %v3561_v15  ;;  %v3525_v8 = vmul.f32 %v6190_v49, %v8592_v13  ;;  %6205 = vrcp.f32 %v3867_v43  ;;  %v5314_v26 = vmul.f32 -1.442695, %v8726_v1  ;;  %v581_v34 = vmul.f32 %v11636_v10, %v8690_v41 }
 0x175   : > { %v1242_v21 = vadd.f32 1.0, %v6192_v5  ;;  %6207 = vpow2.f32 %v5313_v46  ;;  %v612_v28 = vadd.f32 %v580_v45, %v546_v53  ;;  %v646_v7 = vmul.f32 %v11637_v42, %v8695_v61 }
 0x176   : > { %v6194_v16 = vpop.eup %6193  ;;  %v3558_v12 = vadd.f32 %v3525_v8, %v3524_v56  ;;  %6209 = vpow2.f32 %v5314_v26  ;;  %v613_v3 = vadd.f32 %v581_v34, %v547_v23  ;;  %v647_v2 = vmul.f32 %v11637_v42, %v8698_v32 }
 0x177   : > { %v1243_v13 = vadd.f32 1.0, %v6194_v16  ;;  %6211 = vrcp.f32 %v1242_v21  ;;  %v8740_v31 = vadd.f32 %v646_v7, %v612_v28  ;;  %v1422_v58 = vmul.f32 %v7913_v60, %v8671_v30 }
 0x178   : > { %v6196_v15 = vpop.eup %6195  ;;  %3559 = vadd.xlane.f32.xlu0 %v3558_v12  ;;  %v8744_v53 = vadd.f32 %v647_v2, %v613_v3  ;;  %v1423_v43 = vmul.f32 %v7913_v60, %v8679_v14  ;;  %v1456_v23 = vmul.f32 %v7926_v17, %v8687_v40  ;;  %v1457_v49 = vmul.f32 %v7926_v17, %v8690_v41 }
 0x179   : > { %v6198_v56 = vpop.eup %6197  ;;  %v3964_v46 = vmul.f32 %v6196_v15, %v8604_v59  ;;  %6213 = vrcp.f32 %v1243_v13  ;;  %v5278_v45 = vmul.f32 -1.442695, %v8740_v31  ;;  %v1522_v5 = vmul.f32 %v7929_v18, %v8695_v61 }
 0x17a   : > { %v3965_v8 = vmul.f32 %v6198_v56, %v8614_v55  ;;  %v5279_v26 = vmul.f32 -1.442695, %v8744_v53  ;;  %v1488_v34 = vadd.f32 %v1456_v23, %v1422_v58  ;;  %v1489_v21 = vadd.f32 %v1457_v49, %v1423_v43 }
 0x17b   : > { %v6200_v28 = vpop.eup %6199  ;;  %6215 = vpow2.f32 %v5278_v45  ;;  %v1523_v7 = vmul.f32 %v7929_v18, %v8698_v32  ;;  %v1420_v59 = vmul.f32 %v7913_v60, %v8611_v4  ;;  %v1421_v16 = vmul.f32 %v7913_v60, %v8619_v52 }
 0x17c   : > { %v6202_v12 = vpop.eup %6201  ;;  %v3999_v3 = vadd.f32 %v3965_v8, %v3964_v46  ;;  %v804_v2 = vadd.f32 1.0, %v6200_v28  ;;  %6217 = vpow2.f32 %v5279_v26  ;;  %v8764_v55 = vadd.f32 %v1522_v5, %v1488_v34 }
 0x17d   : > { %v6204_v13 = vpop.eup %6203  ;;  %v805_v58 = vadd.f32 1.0, %v6202_v12  ;;  %v8766_v15 = vadd.f32 %v1523_v7, %v1489_v21  ;;  %v1454_v43 = vmul.f32 %v7926_v17, %v8628_v29  ;;  %v1455_v23 = vmul.f32 %v7926_v17, %v8634_v50 }
 0x17e   : > { %v6206_v49 = vpop.eup %6205  ;;  %4000 = vadd.xlane.f32.xlu1 %v3999_v3  ;;  %v3962_v56 = vmul.f32 %v6204_v13, %v8643_v20  ;;  %6219 = vrcp.f32 %v804_v2  ;;  %v5348_v46 = vmul.f32 -1.442695, %v8764_v55  ;;  %v1520_v45 = vmul.f32 %v7929_v18, %v8637_v35 }
 0x17f   : > { %v6208_v5 = vpop.eup %6207  ;;  %v3963_v8 = vmul.f32 %v6206_v49, %v8647_v44  ;;  %6221 = vrcp.f32 %v805_v58  ;;  %v5349_v26 = vmul.f32 -1.442695, %v8766_v15  ;;  %v1486_v34 = vadd.f32 %v1454_v43, %v1420_v59 }
 0x180   : > { %v6210_v21 = vpop.eup %6209  ;;  %v1244_v28 = vadd.f32 1.0, %v6208_v5  ;;  %6223 = vpow2.f32 %v5348_v46  ;;  %v1487_v7 = vadd.f32 %v1455_v23, %v1421_v16  ;;  %v1521_v20 = vmul.f32 %v7929_v18, %v8650_v24 }
 0x181   : > { %v6212_v12 = vpop.eup %6211  ;;  %v3996_v3 = vadd.f32 %v3963_v8, %v3962_v56  ;;  %v1245_v2 = vadd.f32 1.0, %v6210_v21  ;;  %6225 = vpow2.f32 %v5349_v26  ;;  %v8780_v13 = vadd.f32 %v1520_v45, %v1486_v34 }
 0x182   : > { %v1338_v33 = vmul.f32 %v6212_v12, %v8662_v36  ;;  %6227 = vrcp.f32 %v1244_v28  ;;  %v8783_v44 = vadd.f32 %v1521_v20, %v1487_v7  ;;  %v1860_v59 = vmul.f32 %v7962_v48, %v8671_v30 }
 0x183   : > { %v6214_v58 = vpop.eup %6213  ;;  %3997 = vadd.xlane.f32.xlu0 %v3996_v3  ;;  %6229 = vrcp.f32 %v1245_v2  ;;  %v5346_v16 = vmul.f32 -1.442695, %v8780_v13  ;;  %v1861_v43 = vmul.f32 %v7962_v48, %v8679_v14  ;;  %v1894_v23 = vmul.f32 %v7975_v63, %v8687_v40 }
 0x184   : > { %v1339_v49 = vmul.f32 %v6214_v58, %v8667_v47  ;;  %v5347_v36 = vmul.f32 -1.442695, %v8783_v44  ;;  %v1895_v56 = vmul.f32 %v7975_v63, %v8690_v41  ;;  %v1960_v46 = vmul.f32 %v11624_v9, %v8695_v61 }
 0x185   : > { %v6216_v45 = vpop.eup %6215  ;;  %6231 = vpow2.f32 %v5346_v16  ;;  %v1926_v5 = vadd.f32 %v1894_v23, %v1860_v59  ;;  %v1961_v8 = vmul.f32 %v11624_v9, %v8698_v32  ;;  %v1858_v26 = vmul.f32 %v7962_v48, %v8611_v4  ;;  %v8815_v16 = vld [vmem:[%s7757_s30 + $0x120] sm:$0xff] }
 0x186   : > { %v6218_v34 = vpop.eup %6217  ;;  %v1374_v47 = vadd.f32 %v1339_v49, %v1338_v33  ;;  %v806_v21 = vadd.f32 1.0, %v6216_v45  ;;  %6233 = vpow2.f32 %v5347_v36  ;;  %v1927_v28 = vadd.f32 %v1895_v56, %v1861_v43 }
 0x187   : > { %v807_v7 = vadd.f32 1.0, %v6218_v34  ;;  %v8802_v20 = vadd.f32 %v1960_v46, %v1926_v5  ;;  %v1859_v12 = vmul.f32 %v7962_v48, %v8619_v52  ;;  %v1892_v3 = vmul.f32 %v7975_v63, %v8628_v29  ;;  %v8824_v34 = vld [vmem:[%s7757_s30 + $0x128] sm:$0xff] }
 0x188   : > { %v6220_v2 = vpop.eup %6219  ;;  %1375 = vadd.xlane.f32.xlu1 %v1374_v47  ;;  %6235 = vrcp.f32 %v806_v21  ;;  %v8808_v59 = vadd.f32 %v1961_v8, %v1927_v28  ;;  %v1893_v33 = vmul.f32 %v7975_v63, %v8634_v50  ;;  %v1958_v58 = vmul.f32 %v11624_v9, %v8637_v35 }
 0x189   : > { %v6222_v43 = vpop.eup %6221  ;;  %v900_v23 = vmul.f32 %v6220_v2, %v8704_v0  ;;  %6237 = vrcp.f32 %v807_v7  ;;  %v5383_v49 = vmul.f32 -1.442695, %v8802_v20  ;;  %v1924_v36 = vadd.f32 %v1892_v3, %v1858_v26  ;;  %v8829_v26 = vld [vmem:[%s7757_s30 + $0x130] sm:$0xff]  ;;  %v8836_v2 = vld [vmem:[%s7757_s30 + $0x138] sm:$0xff] }
 0x18a   : > { %v6224_v56 = vpop.eup %6223  ;;  %v901_v46 = vmul.f32 %v6222_v43, %v8710_v57  ;;  %v5384_v45 = vmul.f32 -1.442695, %v8808_v59  ;;  %v1925_v5 = vadd.f32 %v1893_v33, %v1859_v12  ;;  %v1959_v8 = vmul.f32 %v11624_v9, %v8650_v24  ;;  %v8839_v33 = vld [vmem:[%s7757_s30 + $0x140] sm:$0xff]  ;;  %v8842_v43 = vld [vmem:[%s7757_s30 + $0x148] sm:$0xff] }
 0x18b   : > { %v6226_v47 = vpop.eup %6225  ;;  %v1682_v0 = vadd.f32 1.0, %v6224_v56  ;;  %6239 = vpow2.f32 %v5383_v49  ;;  %v8826_v21 = vadd.f32 %v1958_v58, %v1924_v36  ;;  %v548_v57 = vmul.f32 %v11635_v19, %v8815_v16 }
 0x18c   : > { %v6228_v28 = vpop.eup %6227  ;;  %v936_v7 = vadd.f32 %v901_v46, %v900_v23  ;;  %v1683_v3 = vadd.f32 1.0, %v6226_v47  ;;  %6241 = vpow2.f32 %v5384_v45  ;;  %v8833_v12 = vadd.f32 %v1959_v8, %v1925_v5 }
 0x18d   : > { %v6230_v49 = vpop.eup %6229  ;;  %v1340_v58 = vmul.f32 %v6228_v28, %v8722_v54  ;;  %6243 = vrcp.f32 %v1682_v0  ;;  %v5381_v36 = vmul.f32 -1.442695, %v8826_v21  ;;  %v549_v56 = vmul.f32 %v11635_v19, %v8824_v34 }
 0x18e   : > { %937 = vadd.xlane.f32.xlu0 %v936_v7  ;;  %v1341_v23 = vmul.f32 %v6230_v49, %v8726_v1  ;;  %6245 = vrcp.f32 %v1683_v3  ;;  %v5382_v46 = vmul.f32 -1.442695, %v8833_v12  ;;  %v582_v45 = vmul.f32 %v11636_v10, %v8829_v26 }
 0x18f   : > { %v6232_v5 = vpop.eup %6231  ;;  %6247 = vpow2.f32 %v5381_v36  ;;  %v583_v54 = vmul.f32 %v11636_v10, %v8836_v2  ;;  %v648_v8 = vmul.f32 %v11637_v42, %v8839_v33  ;;  %v649_v47 = vmul.f32 %v11637_v42, %v8842_v43 }
 0x190   : > { %v6234_v0 = vpop.eup %6233  ;;  %v1377_v28 = vadd.f32 %v1341_v23, %v1340_v58  ;;  %v1680_v1 = vadd.f32 1.0, %v6232_v5  ;;  %6249 = vpow2.f32 %v5382_v46  ;;  %v614_v7 = vadd.f32 %v582_v45, %v548_v57 }
 0x191   : > { %v1681_v3 = vadd.f32 1.0, %v6234_v0  ;;  %v615_v49 = vadd.f32 %v583_v54, %v549_v56  ;;  %v2296_v9 = vmul.f32 %v11629_v6, %v8611_v4  ;;  %v2297_v36 = vmul.f32 %v11629_v6, %v8619_v52 }
 0x192   : > { %v6236_v63 = vpop.eup %6235  ;;  %1378 = vadd.xlane.f32.xlu1 %v1377_v28  ;;  %6251 = vrcp.f32 %v1680_v1  ;;  %v8862_v48 = vadd.f32 %v648_v8, %v614_v7  ;;  %v2330_v37 = vmul.f32 %v11630_v11, %v8628_v29  ;;  %v2331_v58 = vmul.f32 %v11630_v11, %v8634_v50 }
 0x193   : > { %v6238_v57 = vpop.eup %6237  ;;  %v902_v56 = vmul.f32 %v6236_v63, %v8740_v31  ;;  %6253 = vrcp.f32 %v1681_v3  ;;  %v8869_v23 = vadd.f32 %v649_v47, %v615_v49  ;;  %v2396_v46 = vmul.f32 %v11631_v25, %v8637_v35 }
 0x194   : > { %v903_v45 = vmul.f32 %v6238_v57, %v8744_v53  ;;  %v5280_v5 = vmul.f32 -1.442695, %v8862_v48  ;;  %v2362_v54 = vadd.f32 %v2330_v37, %v2296_v9  ;;  %v2363_v8 = vadd.f32 %v2331_v58, %v2297_v36 }
 0x195   : > { %v6240_v0 = vpop.eup %6239  ;;  %v5281_v28 = vmul.f32 -1.442695, %v8869_v23  ;;  %v2397_v1 = vmul.f32 %v11631_v25, %v8650_v24  ;;  %v2298_v63 = vmul.f32 %v11629_v6, %v8671_v30  ;;  %v2299_v31 = vmul.f32 %v11629_v6, %v8679_v14 }
 0x196   : > { %v6242_v47 = vpop.eup %6241  ;;  %v939_v7 = vadd.f32 %v903_v45, %v902_v56  ;;  %v2120_v3 = vadd.f32 1.0, %v6240_v0  ;;  %6255 = vpow2.f32 %v5280_v5  ;;  %v8882_v53 = vadd.f32 %v2396_v46, %v2362_v54 }
 0x197   : > { %v6244_v37 = vpop.eup %6243  ;;  %v2121_v9 = vadd.f32 1.0, %v6242_v47  ;;  %6257 = vpow2.f32 %v5281_v28  ;;  %v8884_v49 = vadd.f32 %v2397_v1, %v2363_v8  ;;  %v2332_v36 = vmul.f32 %v11630_v11, %v8687_v40 }
 0x198   : > { %v6246_v58 = vpop.eup %6245  ;;  %940 = vadd.xlane.f32.xlu0 %v939_v7  ;;  %v1778_v57 = vmul.f32 %v6244_v37, %v8764_v55  ;;  %6259 = vrcp.f32 %v2120_v3  ;;  %v5416_v6 = vmul.f32 -1.442695, %v8882_v53  ;;  %v2333_v56 = vmul.f32 %v11630_v11, %v8690_v41  ;;  %v8944_v41 = vld [vmem:[%s7757_s30 + $0x178] sm:$0xff] }
 0x199   : > { %v6248_v46 = vpop.eup %6247  ;;  %v1779_v45 = vmul.f32 %v6246_v58, %v8766_v15  ;;  %6261 = vrcp.f32 %v2121_v9  ;;  %v5417_v5 = vmul.f32 -1.442695, %v8884_v49  ;;  %v2364_v54 = vadd.f32 %v2332_v36, %v2298_v63 }
 0x19a   : > { %v6250_v8 = vpop.eup %6249  ;;  %v2118_v0 = vadd.f32 1.0, %v6248_v46  ;;  %6263 = vpow2.f32 %v5416_v6  ;;  %v2365_v28 = vadd.f32 %v2333_v56, %v2299_v31  ;;  %v2398_v55 = vmul.f32 %v11631_v25, %v8695_v61  ;;  %v8905_v31 = vld [vmem:[%s7757_s30 + $0x150] sm:$0xff] }
 0x19b   : > { %v1815_v1 = vadd.f32 %v1779_v45, %v1778_v57  ;;  %v2119_v47 = vadd.f32 1.0, %v6250_v8  ;;  %6265 = vpow2.f32 %v5417_v5  ;;  %v2399_v7 = vmul.f32 %v11631_v25, %v8698_v32  ;;  %v8913_v57 = vld [vmem:[%s7757_s30 + $0x158] sm:$0xff] }
 0x19c   : > { %v6252_v15 = vpop.eup %6251  ;;  %6267 = vrcp.f32 %v2118_v0  ;;  %v8898_v3 = vadd.f32 %v2398_v55, %v2364_v54  ;;  %v986_v63 = vmul.f32 %v11632_v62, %v8815_v16  ;;  %v987_v6 = vmul.f32 %v11632_v62, %v8824_v34  ;;  %v8922_v54 = vld [vmem:[%s7757_s30 + $0x160] sm:$0xff]  ;;  %v8931_v55 = vld [vmem:[%s7757_s30 + $0x170] sm:$0xff] }
 0x19d   : > { %v6254_v37 = vpop.eup %6253  ;;  %1816 = vadd.xlane.f32.xlu1 %v1815_v1  ;;  %v1776_v9 = vmul.f32 %v6252_v15, %v8780_v13  ;;  %6269 = vrcp.f32 %v2119_v47  ;;  %v8908_v36 = vadd.f32 %v2399_v7, %v2365_v28  ;;  %v1020_v58 = vmul.f32 %v11633_v39, %v8829_v26  ;;  %v8928_v28 = vld [vmem:[%s7757_s30 + $0x168] sm:$0xff] }
 0x19e   : > { %v1777_v56 = vmul.f32 %v6254_v37, %v8783_v44  ;;  %v5418_v46 = vmul.f32 -1.442695, %v8898_v3  ;;  %v1021_v45 = vmul.f32 %v11633_v39, %v8836_v2  ;;  %v1086_v5 = vmul.f32 %v11634_v51, %v8839_v33 }
 0x19f   : > { %v5419_v13 = vmul.f32 -1.442695, %v8908_v36  ;;  %v1052_v8 = vadd.f32 %v1020_v58, %v986_v63  ;;  %v1087_v0 = vmul.f32 %v11634_v51, %v8842_v43  ;;  %v550_v44 = vmul.f32 %v11635_v19, %v8905_v31 }
 0x1a0   : > { %v6256_v1 = vpop.eup %6255  ;;  %v1812_v47 = vadd.f32 %v1777_v56, %v1776_v9  ;;  %6271 = vpow2.f32 %v5418_v46  ;;  %v1053_v7 = vadd.f32 %v1021_v45, %v987_v6  ;;  %v551_v15 = vmul.f32 %v11635_v19, %v8913_v57 }
 0x1a1   : > { %v6258_v37 = vpop.eup %6257  ;;  %v808_v63 = vadd.f32 1.0, %v6256_v1  ;;  %6273 = vpow2.f32 %v5419_v13  ;;  %v8937_v58 = vadd.f32 %v1086_v5, %v1052_v8  ;;  %v584_v25 = vmul.f32 %v11636_v10, %v8922_v54 }
 0x1a2   : > { %v6260_v11 = vpop.eup %6259  ;;  %1813 = vadd.xlane.f32.xlu0 %v1812_v47  ;;  %v809_v32 = vadd.f32 1.0, %v6258_v37  ;;  %v8941_v61 = vadd.f32 %v1087_v0, %v1053_v7  ;;  %v585_v6 = vmul.f32 %v11636_v10, %v8928_v28  ;;  %v650_v9 = vmul.f32 %v11637_v42, %v8931_v55 }
 0x1a3   : > { %v6262_v56 = vpop.eup %6261  ;;  %v2216_v46 = vmul.f32 %v6260_v11, %v8802_v20  ;;  %6275 = vrcp.f32 %v808_v63  ;;  %v5315_v45 = vmul.f32 -1.442695, %v8937_v58  ;;  %v616_v5 = vadd.f32 %v584_v25, %v550_v44 }
 0x1a4   : > { %v6264_v13 = vpop.eup %6263  ;;  %v2217_v8 = vmul.f32 %v6262_v56, %v8808_v59  ;;  %6277 = vrcp.f32 %v809_v32  ;;  %v5316_v0 = vmul.f32 -1.442695, %v8941_v61  ;;  %v617_v1 = vadd.f32 %v585_v6, %v551_v15 }
 0x1a5   : > { %v6266_v47 = vpop.eup %6265  ;;  %v2556_v7 = vadd.f32 1.0, %v6264_v13  ;;  %6279 = vpow2.f32 %v5315_v45  ;;  %v651_v37 = vmul.f32 %v11637_v42, %v8944_v41  ;;  %v8956_v10 = vadd.f32 %v650_v9, %v616_v5  ;;  %v11654_v42 = vld [vmem:[#allocation35_spill] sm:$0xff] }
 0x1a6   : > { %v6268_v11 = vpop.eup %6267  ;;  %v2253_v20 = vadd.f32 %v2217_v8, %v2216_v46  ;;  %v2557_v63 = vadd.f32 1.0, %v6266_v47  ;;  %6281 = vpow2.f32 %v5316_v0  ;;  %v2734_v25 = vmul.f32 %v8174_v38, %v8611_v4 }
 0x1a7   : > { %v6270_v59 = vpop.eup %6269  ;;  %v2214_v32 = vmul.f32 %v6268_v11, %v8826_v21  ;;  %6283 = vrcp.f32 %v2556_v7  ;;  %v8961_v44 = vadd.f32 %v651_v37, %v617_v1  ;;  %v5282_v15 = vmul.f32 -1.442695, %v8956_v10 }
 0x1a8   : > { %2254 = vadd.xlane.f32.xlu1 %v2253_v20  ;;  %v2215_v6 = vmul.f32 %v6270_v59, %v8833_v12  ;;  %6285 = vrcp.f32 %v2557_v63  ;;  %v2735_v9 = vmul.f32 %v8174_v38, %v8619_v52  ;;  %v2768_v56 = vmul.f32 %v8177_v22, %v8628_v29 }
 0x1a9   : > { %6287 = vpow2.f32 %v5282_v15  ;;  %v5283_v46 = vmul.f32 -1.442695, %v8961_v44  ;;  %v2769_v21 = vmul.f32 %v8177_v22, %v8634_v50  ;;  %v2834_v45 = vmul.f32 %v8192_v27, %v8637_v35 }
 0x1aa   : > { %v6272_v5 = vpop.eup %6271  ;;  %v2250_v13 = vadd.f32 %v2215_v6, %v2214_v32  ;;  %v2800_v8 = vadd.f32 %v2768_v56, %v2734_v25  ;;  %v2835_v12 = vmul.f32 %v8192_v27, %v8650_v24  ;;  %v1424_v0 = vmul.f32 %v7913_v60, %v8815_v16 }
 0x1ab   : > { %v6274_v1 = vpop.eup %6273  ;;  %v2558_v47 = vadd.f32 1.0, %v6272_v5  ;;  %6289 = vpow2.f32 %v5283_v46  ;;  %v2801_v7 = vadd.f32 %v2769_v21, %v2735_v9  ;;  %v1425_v37 = vmul.f32 %v7913_v60, %v8824_v34 }
 0x1ac   : > { %2251 = vadd.xlane.f32.xlu0 %v2250_v13  ;;  %v2559_v11 = vadd.f32 1.0, %v6274_v1  ;;  %v8980_v20 = vadd.f32 %v2834_v45, %v2800_v8  ;;  %v1458_v63 = vmul.f32 %v7926_v17, %v8829_v26  ;;  %v1459_v25 = vmul.f32 %v7926_v17, %v8836_v2 }
 0x1ad   : > { %v6276_v59 = vpop.eup %6275  ;;  %6291 = vrcp.f32 %v2558_v47  ;;  %v8986_v32 = vadd.f32 %v2835_v12, %v2801_v7  ;;  %v1524_v15 = vmul.f32 %v7929_v18, %v8839_v33  ;;  %v1525_v6 = vmul.f32 %v7929_v18, %v8842_v43 }
 0x1ae   : > { %v6278_v9 = vpop.eup %6277  ;;  %v904_v56 = vmul.f32 %v6276_v59, %v8862_v48  ;;  %6293 = vrcp.f32 %v2559_v11  ;;  %v5451_v46 = vmul.f32 -1.442695, %v8980_v20  ;;  %v1490_v21 = vadd.f32 %v1458_v63, %v1424_v0 }
 0x1af   : > { %v6280_v45 = vpop.eup %6279  ;;  %v905_v5 = vmul.f32 %v6278_v9, %v8869_v23  ;;  %v5452_v13 = vmul.f32 -1.442695, %v8986_v32  ;;  %v1491_v8 = vadd.f32 %v1459_v25, %v1425_v37  ;;  %v988_v12 = vmul.f32 %v11632_v62, %v8905_v31 }
 0x1b0   : > { %v6282_v1 = vpop.eup %6281  ;;  %v1246_v47 = vadd.f32 1.0, %v6280_v45  ;;  %6295 = vpow2.f32 %v5451_v46  ;;  %v8998_v7 = vadd.f32 %v1524_v15, %v1490_v21  ;;  %v989_v48 = vmul.f32 %v11632_v62, %v8913_v57 }
 0x1b1   : > { %v6284_v11 = vpop.eup %6283  ;;  %v942_v59 = vadd.f32 %v905_v5, %v904_v56  ;;  %v1247_v0 = vadd.f32 1.0, %v6282_v1  ;;  %6297 = vpow2.f32 %v5452_v13  ;;  %v9002_v63 = vadd.f32 %v1525_v6, %v1491_v8 }
 0x1b2   : > { %v6286_v23 = vpop.eup %6285  ;;  %v2652_v37 = vmul.f32 %v6284_v11, %v8882_v53  ;;  %6299 = vrcp.f32 %v1246_v47  ;;  %v5350_v25 = vmul.f32 -1.442695, %v8998_v7  ;;  %v1022_v9 = vmul.f32 %v11633_v39, %v8922_v54  ;;  %v11641_v11 = vld [vmem:[#allocation41_spill] sm:$0xff] }
 0x1b3   : > { %v6288_v15 = vpop.eup %6287  ;;  %943 = vadd.xlane.f32.xlu1 %v942_v59  ;;  %v2653_v46 = vmul.f32 %v6286_v23, %v8884_v49  ;;  %6301 = vrcp.f32 %v1247_v0  ;;  %v5351_v56 = vmul.f32 -1.442695, %v9002_v63  ;;  %v1023_v6 = vmul.f32 %v11633_v39, %v8928_v28 }
 0x1b4   : > { %v810_v21 = vadd.f32 1.0, %v6288_v15  ;;  %6303 = vpow2.f32 %v5350_v25  ;;  %v1054_v45 = vadd.f32 %v1022_v9, %v988_v12  ;;  %v1088_v53 = vmul.f32 %v11634_v51, %v8931_v55 }
 0x1b5   : > { %v6290_v5 = vpop.eup %6289  ;;  %v2688_v13 = vadd.f32 %v2653_v46, %v2652_v37  ;;  %6305 = vpow2.f32 %v5351_v56  ;;  %v1055_v8 = vadd.f32 %v1023_v6, %v989_v48  ;;  %v1089_v1 = vmul.f32 %v11634_v51, %v8944_v41  ;;  %v11642_v37 = vld [vmem:[#allocation42_spill] sm:$0xff] }
 0x1b6   : > { %v811_v49 = vadd.f32 1.0, %v6290_v5  ;;  %6307 = vrcp.f32 %v810_v21  ;;  %v9016_v47 = vadd.f32 %v1088_v53, %v1054_v45  ;;  %v3172_v59 = vmul.f32 %v11641_v11, %v8611_v4  ;;  %v11643_v4 = vld [vmem:[#allocation43_spill] sm:$0xff] }
 0x1b7   : > { %v6292_v0 = vpop.eup %6291  ;;  %2689 = vadd.xlane.f32.xlu0 %v2688_v13  ;;  %v9020_v12 = vadd.f32 %v1089_v1, %v1055_v8  ;;  %v3173_v23 = vmul.f32 %v11641_v11, %v8619_v52  ;;  %v3206_v48 = vmul.f32 %v11642_v37, %v8628_v29  ;;  %v3207_v25 = vmul.f32 %v11642_v37, %v8634_v50 }
 0x1b8   : > { %v6294_v9 = vpop.eup %6293  ;;  %v2654_v15 = vmul.f32 %v6292_v0, %v8898_v3  ;;  %6309 = vrcp.f32 %v811_v49  ;;  %v5317_v46 = vmul.f32 -1.442695, %v9016_v47  ;;  %v3272_v56 = vmul.f32 %v11643_v4, %v8637_v35 }
 0x1b9   : > { %v2655_v6 = vmul.f32 %v6294_v9, %v8908_v36  ;;  %v5318_v21 = vmul.f32 -1.442695, %v9020_v12  ;;  %v3238_v52 = vadd.f32 %v3206_v48, %v3172_v59  ;;  %v3239_v45 = vadd.f32 %v3207_v25, %v3173_v23  ;;  %v11645_v48 = vld [vmem:[#allocation47_spill] sm:$0xff] }
 0x1ba   : > { %v6296_v53 = vpop.eup %6295  ;;  %6311 = vpow2.f32 %v5317_v46  ;;  %v3273_v29 = vmul.f32 %v11643_v4, %v8650_v24  ;;  %v2736_v50 = vmul.f32 %v8174_v38, %v8671_v30  ;;  %v2737_v3 = vmul.f32 %v8174_v38, %v8679_v14  ;;  %v11644_v24 = vld [vmem:[#allocation46_spill] sm:$0xff] }
 0x1bb   : > { %v6298_v5 = vpop.eup %6297  ;;  %v2691_v13 = vadd.f32 %v2655_v6, %v2654_v15  ;;  %v2994_v35 = vadd.f32 1.0, %v6296_v53  ;;  %6313 = vpow2.f32 %v5318_v21  ;;  %v9040_v36 = vadd.f32 %v3272_v56, %v3238_v52  ;;  %v11646_v52 = vld [vmem:[#allocation48_spill] sm:$0xff] }
 0x1bc   : > { %v6300_v8 = vpop.eup %6299  ;;  %v2995_v1 = vadd.f32 1.0, %v6298_v5  ;;  %v9042_v49 = vadd.f32 %v3273_v29, %v3239_v45  ;;  %v2770_v59 = vmul.f32 %v8177_v22, %v8687_v40  ;;  %v2771_v0 = vmul.f32 %v8177_v22, %v11644_v24 }
 0x1bd   : > { %v6302_v30 = vpop.eup %6301  ;;  %2692 = vadd.xlane.f32.xlu1 %v2691_v13  ;;  %v1342_v14 = vmul.f32 %v6300_v8, %v8937_v58  ;;  %6315 = vrcp.f32 %v2994_v35  ;;  %v5486_v23 = vmul.f32 -1.442695, %v9040_v36  ;;  %v2836_v25 = vmul.f32 %v8192_v27, %v11645_v48 }
 0x1be   : > { %v6304_v9 = vpop.eup %6303  ;;  %v1343_v15 = vmul.f32 %v6302_v30, %v8941_v61  ;;  %6317 = vrcp.f32 %v2995_v1  ;;  %v5487_v46 = vmul.f32 -1.442695, %v9042_v49  ;;  %v2802_v40 = vadd.f32 %v2770_v59, %v2736_v50  ;;  %v11647_v50 = vld [vmem:[#allocation31_spill] sm:$0xff]  ;;  %v11648_v59 = vld [vmem:[#allocation32_spill] sm:$0xff] }
 0x1bf   : > { %v6306_v56 = vpop.eup %6305  ;;  %v1684_v6 = vadd.f32 1.0, %v6304_v9  ;;  %6319 = vpow2.f32 %v5486_v23  ;;  %v2803_v21 = vadd.f32 %v2771_v0, %v2737_v3  ;;  %v2837_v58 = vmul.f32 %v8192_v27, %v11646_v52 }
 0x1c0   : > { %v6308_v45 = vpop.eup %6307  ;;  %v1380_v53 = vadd.f32 %v1343_v15, %v1342_v14  ;;  %v1685_v29 = vadd.f32 1.0, %v6306_v56  ;;  %6321 = vpow2.f32 %v5487_v46  ;;  %v9056_v5 = vadd.f32 %v2836_v25, %v2802_v40  ;;  %v11649_v14 = vld [vmem:[#allocation33_spill] sm:$0xff] }
 0x1c1   : > { %v906_v13 = vmul.f32 %v6308_v45, %v8956_v10  ;;  %6323 = vrcp.f32 %v1684_v6  ;;  %v9059_v61 = vadd.f32 %v2837_v58, %v2803_v21  ;;  %v1862_v35 = vmul.f32 %v11647_v50, %v8815_v16 }
 0x1c2   : > { %v6310_v8 = vpop.eup %6309  ;;  %1381 = vadd.xlane.f32.xlu0 %v1380_v53  ;;  %6325 = vrcp.f32 %v1685_v29  ;;  %v5453_v3 = vmul.f32 -1.442695, %v9056_v5  ;;  %v1863_v1 = vmul.f32 %v11647_v50, %v8824_v34  ;;  %v1896_v24 = vmul.f32 %v11648_v59, %v8829_v26 }
 0x1c3   : > { %v907_v0 = vmul.f32 %v6310_v8, %v8961_v44  ;;  %v5454_v10 = vmul.f32 -1.442695, %v9059_v61  ;;  %v1897_v30 = vmul.f32 %v11648_v59, %v8836_v2  ;;  %v1962_v23 = vmul.f32 %v11649_v14, %v8839_v33 }
 0x1c4   : > { %v6312_v48 = vpop.eup %6311  ;;  %6327 = vpow2.f32 %v5453_v3  ;;  %v1928_v25 = vadd.f32 %v1896_v24, %v1862_v35  ;;  %v1963_v9 = vmul.f32 %v11649_v14, %v8842_v43  ;;  %v1426_v15 = vmul.f32 %v7913_v60, %v8905_v31 }
 0x1c5   : > { %v6314_v46 = vpop.eup %6313  ;;  %v945_v40 = vadd.f32 %v907_v0, %v906_v13  ;;  %v1248_v44 = vadd.f32 1.0, %v6312_v48  ;;  %6329 = vpow2.f32 %v5454_v10  ;;  %v1929_v56 = vadd.f32 %v1897_v30, %v1863_v1 }
 0x1c6   : > { %v1249_v6 = vadd.f32 1.0, %v6314_v46  ;;  %v9078_v21 = vadd.f32 %v1962_v23, %v1928_v25  ;;  %v1427_v52 = vmul.f32 %v7913_v60, %v8913_v57  ;;  %v1460_v58 = vmul.f32 %v7926_v17, %v8922_v54  ;;  %v11650_v46 = vld [vmem:[#allocation39_spill] sm:$0xff]  ;;  %v9150_v60 = vld [vmem:[%s7757_s30 + $0x118] sm:$0xff] }
 0x1c7   : > { %v6316_v45 = vpop.eup %6315  ;;  %946 = vadd.xlane.f32.xlu1 %v945_v40  ;;  %6331 = vrcp.f32 %v1248_v44  ;;  %v9084_v53 = vadd.f32 %v1963_v9, %v1929_v56  ;;  %v1461_v29 = vmul.f32 %v7926_v17, %v8928_v28  ;;  %v1526_v13 = vmul.f32 %v7929_v18, %v8931_v55 }
 0x1c8   : > { %v6318_v35 = vpop.eup %6317  ;;  %v3090_v8 = vmul.f32 %v6316_v45, %v8980_v20  ;;  %6333 = vrcp.f32 %v1249_v6  ;;  %v5385_v3 = vmul.f32 -1.442695, %v9078_v21  ;;  %v1492_v1 = vadd.f32 %v1460_v58, %v1426_v15  ;;  %v7177_v20 = vld [vmem:[%s7757_s30 + $0xc0] sm:$0xff]  ;;  %v7178_v45 = vld [vmem:[%s7757_s30 + $0xc8] sm:$0xff] }
 0x1c9   : > { %v6320_v24 = vpop.eup %6319  ;;  %v3091_v0 = vmul.f32 %v6318_v35, %v8986_v32  ;;  %v5386_v10 = vmul.f32 -1.442695, %v9084_v53  ;;  %v1493_v30 = vadd.f32 %v1461_v29, %v1427_v52  ;;  %v1527_v23 = vmul.f32 %v7929_v18, %v8944_v41 }
 0x1ca   : > { %v6322_v48 = vpop.eup %6321  ;;  %v3432_v25 = vadd.f32 1.0, %v6320_v24  ;;  %6335 = vpow2.f32 %v5385_v3  ;;  %v9096_v9 = vadd.f32 %v1526_v13, %v1492_v1  ;;  %v3610_v40 = vmul.f32 %v7177_v20, %v11650_v46  ;;  %v11651_v3 = vld [vmem:[#allocation44_spill] sm:$0xff] }
 0x1cb   : > { %v6324_v15 = vpop.eup %6323  ;;  %v3126_v44 = vadd.f32 %v3091_v0, %v3090_v8  ;;  %v3433_v56 = vadd.f32 1.0, %v6322_v48  ;;  %6337 = vpow2.f32 %v5386_v10  ;;  %v9100_v32 = vadd.f32 %v1527_v23, %v1493_v30  ;;  %v7179_v8 = vld [vmem:[%s7757_s30 + $0xd0] sm:$0xff]  ;;  %v7181_v10 = vld [vmem:[%s7757_s30 + $0xe0] sm:$0xff]  ;;  %v7182_v48 = vld [vmem:[%s7757_s30 + $0xe8] sm:$0xff] }
 0x1cc   : > { %v6326_v6 = vpop.eup %6325  ;;  %v1780_v52 = vmul.f32 %v6324_v15, %v8998_v7  ;;  %6339 = vrcp.f32 %v3432_v25  ;;  %v5352_v58 = vmul.f32 -1.442695, %v9096_v9  ;;  %v3611_v29 = vmul.f32 %v7178_v45, %v11650_v46  ;;  %v7180_v7 = vld [vmem:[%s7757_s30 + $0xd8] sm:$0xff] }
 0x1cd   : > { %3127 = vadd.xlane.f32.xlu0 %v3126_v44  ;;  %v1781_v13 = vmul.f32 %v6326_v6, %v9002_v63  ;;  %6341 = vrcp.f32 %v3433_v56  ;;  %v5353_v35 = vmul.f32 -1.442695, %v9100_v32  ;;  %v3644_v1 = vmul.f32 %v7179_v8, %v11651_v3  ;;  %v11652_v30 = vld [vmem:[#allocation45_spill] sm:$0xff] }
 0x1ce   : > { %v6328_v24 = vpop.eup %6327  ;;  %6343 = vpow2.f32 %v5352_v58  ;;  %v3645_v0 = vmul.f32 %v7180_v7, %v11651_v3  ;;  %v3710_v23 = vmul.f32 %v7181_v10, %v11652_v30  ;;  %v3711_v25 = vmul.f32 %v7182_v48, %v11652_v30  ;;  %v9117_v58 = vld [vmem:[%s7757_s30 + $0xf0] sm:$0xff]  ;;  %v9122_v8 = vld [vmem:[%s7757_s30 + $0xf8] sm:$0xff] }
 0x1cf   : > { %v6330_v63 = vpop.eup %6329  ;;  %v1818_v20 = vadd.f32 %v1781_v13, %v1780_v52  ;;  %v2996_v15 = vadd.f32 1.0, %v6328_v24  ;;  %6345 = vpow2.f32 %v5353_v35  ;;  %v3676_v44 = vadd.f32 %v3644_v1, %v3610_v40  ;;  %v9129_v13 = vld [vmem:[%s7757_s30 + $0x100] sm:$0xff]  ;;  %v9142_v48 = vld [vmem:[%s7757_s30 + $0x110] sm:$0xff] }
 0x1d0   : > { %v2997_v56 = vadd.f32 1.0, %v6330_v63  ;;  %v3677_v6 = vadd.f32 %v3645_v0, %v3611_v29  ;;  %v3174_v45 = vmul.f32 %v9117_v58, %v11641_v11  ;;  %v3175_v7 = vmul.f32 %v9122_v8, %v11641_v11  ;;  %v9134_v29 = vld [vmem:[%s7757_s30 + $0x108] sm:$0xff] }
 0x1d1   : > { %v6332_v10 = vpop.eup %6331  ;;  %1819 = vadd.xlane.f32.xlu1 %v1818_v20  ;;  %6347 = vrcp.f32 %v2996_v15  ;;  %v9126_v52 = vadd.f32 %v3710_v23, %v3676_v44  ;;  %v3208_v40 = vmul.f32 %v9129_v13, %v11642_v37  ;;  %v3209_v35 = vmul.f32 %v9134_v29, %v11642_v37 }
 0x1d2   : > { %v6334_v1 = vpop.eup %6333  ;;  %v1344_v24 = vmul.f32 %v6332_v10, %v9016_v47  ;;  %6349 = vrcp.f32 %v2997_v56  ;;  %v9139_v0 = vadd.f32 %v3711_v25, %v3677_v6  ;;  %v3274_v23 = vmul.f32 %v9142_v48, %v11643_v4  ;;  %v11653_v25 = vld [vmem:[#allocation34_spill] sm:$0xff] }
 0x1d3   : > { %v1345_v63 = vmul.f32 %v6334_v1, %v9020_v12  ;;  %v5521_v20 = vmul.f32 -1.442695, %v9126_v52  ;;  %v3240_v15 = vadd.f32 %v3208_v40, %v3174_v45  ;;  %v3241_v44 = vadd.f32 %v3209_v35, %v3175_v7 }
 0x1d4   : > { %v6336_v18 = vpop.eup %6335  ;;  %v5522_v17 = vmul.f32 -1.442695, %v9139_v0  ;;  %v3275_v47 = vmul.f32 %v9150_v60, %v11643_v4  ;;  %v2300_v56 = vmul.f32 %v11653_v25, %v8815_v16  ;;  %v2301_v6 = vmul.f32 %v11653_v25, %v8824_v34 }
 0x1d5   : > { %v6338_v10 = vpop.eup %6337  ;;  %v1383_v12 = vadd.f32 %v1345_v63, %v1344_v24  ;;  %v2122_v1 = vadd.f32 1.0, %v6336_v18  ;;  %6351 = vpow2.f32 %v5521_v20  ;;  %v9158_v45 = vadd.f32 %v3274_v23, %v3240_v15 }
 0x1d6   : > { %v6340_v7 = vpop.eup %6339  ;;  %v2123_v40 = vadd.f32 1.0, %v6338_v10  ;;  %6353 = vpow2.f32 %v5522_v17  ;;  %v9160_v35 = vadd.f32 %v3275_v47, %v3241_v44  ;;  %v2334_v19 = vmul.f32 %v11654_v42, %v8829_v26  ;;  %v11655_v44 = vld [vmem:[#allocation36_spill] sm:$0xff] }
 0x1d7   : > { %v6342_v51 = vpop.eup %6341  ;;  %1384 = vadd.xlane.f32.xlu0 %v1383_v12  ;;  %v3528_v16 = vmul.f32 %v6340_v7, %v9040_v36  ;;  %6355 = vrcp.f32 %v2122_v1  ;;  %v5488_v39 = vmul.f32 -1.442695, %v9158_v45  ;;  %v2335_v18 = vmul.f32 %v11654_v42, %v8836_v2 }
 0x1d8   : > { %v6344_v24 = vpop.eup %6343  ;;  %v3529_v23 = vmul.f32 %v6342_v51, %v9042_v49  ;;  %6357 = vrcp.f32 %v2123_v40  ;;  %v5489_v17 = vmul.f32 -1.442695, %v9160_v35  ;;  %v2366_v63 = vadd.f32 %v2334_v19, %v2300_v56 }
 0x1d9   : > { %v6346_v20 = vpop.eup %6345  ;;  %v1686_v15 = vadd.f32 1.0, %v6344_v24  ;;  %6359 = vpow2.f32 %v5488_v39  ;;  %v2367_v26 = vadd.f32 %v2335_v18, %v2301_v6  ;;  %v2400_v36 = vmul.f32 %v11655_v44, %v8839_v33 }
 0x1da   : > { %v3564_v47 = vadd.f32 %v3529_v23, %v3528_v16  ;;  %v1687_v10 = vadd.f32 1.0, %v6346_v20  ;;  %6361 = vpow2.f32 %v5489_v17  ;;  %v2401_v2 = vmul.f32 %v11655_v44, %v8842_v43 }
 0x1db   : > { %v6348_v12 = vpop.eup %6347  ;;  %6363 = vrcp.f32 %v1686_v15  ;;  %v9174_v51 = vadd.f32 %v2400_v36, %v2366_v63  ;;  %v1864_v19 = vmul.f32 %v11647_v50, %v8905_v31  ;;  %v1865_v39 = vmul.f32 %v11647_v50, %v8913_v57 }
 0x1dc   : > { %v6350_v49 = vpop.eup %6349  ;;  %3565 = vadd.xlane.f32.xlu1 %v3564_v47  ;;  %v3092_v33 = vmul.f32 %v6348_v12, %v9056_v5  ;;  %6365 = vrcp.f32 %v1687_v10  ;;  %v9181_v56 = vadd.f32 %v2401_v2, %v2367_v26  ;;  %v1898_v43 = vmul.f32 %v11648_v59, %v8922_v54 }
 0x1dd   : > { %v3093_v6 = vmul.f32 %v6350_v49, %v9059_v61  ;;  %v5420_v1 = vmul.f32 -1.442695, %v9174_v51  ;;  %v1899_v7 = vmul.f32 %v11648_v59, %v8928_v28  ;;  %v1964_v40 = vmul.f32 %v11649_v14, %v8931_v55 }
 0x1de   : > { %v5421_v16 = vmul.f32 -1.442695, %v9181_v56  ;;  %v1930_v18 = vadd.f32 %v1898_v43, %v1864_v19  ;;  %v1965_v5 = vmul.f32 %v11649_v14, %v8944_v41  ;;  %v2302_v24 = vmul.f32 %v11653_v25, %v8905_v31 }
 0x1df   : > { %v6352_v23 = vpop.eup %6351  ;;  %v3129_v17 = vadd.f32 %v3093_v6, %v3092_v33  ;;  %6367 = vpow2.f32 %v5420_v1  ;;  %v1931_v61 = vadd.f32 %v1899_v7, %v1865_v39  ;;  %v2303_v63 = vmul.f32 %v11653_v25, %v8913_v57 }
 0x1e0   : > { %v6354_v20 = vpop.eup %6353  ;;  %v3870_v15 = vadd.f32 1.0, %v6352_v23  ;;  %6369 = vpow2.f32 %v5421_v16  ;;  %v9198_v26 = vadd.f32 %v1964_v40, %v1930_v18  ;;  %v2336_v36 = vmul.f32 %v11654_v42, %v8922_v54 }
 0x1e1   : > { %v6356_v47 = vpop.eup %6355  ;;  %3130 = vadd.xlane.f32.xlu0 %v3129_v17  ;;  %v3871_v10 = vadd.f32 1.0, %v6354_v20  ;;  %v9202_v2 = vadd.f32 %v1965_v5, %v1931_v61  ;;  %v2337_v12 = vmul.f32 %v11654_v42, %v8928_v28  ;;  %v2402_v19 = vmul.f32 %v11655_v44, %v8931_v55 }
 0x1e2   : > { %v6358_v39 = vpop.eup %6357  ;;  %v2218_v49 = vmul.f32 %v6356_v47, %v9078_v21  ;;  %6371 = vrcp.f32 %v3870_v15  ;;  %v5387_v33 = vmul.f32 -1.442695, %v9198_v26  ;;  %v2368_v43 = vadd.f32 %v2336_v36, %v2302_v24 }
 0x1e3   : > { %v6360_v6 = vpop.eup %6359  ;;  %v2219_v1 = vmul.f32 %v6358_v39, %v9084_v53  ;;  %6373 = vrcp.f32 %v3871_v10  ;;  %v5388_v7 = vmul.f32 -1.442695, %v9202_v2  ;;  %v2369_v40 = vadd.f32 %v2337_v12, %v2303_v63 }
 0x1e4   : > { %v6362_v16 = vpop.eup %6361  ;;  %v3434_v18 = vadd.f32 1.0, %v6360_v6  ;;  %6375 = vpow2.f32 %v5387_v33  ;;  %v2403_v5 = vmul.f32 %v11655_v44, %v8944_v41  ;;  %v9214_v23 = vadd.f32 %v2402_v19, %v2368_v43 }
 0x1e5   : > { %v6364_v21 = vpop.eup %6363  ;;  %v2256_v17 = vadd.f32 %v2219_v1, %v2218_v49  ;;  %v3435_v61 = vadd.f32 1.0, %v6362_v16  ;;  %6377 = vpow2.f32 %v5388_v7  ;;  %v3612_v24 = vmul.f32 %v9117_v58, %v11650_v46 }
 0x1e6   : > { %v6366_v53 = vpop.eup %6365  ;;  %v1782_v20 = vmul.f32 %v6364_v21, %v9096_v9  ;;  %6379 = vrcp.f32 %v3434_v18  ;;  %v9219_v63 = vadd.f32 %v2403_v5, %v2369_v40  ;;  %v5422_v15 = vmul.f32 -1.442695, %v9214_v23 }
 0x1e7   : > { %2257 = vadd.xlane.f32.xlu1 %v2256_v17  ;;  %v1783_v36 = vmul.f32 %v6366_v53, %v9100_v32  ;;  %6381 = vrcp.f32 %v3435_v61  ;;  %v3613_v47 = vmul.f32 %v9122_v8, %v11650_v46  ;;  %v3646_v10 = vmul.f32 %v9129_v13, %v11651_v3 }
 0x1e8   : > { %6383 = vpow2.f32 %v5422_v15  ;;  %v5423_v58 = vmul.f32 -1.442695, %v9219_v63  ;;  %v3647_v9 = vmul.f32 %v9134_v29, %v11651_v3  ;;  %v3712_v12 = vmul.f32 %v9142_v48, %v11652_v30 }
 0x1e9   : > { %v6368_v19 = vpop.eup %6367  ;;  %v1821_v39 = vadd.f32 %v1783_v36, %v1782_v20  ;;  %v3678_v49 = vadd.f32 %v3646_v10, %v3612_v24  ;;  %v3713_v32 = vmul.f32 %v9150_v60, %v11652_v30  ;;  %v2740_v8 = vmul.f32 %v8174_v38, %v8905_v31  ;;  %v9255_v36 = vld [vmem:[%s7757_s30 + $0x120] sm:$0xff] }
 0x1ea   : > { %v6370_v33 = vpop.eup %6369  ;;  %v2560_v13 = vadd.f32 1.0, %v6368_v19  ;;  %6385 = vpow2.f32 %v5423_v58  ;;  %v3679_v43 = vadd.f32 %v3647_v9, %v3613_v47  ;;  %v2741_v6 = vmul.f32 %v8174_v38, %v8913_v57 }
 0x1eb   : > { %1822 = vadd.xlane.f32.xlu0 %v1821_v39  ;;  %v2561_v29 = vadd.f32 1.0, %v6370_v33  ;;  %v9238_v1 = vadd.f32 %v3712_v12, %v3678_v49  ;;  %v2774_v48 = vmul.f32 %v8177_v22, %v8922_v54  ;;  %v2775_v60 = vmul.f32 %v8177_v22, %v8928_v28  ;;  %v9268_v33 = vld [vmem:[%s7757_s30 + $0x130] sm:$0xff] }
 0x1ec   : > { %v6372_v7 = vpop.eup %6371  ;;  %6387 = vrcp.f32 %v2560_v13  ;;  %v9244_v40 = vadd.f32 %v3713_v32, %v3679_v43  ;;  %v2840_v16 = vmul.f32 %v8192_v27, %v8931_v55  ;;  %v2841_v18 = vmul.f32 %v8192_v27, %v8944_v41 }
 0x1ed   : > { %v6374_v5 = vpop.eup %6373  ;;  %v3966_v21 = vmul.f32 %v6372_v7, %v9126_v52  ;;  %6389 = vrcp.f32 %v2561_v29  ;;  %v5523_v17 = vmul.f32 -1.442695, %v9238_v1  ;;  %v2806_v61 = vadd.f32 %v2774_v48, %v2740_v8  ;;  %v9275_v29 = vld [vmem:[%s7757_s30 + $0x138] sm:$0xff]  ;;  %v9280_v7 = vld [vmem:[%s7757_s30 + $0x140] sm:$0xff] }
 0x1ee   : > { %v6376_v24 = vpop.eup %6375  ;;  %v3967_v53 = vmul.f32 %v6374_v5, %v9139_v0  ;;  %v5524_v20 = vmul.f32 -1.442695, %v9244_v40  ;;  %v2807_v15 = vadd.f32 %v2775_v60, %v2741_v6  ;;  %v2738_v47 = vmul.f32 %v9255_v36, %v8174_v38 }
 0x1ef   : > { %v6378_v10 = vpop.eup %6377  ;;  %v2124_v58 = vadd.f32 1.0, %v6376_v24  ;;  %6391 = vpow2.f32 %v5523_v17  ;;  %v9259_v52 = vadd.f32 %v2840_v16, %v2806_v61  ;;  %v2739_v9 = vmul.f32 %v8174_v38, %v8824_v34 }
 0x1f0   : > { %v6380_v12 = vpop.eup %6379  ;;  %v4002_v0 = vadd.f32 %v3967_v53, %v3966_v21  ;;  %v2125_v19 = vadd.f32 1.0, %v6378_v10  ;;  %6393 = vpow2.f32 %v5524_v20  ;;  %v9263_v39 = vadd.f32 %v2841_v18, %v2807_v15  ;;  %v9285_v21 = vld [vmem:[%s7757_s30 + $0x148] sm:$0xff] }
 0x1f1   : > { %v6382_v49 = vpop.eup %6381  ;;  %v3530_v32 = vmul.f32 %v6380_v12, %v9158_v45  ;;  %6395 = vrcp.f32 %v2124_v58  ;;  %v5457_v8 = vmul.f32 -1.442695, %v9259_v52  ;;  %v2772_v13 = vmul.f32 %v9268_v33, %v8177_v22 }
 0x1f2   : > { %v6384_v34 = vpop.eup %6383  ;;  %4003 = vadd.xlane.f32.xlu1 %v4002_v0  ;;  %v3531_v43 = vmul.f32 %v6382_v49, %v9160_v35  ;;  %6397 = vrcp.f32 %v2125_v19  ;;  %v5458_v6 = vmul.f32 -1.442695, %v9263_v39  ;;  %v2773_v45 = vmul.f32 %v9275_v29, %v8177_v22 }
 0x1f3   : > { %v2562_v48 = vadd.f32 1.0, %v6384_v34  ;;  %6399 = vpow2.f32 %v5457_v8  ;;  %v2804_v60 = vadd.f32 %v2772_v13, %v2738_v47  ;;  %v2838_v16 = vmul.f32 %v9280_v7, %v8192_v27 }
 0x1f4   : > { %v6386_v18 = vpop.eup %6385  ;;  %v3567_v5 = vadd.f32 %v3531_v43, %v3530_v32  ;;  %6401 = vpow2.f32 %v5458_v6  ;;  %v2805_v35 = vadd.f32 %v2773_v45, %v2739_v9  ;;  %v2839_v17 = vmul.f32 %v9285_v21, %v8192_v27  ;;  %v7194_v6 = vld [vmem:[%s7757_s30 + $0x128] sm:$0xff] }
 0x1f5   : > { %v2563_v61 = vadd.f32 1.0, %v6386_v18  ;;  %6403 = vrcp.f32 %v2562_v48  ;;  %v9289_v24 = vadd.f32 %v2838_v16, %v2804_v60  ;;  %v3178_v53 = vmul.f32 %v11641_v11, %v8905_v31 }
 0x1f6   : > { %v6388_v20 = vpop.eup %6387  ;;  %3568 = vadd.xlane.f32.xlu0 %v3567_v5  ;;  %v9293_v15 = vadd.f32 %v2839_v17, %v2805_v35  ;;  %v3179_v47 = vmul.f32 %v11641_v11, %v8913_v57  ;;  %v3212_v10 = vmul.f32 %v11642_v37, %v8922_v54  ;;  %v3213_v58 = vmul.f32 %v11642_v37, %v8928_v28 }
 0x1f7   : > { %v6390_v9 = vpop.eup %6389  ;;  %v2656_v12 = vmul.f32 %v6388_v20, %v9174_v51  ;;  %6405 = vrcp.f32 %v2563_v61  ;;  %v5455_v0 = vmul.f32 -1.442695, %v9289_v24  ;;  %v3278_v19 = vmul.f32 %v11643_v4, %v8931_v55 }
 0x1f8   : > { %v2657_v49 = vmul.f32 %v6390_v9, %v9181_v56  ;;  %v5456_v32 = vmul.f32 -1.442695, %v9293_v15  ;;  %v3244_v8 = vadd.f32 %v3212_v10, %v3178_v53  ;;  %v3245_v13 = vadd.f32 %v3213_v58, %v3179_v47 }
 0x1f9   : > { %v6392_v34 = vpop.eup %6391  ;;  %6407 = vpow2.f32 %v5455_v0  ;;  %v3279_v43 = vmul.f32 %v11643_v4, %v8944_v41  ;;  %v3176_v51 = vmul.f32 %v9255_v36, %v11641_v11  ;;  %v3177_v45 = vmul.f32 %v7194_v6, %v11641_v11 }
 0x1fa   : > { %v6394_v48 = vpop.eup %6393  ;;  %v2694_v60 = vadd.f32 %v2657_v49, %v2656_v12  ;;  %v3872_v16 = vadd.f32 1.0, %v6392_v34  ;;  %6409 = vpow2.f32 %v5456_v32  ;;  %v9313_v56 = vadd.f32 %v3278_v19, %v3244_v8 }
 0x1fb   : > { %v6396_v18 = vpop.eup %6395  ;;  %v3873_v5 = vadd.f32 1.0, %v6394_v48  ;;  %v9315_v35 = vadd.f32 %v3279_v43, %v3245_v13  ;;  %v3210_v17 = vmul.f32 %v9268_v33, %v11642_v37  ;;  %v3211_v61 = vmul.f32 %v9275_v29, %v11642_v37 }
 0x1fc   : > { %v6398_v53 = vpop.eup %6397  ;;  %2695 = vadd.xlane.f32.xlu1 %v2694_v60  ;;  %v2220_v20 = vmul.f32 %v6396_v18, %v9198_v26  ;;  %6411 = vrcp.f32 %v3872_v16  ;;  %v5492_v47 = vmul.f32 -1.442695, %v9313_v56  ;;  %v3276_v10 = vmul.f32 %v9280_v7, %v11643_v4 }
 0x1fd   : > { %v6400_v58 = vpop.eup %6399  ;;  %v2221_v9 = vmul.f32 %v6398_v53, %v9202_v2  ;;  %6413 = vrcp.f32 %v3873_v5  ;;  %v5493_v12 = vmul.f32 -1.442695, %v9315_v35  ;;  %v3242_v0 = vadd.f32 %v3210_v17, %v3176_v51 }
 0x1fe   : > { %v6402_v19 = vpop.eup %6401  ;;  %v3000_v49 = vadd.f32 1.0, %v6400_v58  ;;  %6415 = vpow2.f32 %v5492_v47  ;;  %v3243_v32 = vadd.f32 %v3211_v61, %v3177_v45  ;;  %v3277_v26 = vmul.f32 %v9285_v21, %v11643_v4 }
 0x1ff   : > { %v6404_v8 = vpop.eup %6403  ;;  %v2259_v13 = vadd.f32 %v2221_v9, %v2220_v20  ;;  %v3001_v34 = vadd.f32 1.0, %v6402_v19  ;;  %6417 = vpow2.f32 %v5493_v12  ;;  %v9329_v43 = vadd.f32 %v3276_v10, %v3242_v0  ;;  %v9363_v19 = vld [vmem:[%s7757_s30 + $0x180] sm:$0xff] }
 0x200   : > { %v2658_v48 = vmul.f32 %v6404_v8, %v9214_v23  ;;  %6419 = vrcp.f32 %v3000_v49  ;;  %v9332_v2 = vadd.f32 %v3277_v26, %v3243_v32  ;;  %v3616_v51 = vmul.f32 %v11650_v46, %v8905_v31 }
 0x201   : > { %v6406_v60 = vpop.eup %6405  ;;  %2260 = vadd.xlane.f32.xlu0 %v2259_v13  ;;  %6421 = vrcp.f32 %v3001_v34  ;;  %v5490_v45 = vmul.f32 -1.442695, %v9329_v43  ;;  %v3617_v16 = vmul.f32 %v11650_v46, %v8913_v57  ;;  %v3650_v18 = vmul.f32 %v11651_v3, %v8922_v54  ;;  %v9372_v34 = vld [vmem:[%s7757_s30 + $0x188] sm:$0xff] }
 0x202   : > { %v2659_v5 = vmul.f32 %v6406_v60, %v9219_v63  ;;  %v5491_v23 = vmul.f32 -1.442695, %v9332_v2  ;;  %v3651_v17 = vmul.f32 %v11651_v3, %v8928_v28  ;;  %v3716_v31 = vmul.f32 %v11652_v30, %v8931_v55  ;;  %v9377_v60 = vld [vmem:[%s7757_s30 + $0x190] sm:$0xff] }
 0x203   : > { %v6408_v61 = vpop.eup %6407  ;;  %6423 = vpow2.f32 %v5490_v45  ;;  %v3682_v53 = vadd.f32 %v3650_v18, %v3616_v51  ;;  %v3717_v20 = vmul.f32 %v11652_v30, %v8944_v41  ;;  %v3614_v57 = vmul.f32 %v9255_v36, %v11650_v46 }
 0x204   : > { %v6410_v54 = vpop.eup %6409  ;;  %v2697_v63 = vadd.f32 %v2659_v5, %v2658_v48  ;;  %v2998_v47 = vadd.f32 1.0, %v6408_v61  ;;  %6425 = vpow2.f32 %v5491_v23  ;;  %v3683_v10 = vadd.f32 %v3651_v17, %v3617_v16  ;;  %v9384_v23 = vld [vmem:[%s7757_s30 + $0x198] sm:$0xff]  ;;  %v9390_v17 = vld [vmem:[%s7757_s30 + $0x1a8] sm:$0xff] }
 0x205   : > { %v2999_v58 = vadd.f32 1.0, %v6410_v54  ;;  %v9351_v28 = vadd.f32 %v3716_v31, %v3682_v53  ;;  %v3615_v55 = vmul.f32 %v7194_v6, %v11650_v46  ;;  %v3648_v9 = vmul.f32 %v9268_v33, %v11651_v3 }
 0x206   : > { %v6412_v12 = vpop.eup %6411  ;;  %2698 = vadd.xlane.f32.xlu1 %v2697_v63  ;;  %6427 = vrcp.f32 %v2998_v47  ;;  %v9356_v41 = vadd.f32 %v3717_v20, %v3683_v10  ;;  %v3649_v36 = vmul.f32 %v9275_v29, %v11651_v3  ;;  %v3714_v0 = vmul.f32 %v9280_v7, %v11652_v30  ;;  %v11656_v63 = vld [vmem:[#allocation26_spill] sm:$0xff] }
 0x207   : > { %v6414_v49 = vpop.eup %6413  ;;  %v3968_v6 = vmul.f32 %v6412_v12, %v9238_v1  ;;  %6429 = vrcp.f32 %v2999_v58  ;;  %v5527_v33 = vmul.f32 -1.442695, %v9351_v28  ;;  %v3680_v32 = vadd.f32 %v3648_v9, %v3614_v57  ;;  %v11657_v58 = vld [vmem:[#allocation27_spill] sm:$0xff] }
 0x208   : > { %v6416_v26 = vpop.eup %6415  ;;  %v3969_v8 = vmul.f32 %v6414_v49, %v9244_v40  ;;  %v5528_v13 = vmul.f32 -1.442695, %v9356_v41  ;;  %v3681_v29 = vadd.f32 %v3649_v36, %v3615_v55  ;;  %v3715_v7 = vmul.f32 %v9285_v21, %v11652_v30  ;;  %v9387_v21 = vld [vmem:[%s7757_s30 + $0x1a0] sm:$0xff] }
 0x209   : > { %v6418_v48 = vpop.eup %6417  ;;  %v3438_v1 = vadd.f32 1.0, %v6416_v26  ;;  %6431 = vpow2.f32 %v5527_v33  ;;  %v9374_v51 = vadd.f32 %v3714_v0, %v3680_v32  ;;  %v990_v40 = vmul.f32 %v11632_v62, %v9363_v19  ;;  %v11658_v33 = vld [vmem:[#allocation22_spill] sm:$0xff] }
 0x20a   : > { %v6420_v45 = vpop.eup %6419  ;;  %v4005_v16 = vadd.f32 %v3969_v8, %v3968_v6  ;;  %v3439_v18 = vadd.f32 1.0, %v6418_v48  ;;  %6433 = vpow2.f32 %v5528_v13  ;;  %v9381_v5 = vadd.f32 %v3715_v7, %v3681_v29  ;;  %v11659_v29 = vld [vmem:[#allocation23_spill] sm:$0xff] }
 0x20b   : > { %v6422_v31 = vpop.eup %6421  ;;  %v3096_v61 = vmul.f32 %v6420_v45, %v9259_v52  ;;  %6435 = vrcp.f32 %v3438_v1  ;;  %v5525_v53 = vmul.f32 -1.442695, %v9374_v51  ;;  %v991_v20 = vmul.f32 %v11632_v62, %v9372_v34  ;;  %v9417_v1 = vld [vmem:[%s7757_s30 + $0x1b0] sm:$0xff] }
 0x20c   : > { %4006 = vadd.xlane.f32.xlu0 %v4005_v16  ;;  %v3097_v57 = vmul.f32 %v6422_v31, %v9263_v39  ;;  %6437 = vrcp.f32 %v3439_v18  ;;  %v5526_v54 = vmul.f32 -1.442695, %v9381_v5  ;;  %v1024_v47 = vmul.f32 %v11656_v63, %v9377_v60  ;;  %v11660_v31 = vld [vmem:[#allocation24_spill] sm:$0xff] }
 0x20d   : > { %v6424_v10 = vpop.eup %6423  ;;  %6439 = vpow2.f32 %v5525_v53  ;;  %v1025_v52 = vmul.f32 %v11656_v63, %v9384_v23  ;;  %v1090_v55 = vmul.f32 %v11657_v58, %v9387_v21  ;;  %v1091_v9 = vmul.f32 %v11657_v58, %v9390_v17 }
 0x20e   : > { %v6426_v12 = vpop.eup %6425  ;;  %v3135_v39 = vadd.f32 %v3097_v57, %v3096_v61  ;;  %v3436_v36 = vadd.f32 1.0, %v6424_v10  ;;  %6441 = vpow2.f32 %v5526_v54  ;;  %v1056_v0 = vadd.f32 %v1024_v47, %v990_v40  ;;  %v9420_v40 = vld [vmem:[%s7757_s30 + $0x1b8] sm:$0xff]  ;;  %v9430_v47 = vld [vmem:[%s7757_s30 + $0x1c0] sm:$0xff] }
 0x20f   : > { %v3437_v49 = vadd.f32 1.0, %v6426_v12  ;;  %v1057_v6 = vadd.f32 %v1025_v52, %v991_v20  ;;  %v552_v32 = vmul.f32 %v11658_v33, %v9363_v19  ;;  %v553_v26 = vmul.f32 %v11658_v33, %v9372_v34 }
 0x210   : > { %v6428_v8 = vpop.eup %6427  ;;  %3136 = vadd.xlane.f32.xlu1 %v3135_v39  ;;  %6443 = vrcp.f32 %v3436_v36  ;;  %v9410_v13 = vadd.f32 %v1090_v55, %v1056_v0  ;;  %v586_v7 = vmul.f32 %v11659_v29, %v9377_v60  ;;  %v587_v48 = vmul.f32 %v11659_v29, %v9384_v23  ;;  %v9436_v55 = vld [vmem:[%s7757_s30 + $0x1c8] sm:$0xff] }
 0x211   : > { %v6430_v45 = vpop.eup %6429  ;;  %v3094_v16 = vmul.f32 %v6428_v8, %v9289_v24  ;;  %6445 = vrcp.f32 %v3437_v49  ;;  %v9423_v18 = vadd.f32 %v1091_v9, %v1057_v6  ;;  %v652_v61 = vmul.f32 %v11660_v31, %v9387_v21 }
 0x212   : > { %v3095_v53 = vmul.f32 %v6430_v45, %v9293_v15  ;;  %v5319_v20 = vmul.f32 -1.442695, %v9410_v13  ;;  %v618_v57 = vadd.f32 %v586_v7, %v552_v32  ;;  %v619_v54 = vadd.f32 %v587_v48, %v553_v26  ;;  %v9447_v26 = vld [vmem:[%s7757_s30 + $0x1d0] sm:$0xff] }
 0x213   : > { %v6432_v10 = vpop.eup %6431  ;;  %v5320_v52 = vmul.f32 -1.442695, %v9423_v18  ;;  %v653_v24 = vmul.f32 %v11660_v31, %v9390_v17  ;;  %v992_v9 = vmul.f32 %v11632_v62, %v9417_v1  ;;  %v993_v15 = vmul.f32 %v11632_v62, %v9420_v40 }
 0x214   : > { %v6434_v12 = vpop.eup %6433  ;;  %v3132_v39 = vadd.f32 %v3095_v53, %v3094_v16  ;;  %v3876_v36 = vadd.f32 1.0, %v6432_v10  ;;  %6447 = vpow2.f32 %v5319_v20  ;;  %v9442_v0 = vadd.f32 %v652_v61, %v618_v57  ;;  %v9454_v16 = vld [vmem:[%s7757_s30 + $0x1d8] sm:$0xff] }
 0x215   : > { %v6436_v49 = vpop.eup %6435  ;;  %v3877_v6 = vadd.f32 1.0, %v6434_v12  ;;  %6449 = vpow2.f32 %v5320_v52  ;;  %v9444_v32 = vadd.f32 %v653_v24, %v619_v54  ;;  %v1026_v8 = vmul.f32 %v11656_v63, %v9430_v47 }
 0x216   : > { %v6438_v7 = vpop.eup %6437  ;;  %3133 = vadd.xlane.f32.xlu0 %v3132_v39  ;;  %v3534_v48 = vmul.f32 %v6436_v49, %v9313_v56  ;;  %6451 = vrcp.f32 %v3876_v36  ;;  %v5284_v45 = vmul.f32 -1.442695, %v9442_v0  ;;  %v1027_v61 = vmul.f32 %v11656_v63, %v9436_v55 }
 0x217   : > { %v6440_v53 = vpop.eup %6439  ;;  %v3535_v20 = vmul.f32 %v6438_v7, %v9315_v35  ;;  %6453 = vrcp.f32 %v3877_v6  ;;  %v5285_v57 = vmul.f32 -1.442695, %v9444_v32  ;;  %v1058_v54 = vadd.f32 %v1026_v8, %v992_v9 }
 0x218   : > { %v6442_v10 = vpop.eup %6441  ;;  %v3874_v52 = vadd.f32 1.0, %v6440_v53  ;;  %6455 = vpow2.f32 %v5284_v45  ;;  %v1059_v24 = vadd.f32 %v1027_v61, %v993_v15  ;;  %v1092_v56 = vmul.f32 %v11657_v58, %v9447_v26 }
 0x219   : > { %v3573_v12 = vadd.f32 %v3535_v20, %v3534_v48  ;;  %v3875_v39 = vadd.f32 1.0, %v6442_v10  ;;  %6457 = vpow2.f32 %v5285_v57  ;;  %v1093_v36 = vmul.f32 %v11657_v58, %v9454_v16  ;;  %v11661_v10 = vld [vmem:[#allocation28_spill] sm:$0xff] }
 0x21a   : > { %v6444_v49 = vpop.eup %6443  ;;  %6459 = vrcp.f32 %v3874_v52  ;;  %v9464_v35 = vadd.f32 %v1092_v56, %v1058_v54  ;;  %v554_v9 = vmul.f32 %v11658_v33, %v9417_v1  ;;  %v555_v6 = vmul.f32 %v11658_v33, %v9420_v40 }
 0x21b   : > { %v6446_v15 = vpop.eup %6445  ;;  %3574 = vadd.xlane.f32.xlu1 %v3573_v12  ;;  %v3532_v8 = vmul.f32 %v6444_v49, %v9329_v43  ;;  %6461 = vrcp.f32 %v3875_v39  ;;  %v9471_v7 = vadd.f32 %v1093_v36, %v1059_v24  ;;  %v588_v48 = vmul.f32 %v11659_v29, %v9430_v47 }
 0x21c   : > { %v3533_v45 = vmul.f32 %v6446_v15, %v9332_v2  ;;  %v5321_v61 = vmul.f32 -1.442695, %v9464_v35  ;;  %v589_v53 = vmul.f32 %v11659_v29, %v9436_v55  ;;  %v654_v20 = vmul.f32 %v11660_v31, %v9447_v26 }
 0x21d   : > { %v5322_v57 = vmul.f32 -1.442695, %v9471_v7  ;;  %v620_v54 = vadd.f32 %v588_v48, %v554_v9  ;;  %v655_v43 = vmul.f32 %v11660_v31, %v9454_v16  ;;  %v1430_v52 = vmul.f32 %v11661_v10, %v9417_v1  ;;  %v11662_v9 = vld [vmem:[#allocation29_spill] sm:$0xff] }
 0x21e   : > { %v6448_v24 = vpop.eup %6447  ;;  %v3570_v56 = vadd.f32 %v3533_v45, %v3532_v8  ;;  %6463 = vpow2.f32 %v5321_v61  ;;  %v621_v2 = vadd.f32 %v589_v53, %v555_v6  ;;  %v1431_v12 = vmul.f32 %v11661_v10, %v9420_v40  ;;  %v11663_v6 = vld [vmem:[#allocation30_spill] sm:$0xff] }
 0x21f   : > { %v6450_v39 = vpop.eup %6449  ;;  %v1250_v36 = vadd.f32 1.0, %v6448_v24  ;;  %6465 = vpow2.f32 %v5322_v57  ;;  %v9488_v49 = vadd.f32 %v654_v20, %v620_v54  ;;  %v1464_v15 = vmul.f32 %v11662_v9, %v9430_v47 }
 0x220   : > { %v6452_v48 = vpop.eup %6451  ;;  %3571 = vadd.xlane.f32.xlu0 %v3570_v56  ;;  %v1251_v30 = vadd.f32 1.0, %v6450_v39  ;;  %v9492_v3 = vadd.f32 %v655_v43, %v621_v2  ;;  %v1465_v8 = vmul.f32 %v11662_v9, %v9436_v55  ;;  %v1530_v45 = vmul.f32 %v11663_v6, %v9447_v26 }
 0x221   : > { %v6454_v61 = vpop.eup %6453  ;;  %v3972_v53 = vmul.f32 %v6452_v48, %v9351_v28  ;;  %6467 = vrcp.f32 %v1250_v36  ;;  %v5286_v20 = vmul.f32 -1.442695, %v9488_v49  ;;  %v1496_v57 = vadd.f32 %v1464_v15, %v1430_v52 }
 0x222   : > { %v6456_v54 = vpop.eup %6455  ;;  %v3973_v24 = vmul.f32 %v6454_v61, %v9356_v41  ;;  %6469 = vrcp.f32 %v1251_v30  ;;  %v5287_v43 = vmul.f32 -1.442695, %v9492_v3  ;;  %v1497_v56 = vadd.f32 %v1465_v8, %v1431_v12 }
 0x223   : > { %v6458_v2 = vpop.eup %6457  ;;  %v812_v39 = vadd.f32 1.0, %v6456_v54  ;;  %6471 = vpow2.f32 %v5286_v20  ;;  %v1531_v46 = vmul.f32 %v11663_v6, %v9454_v16  ;;  %v9504_v4 = vadd.f32 %v1530_v45, %v1496_v57 }
 0x224   : > { %v6460_v28 = vpop.eup %6459  ;;  %v4011_v36 = vadd.f32 %v3973_v24, %v3972_v53  ;;  %v813_v48 = vadd.f32 1.0, %v6458_v2  ;;  %6473 = vpow2.f32 %v5287_v43  ;;  %v1428_v52 = vmul.f32 %v11661_v10, %v9363_v19 }
 0x225   : > { %v6462_v41 = vpop.eup %6461  ;;  %v3970_v30 = vmul.f32 %v6460_v28, %v9374_v51  ;;  %6475 = vrcp.f32 %v812_v39  ;;  %v9509_v12 = vadd.f32 %v1531_v46, %v1497_v56  ;;  %v5356_v15 = vmul.f32 -1.442695, %v9504_v4 }
 0x226   : > { %4012 = vadd.xlane.f32.xlu1 %v4011_v36  ;;  %v3971_v8 = vmul.f32 %v6462_v41, %v9381_v5  ;;  %6477 = vrcp.f32 %v813_v48  ;;  %v1429_v45 = vmul.f32 %v11661_v10, %v9372_v34  ;;  %v1462_v61 = vmul.f32 %v11662_v9, %v9377_v60 }
 0x227   : > { %6479 = vpow2.f32 %v5356_v15  ;;  %v5357_v53 = vmul.f32 -1.442695, %v9509_v12  ;;  %v1463_v51 = vmul.f32 %v11662_v9, %v9384_v23  ;;  %v1528_v46 = vmul.f32 %v11663_v6, %v9387_v21 }
 0x228   : > { %v6464_v20 = vpop.eup %6463  ;;  %v4008_v57 = vadd.f32 %v3971_v8, %v3970_v30  ;;  %v1494_v54 = vadd.f32 %v1462_v61, %v1428_v52  ;;  %v1529_v5 = vmul.f32 %v11663_v6, %v9390_v17  ;;  %v1868_v24 = vmul.f32 %v11647_v50, %v9417_v1 }
 0x229   : > { %v6466_v43 = vpop.eup %6465  ;;  %v1252_v56 = vadd.f32 1.0, %v6464_v20  ;;  %6481 = vpow2.f32 %v5357_v53  ;;  %v1495_v2 = vadd.f32 %v1463_v51, %v1429_v45  ;;  %v1869_v39 = vmul.f32 %v11647_v50, %v9420_v40 }
 0x22a   : > { %4009 = vadd.xlane.f32.xlu0 %v4008_v57  ;;  %v1253_v28 = vadd.f32 1.0, %v6466_v43  ;;  %v9528_v36 = vadd.f32 %v1528_v46, %v1494_v54  ;;  %v1902_v48 = vmul.f32 %v11648_v59, %v9430_v47  ;;  %v1903_v52 = vmul.f32 %v11648_v59, %v9436_v55 }
 0x22b   : > { %v6468_v41 = vpop.eup %6467  ;;  %6483 = vrcp.f32 %v1252_v56  ;;  %v9534_v30 = vadd.f32 %v1529_v5, %v1495_v2  ;;  %v1968_v15 = vmul.f32 %v11649_v14, %v9447_v26  ;;  %v1969_v8 = vmul.f32 %v11649_v14, %v9454_v16 }
 0x22c   : > { %v6470_v45 = vpop.eup %6469  ;;  %v1346_v61 = vmul.f32 %v6468_v41, %v9410_v13  ;;  %6485 = vrcp.f32 %v1253_v28  ;;  %v5354_v53 = vmul.f32 -1.442695, %v9528_v36  ;;  %v1934_v51 = vadd.f32 %v1902_v48, %v1868_v24 }
 0x22d   : > { %v6472_v46 = vpop.eup %6471  ;;  %v1347_v20 = vmul.f32 %v6470_v45, %v9423_v18  ;;  %v5355_v57 = vmul.f32 -1.442695, %v9534_v30  ;;  %v1935_v54 = vadd.f32 %v1903_v52, %v1869_v39  ;;  %v1866_v5 = vmul.f32 %v11647_v50, %v9363_v19 }
 0x22e   : > { %v6474_v43 = vpop.eup %6473  ;;  %v814_v56 = vadd.f32 1.0, %v6472_v46  ;;  %6487 = vpow2.f32 %v5354_v53  ;;  %v9546_v2 = vadd.f32 %v1968_v15, %v1934_v51  ;;  %v1867_v13 = vmul.f32 %v11647_v50, %v9372_v34 }
 0x22f   : > { %v6476_v28 = vpop.eup %6475  ;;  %v1386_v24 = vadd.f32 %v1347_v20, %v1346_v61  ;;  %v815_v48 = vadd.f32 1.0, %v6474_v43  ;;  %6489 = vpow2.f32 %v5355_v57  ;;  %v9550_v18 = vadd.f32 %v1969_v8, %v1935_v54  ;;  %v9566_v57 = vld [vmem:[%s7757_s30 + $0x1e8] sm:$0xff]  ;;  %v9569_v54 = vld [vmem:[%s7757_s30 + $0x1f0] sm:$0xff] }
 0x230   : > { %v6478_v41 = vpop.eup %6477  ;;  %v908_v39 = vmul.f32 %v6476_v28, %v9442_v0  ;;  %6491 = vrcp.f32 %v814_v56  ;;  %v5391_v52 = vmul.f32 -1.442695, %v9546_v2  ;;  %v1900_v15 = vmul.f32 %v11648_v59, %v9377_v60  ;;  %v9561_v0 = vld [vmem:[%s7757_s30 + $0x1e0] sm:$0xff] }
 0x231   : > { %v6480_v45 = vpop.eup %6479  ;;  %1387 = vadd.xlane.f32.xlu1 %v1386_v24  ;;  %v909_v61 = vmul.f32 %v6478_v41, %v9444_v32  ;;  %6493 = vrcp.f32 %v815_v48  ;;  %v5392_v8 = vmul.f32 -1.442695, %v9550_v18  ;;  %v1901_v53 = vmul.f32 %v11648_v59, %v9384_v23  ;;  %v9572_v32 = vld [vmem:[%s7757_s30 + $0x1f8] sm:$0xff]  ;;  %v9577_v48 = vld [vmem:[%s7757_s30 + $0x200] sm:$0xff]  ;;  %v9586_v59 = vld [vmem:[%s7757_s30 + $0x208] sm:$0xff] }
 0x232   : > { %v1690_v51 = vadd.f32 1.0, %v6480_v45  ;;  %6495 = vpow2.f32 %v5391_v52  ;;  %v1932_v46 = vadd.f32 %v1900_v15, %v1866_v5  ;;  %v1966_v20 = vmul.f32 %v11649_v14, %v9387_v21 }
 0x233   : > { %v6482_v43 = vpop.eup %6481  ;;  %v948_v56 = vadd.f32 %v909_v61, %v908_v39  ;;  %6497 = vpow2.f32 %v5392_v8  ;;  %v1933_v28 = vadd.f32 %v1901_v53, %v1867_v13  ;;  %v1967_v24 = vmul.f32 %v11649_v14, %v9390_v17 }
 0x234   : > { %v1691_v5 = vadd.f32 1.0, %v6482_v43  ;;  %6499 = vrcp.f32 %v1690_v51  ;;  %v9579_v41 = vadd.f32 %v1966_v20, %v1932_v46  ;;  %v556_v52 = vmul.f32 %v11658_v33, %v9561_v0 }
 0x235   : > { %v6484_v15 = vpop.eup %6483  ;;  %949 = vadd.xlane.f32.xlu0 %v948_v56  ;;  %v9583_v45 = vadd.f32 %v1967_v24, %v1933_v28  ;;  %v557_v13 = vmul.f32 %v11658_v33, %v9566_v57  ;;  %v590_v39 = vmul.f32 %v11659_v29, %v9569_v54  ;;  %v591_v61 = vmul.f32 %v11659_v29, %v9572_v32  ;;  %v929_v56 = vpop.xlane.xlu1 %928 }
 0x236   : > { %v6486_v8 = vpop.eup %6485  ;;  %v1348_v53 = vmul.f32 %v6484_v15, %v9464_v35  ;;  %6501 = vrcp.f32 %v1691_v5  ;;  %v5389_v51 = vmul.f32 -1.442695, %v9579_v41  ;;  %v656_v46 = vmul.f32 %v11660_v31, %v9577_v48  ;;  %v926_v28 = vpop.xlane.xlu0 %925 }
 0x237   : > { %v1349_v20 = vmul.f32 %v6486_v8, %v9471_v7  ;;  %v5390_v43 = vmul.f32 -1.442695, %v9583_v45  ;;  %v622_v24 = vadd.f32 %v590_v39, %v556_v52  ;;  %v623_v14 = vadd.f32 %v591_v61, %v557_v13 }
 0x238   : > { %v6488_v50 = vpop.eup %6487  ;;  %6503 = vpow2.f32 %v5389_v51  ;;  %v657_v37 = vmul.f32 %v11660_v31, %v9586_v59  ;;  %v2304_v35 = vmul.f32 %v11653_v25, %v9363_v19  ;;  %v2305_v5 = vmul.f32 %v11653_v25, %v9372_v34 }
 0x239   : > { %v6490_v15 = vpop.eup %6489  ;;  %v1389_v11 = vadd.f32 %v1349_v20, %v1348_v53  ;;  %v1688_v7 = vadd.f32 1.0, %v6488_v50  ;;  %6505 = vpow2.f32 %v5390_v43  ;;  %v9606_v8 = vadd.f32 %v656_v46, %v622_v24 }
 0x23a   : > { %v6492_v6 = vpop.eup %6491  ;;  %v1689_v52 = vadd.f32 1.0, %v6490_v15  ;;  %v9608_v13 = vadd.f32 %v657_v37, %v623_v14  ;;  %v2338_v39 = vmul.f32 %v11654_v42, %v9377_v60  ;;  %v2339_v61 = vmul.f32 %v11654_v42, %v9384_v23 }
 0x23b   : > { %11664 = vst [vmem:[#allocation46_spill] sm:$0xff] %v9606_v8  ;;  %v6494_v51 = vpop.eup %6493  ;;  %1390 = vadd.xlane.f32.xlu1 %v1389_v11  ;;  %v910_v9 = vmul.f32 %v6492_v6, %v9488_v49  ;;  %6507 = vrcp.f32 %v1688_v7  ;;  %v5288_v50 = vmul.f32 -1.442695, %v9606_v8  ;;  %v2404_v53 = vmul.f32 %v11655_v44, %v9387_v21  ;;  %v1367_v49 = vpop.xlane.xlu1 %1366 }
 0x23c   : > { %v6496_v46 = vpop.eup %6495  ;;  %v911_v37 = vmul.f32 %v6494_v51, %v9492_v3  ;;  %6509 = vrcp.f32 %v1689_v52  ;;  %v5289_v14 = vmul.f32 -1.442695, %v9608_v13  ;;  %v2370_v20 = vadd.f32 %v2338_v39, %v2304_v35  ;;  %v1364_v6 = vpop.xlane.xlu0 %1363 }
 0x23d   : > { %v6498_v43 = vpop.eup %6497  ;;  %v2128_v24 = vadd.f32 1.0, %v6496_v46  ;;  %6511 = vpow2.f32 %v5288_v50  ;;  %v2371_v15 = vadd.f32 %v2339_v61, %v2305_v5  ;;  %v2405_v11 = vmul.f32 %v11655_v44, %v9390_v17 }
 0x23e   : > { %v6500_v7 = vpop.eup %6499  ;;  %v951_v10 = vadd.f32 %v911_v37, %v910_v9  ;;  %v2129_v8 = vadd.f32 1.0, %v6498_v43  ;;  %6513 = vpow2.f32 %v5289_v14  ;;  %v9622_v27 = vadd.f32 %v2404_v53, %v2370_v20 }
 0x23f   : > { %v1786_v3 = vmul.f32 %v6500_v7, %v9504_v4  ;;  %6515 = vrcp.f32 %v2128_v24  ;;  %v9625_v52 = vadd.f32 %v2405_v11, %v2371_v15  ;;  %v4040_v39 = vsel %vm4038_vm0, %v929_v56, %v1367_v49 }
 0x240   : > { %v6502_v35 = vpop.eup %6501  ;;  %952 = vadd.xlane.f32.xlu0 %v951_v10  ;;  %6517 = vrcp.f32 %v2129_v8  ;;  %v5424_v5 = vmul.f32 -1.442695, %v9622_v27  ;;  %v4039_v61 = vsel %vm4038_vm0, %v926_v28, %v1364_v6  ;;  %v2306_v4 = vmul.f32 %v11653_v25, %v9417_v1 }
 0x241   : > { %v1787_v9 = vmul.f32 %v6502_v35, %v9509_v12  ;;  %v5425_v51 = vmul.f32 -1.442695, %v9625_v52  ;;  %v2307_v50 = vmul.f32 %v11653_v25, %v9420_v40  ;;  %v2340_v10 = vmul.f32 %v11654_v42, %v9430_v47 }
 0x242   : > { %v6504_v53 = vpop.eup %6503  ;;  %6519 = vpow2.f32 %v5424_v5  ;;  %v2341_v56 = vmul.f32 %v11654_v42, %v9436_v55  ;;  %v2406_v28 = vmul.f32 %v11655_v44, %v9447_v26  ;;  %v2407_v37 = vmul.f32 %v11655_v44, %v9454_v16 }
 0x243   : > { %v6506_v12 = vpop.eup %6505  ;;  %v1827_v8 = vadd.f32 %v1787_v9, %v1786_v3  ;;  %v2126_v46 = vadd.f32 1.0, %v6504_v53  ;;  %6521 = vpow2.f32 %v5425_v51  ;;  %v2372_v20 = vadd.f32 %v2340_v10, %v2306_v4  ;;  %v1805_v10 = vpop.xlane.xlu1 %1804 }
 0x244   : > { %v2127_v14 = vadd.f32 1.0, %v6506_v12  ;;  %v2373_v43 = vadd.f32 %v2341_v56, %v2307_v50  ;;  %v994_v24 = vmul.f32 %v11632_v62, %v9561_v0  ;;  %v995_v11 = vmul.f32 %v11632_v62, %v9566_v57 }
 0x245   : > { %v6508_v15 = vpop.eup %6507  ;;  %1828 = vadd.xlane.f32.xlu1 %v1827_v8  ;;  %6523 = vrcp.f32 %v2126_v46  ;;  %v1028_v49 = vmul.f32 %v11656_v63, %v9569_v54  ;;  %v1029_v6 = vmul.f32 %v11656_v63, %v9572_v32  ;;  %v9653_v35 = vadd.f32 %v2406_v28, %v2372_v20  ;;  %v1802_v46 = vpop.xlane.xlu0 %1801 }
 0x246   : > { %v6510_v7 = vpop.eup %6509  ;;  %v1784_v3 = vmul.f32 %v6508_v15, %v9528_v36  ;;  %6525 = vrcp.f32 %v2127_v14  ;;  %v9655_v5 = vadd.f32 %v2407_v37, %v2373_v43  ;;  %v1094_v53 = vmul.f32 %v11657_v58, %v9577_v48  ;;  %v9667_v43 = vld [vmem:[%s7757_s30 + $0x210] sm:$0xff] }
 0x247   : > { %v6512_v9 = vpop.eup %6511  ;;  %v1785_v51 = vmul.f32 %v6510_v7, %v9534_v30  ;;  %v1060_v4 = vadd.f32 %v1028_v49, %v994_v24  ;;  %v1061_v50 = vadd.f32 %v1029_v6, %v995_v11  ;;  %v5426_v36 = vmul.f32 -1.442695, %v9653_v35  ;;  %v9670_v24 = vld [vmem:[%s7757_s30 + $0x218] sm:$0xff]  ;;  %v9677_v7 = vld [vmem:[%s7757_s30 + $0x220] sm:$0xff] }
 0x248   : > { %v6514_v56 = vpop.eup %6513  ;;  %v816_v12 = vadd.f32 1.0, %v6512_v9  ;;  %v5427_v28 = vmul.f32 -1.442695, %v9655_v5  ;;  %v1095_v8 = vmul.f32 %v11657_v58, %v9586_v59  ;;  %v4057_v6 = vsel %vm4055_vm1, %v4040_v39, %v1805_v10 }
 0x249   : > { %v6516_v30 = vpop.eup %6515  ;;  %v1824_v37 = vadd.f32 %v1785_v51, %v1784_v3  ;;  %v817_v14 = vadd.f32 1.0, %v6514_v56  ;;  %v9664_v20 = vadd.f32 %v1094_v53, %v1060_v4  ;;  %v4056_v51 = vsel %vm4055_vm1, %v4039_v61, %v1802_v46  ;;  %v9683_v4 = vld [vmem:[%s7757_s30 + $0x228] sm:$0xff]  ;;  %v9686_v53 = vld [vmem:[%s7757_s30 + $0x230] sm:$0xff]  ;;  %v9690_v56 = vld [vmem:[%s7757_s30 + $0x238] sm:$0xff] }
 0x24a   : > { %v6518_v15 = vpop.eup %6517  ;;  %v2224_v11 = vmul.f32 %v6516_v30, %v9546_v2  ;;  %6527 = vrcp.f32 %v816_v12  ;;  %v9673_v49 = vadd.f32 %v1095_v8, %v1061_v50  ;;  %v558_v39 = vmul.f32 %v11658_v33, %v9667_v43 }
 0x24b   : > { %1825 = vadd.xlane.f32.xlu0 %v1824_v37  ;;  %v2225_v3 = vmul.f32 %v6518_v15, %v9550_v18  ;;  %6529 = vrcp.f32 %v817_v14  ;;  %v5323_v9 = vmul.f32 -1.442695, %v9664_v20  ;;  %v559_v18 = vmul.f32 %v11658_v33, %v9670_v24  ;;  %v11666_v33 = vld [vmem:[#allocation46_spill] sm:$0xff] }
 0x24c   : > { %v6520_v2 = vpop.eup %6519  ;;  %6531 = vpow2.f32 %v5426_v36  ;;  %v5324_v50 = vmul.f32 -1.442695, %v9673_v49  ;;  %v592_v61 = vmul.f32 %v11659_v29, %v9677_v7  ;;  %v593_v36 = vmul.f32 %v11659_v29, %v9683_v4 }
 0x24d   : > { %v6522_v10 = vpop.eup %6521  ;;  %v2265_v12 = vadd.f32 %v2225_v3, %v2224_v11  ;;  %v2564_v8 = vadd.f32 1.0, %v6520_v2  ;;  %6533 = vpow2.f32 %v5427_v28  ;;  %v658_v30 = vmul.f32 %v11660_v31, %v9686_v53 }
 0x24e   : > { %v2565_v46 = vadd.f32 1.0, %v6522_v10  ;;  %6535 = vpow2.f32 %v5323_v9  ;;  %v624_v14 = vadd.f32 %v592_v61, %v558_v39  ;;  %v659_v15 = vmul.f32 %v11660_v31, %v9690_v56  ;;  %v2240_v61 = vpop.xlane.xlu0 %2239 }
 0x24f   : > { %v6524_v37 = vpop.eup %6523  ;;  %2266 = vadd.xlane.f32.xlu1 %v2265_v12  ;;  %6537 = vrcp.f32 %v2564_v8  ;;  %v2742_v28 = vmul.f32 %v8174_v38, %v9363_v19  ;;  %v625_v9 = vadd.f32 %v593_v36, %v559_v18  ;;  %v2743_v2 = vmul.f32 %v8174_v38, %v9372_v34  ;;  %v2243_v8 = vpop.xlane.xlu1 %2242  ;;  %v11665_v18 = vld [vmem:[#allocation40_spill] sm:$0xff] }
 0x250   : > { %v6526_v11 = vpop.eup %6525  ;;  %v2222_v3 = vmul.f32 %v6524_v37, %v9579_v41  ;;  %6539 = vrcp.f32 %v2565_v46  ;;  %v9710_v12 = vadd.f32 %v658_v30, %v624_v14  ;;  %v2776_v39 = vmul.f32 %v8177_v22, %v9377_v60 }
 0x251   : > { %v2223_v10 = vmul.f32 %v6526_v11, %v9583_v45  ;;  %6541 = vpow2.f32 %v5324_v50  ;;  %v9714_v31 = vadd.f32 %v659_v15, %v625_v9  ;;  %v2777_v41 = vmul.f32 %v8177_v22, %v9384_v23 }
 0x252   : > { %v2842_v46 = vmul.f32 %v11665_v18, %v9387_v21  ;;  %v2843_v36 = vmul.f32 %v11665_v18, %v9390_v17  ;;  %v5290_v50 = vmul.f32 -1.442695, %v9710_v12  ;;  %v2808_v30 = vadd.f32 %v2776_v39, %v2742_v28  ;;  %v11668_v28 = vld [vmem:[#allocation28_spill] sm:$0xff] }
 0x253   : > { %v2262_v45 = vadd.f32 %v2223_v10, %v2222_v3  ;;  %v5291_v14 = vmul.f32 -1.442695, %v9714_v31  ;;  %v2809_v11 = vadd.f32 %v2777_v41, %v2743_v2  ;;  %v9725_v15 = vsel %vm4072_vm2, %v4057_v6, %v2243_v8 }
 0x254   : > { %v6528_v37 = vpop.eup %6527  ;;  %v9728_v9 = vsel %vm4072_vm2, %v4056_v51, %v2240_v61  ;;  %6543 = vpow2.f32 %v5290_v50  ;;  %v9731_v3 = vadd.f32 %v2842_v46, %v2808_v30  ;;  %v1432_v10 = vmul.f32 %v11668_v28, %v9561_v0 }
 0x255   : > { %v6530_v29 = vpop.eup %6529  ;;  %2263 = vadd.xlane.f32.xlu0 %v2262_v45  ;;  %v912_v44 = vmul.f32 %v6528_v37, %v11666_v33  ;;  %6545 = vpow2.f32 %v5291_v14  ;;  %v9736_v2 = vadd.f32 %v2843_v36, %v2809_v11  ;;  %v1433_v6 = vmul.f32 %v11668_v28, %v9566_v57  ;;  %v11670_v33 = vld [vmem:[#allocation29_spill] sm:$0xff] }
 0x256   : > { %11667 = vst [vmem:[#allocation47_spill] sm:$0xff] %v9731_v3  ;;  %v6532_v39 = vpop.eup %6531  ;;  %v913_v42 = vmul.f32 %v6530_v29, %v9608_v13  ;;  %v5459_v61 = vmul.f32 -1.442695, %v9731_v3  ;;  %v1466_v41 = vmul.f32 %v11670_v33, %v9569_v54  ;;  %v1467_v46 = vmul.f32 %v11670_v33, %v9572_v32  ;;  %v11671_v13 = vld [vmem:[#allocation30_spill] sm:$0xff] }
 0x257   : > { %11669 = vst [vmem:[#allocation48_spill] sm:$0xff] %v9736_v2  ;;  %v6534_v51 = vpop.eup %6533  ;;  %v2566_v8 = vadd.f32 1.0, %v6532_v39  ;;  %v5460_v29 = vmul.f32 -1.442695, %v9736_v2  ;;  %v1532_v36 = vmul.f32 %v11671_v13, %v9577_v48  ;;  %v1533_v33 = vmul.f32 %v11671_v13, %v9586_v59 }
 0x258   : > { %v6536_v45 = vpop.eup %6535  ;;  %v954_v50 = vadd.f32 %v913_v42, %v912_v44  ;;  %v2567_v30 = vadd.f32 1.0, %v6534_v51  ;;  %v1498_v11 = vadd.f32 %v1466_v41, %v1432_v10  ;;  %v1499_v39 = vadd.f32 %v1467_v46, %v1433_v6 }
 0x259   : > { %v6538_v37 = vpop.eup %6537  ;;  %6547 = vrcp.f32 %v2566_v8  ;;  %v1254_v14 = vadd.f32 1.0, %v6536_v45  ;;  %v996_v42 = vmul.f32 %v11632_v62, %v9667_v43  ;;  %v997_v10 = vmul.f32 %v11632_v62, %v9670_v24  ;;  %v4157_v45 = vld [vmem:[%s11444_s2] sm:$0xff] }
 0x25a   : > { %v6540_v25 = vpop.eup %6539  ;;  %955 = vadd.xlane.f32.xlu1 %v954_v50  ;;  %v2660_v3 = vmul.f32 %v6538_v37, %v9622_v27  ;;  %6549 = vrcp.f32 %v2567_v30  ;;  %v9754_v2 = vadd.f32 %v1532_v36, %v1498_v11  ;;  %v9758_v8 = vadd.f32 %v1533_v33, %v1499_v39  ;;  %5696 = vmatprep.subr.mxu0 %v4157_v45 }
 0x25b   : > { %v6542_v44 = vpop.eup %6541  ;;  %v2661_v51 = vmul.f32 %v6540_v25, %v9625_v52  ;;  %6551 = vrcp.f32 %v1254_v14  ;;  %v1030_v27 = vmul.f32 %v11656_v63, %v9677_v7  ;;  %v1031_v25 = vmul.f32 %v11656_v63, %v9683_v4  ;;  %v2678_v52 = vpop.xlane.xlu0 %2677  ;;  %5697 = vmatpush3.msra.mxu0 %v4157_v45  ;;  %v11674_v45 = vld [vmem:[#allocation43_spill] sm:$0xff]  ;;  %v11684_v63 = vld [vmem:[#allocation34_spill] sm:$0xff] }
 0x25c   : > { %v1255_v6 = vadd.f32 1.0, %v6542_v44  ;;  %6553 = vpow2.f32 %v5459_v61  ;;  %v5358_v46 = vmul.f32 -1.442695, %v9754_v2  ;;  %v5359_v61 = vmul.f32 -1.442695, %v9758_v8  ;;  %v932_v44 = vpop.xlane.xlu1 %931 }
 0x25d   : > { %v2700_v41 = vadd.f32 %v2661_v51, %v2660_v3  ;;  %6555 = vpow2.f32 %v5460_v29  ;;  %v1062_v33 = vadd.f32 %v1030_v27, %v996_v42  ;;  %v1096_v50 = vmul.f32 %v11657_v58, %v9686_v53  ;;  %v11672_v51 = vld [vmem:[#allocation41_spill] sm:$0xff] }
 0x25e   : > { %6557 = vrcp.f32 %v1255_v6  ;;  %v6544_v3 = vpop.eup %6543  ;;  %v1063_v30 = vadd.f32 %v1031_v25, %v997_v10  ;;  %v1097_v29 = vmul.f32 %v11657_v58, %v9690_v56  ;;  %v9777_v11 = vsel %vm4089_vm3, %v9728_v9, %v2678_v52 }
 0x25f   : > { %2701 = vadd.xlane.f32.xlu0 %v2700_v41  ;;  %6559 = vpow2.f32 %v5358_v46  ;;  %v6546_v36 = vpop.eup %6545  ;;  %v818_v37 = vadd.f32 1.0, %v6544_v3  ;;  %v9773_v14 = vadd.f32 %v1096_v50, %v1062_v33  ;;  %v3180_v10 = vmul.f32 %v11672_v51, %v9363_v19  ;;  %v11673_v41 = vld [vmem:[#allocation42_spill] sm:$0xff] }
 0x260   : > { %6561 = vpow2.f32 %v5359_v61  ;;  %v819_v39 = vadd.f32 1.0, %v6546_v36  ;;  %v9779_v42 = vadd.f32 %v1097_v29, %v1063_v30  ;;  %v3181_v6 = vmul.f32 %v11672_v51, %v9372_v34 }
 0x261   : > { %6563 = vrcp.f32 %v818_v37  ;;  %v5325_v27 = vmul.f32 -1.442695, %v9773_v14  ;;  %v3214_v46 = vmul.f32 %v11673_v41, %v9377_v60  ;;  %v3215_v9 = vmul.f32 %v11673_v41, %v9384_v23 }
 0x262   : > { %6565 = vrcp.f32 %v819_v39  ;;  %v5326_v52 = vmul.f32 -1.442695, %v9779_v42  ;;  %v3280_v61 = vmul.f32 %v11674_v45, %v9387_v21  ;;  %v3281_v19 = vmul.f32 %v11674_v45, %v9390_v17 }
 0x263   : > { %v6548_v25 = vpop.eup %6547  ;;  %6567 = vpow2.f32 %v5325_v27  ;;  %v3246_v50 = vadd.f32 %v3214_v46, %v3180_v10  ;;  %v3247_v3 = vadd.f32 %v3215_v9, %v3181_v6  ;;  %v2744_v23 = vmul.f32 %v8174_v38, %v9417_v1 }
 0x264   : > { %v6550_v34 = vpop.eup %6549  ;;  %v2662_v33 = vmul.f32 %v6548_v25, %v9653_v35  ;;  %6569 = vpow2.f32 %v5326_v52  ;;  %v2745_v29 = vmul.f32 %v8174_v38, %v9420_v40  ;;  %v2778_v35 = vmul.f32 %v8177_v22, %v9430_v47  ;;  %v2681_v40 = vpop.xlane.xlu1 %2680 }
 0x265   : > { %v6552_v60 = vpop.eup %6551  ;;  %v2663_v30 = vmul.f32 %v6550_v34, %v9655_v5  ;;  %v9802_v17 = vadd.f32 %v3280_v61, %v3246_v50  ;;  %v9804_v37 = vadd.f32 %v3281_v19, %v3247_v3  ;;  %v2779_v6 = vmul.f32 %v8177_v22, %v9436_v55  ;;  %v1370_v19 = vpop.xlane.xlu0 %1369 }
 0x266   : > { %v6554_v21 = vpop.eup %6553  ;;  %v1350_v36 = vmul.f32 %v6552_v60, %v9664_v20  ;;  %v2844_v1 = vmul.f32 %v11665_v18, %v9447_v26  ;;  %v2810_v25 = vadd.f32 %v2778_v35, %v2744_v23  ;;  %v2845_v55 = vmul.f32 %v11665_v18, %v9454_v16 }
 0x267   : > { %v6556_v39 = vpop.eup %6555  ;;  %v2703_v10 = vadd.f32 %v2663_v30, %v2662_v33  ;;  %v3002_v5 = vadd.f32 1.0, %v6554_v21  ;;  %v5494_v20 = vmul.f32 -1.442695, %v9802_v17  ;;  %v5495_v9 = vmul.f32 -1.442695, %v9804_v37 }
 0x268   : > { %v6558_v27 = vpop.eup %6557  ;;  %v3003_v46 = vadd.f32 1.0, %v6556_v39  ;;  %v2811_v61 = vadd.f32 %v2779_v6, %v2745_v29  ;;  %v9817_v33 = vadd.f32 %v2844_v1, %v2810_v25  ;;  %v9821_v50 = vsel %vm4089_vm3, %v9725_v15, %v2681_v40  ;;  %v11675_v29 = vld [vmem:[#allocation31_spill] sm:$0xff] }
 0x269   : > { %v6560_v52 = vpop.eup %6559  ;;  %2704 = vadd.xlane.f32.xlu1 %v2703_v10  ;;  %v1351_v47 = vmul.f32 %v6558_v27, %v9673_v49  ;;  %6571 = vrcp.f32 %v3002_v5  ;;  %v9827_v16 = vsel %vm4038_vm0, %v932_v44, %v1370_v19  ;;  %v1870_v21 = vmul.f32 %v11675_v29, %v9561_v0  ;;  %v11676_v44 = vld [vmem:[#allocation32_spill] sm:$0xff]  ;;  %v11678_v19 = vld [vmem:[#allocation29_spill] sm:$0xff] }
 0x26a   : > { %v6562_v34 = vpop.eup %6561  ;;  %6573 = vrcp.f32 %v3003_v46  ;;  %v1692_v26 = vadd.f32 1.0, %v6560_v52  ;;  %v9823_v30 = vadd.f32 %v2845_v55, %v2811_v61  ;;  %v5461_v23 = vmul.f32 -1.442695, %v9817_v33 }
 0x26b   : > { %v1392_v3 = vadd.f32 %v1351_v47, %v1350_v36  ;;  %v1693_v60 = vadd.f32 1.0, %v6562_v34  ;;  %6575 = vpow2.f32 %v5494_v20  ;;  %v6564_v49 = vpop.eup %6563  ;;  %v1871_v39 = vmul.f32 %v11675_v29, %v9566_v57 }
 0x26c   : > { %6577 = vrcp.f32 %v1692_v26  ;;  %v6566_v35 = vpop.eup %6565  ;;  %v914_v15 = vmul.f32 %v6564_v49, %v9710_v12  ;;  %v5462_v36 = vmul.f32 -1.442695, %v9823_v30  ;;  %v1904_v6 = vmul.f32 %v11676_v44, %v9569_v54  ;;  %v11677_v12 = vld [vmem:[#allocation33_spill] sm:$0xff] }
 0x26d   : > { %1393 = vadd.xlane.f32.xlu0 %v1392_v3  ;;  %6579 = vrcp.f32 %v1693_v60  ;;  %v6568_v10 = vpop.eup %6567  ;;  %v915_v5 = vmul.f32 %v6566_v35, %v9714_v31  ;;  %v1905_v1 = vmul.f32 %v11676_v44, %v9572_v32  ;;  %v1970_v46 = vmul.f32 %v11677_v12, %v9577_v48  ;;  %v3116_v3 = vpop.xlane.xlu0 %3115 }
 0x26e   : > { %6581 = vpow2.f32 %v5495_v9  ;;  %v6570_v40 = vpop.eup %6569  ;;  %v1256_v27 = vadd.f32 1.0, %v6568_v10  ;;  %v1971_v20 = vmul.f32 %v11677_v12, %v9586_v59  ;;  %v1936_v31 = vadd.f32 %v1904_v6, %v1870_v21 }
 0x26f   : > { %6583 = vpow2.f32 %v5461_v23  ;;  %v957_v25 = vadd.f32 %v915_v5, %v914_v15  ;;  %v1257_v52 = vadd.f32 1.0, %v6570_v40  ;;  %v1937_v9 = vadd.f32 %v1905_v1, %v1871_v39  ;;  %v11679_v15 = vld [vmem:[#allocation47_spill] sm:$0xff]  ;;  %v11680_v1 = vld [vmem:[#allocation48_spill] sm:$0xff] }
 0x270   : > { %6585 = vpow2.f32 %v5462_v36  ;;  %v1434_v47 = vmul.f32 %v11668_v28, %v9667_v43  ;;  %v1435_v61 = vmul.f32 %v11668_v28, %v9670_v24  ;;  %v9848_v55 = vadd.f32 %v1970_v46, %v1936_v31 }
 0x271   : > { %6587 = vrcp.f32 %v1256_v27  ;;  %958 = vadd.xlane.f32.xlu1 %v957_v25  ;;  %v1468_v34 = vmul.f32 %v11678_v19, %v9677_v7  ;;  %v1469_v26 = vmul.f32 %v11678_v19, %v9683_v4  ;;  %v9854_v49 = vadd.f32 %v1971_v20, %v1937_v9  ;;  %v7195_v20 = vld [vmem:[%s7757_s30 + $0x180] sm:$0xff]  ;;  %v11681_v25 = vld [vmem:[#allocation39_spill] sm:$0xff] }
 0x272   : > { %6589 = vrcp.f32 %v1257_v52  ;;  %v1534_v23 = vmul.f32 %v11671_v13, %v9686_v53  ;;  %v1535_v21 = vmul.f32 %v11671_v13, %v9690_v56  ;;  %v5393_v39 = vmul.f32 -1.442695, %v9848_v55 }
 0x273   : > { %v6572_v60 = vpop.eup %6571  ;;  %v1500_v10 = vadd.f32 %v1468_v34, %v1434_v47  ;;  %v1501_v5 = vadd.f32 %v1469_v26, %v1435_v61  ;;  %v5394_v27 = vmul.f32 -1.442695, %v9854_v49  ;;  %v9866_v46 = vsel %vm4106_vm4, %v9777_v11, %v3116_v3  ;;  %v935_v11 = vpop.xlane.xlu1 %934  ;;  %v7196_v3 = vld [vmem:[%s7757_s30 + $0x188] sm:$0xff] }
 0x274   : > { %v6574_v35 = vpop.eup %6573  ;;  %v3098_v36 = vmul.f32 %v6572_v60, %v11679_v15  ;;  %v3618_v52 = vmul.f32 %v7195_v20, %v11681_v25  ;;  %6591 = vpow2.f32 %v5393_v39  ;;  %v11683_v20 = vld [vmem:[#allocation45_spill] sm:$0xff]  ;;  %v2308_v62 = vmul.f32 %v11684_v63, %v9561_v0 }
 0x275   : > { %v6576_v6 = vpop.eup %6575  ;;  %v3099_v40 = vmul.f32 %v6574_v35, %v11680_v1  ;;  %v9870_v60 = vadd.f32 %v1534_v23, %v1500_v10  ;;  %v9872_v47 = vadd.f32 %v1535_v21, %v1501_v5  ;;  %6593 = vpow2.f32 %v5394_v27  ;;  %v7197_v10 = vld [vmem:[%s7757_s30 + $0x190] sm:$0xff]  ;;  %v7198_v1 = vld [vmem:[%s7757_s30 + $0x198] sm:$0xff]  ;;  %v7199_v27 = vld [vmem:[%s7757_s30 + $0x1a0] sm:$0xff] }
 0x276   : > { %v6578_v31 = vpop.eup %6577  ;;  %v3440_v9 = vadd.f32 1.0, %v6576_v6  ;;  %v3619_v35 = vmul.f32 %v7196_v3, %v11681_v25  ;;  %v7200_v3 = vld [vmem:[%s7757_s30 + $0x1a8] sm:$0xff] }
 0x277   : > { %v6580_v61 = vpop.eup %6579  ;;  %v3138_v34 = vadd.f32 %v3099_v40, %v3098_v36  ;;  %v1788_v26 = vmul.f32 %v6578_v31, %v9754_v2  ;;  %v5360_v23 = vmul.f32 -1.442695, %v9870_v60  ;;  %v5361_v21 = vmul.f32 -1.442695, %v9872_v47  ;;  %v11682_v2 = vld [vmem:[#allocation44_spill] sm:$0xff] }
 0x278   : > { %v6582_v15 = vpop.eup %6581  ;;  %v1789_v6 = vmul.f32 %v6580_v61, %v9758_v8  ;;  %6595 = vrcp.f32 %v3440_v9  ;;  %v3652_v5 = vmul.f32 %v7197_v10, %v11682_v2  ;;  %v3653_v40 = vmul.f32 %v7198_v1, %v11682_v2 }
 0x279   : > { %v6584_v39 = vpop.eup %6583  ;;  %3139 = vadd.xlane.f32.xlu0 %v3138_v34  ;;  %v3441_v36 = vadd.f32 1.0, %v6582_v15  ;;  %v3718_v31 = vmul.f32 %v7199_v27, %v11683_v20  ;;  %6597 = vpow2.f32 %v5360_v23  ;;  %v3719_v13 = vmul.f32 %v7200_v3, %v11683_v20  ;;  %v9895_v23 = vld [vmem:[%s7757_s30 + $0x1b8] sm:$0xff] }
 0x27a   : > { %v6586_v8 = vpop.eup %6585  ;;  %v1830_v9 = vadd.f32 %v1789_v6, %v1788_v26  ;;  %v3004_v61 = vadd.f32 1.0, %v6584_v39  ;;  %v3684_v19 = vadd.f32 %v3652_v5, %v3618_v52  ;;  %v3685_v10 = vadd.f32 %v3653_v40, %v3619_v35  ;;  %v9890_v26 = vld [vmem:[%s7757_s30 + $0x1b0] sm:$0xff]  ;;  %v1373_v5 = vpop.xlane.xlu0 %1372  ;;  %v9905_v40 = vld [vmem:[%s7757_s30 + $0x1c0] sm:$0xff] }
 0x27b   : > { %v6588_v34 = vpop.eup %6587  ;;  %6599 = vrcp.f32 %v3441_v36  ;;  %v3005_v15 = vadd.f32 1.0, %v6586_v8  ;;  %v3182_v6 = vmul.f32 %v9890_v26, %v11672_v51  ;;  %v3183_v39 = vmul.f32 %v9895_v23, %v11672_v51  ;;  %v9910_v8 = vld [vmem:[%s7757_s30 + $0x1c8] sm:$0xff] }
 0x27c   : > { %v6590_v28 = vpop.eup %6589  ;;  %1831 = vadd.xlane.f32.xlu1 %v1830_v9  ;;  %v1352_v1 = vmul.f32 %v6588_v34, %v9773_v14  ;;  %6601 = vrcp.f32 %v3004_v61  ;;  %v9900_v35 = vadd.f32 %v3718_v31, %v3684_v19  ;;  %v9902_v36 = vadd.f32 %v3719_v13, %v3685_v10  ;;  %v1808_v14 = vpop.xlane.xlu1 %1807  ;;  %v9922_v31 = vld [vmem:[%s7757_s30 + $0x1d8] sm:$0xff] }
 0x27d   : > { %v1353_v52 = vmul.f32 %v6590_v28, %v9779_v42  ;;  %6603 = vrcp.f32 %v3005_v15  ;;  %v3216_v27 = vmul.f32 %v9905_v40, %v11673_v41  ;;  %v3217_v9 = vmul.f32 %v9910_v8, %v11673_v41  ;;  %v9915_v28 = vld [vmem:[%s7757_s30 + $0x1d0] sm:$0xff] }
 0x27e   : > { %6605 = vpow2.f32 %v5361_v21  ;;  %v3282_v42 = vmul.f32 %v9915_v28, %v11674_v45  ;;  %v5529_v19 = vmul.f32 -1.442695, %v9900_v35  ;;  %v5530_v21 = vmul.f32 -1.442695, %v9902_v36  ;;  %v6592_v3 = vpop.eup %6591 }
 0x27f   : > { %v1395_v13 = vadd.f32 %v1353_v52, %v1352_v1  ;;  %v3283_v61 = vmul.f32 %v9922_v31, %v11674_v45  ;;  %v3248_v34 = vadd.f32 %v3216_v27, %v3182_v6  ;;  %v3249_v15 = vadd.f32 %v3217_v9, %v3183_v39  ;;  %v6594_v1 = vpop.eup %6593 }
 0x280   : > { %v9928_v10 = vsel %vm4055_vm1, %v9827_v16, %v1808_v14  ;;  %v9931_v58 = vsel %vm4038_vm0, %v935_v11, %v1373_v5  ;;  %v2130_v52 = vadd.f32 1.0, %v6592_v3  ;;  %6607 = vpow2.f32 %v5529_v19  ;;  %v11685_v14 = vld [vmem:[#allocation35_spill] sm:$0xff] }
 0x281   : > { %1396 = vadd.xlane.f32.xlu0 %v1395_v13  ;;  %v2309_v45 = vmul.f32 %v11684_v63, %v9566_v57  ;;  %v2131_v6 = vadd.f32 1.0, %v6594_v1  ;;  %6609 = vpow2.f32 %v5530_v21  ;;  %v9937_v39 = vadd.f32 %v3282_v42, %v3248_v34  ;;  %v11686_v42 = vld [vmem:[#allocation36_spill] sm:$0xff] }
 0x282   : > { %v6596_v41 = vpop.eup %6595  ;;  %v9939_v16 = vadd.f32 %v3283_v61, %v3249_v15  ;;  %6611 = vrcp.f32 %v2130_v52  ;;  %v2342_v5 = vmul.f32 %v11685_v14, %v9569_v54  ;;  %v2343_v27 = vmul.f32 %v11685_v14, %v9572_v32 }
 0x283   : > { %v3536_v11 = vmul.f32 %v6596_v41, %v9802_v17  ;;  %v6598_v0 = vpop.eup %6597  ;;  %6613 = vrcp.f32 %v2131_v6  ;;  %v5496_v57 = vmul.f32 -1.442695, %v9937_v39  ;;  %v2408_v13 = vmul.f32 %v11686_v42, %v9577_v48  ;;  %v3119_v6 = vpop.xlane.xlu0 %3118 }
 0x284   : > { %v5497_v9 = vmul.f32 -1.442695, %v9939_v16  ;;  %v1694_v21 = vadd.f32 1.0, %v6598_v0  ;;  %v2374_v61 = vadd.f32 %v2342_v5, %v2308_v62  ;;  %v2375_v41 = vadd.f32 %v2343_v27, %v2309_v45 }
 0x285   : > { %v6600_v19 = vpop.eup %6599  ;;  %v2409_v17 = vmul.f32 %v11686_v42, %v9586_v59  ;;  %6615 = vpow2.f32 %v5496_v57  ;;  %v1872_v32 = vmul.f32 %v11675_v29, %v9667_v43  ;;  %v1873_v34 = vmul.f32 %v11675_v29, %v9670_v24  ;;  %v3554_v57 = vpop.xlane.xlu1 %3553 }
 0x286   : > { %v6602_v54 = vpop.eup %6601  ;;  %v3537_v3 = vmul.f32 %v6600_v19, %v9804_v37  ;;  %6617 = vrcp.f32 %v1694_v21  ;;  %v9958_v1 = vadd.f32 %v2408_v13, %v2374_v61  ;;  %v1906_v37 = vmul.f32 %v11676_v44, %v9677_v7 }
 0x287   : > { %v6604_v15 = vpop.eup %6603  ;;  %v3100_v48 = vmul.f32 %v6602_v54, %v9817_v33  ;;  %v9960_v62 = vadd.f32 %v2409_v17, %v2375_v41  ;;  %6619 = vpow2.f32 %v5497_v9  ;;  %v1907_v33 = vmul.f32 %v11676_v44, %v9683_v4 }
 0x288   : > { %v6606_v45 = vpop.eup %6605  ;;  %v3576_v59 = vadd.f32 %v3537_v3, %v3536_v11  ;;  %v3101_v52 = vmul.f32 %v6604_v15, %v9823_v30  ;;  %v5428_v27 = vmul.f32 -1.442695, %v9958_v1  ;;  %v1938_v19 = vadd.f32 %v1906_v37, %v1872_v32 }
 0x289   : > { %v1695_v5 = vadd.f32 1.0, %v6606_v45  ;;  %v5429_v0 = vmul.f32 -1.442695, %v9960_v62  ;;  %v1972_v30 = vmul.f32 %v11677_v12, %v9686_v53  ;;  %v1973_v11 = vmul.f32 %v11677_v12, %v9690_v56 }
 0x28a   : > { %3577 = vadd.xlane.f32.xlu1 %v3576_v59  ;;  %v3141_v13 = vadd.f32 %v3101_v52, %v3100_v48  ;;  %v6608_v9 = vpop.eup %6607  ;;  %v1939_v21 = vadd.f32 %v1907_v33, %v1873_v34  ;;  %v9975_v61 = vsel %vm4106_vm4, %v9821_v50, %v3119_v6  ;;  %v9981_v3 = vsel %vm4123_vm5, %v9866_v46, %v3554_v57 }
 0x28b   : > { %6621 = vrcp.f32 %v1695_v5  ;;  %v6610_v41 = vpop.eup %6609  ;;  %v3878_v17 = vadd.f32 1.0, %v6608_v9  ;;  %v9977_v54 = vadd.f32 %v1972_v30, %v1938_v19  ;;  %v2310_v34 = vmul.f32 %v11684_v63, %v9667_v43 }
 0x28c   : > { %3142 = vadd.xlane.f32.xlu0 %v3141_v13  ;;  %6623 = vpow2.f32 %v5428_v27  ;;  %v6612_v32 = vpop.eup %6611  ;;  %v3879_v15 = vadd.f32 1.0, %v6610_v41  ;;  %v9983_v48 = vadd.f32 %v1973_v11, %v1939_v21  ;;  %v2311_v52 = vmul.f32 %v11684_v63, %v9670_v24  ;;  %v2246_v41 = vpop.xlane.xlu1 %2245 }
 0x28d   : > { %6625 = vpow2.f32 %v5429_v0  ;;  %v6614_v50 = vpop.eup %6613  ;;  %v2226_v45 = vmul.f32 %v6612_v32, %v9848_v55  ;;  %v5395_v59 = vmul.f32 -1.442695, %v9977_v54  ;;  %v2344_v6 = vmul.f32 %v11685_v14, %v9677_v7 }
 0x28e   : > { %6627 = vrcp.f32 %v3878_v17  ;;  %v2227_v46 = vmul.f32 %v6614_v50, %v9854_v49  ;;  %v5396_v37 = vmul.f32 -1.442695, %v9983_v48  ;;  %v2345_v27 = vmul.f32 %v11685_v14, %v9683_v4 }
 0x28f   : > { %6629 = vrcp.f32 %v3879_v15  ;;  %v6616_v5 = vpop.eup %6615  ;;  %v2410_v55 = vmul.f32 %v11686_v42, %v9686_v53  ;;  %v2411_v0 = vmul.f32 %v11686_v42, %v9690_v56  ;;  %v2376_v13 = vadd.f32 %v2344_v6, %v2310_v34  ;;  %v1811_v34 = vpop.xlane.xlu0 %1810 }
 0x290   : > { %6631 = vpow2.f32 %v5395_v59  ;;  %v6618_v33 = vpop.eup %6617  ;;  %v2268_v57 = vadd.f32 %v2227_v46, %v2226_v45  ;;  %v3442_v49 = vadd.f32 1.0, %v6616_v5  ;;  %v2377_v11 = vadd.f32 %v2345_v27, %v2311_v52 }
 0x291   : > { %6633 = vpow2.f32 %v5396_v37  ;;  %v6620_v19 = vpop.eup %6619  ;;  %v1790_v30 = vmul.f32 %v6618_v33, %v9870_v60  ;;  %v3620_v9 = vmul.f32 %v9890_v26, %v11681_v25  ;;  %v3621_v21 = vmul.f32 %v9895_v23, %v11681_v25 }
 0x292   : > { %2269 = vadd.xlane.f32.xlu1 %v2268_v57  ;;  %v3443_v17 = vadd.f32 1.0, %v6620_v19  ;;  %6635 = vrcp.f32 %v3442_v49  ;;  %v10006_v32 = vadd.f32 %v2410_v55, %v2376_v13  ;;  %v3654_v15 = vmul.f32 %v9905_v40, %v11682_v2 }
 0x293   : > { %v10010_v50 = vadd.f32 %v2411_v0, %v2377_v11  ;;  %v3655_v60 = vmul.f32 %v9910_v8, %v11682_v2  ;;  %v3720_v26 = vmul.f32 %v9915_v28, %v11683_v20  ;;  %v3721_v23 = vmul.f32 %v9922_v31, %v11683_v20 }
 0x294   : > { %6637 = vrcp.f32 %v3443_v17  ;;  %v5430_v59 = vmul.f32 -1.442695, %v10006_v32  ;;  %v3686_v52 = vadd.f32 %v3654_v15, %v3620_v9  ;;  %v10021_v40 = vsel %vm4072_vm2, %v9928_v10, %v2246_v41 }
 0x295   : > { %v6622_v45 = vpop.eup %6621  ;;  %v5431_v8 = vmul.f32 -1.442695, %v10010_v50  ;;  %v3687_v6 = vadd.f32 %v3655_v60, %v3621_v21  ;;  %v10027_v28 = vsel %vm4055_vm1, %v9931_v58, %v1811_v34  ;;  %v2748_v55 = vmul.f32 %v8174_v38, %v9667_v43 }
 0x296   : > { %v6624_v46 = vpop.eup %6623  ;;  %v1791_v37 = vmul.f32 %v6622_v45, %v9872_v47  ;;  %6639 = vpow2.f32 %v5430_v59  ;;  %v10029_v27 = vadd.f32 %v3720_v26, %v3686_v52  ;;  %v2749_v13 = vmul.f32 %v8174_v38, %v9670_v24  ;;  %v10050_v45 = vld [vmem:[%s7757_s30 + $0x1e0] sm:$0xff]  ;;  %v3557_v52 = vpop.xlane.xlu0 %3556 }
 0x297   : > { %v6626_v31 = vpop.eup %6625  ;;  %v2568_v5 = vadd.f32 1.0, %v6624_v46  ;;  %6641 = vpow2.f32 %v5431_v8  ;;  %v10033_v47 = vadd.f32 %v3721_v23, %v3687_v6  ;;  %v2782_v9 = vmul.f32 %v8177_v22, %v9677_v7  ;;  %v10058_v8 = vld [vmem:[%s7757_s30 + $0x1e8] sm:$0xff] }
 0x298   : > { %v6628_v10 = vpop.eup %6627  ;;  %v1833_v0 = vadd.f32 %v1791_v37, %v1790_v30  ;;  %v2569_v33 = vadd.f32 1.0, %v6626_v31  ;;  %v5531_v58 = vmul.f32 -1.442695, %v10029_v27  ;;  %v2848_v17 = vmul.f32 %v11665_v18, %v9686_v53 }
 0x299   : > { %v6630_v57 = vpop.eup %6629  ;;  %v3974_v49 = vmul.f32 %v6628_v10, %v9900_v35  ;;  %6643 = vrcp.f32 %v2568_v5  ;;  %v5532_v30 = vmul.f32 -1.442695, %v10033_v47  ;;  %v2783_v35 = vmul.f32 %v8177_v22, %v9683_v4 }
 0x29a   : > { %v6632_v19 = vpop.eup %6631  ;;  %1834 = vadd.xlane.f32.xlu0 %v1833_v0  ;;  %v3975_v11 = vmul.f32 %v6630_v57, %v9902_v36  ;;  %6645 = vrcp.f32 %v2569_v33  ;;  %v2814_v36 = vadd.f32 %v2782_v9, %v2748_v55  ;;  %v2849_v23 = vmul.f32 %v11665_v18, %v9690_v56  ;;  %v10065_v55 = vld [vmem:[%s7757_s30 + $0x1f0] sm:$0xff]  ;;  %v10070_v0 = vld [vmem:[%s7757_s30 + $0x1f8] sm:$0xff]  ;;  %v10075_v33 = vld [vmem:[%s7757_s30 + $0x200] sm:$0xff] }
 0x29b   : > { %v6634_v21 = vpop.eup %6633  ;;  %v2132_v41 = vadd.f32 1.0, %v6632_v19  ;;  %6647 = vpow2.f32 %v5531_v58  ;;  %v2815_v26 = vadd.f32 %v2783_v35, %v2749_v13  ;;  %v2746_v59 = vmul.f32 %v10050_v45, %v8174_v38  ;;  %v10082_v19 = vld [vmem:[%s7757_s30 + $0x208] sm:$0xff] }
 0x29c   : > { %v4014_v15 = vadd.f32 %v3975_v11, %v3974_v49  ;;  %v2133_v34 = vadd.f32 1.0, %v6634_v21  ;;  %6649 = vpow2.f32 %v5532_v30  ;;  %v6636_v60 = vpop.eup %6635  ;;  %v10055_v37 = vadd.f32 %v2848_v17, %v2814_v36  ;;  %v3992_v49 = vpop.xlane.xlu1 %3991 }
 0x29d   : > { %6651 = vrcp.f32 %v2132_v41  ;;  %v3538_v46 = vmul.f32 %v6636_v60, %v9937_v39  ;;  %v2747_v6 = vmul.f32 %v10058_v8, %v8174_v38  ;;  %v10062_v5 = vadd.f32 %v2849_v23, %v2815_v26 }
 0x29e   : > { %4015 = vadd.xlane.f32.xlu1 %v4014_v15  ;;  %6653 = vrcp.f32 %v2133_v34  ;;  %v6638_v31 = vpop.eup %6637  ;;  %v2780_v10 = vmul.f32 %v10065_v55, %v8177_v22  ;;  %v2781_v39 = vmul.f32 %v10070_v0, %v8177_v22  ;;  %v2846_v57 = vmul.f32 %v10075_v33, %v11665_v18 }
 0x29f   : > { %v3539_v58 = vmul.f32 %v6638_v31, %v9939_v16  ;;  %v5465_v13 = vmul.f32 -1.442695, %v10055_v37  ;;  %v2847_v11 = vmul.f32 %v10082_v19, %v11665_v18  ;;  %v10088_v30 = vsel %vm4123_vm5, %v9975_v61, %v3557_v52 }
 0x2a0   : > { %v6640_v9 = vpop.eup %6639  ;;  %v5466_v21 = vmul.f32 -1.442695, %v10062_v5  ;;  %v2812_v41 = vadd.f32 %v2780_v10, %v2746_v59  ;;  %v2813_v35 = vadd.f32 %v2781_v39, %v2747_v6  ;;  %v4141_v34 = vsel %vm4140_vm6, %v9981_v3, %v3992_v49  ;;  %v2684_v10 = vpop.xlane.xlu1 %2683 }
 0x2a1   : > { %v6642_v17 = vpop.eup %6641  ;;  %v3579_v15 = vadd.f32 %v3539_v58, %v3538_v46  ;;  %v2570_v16 = vadd.f32 1.0, %v6640_v9  ;;  %6655 = vpow2.f32 %v5465_v13  ;;  %v3186_v52 = vmul.f32 %v11672_v51, %v9667_v43  ;;  %5698 = vmatprep.mubr.msk.f32.mxu0 %vm4158_vm7, %v4141_v34  ;;  %v2249_v39 = vpop.xlane.xlu0 %2248  ;;  %v11687_v58 = vld [vmem:[#allocation42_spill] sm:$0xff] }
 0x2a2   : > { %v2571_v60 = vadd.f32 1.0, %v6642_v17  ;;  %6657 = vpow2.f32 %v5466_v21  ;;  %v10093_v26 = vadd.f32 %v2846_v57, %v2812_v41  ;;  %v10095_v61 = vadd.f32 %v2847_v11, %v2813_v35  ;;  %v11688_v21 = vld [vmem:[#allocation43_spill] sm:$0xff] }
 0x2a3   : > { %v6644_v36 = vpop.eup %6643  ;;  %3580 = vadd.xlane.f32.xlu0 %v3579_v15  ;;  %6659 = vrcp.f32 %v2570_v16  ;;  %v3220_v43 = vmul.f32 %v11687_v58, %v9677_v7  ;;  %v3286_v41 = vmul.f32 %v11688_v21, %v9686_v53  ;;  %v3287_v7 = vmul.f32 %v11688_v21, %v9690_v56 }
 0x2a4   : > { %v6646_v23 = vpop.eup %6645  ;;  %v2664_v59 = vmul.f32 %v6644_v36, %v9958_v1  ;;  %6661 = vrcp.f32 %v2571_v60  ;;  %v5463_v3 = vmul.f32 -1.442695, %v10093_v26  ;;  %v5464_v31 = vmul.f32 -1.442695, %v10095_v61 }
 0x2a5   : > { %v6648_v46 = vpop.eup %6647  ;;  %v2665_v6 = vmul.f32 %v6646_v23, %v9960_v62  ;;  %v3187_v1 = vmul.f32 %v11672_v51, %v9670_v24  ;;  %v3221_v62 = vmul.f32 %v11687_v58, %v9683_v4  ;;  %v3252_v15 = vadd.f32 %v3220_v43, %v3186_v52  ;;  %v10130_v23 = vpop.xlane.xlu1 %2686 }
 0x2a6   : > { %v6650_v57 = vpop.eup %6649  ;;  %v3880_v49 = vadd.f32 1.0, %v6648_v46  ;;  %6663 = vpow2.f32 %v5463_v3  ;;  %v3184_v4 = vmul.f32 %v10050_v45, %v11672_v51  ;;  %v3185_v53 = vmul.f32 %v10058_v8, %v11672_v51 }
 0x2a7   : > { %v6652_v13 = vpop.eup %6651  ;;  %v2706_v11 = vadd.f32 %v2665_v6, %v2664_v59  ;;  %v3881_v9 = vadd.f32 1.0, %v6650_v57  ;;  %v3253_v16 = vadd.f32 %v3221_v62, %v3187_v1  ;;  %v10118_v34 = vadd.f32 %v3286_v41, %v3252_v15  ;;  %v10132_v59 = vpop.xlane.xlu0 %3994  ;;  %v7213_v41 = vld [vmem:[%s7757_s30 + $0x210] sm:$0xff]  ;;  %v7214_v15 = vld [vmem:[%s7757_s30 + $0x218] sm:$0xff] }
 0x2a8   : > { %v6654_v35 = vpop.eup %6653  ;;  %v2228_v17 = vmul.f32 %v6652_v13, %v9977_v54  ;;  %6665 = vrcp.f32 %v3880_v49  ;;  %v3218_v54 = vmul.f32 %v10065_v55, %v11687_v58  ;;  %v3284_v56 = vmul.f32 %v10075_v33, %v11688_v21 }
 0x2a9   : > { %2707 = vadd.xlane.f32.xlu1 %v2706_v11  ;;  %v2229_v24 = vmul.f32 %v6654_v35, %v9983_v48  ;;  %6667 = vrcp.f32 %v3881_v9  ;;  %v10124_v60 = vadd.f32 %v3287_v7, %v3253_v16  ;;  %v3219_v48 = vmul.f32 %v10070_v0, %v11687_v58 }
 0x2aa   : > { %6669 = vpow2.f32 %v5464_v31  ;;  %v5500_v46 = vmul.f32 -1.442695, %v10118_v34  ;;  %v3250_v6 = vadd.f32 %v3218_v54, %v3184_v4  ;;  %v3285_v3 = vmul.f32 %v10082_v19, %v11688_v21 }
 0x2ab   : > { %v2271_v36 = vadd.f32 %v2229_v24, %v2228_v17  ;;  %v6656_v52 = vpop.eup %6655  ;;  %v10139_v31 = vsel %vm4089_vm3, %v10021_v40, %v2684_v10  ;;  %v5501_v1 = vmul.f32 -1.442695, %v10124_v60  ;;  %v3251_v43 = vadd.f32 %v3219_v48, %v3185_v53  ;;  %v7215_v24 = vld [vmem:[%s7757_s30 + $0x220] sm:$0xff] }
 0x2ac   : > { %v6658_v57 = vpop.eup %6657  ;;  %v3008_v49 = vadd.f32 1.0, %v6656_v52  ;;  %v10144_v62 = vsel %vm4072_vm2, %v10027_v28, %v2249_v39  ;;  %6671 = vpow2.f32 %v5500_v46  ;;  %v10146_v9 = vadd.f32 %v3284_v56, %v3250_v6  ;;  %v10164_v56 = vpop.xlane.xlu1 %3124 }
 0x2ad   : > { %2272 = vadd.xlane.f32.xlu0 %v2271_v36  ;;  %v6660_v13 = vpop.eup %6659  ;;  %v3009_v11 = vadd.f32 1.0, %v6658_v57  ;;  %v3624_v40 = vmul.f32 %v7213_v41, %v11681_v25  ;;  %v10151_v17 = vadd.f32 %v3285_v3, %v3251_v43  ;;  %v3625_v28 = vmul.f32 %v7214_v15, %v11681_v25  ;;  %v7217_v36 = vld [vmem:[%s7757_s30 + $0x230] sm:$0xff]  ;;  %v7218_v43 = vld [vmem:[%s7757_s30 + $0x238] sm:$0xff] }
 0x2ae   : > { %v6662_v10 = vpop.eup %6661  ;;  %v2666_v35 = vmul.f32 %v6660_v13, %v10006_v32  ;;  %6673 = vrcp.f32 %v3008_v49  ;;  %v5498_v16 = vmul.f32 -1.442695, %v10146_v9  ;;  %v3658_v7 = vmul.f32 %v7215_v24, %v11682_v2  ;;  %v7216_v32 = vld [vmem:[%s7757_s30 + $0x228] sm:$0xff] }
 0x2af   : > { %v2667_v39 = vmul.f32 %v6662_v10, %v10010_v50  ;;  %6675 = vrcp.f32 %v3009_v11  ;;  %v5499_v53 = vmul.f32 -1.442695, %v10151_v17  ;;  %v3659_v54 = vmul.f32 %v7216_v32, %v11682_v2  ;;  %v10166_v50 = vpop.xlane.xlu0 %3121 }
 0x2b0   : > { %v6664_v4 = vpop.eup %6663  ;;  %6677 = vpow2.f32 %v5501_v1  ;;  %v3724_v48 = vmul.f32 %v7217_v36, %v11683_v20  ;;  %v3690_v3 = vadd.f32 %v3658_v7, %v3624_v40  ;;  %v3725_v13 = vmul.f32 %v7218_v43, %v11683_v20  ;;  %v10199_v32 = vpop.xlane.xlu1 %3562 }
 0x2b1   : > { %v2709_v46 = vadd.f32 %v2667_v39, %v2666_v35  ;;  %v3006_v6 = vadd.f32 1.0, %v6664_v4  ;;  %6679 = vpow2.f32 %v5498_v16  ;;  %v3691_v1 = vadd.f32 %v3659_v54, %v3625_v28 }
 0x2b2   : > { %v6666_v52 = vpop.eup %6665  ;;  %6681 = vpow2.f32 %v5499_v53  ;;  %v10172_v10 = vadd.f32 %v3724_v48, %v3690_v3  ;;  %v3622_v40 = vmul.f32 %v10050_v45, %v11681_v25  ;;  %v3623_v15 = vmul.f32 %v10058_v8, %v11681_v25  ;;  %v10188_v45 = vld [vmem:[%s7757_s30 + $0x240] sm:$0xff]  ;;  %v10197_v53 = vld [vmem:[%s7757_s30 + $0x250] sm:$0xff]  ;;  %v10212_v48 = vld [vmem:[%s7757_s30 + $0x258] sm:$0xff] }
 0x2b3   : > { %v6668_v57 = vpop.eup %6667  ;;  %v3976_v49 = vmul.f32 %v6666_v52, %v10029_v27  ;;  %2710 = vadd.xlane.f32.xlu1 %v2709_v46  ;;  %6683 = vrcp.f32 %v3006_v6  ;;  %v10176_v27 = vadd.f32 %v3725_v13, %v3691_v1  ;;  %v3656_v28 = vmul.f32 %v10065_v55, %v11682_v2  ;;  %v10194_v55 = vld [vmem:[%s7757_s30 + $0x248] sm:$0xff]  ;;  %v10218_v3 = vld [vmem:[%s7757_s30 + $0x260] sm:$0xff] }
 0x2b4   : > { %v6670_v11 = vpop.eup %6669  ;;  %v3977_v41 = vmul.f32 %v6668_v57, %v10033_v47  ;;  %v5535_v47 = vmul.f32 -1.442695, %v10172_v10  ;;  %v3657_v16 = vmul.f32 %v10070_v0, %v11682_v2  ;;  %v3722_v24 = vmul.f32 %v10075_v33, %v11683_v20  ;;  %v10201_v0 = vpop.xlane.xlu0 %3559  ;;  %v11689_v57 = vld [vmem:[#allocation25_spill] sm:$0xff] }
 0x2b5   : > { %v3007_v35 = vadd.f32 1.0, %v6670_v11  ;;  %v5536_v7 = vmul.f32 -1.442695, %v10176_v27  ;;  %v3688_v4 = vadd.f32 %v3656_v28, %v3622_v40  ;;  %v3723_v8 = vmul.f32 %v10082_v19, %v11683_v20  ;;  %v10232_v40 = vld [vmem:[%s7757_s30 + $0x268] sm:$0xff] }
 0x2b6   : > { %v4017_v39 = vadd.f32 %v3977_v41, %v3976_v49  ;;  %v6672_v33 = vpop.eup %6671  ;;  %v3689_v54 = vadd.f32 %v3657_v16, %v3623_v15  ;;  %v10206_v36 = vsel %vm4089_vm3, %v10144_v62, %v10130_v23  ;;  %v4142_v19 = vsel %vm4140_vm6, %v10088_v30, %v10132_v59  ;;  %v11690_v59 = vld [vmem:[#allocation26_spill] sm:$0xff] }
 0x2b7   : > { %6685 = vrcp.f32 %v3007_v35  ;;  %v3446_v46 = vadd.f32 1.0, %v6672_v33  ;;  %v10214_v6 = vadd.f32 %v3722_v24, %v3688_v4  ;;  %5699 = vmatmul.mubr.msk.f32.vlgmr.msra.gmra.mrb[0].mxu0 %vm4158_vm7, %v4142_v19  ;;  %v998_v23 = vmul.f32 %v11689_v57, %v10188_v45 }
 0x2b8   : > { %4018 = vadd.xlane.f32.xlu0 %v4017_v39  ;;  %6687 = vpow2.f32 %v5535_v47  ;;  %v6674_v52 = vpop.eup %6673  ;;  %v10223_v1 = vadd.f32 %v3723_v8, %v3689_v54  ;;  %v999_v30 = vmul.f32 %v11689_v57, %v10194_v55  ;;  %v1032_v43 = vmul.f32 %v11690_v59, %v10197_v53  ;;  %v11691_v47 = vld [vmem:[#allocation27_spill] sm:$0xff]  ;;  %v10239_v8 = vpop.xlane.xlu1 %4000 }
 0x2b9   : > { %6689 = vpow2.f32 %v5536_v7  ;;  %v6676_v62 = vpop.eup %6675  ;;  %v3104_v49 = vmul.f32 %v6674_v52, %v10055_v37  ;;  %v5533_v41 = vmul.f32 -1.442695, %v10214_v6  ;;  %v1033_v35 = vmul.f32 %v11690_v59, %v10212_v48  ;;  %v10241_v33 = vpop.xlane.xlu0 %3997 }
 0x2ba   : > { %v6678_v13 = vpop.eup %6677  ;;  %v3105_v11 = vmul.f32 %v6676_v62, %v10062_v5  ;;  %6691 = vrcp.f32 %v3446_v46  ;;  %v5534_v28 = vmul.f32 -1.442695, %v10223_v1  ;;  %v1064_v39 = vadd.f32 %v1032_v43, %v998_v23  ;;  %v11692_v62 = vld [vmem:[#allocation22_spill] sm:$0xff] }
 0x2bb   : > { %v6680_v37 = vpop.eup %6679  ;;  %v3447_v15 = vadd.f32 1.0, %v6678_v13  ;;  %v1098_v16 = vmul.f32 %v11691_v47, %v10218_v3  ;;  %6693 = vpow2.f32 %v5533_v41  ;;  %v1065_v5 = vadd.f32 %v1033_v35, %v999_v30 }
 0x2bc   : > { %v6682_v24 = vpop.eup %6681  ;;  %v3147_v7 = vadd.f32 %v3105_v11, %v3104_v49  ;;  %v3444_v4 = vadd.f32 1.0, %v6680_v37  ;;  %v1099_v52 = vmul.f32 %v11691_v47, %v10232_v40  ;;  %v560_v49 = vmul.f32 %v11692_v62, %v10188_v45  ;;  %v11693_v11 = vld [vmem:[#allocation23_spill] sm:$0xff]  ;;  %v11694_v37 = vld [vmem:[#allocation24_spill] sm:$0xff] }
 0x2bd   : > { %v6684_v54 = vpop.eup %6683  ;;  %6695 = vrcp.f32 %v3447_v15  ;;  %v3445_v19 = vadd.f32 1.0, %v6682_v24  ;;  %v10245_v46 = vadd.f32 %v1098_v16, %v1064_v39  ;;  %v561_v30 = vmul.f32 %v11692_v62, %v10194_v55 }
 0x2be   : > { %3148 = vadd.xlane.f32.xlu1 %v3147_v7  ;;  %v3102_v23 = vmul.f32 %v6684_v54, %v10093_v26  ;;  %6697 = vrcp.f32 %v3444_v4  ;;  %v10252_v43 = vadd.f32 %v1099_v52, %v1065_v5  ;;  %v594_v41 = vmul.f32 %v11693_v11, %v10197_v53  ;;  %v10269_v5 = vld [vmem:[%s7757_s30 + $0x278] sm:$0xff] }
 0x2bf   : > { %6699 = vrcp.f32 %v3445_v19  ;;  %v5327_v13 = vmul.f32 -1.442695, %v10245_v46  ;;  %v595_v26 = vmul.f32 %v11693_v11, %v10212_v48  ;;  %v660_v15 = vmul.f32 %v11694_v37, %v10218_v3 }
 0x2c0   : > { %6701 = vpow2.f32 %v5534_v28  ;;  %v661_v39 = vmul.f32 %v11694_v37, %v10232_v40  ;;  %v5328_v7 = vmul.f32 -1.442695, %v10252_v43  ;;  %v626_v4 = vadd.f32 %v594_v41, %v560_v49  ;;  %v10266_v28 = vld [vmem:[%s7757_s30 + $0x270] sm:$0xff]  ;;  %v10282_v49 = vld [vmem:[%s7757_s30 + $0x280] sm:$0xff]  ;;  %v10286_v41 = vpop.xlane.xlu0 %937 }
 0x2c1   : > { %v6686_v35 = vpop.eup %6685  ;;  %6703 = vpow2.f32 %v5327_v13  ;;  %v627_v52 = vadd.f32 %v595_v26, %v561_v30  ;;  %v10274_v20 = vsel %vm4106_vm4, %v10206_v36, %v10164_v56  ;;  %v10284_v13 = vpop.xlane.xlu1 %1375  ;;  %v10291_v26 = vld [vmem:[%s7757_s30 + $0x288] sm:$0xff]  ;;  %v10294_v56 = vld [vmem:[%s7757_s30 + $0x290] sm:$0xff]  ;;  %v10297_v36 = vld [vmem:[%s7757_s30 + $0x298] sm:$0xff]  ;;  %v563_v51 = vmul.f32 %v11692_v62, %v10269_v5 }
 0x2c2   : > { %v6688_v16 = vpop.eup %6687  ;;  %v3103_v24 = vmul.f32 %v6686_v35, %v10095_v61  ;;  %v10279_v61 = vsel %vm4106_vm4, %v10139_v31, %v10166_v50  ;;  %6705 = vpow2.f32 %v5328_v7  ;;  %v10288_v30 = vadd.f32 %v660_v15, %v626_v4  ;;  %11695 = vst [vmem:[#allocation46_spill] sm:$0xff] %v10297_v36 }
 0x2c3   : > { %v6690_v54 = vpop.eup %6689  ;;  %v3884_v19 = vadd.f32 1.0, %v6688_v16  ;;  %v10299_v31 = vadd.f32 %v661_v39, %v627_v52  ;;  %v1000_v50 = vmul.f32 %v11689_v57, %v10266_v28  ;;  %v1034_v7 = vmul.f32 %v11690_v59, %v10282_v49 }
 0x2c4   : > { %v3144_v35 = vadd.f32 %v3103_v24, %v3102_v23  ;;  %v3885_v2 = vadd.f32 1.0, %v6690_v54  ;;  %v6692_v16 = vpop.eup %6691  ;;  %v1001_v23 = vmul.f32 %v11689_v57, %v10269_v5  ;;  %v5292_v24 = vmul.f32 -1.442695, %v10288_v30  ;;  %v10323_v22 = vpop.xlane.xlu0 %940 }
 0x2c5   : > { %6707 = vrcp.f32 %v3884_v19  ;;  %v3542_v15 = vmul.f32 %v6692_v16, %v10118_v34  ;;  %v6694_v4 = vpop.eup %6693  ;;  %v5293_v54 = vmul.f32 -1.442695, %v10299_v31  ;;  %v1035_v39 = vmul.f32 %v11690_v59, %v10291_v26  ;;  %v10321_v18 = vpop.xlane.xlu1 %1378 }
 0x2c6   : > { %3145 = vadd.xlane.f32.xlu0 %v3144_v35  ;;  %6709 = vrcp.f32 %v3885_v2  ;;  %v1100_v19 = vmul.f32 %v11691_v47, %v10294_v56  ;;  %v1101_v52 = vmul.f32 %v11691_v47, %v10297_v36  ;;  %v3882_v34 = vadd.f32 1.0, %v6694_v4 }
 0x2c7   : > { %v6696_v35 = vpop.eup %6695  ;;  %6711 = vpow2.f32 %v5292_v24  ;;  %v1066_v2 = vadd.f32 %v1034_v7, %v1000_v50  ;;  %v562_v16 = vmul.f32 %v11692_v62, %v10266_v28  ;;  %v1067_v58 = vadd.f32 %v1035_v39, %v1001_v23 }
 0x2c8   : > { %v6698_v25 = vpop.eup %6697  ;;  %v3543_v21 = vmul.f32 %v6696_v35, %v10124_v60  ;;  %6713 = vpow2.f32 %v5293_v54  ;;  %v596_v24 = vmul.f32 %v11693_v11, %v10282_v49  ;;  %v597_v39 = vmul.f32 %v11693_v11, %v10291_v26 }
 0x2c9   : > { %v6700_v38 = vpop.eup %6699  ;;  %v3540_v4 = vmul.f32 %v6698_v25, %v10146_v9  ;;  %6715 = vrcp.f32 %v3882_v34  ;;  %v10326_v50 = vadd.f32 %v1100_v19, %v1066_v2  ;;  %v10331_v54 = vadd.f32 %v1101_v52, %v1067_v58 }
 0x2ca   : > { %v6702_v7 = vpop.eup %6701  ;;  %v3585_v60 = vadd.f32 %v3543_v21, %v3542_v15  ;;  %v3541_v23 = vmul.f32 %v6700_v38, %v10151_v17  ;;  %v628_v25 = vadd.f32 %v596_v24, %v562_v16  ;;  %v662_v9 = vmul.f32 %v11694_v37, %v10294_v56  ;;  %v10351_v24 = vpop.xlane.xlu1 %1816 }
 0x2cb   : > { %v6704_v35 = vpop.eup %6703  ;;  %v3883_v47 = vadd.f32 1.0, %v6702_v7  ;;  %v5329_v59 = vmul.f32 -1.442695, %v10326_v50  ;;  %v5330_v21 = vmul.f32 -1.442695, %v10331_v54  ;;  %v629_v15 = vadd.f32 %v597_v39, %v563_v51  ;;  %v11696_v51 = vld [vmem:[#allocation28_spill] sm:$0xff]  ;;  %v10353_v7 = vpop.xlane.xlu0 %1813 }
 0x2cc   : > { %3586 = vadd.xlane.f32.xlu1 %v3585_v60  ;;  %v3582_v19 = vadd.f32 %v3541_v23, %v3540_v4  ;;  %v1258_v34 = vadd.f32 1.0, %v6704_v35  ;;  %v6706_v38 = vpop.eup %6705  ;;  %v663_v58 = vmul.f32 %v11694_v37, %v10297_v36  ;;  %v10341_v17 = vadd.f32 %v662_v9, %v628_v25  ;;  %11697 = vst [vmem:[#allocation47_spill] sm:$0xff] %v10351_v24 }
 0x2cd   : > { %6717 = vrcp.f32 %v3883_v47  ;;  %v4127_v52 = vsel %vm4123_vm5, %v10274_v20, %v10199_v32  ;;  %v1259_v16 = vadd.f32 1.0, %v6706_v38  ;;  %v4126_v4 = vsel %vm4123_vm5, %v10279_v61, %v10201_v0  ;;  %11698 = vst [vmem:[#allocation48_spill] sm:$0xff] %v10353_v7  ;;  %v11699_v61 = vld [vmem:[#allocation29_spill] sm:$0xff] }
 0x2ce   : > { %3583 = vadd.xlane.f32.xlu0 %v3582_v19  ;;  %6719 = vrcp.f32 %v1258_v34  ;;  %v1438_v47 = vmul.f32 %v11696_v51, %v10266_v28  ;;  %v10356_v20 = vadd.f32 %v663_v58, %v629_v15  ;;  %v5294_v32 = vmul.f32 -1.442695, %v10341_v17 }
 0x2cf   : > { %v6708_v2 = vpop.eup %6707  ;;  %6721 = vpow2.f32 %v5329_v59  ;;  %v1439_v0 = vmul.f32 %v11696_v51, %v10269_v5  ;;  %v1472_v35 = vmul.f32 %v11699_v61, %v10282_v49  ;;  %v11700_v59 = vld [vmem:[#allocation30_spill] sm:$0xff]  ;;  %v1436_v24 = vmul.f32 %v11696_v51, %v10188_v45 }
 0x2d0   : > { %v6710_v60 = vpop.eup %6709  ;;  %v3980_v23 = vmul.f32 %v6708_v2, %v10172_v10  ;;  %6723 = vrcp.f32 %v1259_v16  ;;  %v5295_v9 = vmul.f32 -1.442695, %v10356_v20  ;;  %v1473_v10 = vmul.f32 %v11699_v61, %v10291_v26 }
 0x2d1   : > { %v3981_v39 = vmul.f32 %v6710_v60, %v10176_v27  ;;  %v6712_v25 = vpop.eup %6711  ;;  %6725 = vpow2.f32 %v5330_v21  ;;  %v1538_v19 = vmul.f32 %v11700_v59, %v10294_v56  ;;  %v1504_v38 = vadd.f32 %v1472_v35, %v1438_v47 }
 0x2d2   : > { %v6714_v34 = vpop.eup %6713  ;;  %v820_v27 = vadd.f32 1.0, %v6712_v25  ;;  %6727 = vpow2.f32 %v5294_v32  ;;  %v1505_v16 = vadd.f32 %v1473_v10, %v1439_v0  ;;  %v1539_v21 = vmul.f32 %v11700_v59, %v10297_v36  ;;  %v10378_v32 = vpop.xlane.xlu0 %2251 }
 0x2d3   : > { %v4023_v15 = vadd.f32 %v3981_v39, %v3980_v23  ;;  %v6716_v58 = vpop.eup %6715  ;;  %v821_v2 = vadd.f32 1.0, %v6714_v34  ;;  %6729 = vpow2.f32 %v5295_v9  ;;  %v10372_v7 = vadd.f32 %v1538_v19, %v1504_v38  ;;  %v10376_v23 = vpop.xlane.xlu1 %2254 }
 0x2d4   : > { %v3978_v60 = vmul.f32 %v6716_v58, %v10214_v6  ;;  %6731 = vrcp.f32 %v820_v27  ;;  %v10380_v47 = vadd.f32 %v1539_v21, %v1505_v16  ;;  %v1437_v39 = vmul.f32 %v11696_v51, %v10194_v55 }
 0x2d5   : > { %4024 = vadd.xlane.f32.xlu1 %v4023_v15  ;;  %6733 = vrcp.f32 %v821_v2  ;;  %v1470_v0 = vmul.f32 %v11699_v61, %v10197_v53  ;;  %v5364_v6 = vmul.f32 -1.442695, %v10372_v7  ;;  %v1471_v35 = vmul.f32 %v11699_v61, %v10212_v48 }
 0x2d6   : > { %v1536_v25 = vmul.f32 %v11700_v59, %v10218_v3  ;;  %v1537_v9 = vmul.f32 %v11700_v59, %v10232_v40  ;;  %v5365_v19 = vmul.f32 -1.442695, %v10380_v47  ;;  %v4144_v15 = vsel %vm4140_vm6, %v4127_v52, %v10239_v8 }
 0x2d7   : > { %v6718_v10 = vpop.eup %6717  ;;  %v1502_v34 = vadd.f32 %v1470_v0, %v1436_v24  ;;  %v4143_v27 = vsel %vm4140_vm6, %v4126_v4, %v10241_v33  ;;  %6735 = vpow2.f32 %v5364_v6  ;;  %v1503_v2 = vadd.f32 %v1471_v35, %v1437_v39  ;;  %v10412_v0 = vpop.xlane.xlu1 %943 }
 0x2d8   : > { %v6720_v38 = vpop.eup %6719  ;;  %v3979_v58 = vmul.f32 %v6718_v10, %v10223_v1  ;;  %5701 = vmatprep.mubr.msk.f32.mxu0 %vm4158_vm7, %v4143_v27  ;;  %v1876_v16 = vmul.f32 %v11675_v29, %v10266_v28  ;;  %6737 = vpow2.f32 %v5365_v19  ;;  %v1877_v8 = vmul.f32 %v11675_v29, %v10269_v5  ;;  %11701 = vst [vmem:[#allocation25_spill] sm:$0xff] %v10412_v0  ;;  %v10414_v6 = vpop.xlane.xlu0 %2689 }
 0x2d9   : > { %v6722_v21 = vpop.eup %6721  ;;  %v1354_v59 = vmul.f32 %v6720_v38, %v10245_v46  ;;  %v10403_v24 = vadd.f32 %v1536_v25, %v1502_v34  ;;  %5702 = vmatmul.mubr.msk.f32.gmra.mrb[2].mxu0 %vm4158_vm7, %v4144_v15  ;;  %v10408_v4 = vadd.f32 %v1537_v9, %v1503_v2  ;;  %v1910_v39 = vmul.f32 %v11676_v44, %v10282_v49 }
 0x2da   : > { %v6724_v33 = vpop.eup %6723  ;;  %v4020_v1 = vadd.f32 %v3979_v58, %v3978_v60  ;;  %v1260_v52 = vadd.f32 1.0, %v6722_v21  ;;  %11702 = vst [vmem:[#allocation22_spill] sm:$0xff] %v10414_v6  ;;  %v1911_v10 = vmul.f32 %v11676_v44, %v10291_v26  ;;  %v1976_v60 = vmul.f32 %v11677_v12, %v10294_v56 }
 0x2db   : > { %v6726_v46 = vpop.eup %6725  ;;  %v1355_v35 = vmul.f32 %v6724_v33, %v10252_v43  ;;  %v5362_v25 = vmul.f32 -1.442695, %v10403_v24  ;;  %v5363_v34 = vmul.f32 -1.442695, %v10408_v4  ;;  %v1942_v15 = vadd.f32 %v1910_v39, %v1876_v16 }
 0x2dc   : > { %v6728_v9 = vpop.eup %6727  ;;  %4021 = vadd.xlane.f32.xlu0 %v4020_v1  ;;  %v1261_v19 = vadd.f32 1.0, %v6726_v46  ;;  %6739 = vrcp.f32 %v1260_v52  ;;  %v1943_v43 = vadd.f32 %v1911_v10, %v1877_v8  ;;  %v1977_v33 = vmul.f32 %v11677_v12, %v10297_v36  ;;  %v10436_v46 = vpop.xlane.xlu1 %2692  ;;  %v10450_v10 = vld [vmem:[%s7757_s30 + $0x2a8] sm:$0xff] }
 0x2dd   : > { %v6730_v27 = vpop.eup %6729  ;;  %v1398_v38 = vadd.f32 %v1355_v35, %v1354_v59  ;;  %v822_v58 = vadd.f32 1.0, %v6728_v9  ;;  %6741 = vpow2.f32 %v5362_v25  ;;  %v10425_v0 = vadd.f32 %v1976_v60, %v1942_v15  ;;  %11703 = vst [vmem:[#allocation23_spill] sm:$0xff] %v10436_v46  ;;  %v10438_v35 = vpop.xlane.xlu0 %1381  ;;  %v10456_v15 = vld [vmem:[%s7757_s30 + $0x2b0] sm:$0xff] }
 0x2de   : > { %v6732_v2 = vpop.eup %6731  ;;  %6743 = vrcp.f32 %v1261_v19  ;;  %v823_v21 = vadd.f32 1.0, %v6730_v27  ;;  %v1874_v59 = vmul.f32 %v11675_v29, %v10188_v45  ;;  %v1875_v16 = vmul.f32 %v11675_v29, %v10194_v55  ;;  %11704 = vst [vmem:[#allocation24_spill] sm:$0xff] %v10438_v35 }
 0x2df   : > { %v6734_v6 = vpop.eup %6733  ;;  %1399 = vadd.xlane.f32.xlu1 %v1398_v38  ;;  %v916_v1 = vmul.f32 %v6732_v2, %v10288_v30  ;;  %6745 = vrcp.f32 %v822_v58  ;;  %v10433_v52 = vadd.f32 %v1977_v33, %v1943_v43  ;;  %v5399_v39 = vmul.f32 -1.442695, %v10425_v0  ;;  %v10467_v33 = vld [vmem:[%s7757_s30 + $0x2c0] sm:$0xff] }
 0x2e0   : > { %v917_v8 = vmul.f32 %v6734_v6, %v10299_v31  ;;  %6747 = vrcp.f32 %v823_v21  ;;  %v1908_v30 = vmul.f32 %v11676_v44, %v10197_v53  ;;  %v1909_v25 = vmul.f32 %v11676_v44, %v10212_v48  ;;  %v10447_v6 = vld [vmem:[%s7757_s30 + $0x2a0] sm:$0xff]  ;;  %v10464_v21 = vld [vmem:[%s7757_s30 + $0x2b8] sm:$0xff] }
 0x2e1   : > { %6749 = vpow2.f32 %v5363_v34  ;;  %v1974_v31 = vmul.f32 %v11677_v12, %v10218_v3  ;;  %v6736_v60 = vpop.eup %6735  ;;  %v5400_v19 = vmul.f32 -1.442695, %v10433_v52  ;;  %v1975_v34 = vmul.f32 %v11677_v12, %v10232_v40 }
 0x2e2   : > { %v960_v9 = vadd.f32 %v917_v8, %v916_v1  ;;  %6751 = vpow2.f32 %v5399_v39  ;;  %v6738_v27 = vpop.eup %6737  ;;  %v1698_v38 = vadd.f32 1.0, %v6736_v60  ;;  %v1940_v58 = vadd.f32 %v1908_v30, %v1874_v59  ;;  %v10470_v1 = vld [vmem:[%s7757_s30 + $0x2c8] sm:$0xff] }
 0x2e3   : > { %v1941_v43 = vadd.f32 %v1909_v25, %v1875_v16  ;;  %v10461_v2 = vsel %vm4038_vm0, %v10286_v41, %v10284_v13  ;;  %v1699_v8 = vadd.f32 1.0, %v6738_v27  ;;  %6753 = vpow2.f32 %v5400_v19  ;;  %v10488_v19 = vpop.xlane.xlu1 %946 }
 0x2e4   : > { %961 = vadd.xlane.f32.xlu0 %v960_v9  ;;  %v564_v39 = vmul.f32 %v11692_v62, %v10447_v6  ;;  %v565_v59 = vmul.f32 %v11692_v62, %v10450_v10  ;;  %6755 = vrcp.f32 %v1698_v38  ;;  %v10476_v16 = vadd.f32 %v1974_v31, %v1940_v58  ;;  %11705 = vst [vmem:[#allocation49_spill] sm:$0xff] %v10488_v19  ;;  %v10490_v31 = vpop.xlane.xlu0 %3127 }
 0x2e5   : > { %v10478_v13 = vadd.f32 %v1975_v34, %v1941_v43  ;;  %v598_v41 = vmul.f32 %v11693_v11, %v10456_v15  ;;  %6757 = vrcp.f32 %v1699_v8  ;;  %v599_v25 = vmul.f32 %v11693_v11, %v10464_v21  ;;  %11706 = vst [vmem:[#allocation50_spill] sm:$0xff] %v10490_v31 }
 0x2e6   : > { %v6740_v30 = vpop.eup %6739  ;;  %v664_v60 = vmul.f32 %v11694_v37, %v10467_v33  ;;  %v665_v9 = vmul.f32 %v11694_v37, %v10470_v1  ;;  %v5397_v38 = vmul.f32 -1.442695, %v10476_v16  ;;  %v2312_v29 = vmul.f32 %v11684_v63, %v10188_v45 }
 0x2e7   : > { %v6742_v34 = vpop.eup %6741  ;;  %v1356_v27 = vmul.f32 %v6740_v30, %v10326_v50  ;;  %v5398_v58 = vmul.f32 -1.442695, %v10478_v13  ;;  %v630_v43 = vadd.f32 %v598_v41, %v564_v39  ;;  %v631_v44 = vadd.f32 %v599_v25, %v565_v59 }
 0x2e8   : > { %v6744_v8 = vpop.eup %6743  ;;  %v1696_v12 = vadd.f32 1.0, %v6742_v34  ;;  %v2313_v35 = vmul.f32 %v11684_v63, %v10194_v55  ;;  %6759 = vpow2.f32 %v5397_v38  ;;  %v2346_v50 = vmul.f32 %v11685_v14, %v10197_v53 }
 0x2e9   : > { %v6746_v19 = vpop.eup %6745  ;;  %v1357_v31 = vmul.f32 %v6744_v8, %v10331_v54  ;;  %v10500_v46 = vadd.f32 %v664_v60, %v630_v43  ;;  %v10505_v59 = vadd.f32 %v665_v9, %v631_v44  ;;  %v2347_v41 = vmul.f32 %v11685_v14, %v10212_v48  ;;  %v10514_v44 = vpop.xlane.xlu0 %1384 }
 0x2ea   : > { %v6748_v30 = vpop.eup %6747  ;;  %v918_v39 = vmul.f32 %v6746_v19, %v10341_v17  ;;  %6761 = vrcp.f32 %v1696_v12  ;;  %v2378_v8 = vadd.f32 %v2346_v50, %v2312_v29  ;;  %v10512_v17 = vpop.xlane.xlu1 %1819  ;;  %11708 = vst [vmem:[#allocation52_spill] sm:$0xff] %v10514_v44  ;;  %v4044_v29 = vsel %vm4038_vm0, %v10323_v22, %v10321_v18 }
 0x2eb   : > { %v6750_v25 = vpop.eup %6749  ;;  %v1401_v34 = vadd.f32 %v1357_v31, %v1356_v27  ;;  %v919_v61 = vmul.f32 %v6748_v30, %v10356_v20  ;;  %6763 = vpow2.f32 %v5398_v58  ;;  %v5296_v54 = vmul.f32 -1.442695, %v10500_v46  ;;  %11707 = vst [vmem:[#allocation51_spill] sm:$0xff] %v10512_v17 }
 0x2ec   : > { %v6752_v60 = vpop.eup %6751  ;;  %v1697_v38 = vadd.f32 1.0, %v6750_v25  ;;  %v5297_v43 = vmul.f32 -1.442695, %v10505_v59  ;;  %v2379_v51 = vadd.f32 %v2347_v41, %v2313_v35  ;;  %v2412_v20 = vmul.f32 %v11686_v42, %v10218_v3 }
 0x2ed   : > { %1402 = vadd.xlane.f32.xlu1 %v1401_v34  ;;  %v963_v12 = vadd.f32 %v919_v61, %v918_v39  ;;  %v2136_v9 = vadd.f32 1.0, %v6752_v60  ;;  %6765 = vpow2.f32 %v5296_v54  ;;  %v6754_v19 = vpop.eup %6753  ;;  %v2413_v31 = vmul.f32 %v11686_v42, %v10232_v40 }
 0x2ee   : > { %6767 = vrcp.f32 %v1697_v38  ;;  %v2314_v35 = vmul.f32 %v11684_v63, %v10266_v28  ;;  %v6756_v27 = vpop.eup %6755  ;;  %v2137_v61 = vadd.f32 1.0, %v6754_v19  ;;  %v10525_v58 = vadd.f32 %v2412_v20, %v2378_v8  ;;  %v10543_v38 = vpop.xlane.xlu1 %3565 }
 0x2ef   : > { %964 = vadd.xlane.f32.xlu0 %v963_v12  ;;  %6769 = vrcp.f32 %v2136_v9  ;;  %v2315_v50 = vmul.f32 %v11684_v63, %v10269_v5  ;;  %v6758_v30 = vpop.eup %6757  ;;  %v1794_v39 = vmul.f32 %v6756_v27, %v10372_v7  ;;  %v10530_v41 = vadd.f32 %v2413_v31, %v2379_v51  ;;  %11709 = vst [vmem:[#allocation53_spill] sm:$0xff] %v10543_v38 }
 0x2f0   : > { %6771 = vpow2.f32 %v5297_v43  ;;  %v2348_v22 = vmul.f32 %v11685_v14, %v10282_v49  ;;  %v1795_v18 = vmul.f32 %v6758_v30, %v10380_v47  ;;  %v5432_v25 = vmul.f32 -1.442695, %v10525_v58  ;;  %v10545_v43 = vpop.xlane.xlu0 %3130 }
 0x2f1   : > { %6773 = vrcp.f32 %v2137_v61  ;;  %v2349_v34 = vmul.f32 %v11685_v14, %v10291_v26  ;;  %v5433_v54 = vmul.f32 -1.442695, %v10530_v41  ;;  %v2414_v7 = vmul.f32 %v11686_v42, %v10294_v56  ;;  %11710 = vst [vmem:[#allocation54_spill] sm:$0xff] %v10545_v43  ;;  %v10591_v14 = vld [vmem:[%s7757_s30 + $0x2e0] sm:$0xff] }
 0x2f2   : > { %v2380_v60 = vadd.f32 %v2348_v22, %v2314_v35  ;;  %v2415_v51 = vmul.f32 %v11686_v42, %v10297_v36  ;;  %v6760_v47 = vpop.eup %6759  ;;  %v1839_v8 = vadd.f32 %v1795_v18, %v1794_v39  ;;  %6775 = vpow2.f32 %v5432_v25 }
 0x2f3   : > { %v2381_v12 = vadd.f32 %v2349_v34, %v2315_v50  ;;  %v1002_v9 = vmul.f32 %v11689_v57, %v10447_v6  ;;  %v2134_v19 = vadd.f32 1.0, %v6760_v47  ;;  %6777 = vpow2.f32 %v5433_v54  ;;  %v11711_v50 = vld [vmem:[#allocation26_spill] sm:$0xff]  ;;  %v11712_v34 = vld [vmem:[#allocation27_spill] sm:$0xff] }
 0x2f4   : > { %v6762_v20 = vpop.eup %6761  ;;  %v10549_v31 = vadd.f32 %v2414_v7, %v2380_v60  ;;  %v1003_v35 = vmul.f32 %v11689_v57, %v10450_v10  ;;  %1840 = vadd.xlane.f32.xlu1 %v1839_v8  ;;  %v1036_v39 = vmul.f32 %v11711_v50, %v10456_v15  ;;  %v1037_v22 = vmul.f32 %v11711_v50, %v10464_v21  ;;  %v10567_v8 = vld [vmem:[%s7757_s30 + $0x2d0] sm:$0xff] }
 0x2f5   : > { %v6764_v27 = vpop.eup %6763  ;;  %v1792_v61 = vmul.f32 %v6762_v20, %v10403_v24  ;;  %v10554_v30 = vadd.f32 %v2415_v51, %v2381_v12  ;;  %6779 = vrcp.f32 %v2134_v19  ;;  %v1102_v54 = vmul.f32 %v11712_v34, %v10467_v33  ;;  %v10570_v12 = vld [vmem:[%s7757_s30 + $0x2d8] sm:$0xff] }
 0x2f6   : > { %v2135_v18 = vadd.f32 1.0, %v6764_v27  ;;  %v5434_v25 = vmul.f32 -1.442695, %v10549_v31  ;;  %v1068_v47 = vadd.f32 %v1036_v39, %v1002_v9  ;;  %v1069_v24 = vadd.f32 %v1037_v22, %v1003_v35  ;;  %v11713_v27 = vld [vmem:[#allocation47_spill] sm:$0xff]  ;;  %v11714_v9 = vld [vmem:[#allocation48_spill] sm:$0xff]  ;;  %v10581_v39 = vpop.xlane.xlu1 %2257  ;;  %v10583_v22 = vpop.xlane.xlu0 %1822 }
 0x2f7   : > { %v6766_v60 = vpop.eup %6765  ;;  %v5435_v7 = vmul.f32 -1.442695, %v10554_v30  ;;  %v1103_v51 = vmul.f32 %v11712_v34, %v10470_v1  ;;  %v10574_v43 = vsel %vm4055_vm1, %v4044_v29, %v11713_v27  ;;  %v10579_v35 = vsel %vm4055_vm1, %v10461_v2, %v11714_v9  ;;  %11715 = vst [vmem:[#allocation26_spill] sm:$0xff] %v10581_v39  ;;  %11716 = vst [vmem:[#allocation27_spill] sm:$0xff] %v10583_v22  ;;  %v10594_v29 = vld [vmem:[%s7757_s30 + $0x2e8] sm:$0xff]  ;;  %v10598_v9 = vld [vmem:[%s7757_s30 + $0x2f0] sm:$0xff] }
 0x2f8   : > { %v6768_v20 = vpop.eup %6767  ;;  %6781 = vrcp.f32 %v2135_v18  ;;  %v824_v19 = vadd.f32 1.0, %v6766_v60  ;;  %v10586_v18 = vadd.f32 %v1102_v54, %v1068_v47  ;;  %v10601_v39 = vld [vmem:[%s7757_s30 + $0x2f8] sm:$0xff] }
 0x2f9   : > { %v6770_v38 = vpop.eup %6769  ;;  %v1793_v42 = vmul.f32 %v6768_v20, %v10408_v4  ;;  %6783 = vpow2.f32 %v5434_v25  ;;  %v10588_v60 = vadd.f32 %v1103_v51, %v1069_v24  ;;  %v566_v4 = vmul.f32 %v11692_v62, %v10567_v8 }
 0x2fa   : > { %v6772_v27 = vpop.eup %6771  ;;  %v2232_v2 = vmul.f32 %v6770_v38, %v10425_v0  ;;  %6785 = vrcp.f32 %v824_v19  ;;  %v567_v25 = vmul.f32 %v11692_v62, %v10570_v12  ;;  %v5331_v51 = vmul.f32 -1.442695, %v10586_v18  ;;  %v10620_v44 = vpop.xlane.xlu1 %4003 }
 0x2fb   : > { %v6774_v54 = vpop.eup %6773  ;;  %v1836_v47 = vadd.f32 %v1793_v42, %v1792_v61  ;;  %v825_v24 = vadd.f32 1.0, %v6772_v27  ;;  %6787 = vpow2.f32 %v5435_v7  ;;  %v5332_v0 = vmul.f32 -1.442695, %v10588_v60  ;;  %v11717_v61 = vld [vmem:[#allocation37_spill] sm:$0xff]  ;;  %11718 = vst [vmem:[#allocation47_spill] sm:$0xff] %v10620_v44 }
 0x2fc   : > { %v2233_v20 = vmul.f32 %v6774_v54, %v10433_v52  ;;  %v600_v38 = vmul.f32 %v11693_v11, %v10591_v14  ;;  %v601_v19 = vmul.f32 %v11693_v11, %v10594_v29  ;;  %v6776_v22 = vpop.eup %6775  ;;  %v666_v42 = vmul.f32 %v11694_v37, %v10598_v9  ;;  %v10622_v11 = vpop.xlane.xlu0 %3568 }
 0x2fd   : > { %1837 = vadd.xlane.f32.xlu0 %v1836_v47  ;;  %6789 = vrcp.f32 %v825_v24  ;;  %v667_v62 = vmul.f32 %v11694_v37, %v10601_v39  ;;  %v2750_v52 = vmul.f32 %v11717_v61, %v10188_v45  ;;  %v6778_v7 = vpop.eup %6777  ;;  %v2572_v54 = vadd.f32 1.0, %v6776_v22  ;;  %11719 = vst [vmem:[#allocation48_spill] sm:$0xff] %v10622_v11 }
 0x2fe   : > { %v2277_v27 = vadd.f32 %v2233_v20, %v2232_v2  ;;  %6791 = vpow2.f32 %v5331_v51  ;;  %v632_v63 = vadd.f32 %v600_v38, %v566_v4  ;;  %v2573_v47 = vadd.f32 1.0, %v6778_v7  ;;  %v11720_v2 = vld [vmem:[#allocation38_spill] sm:$0xff] }
 0x2ff   : > { %6793 = vpow2.f32 %v5332_v0  ;;  %v633_v24 = vadd.f32 %v601_v19, %v567_v25  ;;  %v2751_v17 = vmul.f32 %v11717_v61, %v10194_v55  ;;  %v6780_v36 = vpop.eup %6779  ;;  %v2784_v22 = vmul.f32 %v11720_v2, %v10197_v53  ;;  %v11721_v25 = vld [vmem:[#allocation40_spill] sm:$0xff] }
 0x300   : > { %2278 = vadd.xlane.f32.xlu1 %v2277_v27  ;;  %6795 = vrcp.f32 %v2572_v54  ;;  %v10626_v37 = vadd.f32 %v666_v42, %v632_v63  ;;  %v2785_v4 = vmul.f32 %v11720_v2, %v10212_v48  ;;  %v2230_v51 = vmul.f32 %v6780_v36, %v10476_v16 }
 0x301   : > { %6797 = vrcp.f32 %v2573_v47  ;;  %v10633_v20 = vadd.f32 %v667_v62, %v633_v24  ;;  %v2850_v0 = vmul.f32 %v11721_v25, %v10218_v3  ;;  %v2816_v7 = vadd.f32 %v2784_v22, %v2750_v52  ;;  %v10654_v24 = vpop.xlane.xlu1 %2695 }
 0x302   : > { %v6782_v38 = vpop.eup %6781  ;;  %v5298_v19 = vmul.f32 -1.442695, %v10626_v37  ;;  %v2817_v63 = vadd.f32 %v2785_v4, %v2751_v17  ;;  %v2851_v42 = vmul.f32 %v11721_v25, %v10232_v40  ;;  %v10645_v36 = vsel %vm4072_vm2, %v10574_v43, %v10376_v23  ;;  %11724 = vst [vmem:[#allocation40_spill] sm:$0xff] %v10654_v24  ;;  %v11726_v43 = vld [vmem:[#allocation28_spill] sm:$0xff] }
 0x303   : > { %v6784_v27 = vpop.eup %6783  ;;  %v2231_v54 = vmul.f32 %v6782_v38, %v10478_v13  ;;  %v5299_v11 = vmul.f32 -1.442695, %v10633_v20  ;;  %v4077_v16 = vsel %vm4072_vm2, %v10579_v35, %v10378_v32  ;;  %v10650_v17 = vadd.f32 %v2850_v0, %v2816_v7  ;;  %v10656_v13 = vpop.xlane.xlu0 %2260 }
 0x304   : > { %v6786_v62 = vpop.eup %6785  ;;  %v2574_v52 = vadd.f32 1.0, %v6784_v27  ;;  %6799 = vpow2.f32 %v5298_v19  ;;  %v10652_v47 = vadd.f32 %v2851_v42, %v2817_v63  ;;  %11725 = vst [vmem:[#allocation55_spill] sm:$0xff] %v10656_v13  ;;  %v1440_v38 = vmul.f32 %v11726_v43, %v10447_v6  ;;  %v11727_v63 = vld [vmem:[#allocation29_spill] sm:$0xff] }
 0x305   : > { %11722 = vst [vmem:[#allocation37_spill] sm:$0xff] %v10650_v17  ;;  %v6788_v22 = vpop.eup %6787  ;;  %v2274_v4 = vadd.f32 %v2231_v54, %v2230_v51  ;;  %v920_v23 = vmul.f32 %v6786_v62, %v10500_v46  ;;  %6801 = vpow2.f32 %v5299_v11  ;;  %v5467_v35 = vmul.f32 -1.442695, %v10650_v17  ;;  %v11728_v11 = vld [vmem:[#allocation30_spill] sm:$0xff] }
 0x306   : > { %11723 = vst [vmem:[#allocation38_spill] sm:$0xff] %v10652_v47  ;;  %v2575_v32 = vadd.f32 1.0, %v6788_v22  ;;  %6803 = vrcp.f32 %v2574_v52  ;;  %v5468_v0 = vmul.f32 -1.442695, %v10652_v47  ;;  %v1441_v7 = vmul.f32 %v11726_v43, %v10450_v10 }
 0x307   : > { %v6790_v19 = vpop.eup %6789  ;;  %2275 = vadd.xlane.f32.xlu0 %v2274_v4  ;;  %v1474_v51 = vmul.f32 %v11727_v63, %v10456_v15  ;;  %v1475_v46 = vmul.f32 %v11727_v63, %v10464_v21  ;;  %v1540_v42 = vmul.f32 %v11728_v11, %v10467_v33  ;;  %v1541_v62 = vmul.f32 %v11728_v11, %v10470_v1 }
 0x308   : > { %v6792_v27 = vpop.eup %6791  ;;  %v921_v54 = vmul.f32 %v6790_v19, %v10505_v59  ;;  %6805 = vrcp.f32 %v2575_v32  ;;  %v1004_v52 = vmul.f32 %v11689_v57, %v10567_v8  ;;  %v1005_v17 = vmul.f32 %v11689_v57, %v10570_v12  ;;  %v10678_v59 = vpop.xlane.xlu1 %2698 }
 0x309   : > { %v6794_v22 = vpop.eup %6793  ;;  %v1262_v4 = vadd.f32 1.0, %v6792_v27  ;;  %6807 = vpow2.f32 %v5467_v35  ;;  %v1506_v13 = vadd.f32 %v1474_v51, %v1440_v38  ;;  %v1507_v24 = vadd.f32 %v1475_v46, %v1441_v7  ;;  %11729 = vst [vmem:[#allocation56_spill] sm:$0xff] %v10678_v59  ;;  %v10680_v32 = vpop.xlane.xlu0 %4006 }
 0x30a   : > { %v6796_v44 = vpop.eup %6795  ;;  %v966_v47 = vadd.f32 %v921_v54, %v920_v23  ;;  %v1263_v63 = vadd.f32 1.0, %v6794_v22  ;;  %6809 = vpow2.f32 %v5468_v0  ;;  %11730 = vst [vmem:[#allocation57_spill] sm:$0xff] %v10680_v32  ;;  %v1038_v38 = vmul.f32 %v11711_v50, %v10591_v14  ;;  %v11734_v54 = vld [vmem:[#allocation41_spill] sm:$0xff] }
 0x30b   : > { %v6798_v19 = vpop.eup %6797  ;;  %v2668_v11 = vmul.f32 %v6796_v44, %v10525_v58  ;;  %6811 = vrcp.f32 %v1262_v4  ;;  %v10683_v43 = vadd.f32 %v1540_v42, %v1506_v13  ;;  %v10685_v35 = vadd.f32 %v1541_v62, %v1507_v24  ;;  %v11735_v4 = vld [vmem:[#allocation42_spill] sm:$0xff] }
 0x30c   : > { %967 = vadd.xlane.f32.xlu1 %v966_v47  ;;  %v2669_v23 = vmul.f32 %v6798_v19, %v10530_v41  ;;  %6813 = vrcp.f32 %v1263_v63  ;;  %v1039_v57 = vmul.f32 %v11711_v50, %v10594_v29  ;;  %v1104_v44 = vmul.f32 %v11712_v34, %v10598_v9  ;;  %v11731_v63 = vld [vmem:[#allocation22_spill] sm:$0xff]  ;;  %v10702_v46 = vpop.xlane.xlu1 %3136 }
 0x30d   : > { %v5366_v0 = vmul.f32 -1.442695, %v10683_v43  ;;  %v5367_v7 = vmul.f32 -1.442695, %v10685_v35  ;;  %v1105_v58 = vmul.f32 %v11712_v34, %v10601_v39  ;;  %v1070_v41 = vadd.f32 %v1038_v38, %v1004_v52  ;;  %11732 = vst [vmem:[#allocation22_spill] sm:$0xff] %v10702_v46  ;;  %v10704_v50 = vpop.xlane.xlu0 %3133 }
 0x30e   : > { %v6800_v47 = vpop.eup %6799  ;;  %v2712_v24 = vadd.f32 %v2669_v23, %v2668_v11  ;;  %v1071_v13 = vadd.f32 %v1039_v57, %v1005_v17  ;;  %v10700_v51 = vsel %vm4089_vm3, %v4077_v16, %v11731_v63  ;;  %11733 = vst [vmem:[#allocation58_spill] sm:$0xff] %v10704_v50  ;;  %v3188_v62 = vmul.f32 %v11734_v54, %v10188_v45  ;;  %v11736_v57 = vld [vmem:[#allocation43_spill] sm:$0xff] }
 0x30f   : > { %v6802_v42 = vpop.eup %6801  ;;  %v826_v27 = vadd.f32 1.0, %v6800_v47  ;;  %6815 = vpow2.f32 %v5366_v0  ;;  %v3189_v34 = vmul.f32 %v11734_v54, %v10194_v55  ;;  %v10710_v52 = vadd.f32 %v1104_v44, %v1070_v41 }
 0x310   : > { %v6804_v11 = vpop.eup %6803  ;;  %2713 = vadd.xlane.f32.xlu0 %v2712_v24  ;;  %v827_v17 = vadd.f32 1.0, %v6802_v42  ;;  %6817 = vpow2.f32 %v5367_v7  ;;  %v10712_v16 = vadd.f32 %v1105_v58, %v1071_v13  ;;  %v3222_v19 = vmul.f32 %v11735_v4, %v10197_v53  ;;  %v10723_v7 = vpop.xlane.xlu1 %3574 }
 0x311   : > { %v2670_v22 = vmul.f32 %v6804_v11, %v10549_v31  ;;  %6819 = vrcp.f32 %v826_v27  ;;  %v3223_v45 = vmul.f32 %v11735_v4, %v10212_v48  ;;  %v5333_v55 = vmul.f32 -1.442695, %v10710_v52  ;;  %11737 = vst [vmem:[#allocation59_spill] sm:$0xff] %v10723_v7  ;;  %v10725_v44 = vpop.xlane.xlu0 %3571 }
 0x312   : > { %v6806_v23 = vpop.eup %6805  ;;  %6821 = vrcp.f32 %v827_v17  ;;  %v5334_v38 = vmul.f32 -1.442695, %v10712_v16  ;;  %v3288_v0 = vmul.f32 %v11736_v57, %v10218_v3  ;;  %11738 = vst [vmem:[#allocation60_spill] sm:$0xff] %v10725_v44  ;;  %v3254_v53 = vadd.f32 %v3222_v19, %v3188_v62 }
 0x313   : > { %v6808_v31 = vpop.eup %6807  ;;  %v2671_v58 = vmul.f32 %v6806_v23, %v10554_v30  ;;  %v3255_v47 = vadd.f32 %v3223_v45, %v3189_v34  ;;  %v3289_v48 = vmul.f32 %v11736_v57, %v10232_v40  ;;  %6823 = vpow2.f32 %v5333_v55 }
 0x314   : > { %v6810_v24 = vpop.eup %6809  ;;  %v3010_v41 = vadd.f32 1.0, %v6808_v31  ;;  %v2752_v13 = vmul.f32 %v11717_v61, %v10266_v28  ;;  %v2753_v3 = vmul.f32 %v11717_v61, %v10269_v5  ;;  %6825 = vpow2.f32 %v5334_v38  ;;  %v10741_v17 = vpop.xlane.xlu1 %4012 }
 0x315   : > { %v6812_v63 = vpop.eup %6811  ;;  %v2715_v42 = vadd.f32 %v2671_v58, %v2670_v22  ;;  %v3011_v27 = vadd.f32 1.0, %v6810_v24  ;;  %v10734_v11 = vadd.f32 %v3288_v0, %v3254_v53  ;;  %v10737_v40 = vadd.f32 %v3289_v48, %v3255_v47  ;;  %11739 = vst [vmem:[#allocation61_spill] sm:$0xff] %v10741_v17  ;;  %v10743_v28 = vpop.xlane.xlu0 %4009  ;;  %v11743_v48 = vld [vmem:[#allocation24_spill] sm:$0xff]  ;;  %v11744_v24 = vld [vmem:[#allocation25_spill] sm:$0xff] }
 0x316   : > { %v6814_v30 = vpop.eup %6813  ;;  %v1358_v62 = vmul.f32 %v6812_v63, %v10586_v18  ;;  %6827 = vrcp.f32 %v3010_v41  ;;  %v2786_v34 = vmul.f32 %v11720_v2, %v10282_v49  ;;  %11740 = vst [vmem:[#allocation62_spill] sm:$0xff] %v10743_v28  ;;  %v2787_v19 = vmul.f32 %v11720_v2, %v10291_v26  ;;  %v11741_v49 = vld [vmem:[#allocation46_spill] sm:$0xff] }
 0x317   : > { %2716 = vadd.xlane.f32.xlu1 %v2715_v42  ;;  %v1359_v5 = vmul.f32 %v6814_v30, %v10588_v60  ;;  %6829 = vrcp.f32 %v3011_v27  ;;  %v5502_v22 = vmul.f32 -1.442695, %v10734_v11  ;;  %v5503_v18 = vmul.f32 -1.442695, %v10737_v40  ;;  %v11742_v60 = vld [vmem:[#allocation23_spill] sm:$0xff] }
 0x318   : > { %v2818_v45 = vadd.f32 %v2786_v34, %v2752_v13  ;;  %v2852_v23 = vmul.f32 %v11721_v25, %v10294_v56  ;;  %v2853_v55 = vmul.f32 %v11721_v25, %v11741_v49  ;;  %v2819_v31 = vadd.f32 %v2787_v19, %v2753_v3  ;;  %v10766_v41 = vpop.xlane.xlu1 %1387 }
 0x319   : > { %v6816_v38 = vpop.eup %6815  ;;  %v1404_v0 = vadd.f32 %v1359_v5, %v1358_v62  ;;  %6831 = vpow2.f32 %v5502_v22  ;;  %v10757_v58 = vsel %vm4089_vm3, %v10645_v36, %v11742_v60  ;;  %v10764_v56 = vsel %vm4038_vm0, %v11744_v24, %v11743_v48  ;;  %11745 = vst [vmem:[#allocation46_spill] sm:$0xff] %v10766_v41  ;;  %v10768_v13 = vpop.xlane.xlu0 %949  ;;  %v11747_v36 = vld [vmem:[#allocation31_spill] sm:$0xff]  ;;  %v11748_v22 = vld [vmem:[#allocation32_spill] sm:$0xff] }
 0x31a   : > { %v6818_v53 = vpop.eup %6817  ;;  %v1700_v26 = vadd.f32 1.0, %v6816_v38  ;;  %6833 = vpow2.f32 %v5503_v18  ;;  %v10759_v47 = vadd.f32 %v2852_v23, %v2818_v45  ;;  %11746 = vst [vmem:[#allocation23_spill] sm:$0xff] %v10768_v13  ;;  %v10770_v42 = vadd.f32 %v2853_v55, %v2819_v31  ;;  %v11749_v38 = vld [vmem:[#allocation33_spill] sm:$0xff]  ;;  %v7224_v41 = vld [vmem:[%s7757_s30 + $0x268] sm:$0xff] }
 0x31b   : > { %v6820_v3 = vpop.eup %6819  ;;  %1405 = vadd.xlane.f32.xlu0 %v1404_v0  ;;  %v1701_v63 = vadd.f32 1.0, %v6818_v53  ;;  %v1878_v27 = vmul.f32 %v11747_v36, %v10447_v6  ;;  %v1879_v30 = vmul.f32 %v11747_v36, %v10450_v10  ;;  %v1912_v19 = vmul.f32 %v11748_v22, %v10456_v15 }
 0x31c   : > { %v6822_v62 = vpop.eup %6821  ;;  %v922_v34 = vmul.f32 %v6820_v3, %v10626_v37  ;;  %6835 = vrcp.f32 %v1700_v26  ;;  %v5469_v5 = vmul.f32 -1.442695, %v10759_v47  ;;  %v5470_v45 = vmul.f32 -1.442695, %v10770_v42  ;;  %v10790_v48 = vpop.xlane.xlu1 %1390 }
 0x31d   : > { %v923_v18 = vmul.f32 %v6822_v62, %v10633_v20  ;;  %6837 = vrcp.f32 %v1701_v63  ;;  %v1913_v23 = vmul.f32 %v11748_v22, %v10464_v21  ;;  %v6824_v49 = vpop.eup %6823  ;;  %v1944_v55 = vadd.f32 %v1912_v19, %v1878_v27  ;;  %v10788_v31 = vpop.xlane.xlu0 %952  ;;  %11751 = vst [vmem:[#allocation25_spill] sm:$0xff] %v10790_v48  ;;  %v11752_v27 = vld [vmem:[#allocation28_spill] sm:$0xff] }
 0x31e   : > { %6839 = vpow2.f32 %v5469_v5  ;;  %v1978_v37 = vmul.f32 %v11749_v38, %v10467_v33  ;;  %v1979_v0 = vmul.f32 %v11749_v38, %v10470_v1  ;;  %11750 = vst [vmem:[#allocation24_spill] sm:$0xff] %v10788_v31  ;;  %v6826_v60 = vpop.eup %6825  ;;  %v1264_v20 = vadd.f32 1.0, %v6824_v49  ;;  %v11753_v31 = vld [vmem:[#allocation37_spill] sm:$0xff] }
 0x31f   : > { %v969_v53 = vadd.f32 %v923_v18, %v922_v34  ;;  %6841 = vpow2.f32 %v5470_v45  ;;  %v1945_v26 = vadd.f32 %v1913_v23, %v1879_v30  ;;  %v1265_v3 = vadd.f32 1.0, %v6826_v60  ;;  %v11754_v30 = vld [vmem:[#allocation29_spill] sm:$0xff]  ;;  %v11755_v45 = vld [vmem:[#allocation38_spill] sm:$0xff] }
 0x320   : > { %v6828_v24 = vpop.eup %6827  ;;  %v10792_v63 = vadd.f32 %v1978_v37, %v1944_v55  ;;  %v1442_v62 = vmul.f32 %v11752_v27, %v10567_v8  ;;  %v1443_v5 = vmul.f32 %v11752_v27, %v10570_v12  ;;  %6843 = vrcp.f32 %v1264_v20 }
 0x321   : > { %v6830_v19 = vpop.eup %6829  ;;  %970 = vadd.xlane.f32.xlu1 %v969_v53  ;;  %v3106_v13 = vmul.f32 %v6828_v24, %v11753_v31  ;;  %v10799_v34 = vadd.f32 %v1979_v0, %v1945_v26  ;;  %v1476_v18 = vmul.f32 %v11754_v30, %v10591_v14  ;;  %6845 = vrcp.f32 %v1265_v3  ;;  %v11756_v31 = vld [vmem:[#allocation30_spill] sm:$0xff] }
 0x322   : > { %v3107_v23 = vmul.f32 %v6830_v19, %v11755_v45  ;;  %v5401_v49 = vmul.f32 -1.442695, %v10792_v63  ;;  %v1477_v55 = vmul.f32 %v11754_v30, %v10594_v29  ;;  %v1542_v20 = vmul.f32 %v11756_v31, %v10598_v9  ;;  %v10812_v19 = vpop.xlane.xlu0 %1825 }
 0x323   : > { %v6832_v37 = vpop.eup %6831  ;;  %v5402_v60 = vmul.f32 -1.442695, %v10799_v34  ;;  %v1508_v53 = vadd.f32 %v1476_v18, %v1442_v62  ;;  %v1543_v0 = vmul.f32 %v11756_v31, %v10601_v39  ;;  %11757 = vst [vmem:[#allocation31_spill] sm:$0xff] %v10812_v19  ;;  %v11758_v62 = vld [vmem:[#allocation50_spill] sm:$0xff]  ;;  %v10821_v31 = vpop.xlane.xlu1 %1828 }
 0x324   : > { %v6834_v26 = vpop.eup %6833  ;;  %v3150_v24 = vadd.f32 %v3107_v23, %v3106_v13  ;;  %v3448_v3 = vadd.f32 1.0, %v6832_v37  ;;  %6847 = vpow2.f32 %v5401_v49  ;;  %v1509_v27 = vadd.f32 %v1477_v55, %v1443_v5  ;;  %11759 = vst [vmem:[#allocation32_spill] sm:$0xff] %v10821_v31  ;;  %v7219_v5 = vld [vmem:[%s7757_s30 + $0x240] sm:$0xff]  ;;  %v11760_v23 = vld [vmem:[#allocation39_spill] sm:$0xff] }
 0x325   : > { %v3449_v30 = vadd.f32 1.0, %v6834_v26  ;;  %6849 = vpow2.f32 %v5402_v60  ;;  %v10814_v45 = vadd.f32 %v1542_v20, %v1508_v53  ;;  %v10819_v18 = vsel %vm4106_vm4, %v10700_v51, %v11758_v62  ;;  %v7220_v55 = vld [vmem:[%s7757_s30 + $0x248] sm:$0xff]  ;;  %v7221_v20 = vld [vmem:[%s7757_s30 + $0x250] sm:$0xff]  ;;  %v7222_v62 = vld [vmem:[%s7757_s30 + $0x258] sm:$0xff] }
 0x326   : > { %v6836_v48 = vpop.eup %6835  ;;  %3151 = vadd.xlane.f32.xlu0 %v3150_v24  ;;  %6851 = vrcp.f32 %v3448_v3  ;;  %v10823_v13 = vadd.f32 %v1543_v0, %v1509_v27  ;;  %v3626_v49 = vmul.f32 %v7219_v5, %v11760_v23  ;;  %v3627_v37 = vmul.f32 %v7220_v55, %v11760_v23  ;;  %v11761_v26 = vld [vmem:[#allocation44_spill] sm:$0xff]  ;;  %v7223_v19 = vld [vmem:[%s7757_s30 + $0x260] sm:$0xff] }
 0x327   : > { %v6838_v60 = vpop.eup %6837  ;;  %v1796_v53 = vmul.f32 %v6836_v48, %v10683_v43  ;;  %6853 = vrcp.f32 %v3449_v30  ;;  %v5368_v51 = vmul.f32 -1.442695, %v10814_v45  ;;  %v3660_v24 = vmul.f32 %v7221_v20, %v11761_v26  ;;  %v11762_v55 = vld [vmem:[#allocation45_spill] sm:$0xff] }
 0x328   : > { %v6840_v3 = vpop.eup %6839  ;;  %v1797_v0 = vmul.f32 %v6838_v60, %v10685_v35  ;;  %v5369_v27 = vmul.f32 -1.442695, %v10823_v13  ;;  %v3661_v5 = vmul.f32 %v7222_v62, %v11761_v26  ;;  %v3726_v31 = vmul.f32 %v7223_v19, %v11762_v55  ;;  %v10841_v60 = vpop.xlane.xlu0 %2263  ;;  %v10846_v19 = vld [vmem:[%s7757_s30 + $0x270] sm:$0xff] }
 0x329   : > { %v6842_v43 = vpop.eup %6841  ;;  %v3012_v48 = vadd.f32 1.0, %v6840_v3  ;;  %6855 = vpow2.f32 %v5368_v51  ;;  %v3692_v30 = vadd.f32 %v3660_v24, %v3626_v49  ;;  %v3727_v20 = vmul.f32 %v7224_v41, %v11762_v55  ;;  %11763 = vst [vmem:[#allocation33_spill] sm:$0xff] %v10841_v60  ;;  %v10851_v51 = vld [vmem:[%s7757_s30 + $0x278] sm:$0xff]  ;;  %v10861_v3 = vld [vmem:[%s7757_s30 + $0x280] sm:$0xff] }
 0x32a   : > { %v1842_v28 = vadd.f32 %v1797_v0, %v1796_v53  ;;  %v3013_v17 = vadd.f32 1.0, %v6842_v43  ;;  %6857 = vpow2.f32 %v5369_v27  ;;  %v3693_v35 = vadd.f32 %v3661_v5, %v3627_v37  ;;  %v6844_v62 = vpop.eup %6843  ;;  %v10855_v53 = vpop.xlane.xlu1 %2266  ;;  %v10868_v43 = vld [vmem:[%s7757_s30 + $0x288] sm:$0xff] }
 0x32b   : > { %6859 = vrcp.f32 %v3012_v48  ;;  %v10843_v44 = vadd.f32 %v3726_v31, %v3692_v30  ;;  %v3190_v49 = vmul.f32 %v10846_v19, %v11734_v54  ;;  %v3191_v41 = vmul.f32 %v10851_v51, %v11734_v54  ;;  %11764 = vst [vmem:[#allocation28_spill] sm:$0xff] %v10855_v53  ;;  %v6846_v37 = vpop.eup %6845 }
 0x32c   : > { %1843 = vadd.xlane.f32.xlu1 %v1842_v28  ;;  %v1360_v24 = vmul.f32 %v6844_v62, %v10710_v52  ;;  %6861 = vrcp.f32 %v3013_v17  ;;  %v10858_v31 = vadd.f32 %v3727_v20, %v3693_v35  ;;  %v3224_v0 = vmul.f32 %v10861_v3, %v11735_v4  ;;  %v10873_v28 = vld [vmem:[%s7757_s30 + $0x290] sm:$0xff]  ;;  %v10879_v35 = vld [vmem:[%s7757_s30 + $0x298] sm:$0xff] }
 0x32d   : > { %v1361_v27 = vmul.f32 %v6846_v37, %v10712_v16  ;;  %v5537_v5 = vmul.f32 -1.442695, %v10843_v44  ;;  %v3225_v48 = vmul.f32 %v10868_v43, %v11735_v4  ;;  %v3290_v52 = vmul.f32 %v10873_v28, %v11736_v57  ;;  %v11765_v62 = vld [vmem:[#allocation51_spill] sm:$0xff] }
 0x32e   : > { %v6848_v17 = vpop.eup %6847  ;;  %v5538_v30 = vmul.f32 -1.442695, %v10858_v31  ;;  %v3256_v20 = vadd.f32 %v3224_v0, %v3190_v49  ;;  %v3291_v16 = vmul.f32 %v10879_v35, %v11736_v57  ;;  %v10886_v37 = vsel %vm4055_vm1, %v10764_v56, %v11765_v62  ;;  %v11766_v49 = vld [vmem:[#allocation52_spill] sm:$0xff]  ;;  %v11767_v0 = vld [vmem:[#allocation49_spill] sm:$0xff]  ;;  %v10895_v57 = vpop.xlane.xlu0 %2701 }
 0x32f   : > { %v6850_v60 = vpop.eup %6849  ;;  %v1407_v53 = vadd.f32 %v1361_v27, %v1360_v24  ;;  %v2138_v7 = vadd.f32 1.0, %v6848_v17  ;;  %6863 = vpow2.f32 %v5537_v5  ;;  %v3257_v50 = vadd.f32 %v3225_v48, %v3191_v41  ;;  %v11768_v41 = vld [vmem:[#allocation34_spill] sm:$0xff]  ;;  %v10902_v27 = vpop.xlane.xlu1 %955 }
 0x330   : > { %v6852_v46 = vpop.eup %6851  ;;  %v2139_v32 = vadd.f32 1.0, %v6850_v60  ;;  %6865 = vpow2.f32 %v5538_v30  ;;  %v10888_v59 = vadd.f32 %v3290_v52, %v3256_v20  ;;  %v10893_v4 = vsel %vm4038_vm0, %v11767_v0, %v11766_v49 }
 0x331   : > { %v6854_v54 = vpop.eup %6853  ;;  %1408 = vadd.xlane.f32.xlu0 %v1407_v53  ;;  %v3544_v56 = vmul.f32 %v6852_v46, %v10734_v11  ;;  %6867 = vrcp.f32 %v2138_v7  ;;  %v10898_v24 = vadd.f32 %v3291_v16, %v3257_v50  ;;  %v2316_v60 = vmul.f32 %v11768_v41, %v10447_v6  ;;  %v11769_v46 = vld [vmem:[#allocation35_spill] sm:$0xff]  ;;  %v11770_v6 = vld [vmem:[#allocation36_spill] sm:$0xff] }
 0x332   : > { %v3545_v5 = vmul.f32 %v6854_v54, %v10737_v40  ;;  %6869 = vrcp.f32 %v2139_v32  ;;  %v5504_v48 = vmul.f32 -1.442695, %v10888_v59  ;;  %v2317_v52 = vmul.f32 %v11768_v41, %v10450_v10  ;;  %v10922_v0 = vpop.xlane.xlu0 %1393 }
 0x333   : > { %v6856_v17 = vpop.eup %6855  ;;  %v5505_v53 = vmul.f32 -1.442695, %v10898_v24  ;;  %v2350_v50 = vmul.f32 %v11769_v46, %v10456_v15  ;;  %v2351_v7 = vmul.f32 %v11769_v46, %v10464_v21  ;;  %v2416_v11 = vmul.f32 %v11770_v6, %v10467_v33 }
 0x334   : > { %v6858_v30 = vpop.eup %6857  ;;  %v3588_v54 = vadd.f32 %v3545_v5, %v3544_v56  ;;  %v1702_v32 = vadd.f32 1.0, %v6856_v17  ;;  %6871 = vpow2.f32 %v5504_v48  ;;  %v2417_v40 = vmul.f32 %v11770_v6, %v10470_v1  ;;  %v10929_v5 = vpop.xlane.xlu1 %2704 }
 0x335   : > { %v6860_v10 = vpop.eup %6859  ;;  %v1703_v20 = vadd.f32 1.0, %v6858_v30  ;;  %6873 = vpow2.f32 %v5505_v53  ;;  %v2382_v16 = vadd.f32 %v2350_v50, %v2316_v60  ;;  %v2383_v62 = vadd.f32 %v2351_v7, %v2317_v52  ;;  %v11771_v7 = vld [vmem:[#allocation53_spill] sm:$0xff] }
 0x336   : > { %v6862_v49 = vpop.eup %6861  ;;  %3589 = vadd.xlane.f32.xlu1 %v3588_v54  ;;  %v3108_v15 = vmul.f32 %v6860_v10, %v10759_v47  ;;  %6875 = vrcp.f32 %v1702_v32  ;;  %v1880_v21 = vmul.f32 %v11747_v36, %v10567_v8  ;;  %v1881_v33 = vmul.f32 %v11747_v36, %v10570_v12 }
 0x337   : > { %v3109_v1 = vmul.f32 %v6862_v49, %v10770_v42  ;;  %6877 = vrcp.f32 %v1703_v20  ;;  %v10925_v56 = vadd.f32 %v2416_v11, %v2382_v16  ;;  %v10927_v60 = vadd.f32 %v2417_v40, %v2383_v62  ;;  %v11772_v40 = vld [vmem:[#allocation54_spill] sm:$0xff] }
 0x338   : > { %v1914_v47 = vmul.f32 %v11748_v22, %v10591_v14  ;;  %v1915_v48 = vmul.f32 %v11748_v22, %v10594_v29  ;;  %v1980_v36 = vmul.f32 %v11749_v38, %v10598_v9  ;;  %v1981_v52 = vmul.f32 %v11749_v38, %v10601_v39 }
 0x339   : > { %v6864_v42 = vpop.eup %6863  ;;  %v3153_v17 = vadd.f32 %v3109_v1, %v3108_v15  ;;  %v5436_v53 = vmul.f32 -1.442695, %v10925_v56  ;;  %v5437_v50 = vmul.f32 -1.442695, %v10927_v60  ;;  %v10944_v11 = vsel %vm4123_vm5, %v10819_v18, %v11771_v7 }
 0x33a   : > { %v6866_v30 = vpop.eup %6865  ;;  %v3886_v54 = vadd.f32 1.0, %v6864_v42  ;;  %v1946_v22 = vadd.f32 %v1914_v47, %v1880_v21  ;;  %v1947_v32 = vadd.f32 %v1915_v48, %v1881_v33  ;;  %v10949_v10 = vsel %vm4106_vm4, %v10757_v58, %v11772_v40  ;;  %v10960_v58 = vpop.xlane.xlu0 %3139 }
 0x33b   : > { %v6868_v38 = vpop.eup %6867  ;;  %3154 = vadd.xlane.f32.xlu0 %v3153_v17  ;;  %v3887_v20 = vadd.f32 1.0, %v6866_v30  ;;  %6879 = vpow2.f32 %v5436_v53  ;;  %v2318_v16 = vmul.f32 %v11768_v41, %v10567_v8  ;;  %v2319_v18 = vmul.f32 %v11768_v41, %v10570_v12  ;;  %v10967_v41 = vpop.xlane.xlu1 %958 }
 0x33c   : > { %v6870_v62 = vpop.eup %6869  ;;  %v2234_v49 = vmul.f32 %v6868_v38, %v10792_v63  ;;  %6881 = vrcp.f32 %v3886_v54  ;;  %v10956_v15 = vadd.f32 %v1980_v36, %v1946_v22  ;;  %v10958_v21 = vadd.f32 %v1981_v52, %v1947_v32 }
 0x33d   : > { %v2235_v33 = vmul.f32 %v6870_v62, %v10799_v34  ;;  %6883 = vrcp.f32 %v3887_v20  ;;  %v2352_v1 = vmul.f32 %v11769_v46, %v10591_v14  ;;  %v2353_v47 = vmul.f32 %v11769_v46, %v10594_v29 }
 0x33e   : > { %v6872_v48 = vpop.eup %6871  ;;  %6885 = vpow2.f32 %v5437_v50  ;;  %v5403_v63 = vmul.f32 -1.442695, %v10956_v15  ;;  %v5404_v36 = vmul.f32 -1.442695, %v10958_v21  ;;  %v2418_v52 = vmul.f32 %v11770_v6, %v10598_v9 }
 0x33f   : > { %v6874_v42 = vpop.eup %6873  ;;  %v2280_v34 = vadd.f32 %v2235_v33, %v2234_v49  ;;  %v3450_v17 = vadd.f32 1.0, %v6872_v48  ;;  %v2384_v53 = vadd.f32 %v2352_v1, %v2318_v16  ;;  %v2385_v7 = vadd.f32 %v2353_v47, %v2319_v18  ;;  %v10987_v18 = vpop.xlane.xlu0 %1396  ;;  %v11773_v48 = vld [vmem:[#allocation26_spill] sm:$0xff] }
 0x340   : > { %v6876_v30 = vpop.eup %6875  ;;  %v3451_v54 = vadd.f32 1.0, %v6874_v42  ;;  %6887 = vpow2.f32 %v5403_v63  ;;  %v2419_v46 = vmul.f32 %v11770_v6, %v10601_v39  ;;  %v3628_v50 = vmul.f32 %v10846_v19, %v11760_v23 }
 0x341   : > { %v6878_v22 = vpop.eup %6877  ;;  %2281 = vadd.xlane.f32.xlu1 %v2280_v34  ;;  %v1798_v32 = vmul.f32 %v6876_v30, %v10814_v45  ;;  %6889 = vrcp.f32 %v3450_v17  ;;  %v10978_v40 = vadd.f32 %v2418_v52, %v2384_v53  ;;  %v3629_v38 = vmul.f32 %v10851_v51, %v11760_v23  ;;  %v10994_v51 = vpop.xlane.xlu1 %1831 }
 0x342   : > { %v1799_v20 = vmul.f32 %v6878_v22, %v10823_v13  ;;  %6891 = vrcp.f32 %v3451_v54  ;;  %v10983_v16 = vadd.f32 %v2419_v46, %v2385_v7  ;;  %v3662_v6 = vmul.f32 %v10861_v3, %v11761_v26 }
 0x343   : > { %6893 = vpow2.f32 %v5404_v36  ;;  %v5438_v19 = vmul.f32 -1.442695, %v10978_v40  ;;  %v3663_v45 = vmul.f32 %v10868_v43, %v11761_v26  ;;  %v3728_v62 = vmul.f32 %v10873_v28, %v11762_v55  ;;  %v11774_v43 = vld [vmem:[#allocation27_spill] sm:$0xff] }
 0x344   : > { %v1845_v13 = vadd.f32 %v1799_v20, %v1798_v32  ;;  %v5439_v49 = vmul.f32 -1.442695, %v10983_v16  ;;  %v3694_v33 = vadd.f32 %v3662_v6, %v3628_v50  ;;  %v3729_v3 = vmul.f32 %v10879_v35, %v11762_v55  ;;  %v11024_v50 = vpop.xlane.xlu0 %3142 }
 0x345   : > { %v6880_v1 = vpop.eup %6879  ;;  %6895 = vpow2.f32 %v5438_v19  ;;  %v3695_v47 = vadd.f32 %v3663_v45, %v3629_v38  ;;  %v11002_v63 = vsel %vm4072_vm2, %v10886_v37, %v11773_v48  ;;  %v11007_v28 = vsel %vm4055_vm1, %v10893_v4, %v11774_v43  ;;  %v11029_v20 = vpop.xlane.xlu1 %3577  ;;  %v11044_v43 = vld [vmem:[%s7757_s30 + $0x2a8] sm:$0xff] }
 0x346   : > { %v6882_v36 = vpop.eup %6881  ;;  %1846 = vadd.xlane.f32.xlu0 %v1845_v13  ;;  %v2576_v52 = vadd.f32 1.0, %v6880_v1  ;;  %6897 = vpow2.f32 %v5439_v49  ;;  %v11009_v42 = vadd.f32 %v3728_v62, %v3694_v33  ;;  %v2756_v35 = vmul.f32 %v11717_v61, %v10567_v8  ;;  %v11036_v33 = vld [vmem:[%s7757_s30 + $0x2a0] sm:$0xff] }
 0x347   : > { %v6884_v34 = vpop.eup %6883  ;;  %v3982_v17 = vmul.f32 %v6882_v36, %v10843_v44  ;;  %v11014_v53 = vadd.f32 %v3729_v3, %v3695_v47  ;;  %v2757_v37 = vmul.f32 %v11717_v61, %v10570_v12  ;;  %v2790_v4 = vmul.f32 %v11720_v2, %v10591_v14 }
 0x348   : > { %v6886_v7 = vpop.eup %6885  ;;  %v3983_v30 = vmul.f32 %v6884_v34, %v10858_v31  ;;  %6899 = vrcp.f32 %v2576_v52  ;;  %v5539_v54 = vmul.f32 -1.442695, %v11009_v42  ;;  %v2791_v46 = vmul.f32 %v11720_v2, %v10594_v29 }
 0x349   : > { %v2577_v44 = vadd.f32 1.0, %v6886_v7  ;;  %v5540_v22 = vmul.f32 -1.442695, %v11014_v53  ;;  %v2822_v32 = vadd.f32 %v2790_v4, %v2756_v35  ;;  %v2856_v38 = vmul.f32 %v11721_v25, %v10598_v9  ;;  %v11057_v7 = vld [vmem:[%s7757_s30 + $0x2b8] sm:$0xff] }
 0x34a   : > { %v6888_v6 = vpop.eup %6887  ;;  %v4026_v31 = vadd.f32 %v3983_v30, %v3982_v17  ;;  %6901 = vpow2.f32 %v5539_v54  ;;  %v2823_v19 = vadd.f32 %v2791_v46, %v2757_v37  ;;  %v2857_v45 = vmul.f32 %v11721_v25, %v10601_v39  ;;  %v11051_v17 = vld [vmem:[%s7757_s30 + $0x2b0] sm:$0xff]  ;;  %v11062_v30 = vld [vmem:[%s7757_s30 + $0x2c0] sm:$0xff]  ;;  %v11066_v54 = vpop.xlane.xlu0 %1834 }
 0x34b   : > { %v6890_v62 = vpop.eup %6889  ;;  %6903 = vrcp.f32 %v2577_v44  ;;  %v2140_v13 = vadd.f32 1.0, %v6888_v6  ;;  %v11033_v49 = vadd.f32 %v2856_v38, %v2822_v32  ;;  %v2754_v3 = vmul.f32 %v11036_v33, %v11717_v61  ;;  %v11069_v32 = vld [vmem:[%s7757_s30 + $0x2c8] sm:$0xff]  ;;  %v11073_v6 = vpop.xlane.xlu1 %2269 }
 0x34c   : > { %v6892_v1 = vpop.eup %6891  ;;  %4027 = vadd.xlane.f32.xlu1 %v4026_v31  ;;  %v3546_v47 = vmul.f32 %v6890_v62, %v10888_v59  ;;  %6905 = vpow2.f32 %v5540_v22  ;;  %v11041_v48 = vadd.f32 %v2857_v45, %v2823_v19  ;;  %v2755_v36 = vmul.f32 %v11044_v43, %v11717_v61  ;;  %v11775_v45 = vld [vmem:[#allocation47_spill] sm:$0xff] }
 0x34d   : > { %v6894_v52 = vpop.eup %6893  ;;  %v3547_v35 = vmul.f32 %v6892_v1, %v10898_v24  ;;  %6907 = vrcp.f32 %v2140_v13  ;;  %v5473_v34 = vmul.f32 -1.442695, %v11033_v49  ;;  %v2788_v59 = vmul.f32 %v11051_v17, %v11720_v2 }
 0x34e   : > { %v2141_v37 = vadd.f32 1.0, %v6894_v52  ;;  %v5474_v4 = vmul.f32 -1.442695, %v11041_v48  ;;  %v2789_v61 = vmul.f32 %v11057_v7, %v11720_v2  ;;  %v2854_v24 = vmul.f32 %v11062_v30, %v11721_v25 }
 0x34f   : > { %v6896_v46 = vpop.eup %6895  ;;  %v3591_v44 = vadd.f32 %v3547_v35, %v3546_v47  ;;  %6909 = vpow2.f32 %v5473_v34  ;;  %v2820_v22 = vadd.f32 %v2788_v59, %v2754_v3  ;;  %v2855_v38 = vmul.f32 %v11069_v32, %v11721_v25  ;;  %v11776_v3 = vld [vmem:[#allocation48_spill] sm:$0xff] }
 0x350   : > { %v6898_v31 = vpop.eup %6897  ;;  %6911 = vrcp.f32 %v2141_v37  ;;  %v2578_v2 = vadd.f32 1.0, %v6896_v46  ;;  %v2821_v19 = vadd.f32 %v2789_v61, %v2755_v36  ;;  %v4145_v62 = vsel %vm4140_vm6, %v10944_v11, %v11775_v45  ;;  %v11777_v36 = vld [vmem:[#allocation41_spill] sm:$0xff]  ;;  %v11779_v46 = vld [vmem:[#allocation43_spill] sm:$0xff] }
 0x351   : > { %3592 = vadd.xlane.f32.xlu0 %v3591_v44  ;;  %v2579_v13 = vadd.f32 1.0, %v6898_v31  ;;  %6913 = vpow2.f32 %v5474_v4  ;;  %v11078_v1 = vadd.f32 %v2854_v24, %v2820_v22  ;;  %v11083_v47 = vsel %vm4123_vm5, %v10949_v10, %v11776_v3  ;;  %5704 = vmatprep.mubr.msk.f32.mxu0 %vm4158_vm7, %v4145_v62  ;;  %v11778_v10 = vld [vmem:[#allocation42_spill] sm:$0xff]  ;;  %v11103_v44 = vpop.xlane.xlu0 %3580  ;;  %v11107_v31 = vpop.xlane.xlu1 %4015 }
 0x352   : > { %v6900_v25 = vpop.eup %6899  ;;  %6915 = vrcp.f32 %v2578_v2  ;;  %v11086_v52 = vadd.f32 %v2855_v38, %v2821_v19  ;;  %v3194_v35 = vmul.f32 %v11777_v36, %v10567_v8  ;;  %v3195_v11 = vmul.f32 %v11777_v36, %v10570_v12 }
 0x353   : > { %v2672_v34 = vmul.f32 %v6900_v25, %v10925_v56  ;;  %6917 = vrcp.f32 %v2579_v13  ;;  %v5471_v59 = vmul.f32 -1.442695, %v11078_v1  ;;  %v3228_v37 = vmul.f32 %v11778_v10, %v10591_v14 }
 0x354   : > { %v6902_v4 = vpop.eup %6901  ;;  %v5472_v61 = vmul.f32 -1.442695, %v11086_v52  ;;  %v3229_v24 = vmul.f32 %v11778_v10, %v10594_v29  ;;  %v3294_v8 = vmul.f32 %v11779_v46, %v10598_v9  ;;  %v3295_v12 = vmul.f32 %v11779_v46, %v10601_v39 }
 0x355   : > { %v6904_v56 = vpop.eup %6903  ;;  %v3888_v22 = vadd.f32 1.0, %v6902_v4  ;;  %6919 = vpow2.f32 %v5471_v59  ;;  %v3260_v38 = vadd.f32 %v3228_v37, %v3194_v35  ;;  %v3192_v14 = vmul.f32 %v11036_v33, %v11777_v36 }
 0x356   : > { %v6906_v2 = vpop.eup %6905  ;;  %v2673_v29 = vmul.f32 %v6904_v56, %v10927_v60  ;;  %6921 = vpow2.f32 %v5472_v61  ;;  %v3261_v19 = vadd.f32 %v3229_v24, %v3195_v11  ;;  %v3193_v9 = vmul.f32 %v11044_v43, %v11777_v36 }
 0x357   : > { %v6908_v39 = vpop.eup %6907  ;;  %v3889_v45 = vadd.f32 1.0, %v6906_v2  ;;  %6923 = vrcp.f32 %v3888_v22  ;;  %v11112_v62 = vadd.f32 %v3294_v8, %v3260_v38  ;;  %v3226_v13 = vmul.f32 %v11051_v17, %v11778_v10  ;;  %v11127_v8 = vpop.xlane.xlu0 %2272  ;;  %v11780_v22 = vld [vmem:[#allocation40_spill] sm:$0xff] }
 0x358   : > { %v2718_v3 = vadd.f32 %v2673_v29, %v2672_v34  ;;  %v2236_v25 = vmul.f32 %v6908_v39, %v10956_v15  ;;  %v11117_v35 = vadd.f32 %v3295_v12, %v3261_v19  ;;  %v3227_v60 = vmul.f32 %v11057_v7, %v11778_v10  ;;  %v11781_v19 = vld [vmem:[#allocation55_spill] sm:$0xff] }
 0x359   : > { %v6910_v11 = vpop.eup %6909  ;;  %6925 = vrcp.f32 %v3889_v45  ;;  %v5508_v36 = vmul.f32 -1.442695, %v11112_v62  ;;  %v3258_v59 = vadd.f32 %v3226_v13, %v3192_v14  ;;  %v3292_v37 = vmul.f32 %v11062_v30, %v11779_v46  ;;  %v11137_v14 = vpop.xlane.xlu1 %2707 }
 0x35a   : > { %v6912_v4 = vpop.eup %6911  ;;  %2719 = vadd.xlane.f32.xlu1 %v2718_v3  ;;  %v3016_v61 = vadd.f32 1.0, %v6910_v11  ;;  %v5509_v34 = vmul.f32 -1.442695, %v11117_v35  ;;  %v3259_v24 = vadd.f32 %v3227_v60, %v3193_v9  ;;  %v3293_v15 = vmul.f32 %v11069_v32, %v11779_v46  ;;  %v7237_v60 = vld [vmem:[%s7757_s30 + $0x2d0] sm:$0xff] }
 0x35b   : > { %v6914_v10 = vpop.eup %6913  ;;  %v2237_v12 = vmul.f32 %v6912_v4, %v10958_v21  ;;  %6927 = vpow2.f32 %v5508_v36  ;;  %v11130_v56 = vadd.f32 %v3292_v37, %v3258_v59  ;;  %v11135_v38 = vsel %vm4089_vm3, %v11002_v63, %v11780_v22  ;;  %v7240_v37 = vld [vmem:[%s7757_s30 + $0x2e8] sm:$0xff] }
 0x35c   : > { %v6916_v2 = vpop.eup %6915  ;;  %v3017_v29 = vadd.f32 1.0, %v6914_v10  ;;  %6929 = vrcp.f32 %v3016_v61  ;;  %v11139_v46 = vadd.f32 %v3293_v15, %v3259_v24  ;;  %v4080_v21 = vsel %vm4072_vm2, %v11007_v28, %v11781_v19  ;;  %v7238_v28 = vld [vmem:[%s7757_s30 + $0x2d8] sm:$0xff]  ;;  %v7241_v24 = vld [vmem:[%s7757_s30 + $0x2f0] sm:$0xff]  ;;  %v11158_v10 = vpop.xlane.xlu0 %4018 }
 0x35d   : > { %v6918_v9 = vpop.eup %6917  ;;  %v2283_v39 = vadd.f32 %v2237_v12, %v2236_v25  ;;  %v2674_v45 = vmul.f32 %v6916_v2, %v10978_v40  ;;  %6931 = vpow2.f32 %v5509_v34  ;;  %v5506_v63 = vmul.f32 -1.442695, %v11130_v56  ;;  %v7239_v40 = vld [vmem:[%s7757_s30 + $0x2e0] sm:$0xff]  ;;  %v7242_v19 = vld [vmem:[%s7757_s30 + $0x2f8] sm:$0xff] }
 0x35e   : > { %v2675_v13 = vmul.f32 %v6918_v9, %v10983_v16  ;;  %6933 = vrcp.f32 %v3017_v29  ;;  %v5507_v3 = vmul.f32 -1.442695, %v11139_v46  ;;  %v3632_v11 = vmul.f32 %v7237_v60, %v11760_v23 }
 0x35f   : > { %v6920_v36 = vpop.eup %6919  ;;  %2284 = vadd.xlane.f32.xlu0 %v2283_v39  ;;  %6935 = vpow2.f32 %v5506_v63  ;;  %v3633_v25 = vmul.f32 %v7238_v28, %v11760_v23  ;;  %v3666_v59 = vmul.f32 %v7239_v40, %v11761_v26  ;;  %v3667_v16 = vmul.f32 %v7240_v37, %v11761_v26  ;;  %v11162_v39 = vpop.xlane.xlu1 %2710  ;;  %v11782_v37 = vld [vmem:[#allocation56_spill] sm:$0xff] }
 0x360   : > { %v6922_v4 = vpop.eup %6921  ;;  %v2721_v61 = vadd.f32 %v2675_v13, %v2674_v45  ;;  %v3014_v34 = vadd.f32 1.0, %v6920_v36  ;;  %6937 = vpow2.f32 %v5507_v3  ;;  %v3732_v15 = vmul.f32 %v7241_v24, %v11762_v55  ;;  %v11784_v24 = vld [vmem:[#allocation22_spill] sm:$0xff] }
 0x361   : > { %v6924_v12 = vpop.eup %6923  ;;  %v3015_v22 = vadd.f32 1.0, %v6922_v4  ;;  %v3698_v2 = vadd.f32 %v3666_v59, %v3632_v11  ;;  %v3699_v29 = vadd.f32 %v3667_v16, %v3633_v25  ;;  %v3733_v9 = vmul.f32 %v7242_v19, %v11762_v55 }
 0x362   : > { %2722 = vadd.xlane.f32.xlu1 %v2721_v61  ;;  %v3984_v63 = vmul.f32 %v6924_v12, %v11009_v42  ;;  %6939 = vrcp.f32 %v3014_v34  ;;  %v3630_v45 = vmul.f32 %v11036_v33, %v11760_v23  ;;  %v3631_v13 = vmul.f32 %v11044_v43, %v11760_v23 }
 0x363   : > { %v6926_v3 = vpop.eup %6925  ;;  %6941 = vrcp.f32 %v3015_v22  ;;  %v11169_v60 = vadd.f32 %v3732_v15, %v3698_v2  ;;  %v11171_v11 = vadd.f32 %v3733_v9, %v3699_v29  ;;  %v3664_v36 = vmul.f32 %v11051_v17, %v11761_v26  ;;  %v11197_v15 = vpop.xlane.xlu1 %3148  ;;  %v11785_v2 = vld [vmem:[#allocation58_spill] sm:$0xff] }
 0x364   : > { %v3985_v28 = vmul.f32 %v6926_v3, %v11014_v53  ;;  %v3665_v42 = vmul.f32 %v11057_v7, %v11761_v26  ;;  %v3730_v33 = vmul.f32 %v11062_v30, %v11762_v55  ;;  %v3731_v23 = vmul.f32 %v11069_v32, %v11762_v55  ;;  %v11783_v26 = vld [vmem:[#allocation57_spill] sm:$0xff]  ;;  %v11189_v30 = vpop.xlane.xlu0 %3145 }
 0x365   : > { %v6928_v43 = vpop.eup %6927  ;;  %v5543_v25 = vmul.f32 -1.442695, %v11169_v60  ;;  %v5544_v40 = vmul.f32 -1.442695, %v11171_v11  ;;  %v3696_v59 = vadd.f32 %v3664_v36, %v3630_v45  ;;  %v4097_v17 = vsel %vm4089_vm3, %v4080_v21, %v11782_v37  ;;  %v11791_v37 = vld [vmem:[#allocation23_spill] sm:$0xff] }
 0x366   : > { %v6930_v16 = vpop.eup %6929  ;;  %v4029_v53 = vadd.f32 %v3985_v28, %v3984_v63  ;;  %v3454_v4 = vadd.f32 1.0, %v6928_v43  ;;  %v3697_v61 = vadd.f32 %v3665_v42, %v3631_v13  ;;  %v4146_v7 = vsel %vm4140_vm6, %v11083_v47, %v11783_v26  ;;  %v11786_v63 = vld [vmem:[#allocation59_spill] sm:$0xff]  ;;  %v11787_v28 = vld [vmem:[#allocation60_spill] sm:$0xff] }
 0x367   : > { %v6932_v55 = vpop.eup %6931  ;;  %v3112_v32 = vmul.f32 %v6930_v16, %v11033_v49  ;;  %6943 = vpow2.f32 %v5543_v25  ;;  %v11192_v34 = vadd.f32 %v3730_v33, %v3696_v59  ;;  %5705 = vmatmul.mubr.msk.f32.gmra.mrb[4].mxu0 %vm4158_vm7, %v4146_v7  ;;  %v4114_v21 = vsel %vm4106_vm4, %v4097_v17, %v11784_v24  ;;  %v11789_v25 = vld [vmem:[#allocation62_spill] sm:$0xff]  ;;  %v11792_v16 = vld [vmem:[#allocation25_spill] sm:$0xff]  ;;  %v11795_v24 = vld [vmem:[#allocation31_spill] sm:$0xff] }
 0x368   : > { %v6934_v12 = vpop.eup %6933  ;;  %4030 = vadd.xlane.f32.xlu0 %v4029_v53  ;;  %v3455_v22 = vadd.f32 1.0, %v6932_v55  ;;  %6945 = vrcp.f32 %v3454_v4  ;;  %v11199_v47 = vadd.f32 %v3731_v23, %v3697_v61  ;;  %v4113_v49 = vsel %vm4106_vm4, %v11135_v38, %v11785_v2  ;;  %v11788_v38 = vld [vmem:[#allocation61_spill] sm:$0xff]  ;;  %v11790_v59 = vld [vmem:[#allocation46_spill] sm:$0xff]  ;;  %v11793_v53 = vld [vmem:[#allocation24_spill] sm:$0xff]  ;;  %v3584_v61 = vpop.xlane.xlu0 %3583 }
 0x369   : > { %v6936_v29 = vpop.eup %6935  ;;  %v3113_v19 = vmul.f32 %v6934_v12, %v11041_v48  ;;  %6947 = vpow2.f32 %v5544_v40  ;;  %v5541_v9 = vmul.f32 -1.442695, %v11192_v34  ;;  %v4131_v45 = vsel %vm4123_vm5, %v4114_v21, %v11786_v63  ;;  %v11794_v55 = vld [vmem:[#allocation32_spill] sm:$0xff]  ;;  %v3587_v12 = vpop.xlane.xlu1 %3586 }
 0x36a   : > { %v6938_v13 = vpop.eup %6937  ;;  %6949 = vrcp.f32 %v3455_v22  ;;  %v3452_v3 = vadd.f32 1.0, %v6936_v29  ;;  %v5542_v36 = vmul.f32 -1.442695, %v11199_v47  ;;  %v4130_v42 = vsel %vm4123_vm5, %v4113_v49, %v11787_v28  ;;  %v11796_v2 = vld [vmem:[#allocation28_spill] sm:$0xff]  ;;  %v11797_v29 = vld [vmem:[#allocation33_spill] sm:$0xff] }
 0x36b   : > { %v3159_v33 = vadd.f32 %v3113_v19, %v3112_v32  ;;  %v3453_v23 = vadd.f32 1.0, %v6938_v13  ;;  %6951 = vpow2.f32 %v5541_v9  ;;  %v4148_v48 = vsel %vm4140_vm6, %v4131_v45, %v11788_v38 }
 0x36c   : > { %v6940_v43 = vpop.eup %6939  ;;  %6953 = vrcp.f32 %v3452_v3  ;;  %v4147_v40 = vsel %vm4140_vm6, %v4130_v42, %v11789_v25  ;;  %v4047_v17 = vsel %vm4038_vm0, %v11791_v37, %v11790_v59  ;;  %v4048_v4 = vsel %vm4038_vm0, %v11793_v53, %v11792_v16  ;;  %v4022_v28 = vpop.xlane.xlu0 %4021 }
 0x36d   : > { %v6942_v26 = vpop.eup %6941  ;;  %3160 = vadd.xlane.f32.xlu1 %v3159_v33  ;;  %v3110_v7 = vmul.f32 %v6940_v43, %v11078_v1  ;;  %6955 = vrcp.f32 %v3453_v23  ;;  %5707 = vmatprep.mubr.msk.f32.mxu0 %vm4158_vm7, %v4147_v40  ;;  %v4065_v32 = vsel %vm4055_vm1, %v4048_v4, %v11794_v55  ;;  %v4064_v21 = vsel %vm4055_vm1, %v4047_v17, %v11795_v24  ;;  %v4025_v33 = vpop.xlane.xlu1 %4024 }
 0x36e   : > { %v3111_v22 = vmul.f32 %v6942_v26, %v11086_v52  ;;  %6957 = vpow2.f32 %v5542_v36  ;;  %5708 = vmatmul.mubr.msk.f32.gmra.mrb[6].mxu0 %vm4158_vm7, %v4148_v48  ;;  %v4082_v49 = vsel %vm4072_vm2, %v4065_v32, %v11796_v2  ;;  %v4081_v1 = vsel %vm4072_vm2, %v4064_v21, %v11797_v29  ;;  %v5931_v2 = vld [vmem:[#allocation10] sm:$0xff]  }
 0x36f   : > { %v4098_v19 = vsel %vm4089_vm3, %v4081_v1, %v10895_v57  ;;  %v4099_v9 = vsel %vm4089_vm3, %v4082_v49, %v10929_v5  ;;  %v4049_v63 = vsel %vm4038_vm0, %v10902_v27, %v10922_v0  ;;  %v4050_v52 = vsel %vm4038_vm0, %v10967_v41, %v10987_v18  ;;  %v5932_v49 = vld [vmem:[#allocation10 + $0x8] sm:$0xff]   ;;  %5722 = vmatprep.subr.bf16.mxu1 %v5931_v2 }
 0x370   : > { %v3156_v45 = vadd.f32 %v3111_v22, %v3110_v7  ;;  %v4115_v13 = vsel %vm4106_vm4, %v4098_v19, %v10960_v58  ;;  %v4066_v3 = vsel %vm4055_vm1, %v4049_v63, %v10994_v51  ;;  %v4116_v57 = vsel %vm4106_vm4, %v4099_v9, %v11024_v50  ;;  %5723 = vmatpush3.bf16.msra.mxu1 %v5931_v2  ;;  %v5933_v19 = vld [vmem:[#allocation10 + $0x10] sm:$0xff]   ;;  %v5934_v63 = vld [vmem:[#allocation10 + $0x18] sm:$0xff]  }
 0x371   : > { %v6944_v36 = vpop.eup %6943  ;;  %v4132_v5 = vsel %vm4123_vm5, %v4115_v13, %v11029_v20  ;;  %v4083_v27 = vsel %vm4072_vm2, %v4066_v3, %v11073_v6  ;;  %v4067_v0 = vsel %vm4055_vm1, %v4050_v52, %v11066_v54  ;;  %v4133_v41 = vsel %vm4123_vm5, %v4116_v57, %v11103_v44  ;;  %v11287_v21 = vpop.xlane.xlu1 %1399  ;;  %5724 = vmatprep.subr.bf16.mxu1 %v5932_v49 }
 0x372   : > { %v6946_v58 = vpop.eup %6945  ;;  %3157 = vadd.xlane.f32.xlu0 %v3156_v45  ;;  %v3892_v18 = vadd.f32 1.0, %v6944_v36  ;;  %v4149_v51 = vsel %vm4140_vm6, %v4132_v5, %v11107_v31  ;;  %v4100_v50 = vsel %vm4089_vm3, %v4083_v27, %v11137_v14  ;;  %v4084_v20 = vsel %vm4072_vm2, %v4067_v0, %v11127_v8  ;;  %v11291_v22 = vpop.xlane.xlu0 %961 }
 0x373   : > { %v6948_v6 = vpop.eup %6947  ;;  %v3550_v42 = vmul.f32 %v6946_v58, %v11112_v62  ;;  %5710 = vmatprep.mubr.msk.f32.mxu0 %vm4158_vm7, %v4149_v51  ;;  %v4101_v54 = vsel %vm4089_vm3, %v4084_v20, %v11162_v39  ;;  %v4150_v44 = vsel %vm4140_vm6, %v4133_v41, %v11158_v10  ;;  %v4117_v31 = vsel %vm4106_vm4, %v4100_v50, %v11189_v30 }
 0x374   : > { %v6950_v14 = vpop.eup %6949  ;;  %v3893_v23 = vadd.f32 1.0, %v6948_v6  ;;  %6959 = vrcp.f32 %v3892_v18  ;;  %5711 = vmatmul.mubr.msk.f32.gmra.mrb[8].mxu0 %vm4158_vm7, %v4150_v44  ;;  %v4118_v62 = vsel %vm4106_vm4, %v4101_v54, %v11197_v15  ;;  %v4134_v8 = vsel %vm4123_vm5, %v4117_v31, %v3584_v61  ;;  %5725 = vmatpush3.bf16.msra.mxu1 %v5932_v49 }
 0x375   : > { %v6952_v38 = vpop.eup %6951  ;;  %v3551_v39 = vmul.f32 %v6950_v14, %v11117_v35  ;;  %v4135_v48 = vsel %vm4123_vm5, %v4118_v62, %v3587_v12  ;;  %v4151_v10 = vsel %vm4140_vm6, %v4134_v8, %v4022_v28  ;;  %5726 = vmatprep.subr.bf16.mxu1 %v5933_v19 }
 0x376   : > { %v6954_v43 = vpop.eup %6953  ;;  %6961 = vrcp.f32 %v3893_v23  ;;  %v3890_v30 = vadd.f32 1.0, %v6952_v38  ;;  %v4152_v25 = vsel %vm4140_vm6, %v4135_v48, %v4025_v33  ;;  %5713 = vmatprep.mubr.msk.f32.mxu0 %vm4158_vm7, %v4151_v10 }
 0x377   : > { %v6956_v40 = vpop.eup %6955  ;;  %v3597_v59 = vadd.f32 %v3551_v39, %v3550_v42  ;;  %v3548_v15 = vmul.f32 %v6954_v43, %v11130_v56 }
 0x378   : > { %v6958_v37 = vpop.eup %6957  ;;  %v3549_v17 = vmul.f32 %v6956_v40, %v11139_v46  ;;  %6963 = vrcp.f32 %v3890_v30  ;;  %5714 = vmatmul.mubr.msk.f32.gmra.mrb[10].mxu0 %vm4158_vm7, %v4152_v25  ;;  %5727 = vmatpush3.bf16.msra.mxu1 %v5933_v19 }
 0x379   : > { %3598 = vadd.xlane.f32.xlu1 %v3597_v59  ;;  %v3891_v35 = vadd.f32 1.0, %v6958_v37  ;;  %5728 = vmatprep.subr.bf16.mxu1 %v5934_v63 }
 0x37a   : > { %v3594_v16 = vadd.f32 %v3549_v17, %v3548_v15  ;;  %v11289_v12 = vpop.xlane.xlu1 %1402  ;;  %v4051_v15 = vsel %vm4038_vm0, %v11291_v22, %v11287_v21 }
 0x37b   : > { %6965 = vrcp.f32 %v3891_v35 }
 0x37c   : > { %3595 = vadd.xlane.f32.xlu0 %v3594_v16  ;;  %5729 = vmatpush3.bf16.msra.mxu1 %v5934_v63 }
 0x37e   : > { %v6960_v53 = vpop.eup %6959 }
 0x37f   : > { %v3988_v4 = vmul.f32 %v6960_v53, %v11169_v60 }
 0x380   : > { %v6962_v61 = vpop.eup %6961 }
 0x381   : > { %v3989_v26 = vmul.f32 %v6962_v61, %v11171_v11  ;;  %v11293_v11 = vpop.xlane.xlu1 %1840 }
 0x382   : > { %v6964_v7 = vpop.eup %6963 }
 0x383   : > { %v4035_v55 = vadd.f32 %v3989_v26, %v3988_v4  ;;  %v3986_v56 = vmul.f32 %v6964_v7, %v11192_v34 }
 0x385   : > { %v6966_v32 = vpop.eup %6965  ;;  %4036 = vadd.xlane.f32.xlu1 %v4035_v55 }
 0x386   : > { %v3987_v46 = vmul.f32 %v6966_v32, %v11199_v47  ;;  %v11295_v47 = vpop.xlane.xlu0 %964 }
 0x388   : > { %v4032_v24 = vadd.f32 %v3987_v46, %v3986_v56  ;;  %v4052_v46 = vsel %vm4038_vm0, %v11295_v47, %v11289_v12 }
 0x38a   : > { %4033 = vadd.xlane.f32.xlu0 %v4032_v24  ;;  %v5700_v60 = vpop.f32.mrb[0].mxu0  ;;  %v1838_v52 = vpop.xlane.xlu0 %1837  ;;  %v4069_v24 = vsel %vm4055_vm1, %v4052_v46, %v11293_v11 }
 0x38b   : > { %v5562_v29 = vmul.f32 -1.442695, %v5700_v60  ;;  %v4273_v1 = vpop.f32.mrb[1].mxu0  ;;  %v4068_v37 = vsel %vm4055_vm1, %v4051_v15, %v1838_v52 }
 0x38c   : > { %v5561_v34 = vmul.f32 -1.442695, %v4273_v1 }
 0x38d   : > { %6967 = vpow2.f32 %v5562_v29  ;;  %v11297_v9 = vpop.xlane.xlu1 %2278 }
 0x38e   : > { %6969 = vpow2.f32 %v5561_v34  ;;  %v4086_v21 = vsel %vm4072_vm2, %v4069_v24, %v11297_v9 }
 0x394   : > { %v2276_v5 = vpop.xlane.xlu0 %2275 }
 0x395   : > { %v4085_v17 = vsel %vm4072_vm2, %v4068_v37, %v2276_v5 }
 0x397   : > { %v6968_v45 = vpop.eup %6967 }
 0x398   : > { %v6970_v3 = vpop.eup %6969  ;;  %v4401_v57 = vadd.f32 1.0, %v6968_v45 }
 0x399   : > { %v968_v13 = vpop.xlane.xlu1 %967  ;;  %v4400_v36 = vadd.f32 1.0, %v6970_v3 }
 0x39a   : > { %6971 = vrcp.f32 %v4401_v57 }
 0x39b   : > { %6973 = vrcp.f32 %v4400_v36 }
 0x39d   : > { %v2714_v51 = vpop.xlane.xlu0 %2713 }
 0x39e   : > { %v4102_v35 = vsel %vm4089_vm3, %v4085_v17, %v2714_v51 }
 0x3a4   : > { %v2717_v0 = vpop.xlane.xlu1 %2716  ;;  %v6972_v20 = vpop.eup %6971 }
 0x3a5   : > { %v6974_v28 = vpop.eup %6973  ;;  %v4449_v6 = vmul.f32 %v6972_v20, %v5700_v60  ;;  %v4103_v22 = vsel %vm4089_vm3, %v4086_v21, %v2717_v0 }
 0x3a6   : > { %v4448_v54 = vmul.f32 %v6974_v28, %v4273_v1 }
 0x3a8   : > { %v1406_v42 = vpop.xlane.xlu0 %1405  ;;  %v4464_v44 = vpack.c.bf16 %v4449_v6, %v4448_v54 }
 0x3a9   : > { %v4053_v33 = vsel %vm4038_vm0, %v968_v13, %v1406_v42 }
 0x3aa   : > { %5730 = vmatprep.mubr.msk.bf16.mxu1 %vm4520_vm8, %v4464_v44 }
 0x3ac   : > { %v5703_v27 = vpop.f32.mrb[2].mxu0 }
 0x3ad   : > { %v5564_v41 = vmul.f32 -1.442695, %v5703_v27  ;;  %v4283_v58 = vpop.f32.mrb[3].mxu0 }
 0x3ae   : > { %v5563_v18 = vmul.f32 -1.442695, %v4283_v58  ;;  %v971_v50 = vpop.xlane.xlu1 %970 }
 0x3af   : > { %6975 = vpow2.f32 %v5564_v41 }
 0x3b0   : > { %6977 = vpow2.f32 %v5563_v18 }
 0x3b3   : > { %v3152_v40 = vpop.xlane.xlu0 %3151 }
 0x3b4   : > { %v4119_v53 = vsel %vm4106_vm4, %v4102_v35, %v3152_v40 }
 0x3b9   : > { %v6976_v31 = vpop.eup %6975  ;;  %v1844_v14 = vpop.xlane.xlu1 %1843 }
 0x3ba   : > { %v6978_v23 = vpop.eup %6977  ;;  %v4070_v62 = vsel %vm4055_vm1, %v4053_v33, %v1844_v14  ;;  %v4403_v8 = vadd.f32 1.0, %v6976_v31 }
 0x3bb   : > { %v4402_v38 = vadd.f32 1.0, %v6978_v23 }
 0x3bc   : > { %6979 = vrcp.f32 %v4403_v8 }
 0x3bd   : > { %6981 = vrcp.f32 %v4402_v38 }
 0x3be   : > { %v1409_v16 = vpop.xlane.xlu0 %1408 }
 0x3bf   : > { %v4054_v11 = vsel %vm4038_vm0, %v971_v50, %v1409_v16 }
 0x3c3   : > { %v3590_v25 = vpop.xlane.xlu1 %3589 }
 0x3c4   : > { %v4136_v4 = vsel %vm4123_vm5, %v4119_v53, %v3590_v25 }
 0x3c6   : > { %v6980_v39 = vpop.eup %6979 }
 0x3c7   : > { %v6982_v48 = vpop.eup %6981  ;;  %v4451_v10 = vmul.f32 %v6980_v39, %v5703_v27 }
 0x3c8   : > { %v4450_v43 = vmul.f32 %v6982_v48, %v4283_v58  ;;  %v3155_v7 = vpop.xlane.xlu0 %3154 }
 0x3c9   : > { %v4120_v60 = vsel %vm4106_vm4, %v4103_v22, %v3155_v7 }
 0x3ca   : > { %v4465_v30 = vpack.c.bf16 %v4451_v10, %v4450_v43 }
 0x3cc   : > { %5731 = vmatmul.mubr.msk.bf16.vlgmr.msra.gmra.mrb[0].mxu1 %vm4520_vm8, %v4465_v30 }
 0x3ce   : > { %v2282_v59 = vpop.xlane.xlu1 %2281 }
 0x3cf   : > { %v4087_v45 = vsel %vm4072_vm2, %v4070_v62, %v2282_v59 }
 0x3d3   : > { %v1847_v55 = vpop.xlane.xlu0 %1846 }
 0x3d4   : > { %v4071_v9 = vsel %vm4055_vm1, %v4054_v11, %v1847_v55 }
 0x3d9   : > { %v4028_v61 = vpop.xlane.xlu1 %4027 }
 0x3da   : > { %v4153_v26 = vsel %vm4140_vm6, %v4136_v4, %v4028_v61 }
 0x3db   : > { %5716 = vmatprep.mubr.msk.f32.mxu0 %vm4158_vm7, %v4153_v26 }
 0x3de   : > { %v3593_v56 = vpop.xlane.xlu0 %3592 }
 0x3df   : > { %v4137_v2 = vsel %vm4123_vm5, %v4120_v60, %v3593_v56 }
 0x3e7   : > { %v2720_v1 = vpop.xlane.xlu1 %2719 }
 0x3e8   : > { %v4104_v57 = vsel %vm4089_vm3, %v4087_v45, %v2720_v1  ;;  %v5936_v45 = vld [vmem:[#allocation11 + $0x8] sm:$0xff]  }
 0x3ec   : > { %v2285_v32 = vpop.xlane.xlu0 %2284 }
 0x3ed   : > { %v4088_v52 = vsel %vm4072_vm2, %v4071_v9, %v2285_v32 }
 0x3ef   : > { %v2723_v34 = vpop.xlane.xlu1 %2722 }
 0x3f0   : > { %v4105_v13 = vsel %vm4089_vm3, %v4088_v52, %v2723_v34  ;;  %v5935_v52 = vld [vmem:[#allocation11] sm:$0xff]  }
 0x3f1   : > { %5746 = vmatprep.subr.bf16.mxu0 %v5935_v52 }
 0x3f2   : > { %5747 = vmatpush3.bf16.msra.mxu0 %v5935_v52 }
 0x3f3   : > { %5748 = vmatprep.subr.bf16.mxu0 %v5936_v45 }
 0x3f5   : > { %v4031_v49 = vpop.xlane.xlu0 %4030 }
 0x3f6   : > { %v4154_v29 = vsel %vm4140_vm6, %v4137_v2, %v4031_v49  ;;  %5749 = vmatpush3.bf16.msra.mxu0 %v5936_v45 }
 0x3f7   : > { %5717 = vmatmul.mubr.msk.f32.gmra.mrb[12].mxu0 %vm4158_vm7, %v4154_v29 }
 0x3fa   : > { %v3161_v12 = vpop.xlane.xlu1 %3160 }
 0x3fb   : > { %v4122_v36 = vsel %vm4106_vm4, %v4105_v13, %v3161_v12  ;;  %v5937_v13 = vld [vmem:[#allocation11 + $0x10] sm:$0xff]  }
 0x3fc   : > { %5750 = vmatprep.subr.bf16.mxu0 %v5937_v13 }
 0x3fd   : > { %5751 = vmatpush3.bf16.msra.mxu0 %v5937_v13 }
 0x3ff   : > { %v3158_v47 = vpop.xlane.xlu0 %3157 }
 0x400   : > { %v4121_v5 = vsel %vm4106_vm4, %v4104_v57, %v3158_v47  ;;  %v5939_v57 = vld [vmem:[#allocation11 + $0x20] sm:$0xff]  }
 0x406   : > { %v3599_v19 = vpop.xlane.xlu1 %3598 }
 0x407   : > { %v4139_v27 = vsel %vm4123_vm5, %v4122_v36, %v3599_v19  ;;  %v4482_v36 = vld [vmem:[%s7769_s23 + $0x10] sm:$0xff] }
 0x409   : > { %v3596_v63 = vpop.xlane.xlu0 %3595 }
 0x40a   : > { %v4138_v0 = vsel %vm4123_vm5, %v4121_v5, %v3596_v63  ;;  %v4480_v5 = vld [vmem:[%s7769_s23] sm:$0xff] }
 0x412   : > { %v4037_v3 = vpop.xlane.xlu1 %4036 }
 0x413   : > { %v4156_v41 = vsel %vm4140_vm6, %v4139_v27, %v4037_v3  ;;  %v5938_v3 = vld [vmem:[#allocation11 + $0x18] sm:$0xff]   ;;  %v5940_v27 = vld [vmem:[#allocation11 + $0x28] sm:$0xff]  }
 0x414   : > { %5752 = vmatprep.subr.bf16.mxu0 %v5938_v3 }
 0x415   : > { %5753 = vmatpush3.bf16.msra.mxu0 %v5938_v3 }
 0x416   : > { %5754 = vmatprep.subr.bf16.mxu0 %v5939_v57 }
 0x417   : > { %v4034_v58 = vpop.xlane.xlu0 %4033 }
 0x418   : > { %v4155_v18 = vsel %vm4140_vm6, %v4138_v0, %v4034_v58 }
 0x419   : > { %5719 = vmatprep.mubr.msk.f32.mxu0 %vm4158_vm7, %v4155_v18  ;;  %5755 = vmatpush3.bf16.msra.mxu0 %v5939_v57  ;;  %v4486_v57 = vld [vmem:[%s7769_s23 + $0x30] sm:$0xff] }
 0x41a   : > { %5720 = vmatmul.mubr.msk.f32.gmra.mrb[14].mxu0 %vm4158_vm7, %v4156_v41  ;;  %v4483_v41 = vld [vmem:[%s7769_s23 + $0x18] sm:$0xff]  ;;  %5756 = vmatprep.subr.bf16.mxu0 %v5940_v27 }
 0x41d   : > { %5757 = vmatpush3.bf16.msra.mxu0 %v5940_v27  ;;  %v4487_v27 = vld [vmem:[%s7769_s23 + $0x38] sm:$0xff] }
 0x43a   : > { %v5706_v51 = vpop.f32.mrb[4].mxu0 }
 0x43b   : > { %v5566_v50 = vmul.f32 -1.442695, %v5706_v51  ;;  %v4293_v20 = vpop.f32.mrb[5].mxu0 }
 0x43c   : > { %v5565_v28 = vmul.f32 -1.442695, %v4293_v20 }
 0x43d   : > { %6983 = vpow2.f32 %v5566_v50 }
 0x43e   : > { %6985 = vpow2.f32 %v5565_v28 }
 0x441   : > { %v5709_v6 = vpop.f32.mrb[6].mxu0 }
 0x442   : > { %v5568_v42 = vmul.f32 -1.442695, %v5709_v6  ;;  %v4303_v54 = vpop.f32.mrb[7].mxu0 }
 0x443   : > { %v5567_v44 = vmul.f32 -1.442695, %v4303_v54 }
 0x444   : > { %6987 = vpow2.f32 %v5568_v42 }
 0x445   : > { %6989 = vpow2.f32 %v5567_v44 }
 0x447   : > { %v6984_v31 = vpop.eup %6983  ;;  %v5712_v33 = vpop.f32.mrb[8].mxu0 }
 0x448   : > { %v6986_v14 = vpop.eup %6985  ;;  %v4405_v23 = vadd.f32 1.0, %v6984_v31  ;;  %v5570_v62 = vmul.f32 -1.442695, %v5712_v33  ;;  %v4313_v8 = vpop.f32.mrb[9].mxu0 }
 0x449   : > { %v4404_v38 = vadd.f32 1.0, %v6986_v14  ;;  %v5569_v39 = vmul.f32 -1.442695, %v4313_v8 }
 0x44a   : > { %6991 = vrcp.f32 %v4405_v23  ;;  %v5942_v23 = vld [vmem:[#allocation11 + $0x38] sm:$0xff]  }
 0x44b   : > { %6993 = vrcp.f32 %v4404_v38  ;;  %v5715_v48 = vpop.f32.mrb[10].mxu0 }
 0x44c   : > { %6995 = vpow2.f32 %v5570_v62  ;;  %v5572_v10 = vmul.f32 -1.442695, %v5715_v48  ;;  %v4323_v43 = vpop.f32.mrb[11].mxu0 }
 0x44d   : > { %6997 = vpow2.f32 %v5569_v39  ;;  %v5571_v30 = vmul.f32 -1.442695, %v4323_v43 }
 0x44e   : > { %v6988_v25 = vpop.eup %6987  ;;  %6999 = vpow2.f32 %v5572_v10 }
 0x44f   : > { %v6990_v40 = vpop.eup %6989  ;;  %v4407_v59 = vadd.f32 1.0, %v6988_v25  ;;  %7001 = vpow2.f32 %v5571_v30 }
 0x450   : > { %v4406_v15 = vadd.f32 1.0, %v6990_v40 }
 0x451   : > { %7003 = vrcp.f32 %v4407_v59 }
 0x452   : > { %7005 = vrcp.f32 %v4406_v15 }
 0x454   : > { %v6992_v37 = vpop.eup %6991 }
 0x455   : > { %v6994_v17 = vpop.eup %6993  ;;  %v4453_v35 = vmul.f32 %v6992_v37, %v5706_v51  ;;  %v4481_v51 = vld [vmem:[%s7769_s23 + $0x8] sm:$0xff] }
 0x456   : > { %v6996_v16 = vpop.eup %6995  ;;  %v4452_v53 = vmul.f32 %v6994_v17, %v4293_v20 }
 0x457   : > { %v6998_v4 = vpop.eup %6997  ;;  %v4409_v61 = vadd.f32 1.0, %v6996_v16 }
 0x458   : > { %v7000_v26 = vpop.eup %6999  ;;  %v4466_v7 = vpack.c.bf16 %v4453_v35, %v4452_v53  ;;  %v4408_v55 = vadd.f32 1.0, %v6998_v4 }
 0x459   : > { %v7002_v56 = vpop.eup %7001  ;;  %7007 = vrcp.f32 %v4409_v61  ;;  %v4411_v32 = vadd.f32 1.0, %v7000_v26 }
 0x45a   : > { %5734 = vmatprep.mubr.msk.bf16.mxu1 %vm4520_vm8, %v4466_v7  ;;  %7009 = vrcp.f32 %v4408_v55  ;;  %v4410_v46 = vadd.f32 1.0, %v7002_v56 }
 0x45b   : > { %v7004_v24 = vpop.eup %7003  ;;  %7011 = vrcp.f32 %v4411_v32 }
 0x45c   : > { %v7006_v21 = vpop.eup %7005  ;;  %v4455_v22 = vmul.f32 %v7004_v24, %v5709_v6  ;;  %7013 = vrcp.f32 %v4410_v46 }
 0x45d   : > { %v4454_v60 = vmul.f32 %v7006_v21, %v4303_v54  ;;  %v5941_v54 = vld [vmem:[#allocation11 + $0x30] sm:$0xff]  }
 0x45e   : > { %5758 = vmatprep.subr.bf16.mxu0 %v5941_v54 }
 0x45f   : > { %v4467_v2 = vpack.c.bf16 %v4455_v22, %v4454_v60  ;;  %5759 = vmatpush3.bf16.msra.mxu0 %v5941_v54 }
 0x460   : > { %5760 = vmatprep.subr.bf16.mxu0 %v5942_v23 }
 0x461   : > { %5735 = vmatmul.mubr.msk.bf16.gmra.mrb[4].mxu1 %vm4520_vm8, %v4467_v2 }
 0x463   : > { %v7008_v49 = vpop.eup %7007  ;;  %5761 = vmatpush3.bf16.msra.mxu0 %v5942_v23  ;;  %v4491_v23 = vld [vmem:[%s7769_s23 + $0x58] sm:$0xff] }
 0x464   : > { %v7010_v29 = vpop.eup %7009  ;;  %v4457_v1 = vmul.f32 %v7008_v49, %v5712_v33 }
 0x465   : > { %v7012_v34 = vpop.eup %7011  ;;  %v4456_v12 = vmul.f32 %v7010_v29, %v4313_v8 }
 0x466   : > { %v7014_v47 = vpop.eup %7013  ;;  %v4459_v19 = vmul.f32 %v7012_v34, %v5715_v48 }
 0x467   : > { %v4468_v11 = vpack.c.bf16 %v4457_v1, %v4456_v12  ;;  %v4458_v63 = vmul.f32 %v7014_v47, %v4323_v43 }
 0x469   : > { %v4469_v9 = vpack.c.bf16 %v4459_v19, %v4458_v63  ;;  %5738 = vmatprep.mubr.msk.bf16.mxu1 %vm4520_vm8, %v4468_v11 }
 0x46b   : > { %5739 = vmatmul.mubr.msk.bf16.gmra.mrb[8].mxu1 %vm4520_vm8, %v4469_v9 }
 0x49f   : > { %v5732_v0 = vpop.f32.mrb[0].mxu1 }
 0x4a0   : > { %v4588_v58 = vadd.f32 %v5732_v0, %v4482_v36  ;;  %v4579_v18 = vpop.f32.mrb[1].mxu1  ;;  %v4484_v36 = vld [vmem:[%s7769_s23 + $0x20] sm:$0xff] }
 0x4a1   : > { %v4580_v50 = vadd.f32 %v4579_v18, %v4480_v5  ;;  %v5733_v20 = vpop.f32.mrb[2].mxu1 }
 0x4a2   : > { %v5591_v28 = vmul.f32 -1.442695, %v4588_v58  ;;  %v4591_v6 = vadd.f32 %v5733_v20, %v4483_v41  ;;  %v4582_v42 = vpop.f32.mrb[3].mxu1 }
 0x4a3   : > { %v5589_v44 = vmul.f32 -1.442695, %v4580_v50  ;;  %v4583_v31 = vadd.f32 %v4582_v42, %v4481_v51 }
 0x4a4   : > { %7015 = vpow2.f32 %v5591_v28  ;;  %v5592_v33 = vmul.f32 -1.442695, %v4591_v6 }
 0x4a5   : > { %7017 = vpow2.f32 %v5589_v44  ;;  %v5590_v14 = vmul.f32 -1.442695, %v4583_v31 }
 0x4a6   : > { %7019 = vpow2.f32 %v5592_v33  ;;  %v4488_v33 = vld [vmem:[%s7769_s23 + $0x40] sm:$0xff] }
 0x4a7   : > { %7021 = vpow2.f32 %v5590_v14 }
 0x4ae   : > { %v7016_v62 = vpop.eup %7015 }
 0x4af   : > { %v7018_v8 = vpop.eup %7017  ;;  %v4692_v38 = vadd.f32 1.0, %v7016_v62 }
 0x4b0   : > { %v7020_v39 = vpop.eup %7019  ;;  %v4690_v48 = vadd.f32 1.0, %v7018_v8 }
 0x4b1   : > { %v7022_v10 = vpop.eup %7021  ;;  %7023 = vrcp.f32 %v4692_v38  ;;  %v4693_v43 = vadd.f32 1.0, %v7020_v39  ;;  %v4489_v38 = vld [vmem:[%s7769_s23 + $0x48] sm:$0xff] }
 0x4b2   : > { %7025 = vrcp.f32 %v4690_v48  ;;  %v4691_v30 = vadd.f32 1.0, %v7022_v10 }
 0x4b3   : > { %7027 = vrcp.f32 %v4693_v43 }
 0x4b4   : > { %7029 = vrcp.f32 %v4691_v30 }
 0x4bb   : > { %v7024_v25 = vpop.eup %7023 }
 0x4bc   : > { %v7026_v40 = vpop.eup %7025  ;;  %v4740_v37 = vmul.f32 %v7024_v25, %v4588_v58  ;;  %v4485_v58 = vld [vmem:[%s7769_s23 + $0x28] sm:$0xff] }
 0x4bd   : > { %v7028_v59 = vpop.eup %7027  ;;  %v4738_v35 = vmul.f32 %v7026_v40, %v4580_v50 }
 0x4be   : > { %v7030_v15 = vpop.eup %7029  ;;  %v4741_v17 = vmul.f32 %v7028_v59, %v4591_v6 }
 0x4bf   : > { %v4739_v16 = vmul.f32 %v7030_v15, %v4583_v31  ;;  %v4490_v31 = vld [vmem:[%s7769_s23 + $0x50] sm:$0xff] }
 0x4c0   : > { %v4755_v53 = vpack.c.bf16 %v4741_v17, %v4740_v37 }
 0x4c1   : > { %v4754_v4 = vpack.c.bf16 %v4739_v16, %v4738_v35 }
 0x4c3   : > { %5762 = vmatprep.mubr.bf16.mxu0 %v4754_v4 }
 0x4c4   : > { %5763 = vmatmul.mubr.bf16.vlgmr.msra.gmra.mrb[16].mxu0 %v4755_v53 }
 0x4ca   : > { %v5718_v61 = vpop.f32.mrb[12].mxu0 }
 0x4cb   : > { %v5574_v26 = vmul.f32 -1.442695, %v5718_v61  ;;  %v4333_v7 = vpop.f32.mrb[13].mxu0 }
 0x4cc   : > { %v5573_v55 = vmul.f32 -1.442695, %v4333_v7 }
 0x4cd   : > { %7031 = vpow2.f32 %v5574_v26 }
 0x4ce   : > { %7033 = vpow2.f32 %v5573_v55 }
 0x4d7   : > { %v7032_v56 = vpop.eup %7031 }
 0x4d8   : > { %v7034_v32 = vpop.eup %7033  ;;  %v4413_v46 = vadd.f32 1.0, %v7032_v56 }
 0x4d9   : > { %v4412_v24 = vadd.f32 1.0, %v7034_v32 }
 0x4da   : > { %7035 = vrcp.f32 %v4413_v46 }
 0x4db   : > { %7037 = vrcp.f32 %v4412_v24 }
 0x4e4   : > { %v7036_v21 = vpop.eup %7035 }
 0x4e5   : > { %v7038_v22 = vpop.eup %7037  ;;  %v4461_v60 = vmul.f32 %v7036_v21, %v5718_v61 }
 0x4e6   : > { %v4460_v2 = vmul.f32 %v7038_v22, %v4333_v7 }
 0x4e8   : > { %v4470_v49 = vpack.c.bf16 %v4461_v60, %v4460_v2 }
 0x4ea   : > { %5742 = vmatprep.mubr.msk.bf16.mxu1 %vm4520_vm8, %v4470_v49 }
 0x4ed   : > { %v5721_v29 = vpop.f32.mrb[14].mxu0 }
 0x4ee   : > { %v5576_v1 = vmul.f32 -1.442695, %v5721_v29  ;;  %v4343_v34 = vpop.f32.mrb[15].mxu0 }
 0x4ef   : > { %v5575_v12 = vmul.f32 -1.442695, %v4343_v34 }
 0x4f0   : > { %7039 = vpow2.f32 %v5576_v1 }
 0x4f1   : > { %7041 = vpow2.f32 %v5575_v12 }
 0x4fa   : > { %v7040_v47 = vpop.eup %7039 }
 0x4fb   : > { %v7042_v19 = vpop.eup %7041  ;;  %v4415_v11 = vadd.f32 1.0, %v7040_v47 }
 0x4fc   : > { %v4414_v63 = vadd.f32 1.0, %v7042_v19 }
 0x4fd   : > { %7043 = vrcp.f32 %v4415_v11 }
 0x4fe   : > { %7045 = vrcp.f32 %v4414_v63 }
 0x507   : > { %v7044_v9 = vpop.eup %7043 }
 0x508   : > { %v7046_v52 = vpop.eup %7045  ;;  %v4463_v45 = vmul.f32 %v7044_v9, %v5721_v29 }
 0x509   : > { %v4462_v13 = vmul.f32 %v7046_v52, %v4343_v34 }
 0x50b   : > { %v4471_v3 = vpack.c.bf16 %v4463_v45, %v4462_v13 }
 0x50d   : > { %5743 = vmatmul.mubr.msk.bf16.gmra.mrb[12].mxu1 %vm4520_vm8, %v4471_v3 }
 0x534   : > { %v5736_v5 = vpop.f32.mrb[4].mxu1 }
 0x535   : > { %v4604_v0 = vadd.f32 %v5736_v5, %v4486_v57  ;;  %v4595_v41 = vpop.f32.mrb[5].mxu1 }
 0x536   : > { %v4596_v18 = vadd.f32 %v4595_v41, %v4484_v36  ;;  %v5737_v51 = vpop.f32.mrb[6].mxu1  ;;  %v11361_v41 = vld [vmem:[%s11448_s6] ss:$0 sm:$0xff] }
 0x537   : > { %v5595_v50 = vmul.f32 -1.442695, %v4604_v0  ;;  %v4607_v20 = vadd.f32 %v5737_v51, %v4487_v27  ;;  %v4598_v28 = vpop.f32.mrb[7].mxu1 }
 0x538   : > { %v5593_v6 = vmul.f32 -1.442695, %v4596_v18  ;;  %v4599_v42 = vadd.f32 %v4598_v28, %v4485_v58 }
 0x539   : > { %7047 = vpow2.f32 %v5595_v50  ;;  %v5596_v54 = vmul.f32 -1.442695, %v4607_v20 }
 0x53a   : > { %7049 = vpow2.f32 %v5593_v6  ;;  %v5594_v44 = vmul.f32 -1.442695, %v4599_v42 }
 0x53b   : > { %7051 = vpow2.f32 %v5596_v54 }
 0x53c   : > { %7053 = vpow2.f32 %v5594_v44 }
 0x53e   : > { %v5740_v14 = vpop.f32.mrb[8].mxu1 }
 0x53f   : > { %v4620_v62 = vadd.f32 %v5740_v14, %v4490_v31  ;;  %v4611_v8 = vpop.f32.mrb[9].mxu1 }
 0x540   : > { %v4612_v39 = vadd.f32 %v4611_v8, %v4488_v33  ;;  %v5741_v48 = vpop.f32.mrb[10].mxu1 }
 0x541   : > { %v5599_v10 = vmul.f32 -1.442695, %v4620_v62  ;;  %v4623_v43 = vadd.f32 %v5741_v48, %v4491_v23  ;;  %v4614_v30 = vpop.f32.mrb[11].mxu1 }
 0x542   : > { %v5597_v25 = vmul.f32 -1.442695, %v4612_v39  ;;  %v4615_v40 = vadd.f32 %v4614_v30, %v4489_v38 }
 0x543   : > { %v7048_v59 = vpop.eup %7047  ;;  %7055 = vpow2.f32 %v5599_v10  ;;  %v5600_v15 = vmul.f32 -1.442695, %v4623_v43 }
 0x544   : > { %v7050_v37 = vpop.eup %7049  ;;  %v4696_v17 = vadd.f32 1.0, %v7048_v59  ;;  %7057 = vpow2.f32 %v5597_v25  ;;  %v5598_v61 = vmul.f32 -1.442695, %v4615_v40 }
 0x545   : > { %v7052_v35 = vpop.eup %7051  ;;  %v4694_v16 = vadd.f32 1.0, %v7050_v37  ;;  %7059 = vpow2.f32 %v5600_v15 }
 0x546   : > { %v7054_v53 = vpop.eup %7053  ;;  %7061 = vrcp.f32 %v4696_v17  ;;  %v4697_v4 = vadd.f32 1.0, %v7052_v35 }
 0x547   : > { %7063 = vrcp.f32 %v4694_v16  ;;  %v4695_v26 = vadd.f32 1.0, %v7054_v53  ;;  %v4494_v53 = vld [vmem:[%s7769_s23 + $0x70] sm:$0xff] }
 0x548   : > { %7065 = vrcp.f32 %v4697_v4  ;;  %v4492_v4 = vld [vmem:[%s7769_s23 + $0x60] sm:$0xff] }
 0x549   : > { %7067 = vrcp.f32 %v4695_v26  ;;  %v4495_v26 = vld [vmem:[%s7769_s23 + $0x78] sm:$0xff] }
 0x54a   : > { %7069 = vpow2.f32 %v5598_v61 }
 0x54d   : > { %v7056_v7 = vpop.eup %7055 }
 0x54e   : > { %v7058_v55 = vpop.eup %7057  ;;  %v4700_v56 = vadd.f32 1.0, %v7056_v7 }
 0x54f   : > { %v7060_v32 = vpop.eup %7059  ;;  %v4698_v22 = vadd.f32 1.0, %v7058_v55 }
 0x550   : > { %v7062_v46 = vpop.eup %7061  ;;  %7071 = vrcp.f32 %v4700_v56  ;;  %v4701_v24 = vadd.f32 1.0, %v7060_v32  ;;  %v4493_v56 = vld [vmem:[%s7769_s23 + $0x68] sm:$0xff] }
 0x551   : > { %v7064_v21 = vpop.eup %7063  ;;  %v4744_v49 = vmul.f32 %v7062_v46, %v4604_v0  ;;  %v7469_v0 = vmov 0.0|0.0  }
 0x552   : > { %v7066_v60 = vpop.eup %7065  ;;  %7073 = vrcp.f32 %v4701_v24  ;;  %v4742_v34 = vmul.f32 %v7064_v21, %v4596_v18  ;;  %5813 = vmatprep.subr.bf16.mxu1 %v7469_v0 }
 0x553   : > { %v7068_v2 = vpop.eup %7067  ;;  %v4745_v29 = vmul.f32 %v7066_v60, %v4607_v20  ;;  %7075 = vrcp.f32 %v4698_v22 }
 0x554   : > { %v7070_v1 = vpop.eup %7069  ;;  %v4743_v12 = vmul.f32 %v7068_v2, %v4599_v42 }
 0x555   : > { %v4757_v47 = vpack.c.bf16 %v4745_v29, %v4744_v49  ;;  %v4699_v19 = vadd.f32 1.0, %v7070_v1 }
 0x556   : > { %v4756_v11 = vpack.c.bf16 %v4743_v12, %v4742_v34 }
 0x557   : > { %7077 = vrcp.f32 %v4699_v19 }
 0x558   : > { %5766 = vmatprep.mubr.bf16.mxu0 %v4756_v11 }
 0x559   : > { %5767 = vmatmul.mubr.bf16.gmra.mrb[20].mxu0 %v4757_v47 }
 0x55a   : > { %v7072_v63 = vpop.eup %7071 }
 0x55b   : > { %v4748_v52 = vmul.f32 %v7072_v63, %v4620_v62 }
 0x55c   : > { %v7074_v9 = vpop.eup %7073 }
 0x55d   : > { %v4749_v45 = vmul.f32 %v7074_v9, %v4623_v43  ;;  %v7076_v13 = vpop.eup %7075 }
 0x55e   : > { %v4746_v36 = vmul.f32 %v7076_v13, %v4612_v39 }
 0x55f   : > { %v4759_v3 = vpack.c.bf16 %v4749_v45, %v4748_v52 }
 0x561   : > { %v7078_v57 = vpop.eup %7077 }
 0x562   : > { %v4747_v5 = vmul.f32 %v7078_v57, %v4615_v40 }
 0x564   : > { %v4758_v27 = vpack.c.bf16 %v4747_v5, %v4746_v36 }
 0x566   : > { %5770 = vmatprep.mubr.bf16.mxu0 %v4758_v27 }
 0x567   : > { %5771 = vmatmul.mubr.bf16.gmra.mrb[24].mxu0 %v4759_v3 }
 0x597   : > { %v5764_v58 = vpop.f32.mrb[16].mxu0 }
 0x598   : > { %v4876_v18 = vadd.f32 %v5764_v58, %v11361_v41  ;;  %v4867_v51 = vpop.f32.mrb[17].mxu0 }
 0x599   : > { %v4868_v50 = vadd.f32 %v11361_v41, %v4867_v51  ;;  %v5765_v20 = vpop.f32.mrb[18].mxu0 }
 0x59a   : > { %v5616_v28 = vmul.f32 -1.442695, %v4876_v18  ;;  %v4879_v6 = vadd.f32 %v5765_v20, %v11361_v41  ;;  %v4870_v42 = vpop.f32.mrb[19].mxu0 }
 0x59b   : > { %v5614_v54 = vmul.f32 -1.442695, %v4868_v50  ;;  %v4871_v44 = vadd.f32 %v11361_v41, %v4870_v42 }
 0x59c   : > { %7079 = vpow2.f32 %v5616_v28  ;;  %v5617_v31 = vmul.f32 -1.442695, %v4879_v6 }
 0x59d   : > { %7081 = vpow2.f32 %v5614_v54  ;;  %v5615_v33 = vmul.f32 -1.442695, %v4871_v44 }
 0x59e   : > { %7083 = vpow2.f32 %v5617_v31 }
 0x59f   : > { %7085 = vpow2.f32 %v5615_v33 }
 0x5a6   : > { %v7080_v14 = vpop.eup %7079 }
 0x5a7   : > { %v7082_v23 = vpop.eup %7081  ;;  %v4980_v62 = vadd.f32 1.0, %v7080_v14 }
 0x5a8   : > { %v7084_v8 = vpop.eup %7083  ;;  %v4978_v38 = vadd.f32 1.0, %v7082_v23 }
 0x5a9   : > { %v7086_v39 = vpop.eup %7085  ;;  %7087 = vrcp.f32 %v4980_v62  ;;  %v4981_v48 = vadd.f32 1.0, %v7084_v8 }
 0x5aa   : > { %7089 = vrcp.f32 %v4978_v38  ;;  %v4979_v10 = vadd.f32 1.0, %v7086_v39 }
 0x5ab   : > { %7091 = vrcp.f32 %v4981_v48 }
 0x5ac   : > { %7093 = vrcp.f32 %v4979_v10 }
 0x5b3   : > { %v7088_v43 = vpop.eup %7087 }
 0x5b4   : > { %v7090_v30 = vpop.eup %7089  ;;  %v5028_v59 = vmul.f32 %v7088_v43, %v4876_v18 }
 0x5b5   : > { %v7092_v25 = vpop.eup %7091  ;;  %v5026_v37 = vmul.f32 %v7090_v30, %v4868_v50 }
 0x5b6   : > { %v7094_v40 = vpop.eup %7093  ;;  %v5029_v15 = vmul.f32 %v7092_v25, %v4879_v6 }
 0x5b7   : > { %v5027_v17 = vmul.f32 %v7094_v40, %v4871_v44 }
 0x5b8   : > { %v5817_v35 = vpack.c.bf16 %v5029_v15, %v5028_v59 }
 0x5b9   : > { %v5814_v16 = vpack.c.bf16 %v5027_v17, %v5026_v37 }
 0x5bb   : > { %5815 = vmatpush3.bf16.xpose.msra.mxu1 %v5814_v16 }
 0x5bc   : > { %5816 = vmatprep.subr.bf16.mxu1 %v7469_v0 }
 0x5c3   : > { %5818 = vmatpush3.bf16.xpose.msra.mxu1 %v5817_v35 }
 0x5c4   : > { %5819 = vmatprep.subr.bf16.mxu1 %v7469_v0 }
 0x5e0   : > { %v5744_v61 = vpop.f32.mrb[12].mxu1 }
 0x5e1   : > { %v4636_v7 = vadd.f32 %v5744_v61, %v4494_v53  ;;  %v4627_v55 = vpop.f32.mrb[13].mxu1 }
 0x5e2   : > { %v4628_v32 = vadd.f32 %v4627_v55, %v4492_v4  ;;  %v5745_v46 = vpop.f32.mrb[14].mxu1 }
 0x5e3   : > { %v5603_v24 = vmul.f32 -1.442695, %v4636_v7  ;;  %v4639_v21 = vadd.f32 %v5745_v46, %v4495_v26  ;;  %v4630_v22 = vpop.f32.mrb[15].mxu1 }
 0x5e4   : > { %v5601_v60 = vmul.f32 -1.442695, %v4628_v32  ;;  %v4631_v2 = vadd.f32 %v4630_v22, %v4493_v56 }
 0x5e5   : > { %7095 = vpow2.f32 %v5603_v24  ;;  %v5604_v49 = vmul.f32 -1.442695, %v4639_v21 }
 0x5e6   : > { %7097 = vpow2.f32 %v5601_v60  ;;  %v5602_v29 = vmul.f32 -1.442695, %v4631_v2 }
 0x5e7   : > { %7099 = vpow2.f32 %v5604_v49 }
 0x5e8   : > { %7101 = vpow2.f32 %v5602_v29 }
 0x5ef   : > { %v7096_v1 = vpop.eup %7095 }
 0x5f0   : > { %v7098_v34 = vpop.eup %7097  ;;  %v4704_v12 = vadd.f32 1.0, %v7096_v1 }
 0x5f1   : > { %v7100_v47 = vpop.eup %7099  ;;  %v4702_v19 = vadd.f32 1.0, %v7098_v34 }
 0x5f2   : > { %v7102_v11 = vpop.eup %7101  ;;  %7103 = vrcp.f32 %v4704_v12  ;;  %v4705_v63 = vadd.f32 1.0, %v7100_v47 }
 0x5f3   : > { %7105 = vrcp.f32 %v4702_v19  ;;  %v4703_v9 = vadd.f32 1.0, %v7102_v11 }
 0x5f4   : > { %7107 = vrcp.f32 %v4705_v63 }
 0x5f5   : > { %7109 = vrcp.f32 %v4703_v9 }
 0x5fc   : > { %v7104_v52 = vpop.eup %7103 }
 0x5fd   : > { %v7106_v45 = vpop.eup %7105  ;;  %v4752_v57 = vmul.f32 %v7104_v52, %v4636_v7 }
 0x5fe   : > { %v7108_v13 = vpop.eup %7107  ;;  %v4750_v5 = vmul.f32 %v7106_v45, %v4628_v32 }
 0x5ff   : > { %v7110_v3 = vpop.eup %7109  ;;  %v4753_v36 = vmul.f32 %v7108_v13, %v4639_v21 }
 0x600   : > { %v4751_v27 = vmul.f32 %v7110_v3, %v4631_v2 }
 0x601   : > { %v4761_v58 = vpack.c.bf16 %v4753_v36, %v4752_v57 }
 0x602   : > { %v4760_v18 = vpack.c.bf16 %v4751_v27, %v4750_v5 }
 0x604   : > { %5774 = vmatprep.mubr.bf16.mxu0 %v4760_v18 }
 0x605   : > { %5775 = vmatmul.mubr.bf16.gmra.mrb[28].mxu0 %v4761_v58  ;;  %v7471_v58 = vmov 0.0  }
 0x606   : > { %5810 = vmatprep.mubr.msk.f32.mxu1 %vm7470_vm9, %v7471_v58 }
 0x62c   : > { %v5768_v51 = vpop.f32.mrb[20].mxu0 }
 0x62d   : > { %v4892_v50 = vadd.f32 %v5768_v51, %v11361_v41  ;;  %v4883_v20 = vpop.f32.mrb[21].mxu0 }
 0x62e   : > { %v4884_v28 = vadd.f32 %v11361_v41, %v4883_v20  ;;  %v5769_v6 = vpop.f32.mrb[22].mxu0 }
 0x62f   : > { %v5620_v42 = vmul.f32 -1.442695, %v4892_v50  ;;  %v4895_v54 = vadd.f32 %v5769_v6, %v11361_v41  ;;  %v4886_v44 = vpop.f32.mrb[23].mxu0 }
 0x630   : > { %v5618_v31 = vmul.f32 -1.442695, %v4884_v28  ;;  %v4887_v33 = vadd.f32 %v11361_v41, %v4886_v44 }
 0x631   : > { %7111 = vpow2.f32 %v5620_v42  ;;  %v5621_v14 = vmul.f32 -1.442695, %v4895_v54 }
 0x632   : > { %7113 = vpow2.f32 %v5618_v31  ;;  %v5619_v23 = vmul.f32 -1.442695, %v4887_v33 }
 0x633   : > { %7115 = vpow2.f32 %v5621_v14 }
 0x634   : > { %7117 = vpow2.f32 %v5619_v23 }
 0x63a   : > { %v5772_v62 = vpop.f32.mrb[24].mxu0 }
 0x63b   : > { %v7112_v8 = vpop.eup %7111  ;;  %v4908_v38 = vadd.f32 %v5772_v62, %v11361_v41  ;;  %v4899_v39 = vpop.f32.mrb[25].mxu0 }
 0x63c   : > { %v7114_v48 = vpop.eup %7113  ;;  %v4984_v10 = vadd.f32 1.0, %v7112_v8  ;;  %v4900_v43 = vadd.f32 %v11361_v41, %v4899_v39  ;;  %v5773_v30 = vpop.f32.mrb[26].mxu0 }
 0x63d   : > { %v7116_v25 = vpop.eup %7115  ;;  %v4982_v40 = vadd.f32 1.0, %v7114_v48  ;;  %v4911_v59 = vadd.f32 %v5773_v30, %v11361_v41  ;;  %v4902_v15 = vpop.f32.mrb[27].mxu0  ;;  %v5624_v35 = vmul.f32 -1.442695, %v4908_v38 }
 0x63e   : > { %v7118_v37 = vpop.eup %7117  ;;  %7119 = vrcp.f32 %v4984_v10  ;;  %v4985_v17 = vadd.f32 1.0, %v7116_v25  ;;  %v4903_v16 = vadd.f32 %v11361_v41, %v4902_v15  ;;  %v5622_v4 = vmul.f32 -1.442695, %v4900_v43 }
 0x63f   : > { %7121 = vrcp.f32 %v4982_v40  ;;  %v4983_v53 = vadd.f32 1.0, %v7118_v37  ;;  %v5625_v61 = vmul.f32 -1.442695, %v4911_v59 }
 0x640   : > { %7123 = vrcp.f32 %v4985_v17  ;;  %v5623_v26 = vmul.f32 -1.442695, %v4903_v16 }
 0x641   : > { %7125 = vrcp.f32 %v4983_v53  ;;  %v5042_v53 = vld [vmem:[%s11449_s7] sm:$0x1] }
 0x642   : > { %7127 = vpow2.f32 %v5624_v35 }
 0x643   : > { %7129 = vpow2.f32 %v5622_v4  ;;  %v5044_v4 = vstv %s5043_s22 }
 0x644   : > { %7131 = vpow2.f32 %v5625_v61 }
 0x645   : > { %7133 = vpow2.f32 %v5623_v26 }
 0x648   : > { %v7120_v7 = vpop.eup %7119 }
 0x649   : > { %v7122_v55 = vpop.eup %7121  ;;  %v5032_v46 = vmul.f32 %v7120_v7, %v4892_v50 }
 0x64a   : > { %v7124_v56 = vpop.eup %7123  ;;  %v5030_v22 = vmul.f32 %v7122_v55, %v4884_v28 }
 0x64b   : > { %v7126_v32 = vpop.eup %7125  ;;  %v5033_v24 = vmul.f32 %v7124_v56, %v4895_v54 }
 0x64c   : > { %v7128_v21 = vpop.eup %7127  ;;  %v5031_v60 = vmul.f32 %v7126_v32, %v4887_v33 }
 0x64d   : > { %v7130_v2 = vpop.eup %7129  ;;  %v5823_v49 = vpack.c.bf16 %v5033_v24, %v5032_v46  ;;  %v4988_v29 = vadd.f32 1.0, %v7128_v21 }
 0x64e   : > { %v7132_v1 = vpop.eup %7131  ;;  %v5820_v34 = vpack.c.bf16 %v5031_v60, %v5030_v22  ;;  %v4986_v12 = vadd.f32 1.0, %v7130_v2 }
 0x64f   : > { %v7134_v47 = vpop.eup %7133  ;;  %7135 = vrcp.f32 %v4988_v29  ;;  %v4989_v19 = vadd.f32 1.0, %v7132_v1 }
 0x650   : > { %5821 = vmatpush3.bf16.xpose.msra.mxu1 %v5820_v34  ;;  %7137 = vrcp.f32 %v4986_v12  ;;  %v4987_v11 = vadd.f32 1.0, %v7134_v47 }
 0x651   : > { %5822 = vmatprep.subr.bf16.mxu1 %v7469_v0  ;;  %7139 = vrcp.f32 %v4989_v19 }
 0x652   : > { %7141 = vrcp.f32 %v4987_v11 }
 0x658   : > { %5824 = vmatpush3.bf16.xpose.msra.mxu1 %v5823_v49 }
 0x659   : > { %v7136_v63 = vpop.eup %7135  ;;  %5825 = vmatprep.subr.bf16.mxu1 %v7469_v0 }
 0x65a   : > { %v7138_v9 = vpop.eup %7137  ;;  %v5036_v13 = vmul.f32 %v7136_v63, %v4908_v38 }
 0x65b   : > { %v7140_v52 = vpop.eup %7139  ;;  %v5034_v57 = vmul.f32 %v7138_v9, %v4900_v43 }
 0x65c   : > { %v7142_v45 = vpop.eup %7141  ;;  %v5037_v3 = vmul.f32 %v7140_v52, %v4911_v59 }
 0x65d   : > { %v5035_v36 = vmul.f32 %v7142_v45, %v4903_v16 }
 0x65e   : > { %v5829_v5 = vpack.c.bf16 %v5037_v3, %v5036_v13 }
 0x65f   : > { %v5826_v27 = vpack.c.bf16 %v5035_v36, %v5034_v57 }
 0x661   : > { %5827 = vmatpush3.bf16.xpose.msra.mxu1 %v5826_v27 }
 0x662   : > { %5828 = vmatprep.subr.bf16.mxu1 %v7469_v0 }
 0x669   : > { %5830 = vmatpush3.bf16.xpose.msra.mxu1 %v5829_v5 }
 0x66a   : > { %5831 = vmatprep.subr.bf16.mxu1 %v7469_v0 }
 0x6d8   : > { %v5776_v18 = vpop.f32.mrb[28].mxu0 }
 0x6d9   : > { %v4924_v51 = vadd.f32 %v5776_v18, %v11361_v41  ;;  %v4915_v50 = vpop.f32.mrb[29].mxu0 }
 0x6da   : > { %v4916_v20 = vadd.f32 %v11361_v41, %v4915_v50  ;;  %v5777_v28 = vpop.f32.mrb[30].mxu0 }
 0x6db   : > { %v5628_v6 = vmul.f32 -1.442695, %v4924_v51  ;;  %v4927_v42 = vadd.f32 %v5777_v28, %v11361_v41  ;;  %v4918_v54 = vpop.f32.mrb[31].mxu0 }
 0x6dc   : > { %v5626_v44 = vmul.f32 -1.442695, %v4916_v20  ;;  %v4919_v31 = vadd.f32 %v11361_v41, %v4918_v54 }
 0x6dd   : > { %7143 = vpow2.f32 %v5628_v6  ;;  %v5629_v33 = vmul.f32 -1.442695, %v4927_v42 }
 0x6de   : > { %7145 = vpow2.f32 %v5626_v44  ;;  %v5627_v14 = vmul.f32 -1.442695, %v4919_v31 }
 0x6df   : > { %7147 = vpow2.f32 %v5629_v33 }
 0x6e0   : > { %7149 = vpow2.f32 %v5627_v14 }
 0x6e7   : > { %v7144_v23 = vpop.eup %7143 }
 0x6e8   : > { %v7146_v62 = vpop.eup %7145  ;;  %v4992_v8 = vadd.f32 1.0, %v7144_v23 }
 0x6e9   : > { %v7148_v38 = vpop.eup %7147  ;;  %v4990_v39 = vadd.f32 1.0, %v7146_v62 }
 0x6ea   : > { %v7150_v48 = vpop.eup %7149  ;;  %7151 = vrcp.f32 %v4992_v8  ;;  %v4993_v10 = vadd.f32 1.0, %v7148_v38 }
 0x6eb   : > { %7153 = vrcp.f32 %v4990_v39  ;;  %v4991_v43 = vadd.f32 1.0, %v7150_v48 }
 0x6ec   : > { %7155 = vrcp.f32 %v4993_v10 }
 0x6ed   : > { %7157 = vrcp.f32 %v4991_v43 }
 0x6f4   : > { %v7152_v30 = vpop.eup %7151 }
 0x6f5   : > { %v7154_v41 = vpop.eup %7153  ;;  %v5040_v59 = vmul.f32 %v7152_v30, %v4924_v51 }
 0x6f6   : > { %v7156_v25 = vpop.eup %7155  ;;  %v5038_v37 = vmul.f32 %v7154_v41, %v4916_v20 }
 0x6f7   : > { %v7158_v40 = vpop.eup %7157  ;;  %v5041_v15 = vmul.f32 %v7156_v25, %v4927_v42 }
 0x6f8   : > { %v5039_v17 = vmul.f32 %v7158_v40, %v4919_v31 }
 0x6f9   : > { %v5835_v35 = vpack.c.bf16 %v5041_v15, %v5040_v59 }
 0x6fa   : > { %v5832_v16 = vpack.c.bf16 %v5039_v17, %v5038_v37 }
 0x6fc   : > { %5833 = vmatpush3.bf16.xpose.msra.mxu1 %v5832_v16 }
 0x6fd   : > { %5834 = vmatprep.subr.bf16.mxu1 %v7469_v0 }
 0x704   : > { %5836 = vmatpush3.bf16.xpose.msra.mxu1 %v5835_v35 }
 0x70b   : > { %5811 = vmatmul.mubr.f32.vlgmr.msra.gmra.mrb[16].mxu1 %v5042_v53 }
 0x7de   : > { %v5111_v61 = vpop.f32.mrb[16].mxu1 }
 0x7df   : > { %v5112_v26 = vadd.f32 %v5111_v61, %v5044_v4  ;;  %v5812_v7 = vpop.f32.mrb[17].mxu1 }
 0x7e1   : > { %5115 = vst [vmem:[%s434_s18] sm:$0x1] %v5112_v26 }
 0x7e2   : > { %7387 = shalt.err (!%p7384_p13)
}
 0x7e3   : > { %s7388_s27 = scalar_lea.hbm %s11398_s0, 16  ;;  %s7392_s13 = scalar_lea.hbm %s11451_s9, 32 }
 0x7e4   : > { %p7389_p11 = scmp.ne.s32.totalorder %s11398_s0, %s7388_s27  ;;  %p7393_p5 = scmp.lt.u32.totalorder %s11398_s0, %s11451_s9 }
 0x7e5   : > { %p7394_p7 = scmp.lt.u32.totalorder %s7392_s13, %s7388_s27  ;;  %p7396_p3 = scmp.lt.u32.totalorder %s7388_s27, %s11398_s0 }
 0x7e6   : > { %p7390_p1 = pnand %p7389_p11, %p7666_p2 }
 0x7e7   : > { %p7395_p4 = por %p7394_p7, %p7393_p5 }
 0x7e8   : > { %p7391_p10 = pneg %p7390_p1 }
 0x7e9   : > { %p7397_p8 = por %p7396_p3, %p7395_p4 }
 0x7eb   : > { %p7398_p9 = pnand %p7397_p8, %p7391_p10 }
 0x7ed   : > { %7401 = shalt.err (!%p7398_p9)
}
 0x7ee   : > { %5856 = dma.vmem_to_hbm [thread:$0]  (%p7666_p2), %s11400_s19, 16, %s11398_s0, %s5117_s20  }
 0x7ef PF: > { %s5141_s23 = sand.u32 1, %s7444_s11   ;;  %p11798_p12 = scmp.ne.s32.totalorder %s11581_s17, 0 }
 0x7f0   : > { %p11799_p0 = scmp.ge.s32.totalorder %s7456_s14, 2  ;;  %s5142_s1 = scalar_lea.sflag [#allocation5], %s5141_s23 }
 0x7f2   : > { %p5876_p6 = pnand %p11799_p0, %p11798_p12 }
 0x7f4   : > { %7439 = dma.done.wait (!%p5876_p6), %s5142_s1, 16  }
 0x7f5   : > { %7441 = vsyncadd (!%p5876_p6), %s5142_s1, 4294967280  ;;  %s11800_s22 = sld [smem:[#allocation20_spill]]  ;;  %s11801_s13 = sld [smem:[#allocation21_spill]] }
 0x7f6   : > { %p28_p13 = scmp.ge.s32.totalorder %s7652_s15, 4   ;;  %s11802_s11 = smov %s7448_s12 }
 0x7f7   : > { %s11804_s14 = smov %s7652_s15 }
 0x7f8   :  { %30 = sbr.rel (!%p28_p13) target bundleno = 15 (0xf), region = 127 }
 0x7fb   : > { %s11803_s12 = smov %s11800_s22 }
 0x7ff   :  { %5146 = vsyncpa [#allocation4], 1 }
 0x800   :  { %5148 = vsyncpa [#allocation4 + $0x1], 1 }
 0x801   :  { %5149 = vsyncpa [#allocation9], 1 }
 0x802   :  { %5151 = vsyncpa [#allocation9 + $0x1], 1 }
 0x803   :  { %5152 = vsyncpa [#allocation12], 1 }
 0x804   :  { %5153 = vsyncpa [#allocation5], 1 }
 0x805   :  { %5155 = vsyncpa [#allocation5 + $0x1], 1 }
 0x806   :  { %5156 = vsyncpa [#allocation6], 1 }
 0x807   :  { %5158 = vsyncpa [#allocation6 + $0x1], 1 }

</bundles_post_ra>
